<compile_context>
chip_gen: v5e
topology: v5e:2x2
jax: 0.10.0
libtpu: 0.0.40
codegen_flags: <defaults>
</compile_context>

<pallas_src>
import math

import jax
import jax.numpy as jnp
import numpy as np
from jax.experimental import pallas as pl
from jax.experimental.pallas import tpu as pltpu


# --------------------------------------------------------------------------
# In-kernel helpers (operate on VMEM values / refs)
# --------------------------------------------------------------------------

def _pad_hw(h, pad):
    """Symmetric spatial zero-pad of a (Bb, H, W, C) value via concatenation."""
    if pad == 0:
        return h
    Bb, H, W, C = h.shape
    zr = jnp.zeros((Bb, pad, W, C), h.dtype)
    h = jnp.concatenate([zr, h, zr], axis=1)
    zc = jnp.zeros((Bb, H + 2 * pad, pad, C), h.dtype)
    return jnp.concatenate([zc, h, zc], axis=2)


def _conv3x3_relu(h, w_ref, b_ref, pad, compute_dtype):
    """3x3 stride-1 conv + bias + ReLU over a batch block.

    h:      (Bb, H, W, Cin) f32 value.
    w_ref:  (9*Cin, Cout) im2col weight ref, rows ordered (kh, kw, cin),
            already in compute_dtype (lane-padded Cout).
    b_ref:  (1, Cout) f32 bias ref.
    One MXU matmul per kh row -> peak im2col patch is 3x (not 9x) the
    activation size.  Returns (Bb, Ho, Wo, Cout) f32.
    """
    Bb, H, W, Cin = h.shape
    Cout = w_ref.shape[-1]
    hp = _pad_hw(h, pad)
    Ho, Wo = H + 2 * pad - 2, W + 2 * pad - 2
    M = Bb * Ho * Wo
    acc = None
    for kh in range(3):
        taps = [hp[:, kh:kh + Ho, kw:kw + Wo, :] for kw in range(3)]
        patch = jnp.concatenate(taps, axis=-1).reshape(M, 3 * Cin)
        wk = w_ref[pl.ds(kh * 3 * Cin, 3 * Cin), :]          # load only this kh slab
        part = jnp.dot(patch.astype(compute_dtype), wk,
                       preferred_element_type=jnp.float32)   # (M, Cout) f32
        acc = part if acc is None else acc + part
    # Bias broadcast hoisted out of the kh loop; ReLU in f32.
    acc = jnp.maximum(acc + b_ref[...], 0.0)
    return acc.reshape(Bb, Ho, Wo, Cout)


def _maxpool2x2_ceil(h):
    """2x2 / stride-2 max pool with ceil_mode=True on a (Bb, H, W, C) value.

    Inputs are post-ReLU (>= 0), so the ceil-mode overhang can be zero-padded.
    W-pairs are folded into the lane axis (pure VPU max); H-pairs are split on
    a major axis (no sublane relayout).
    """
    Bb, H, W, C = h.shape
    Ho, Wo = (H + 1) // 2, (W + 1) // 2
    if W % 2:
        h = jnp.concatenate([h, jnp.zeros((Bb, H, 1, C), h.dtype)], axis=2)
    h = h.reshape(Bb, H, Wo, 2 * C)
    h = jnp.maximum(h[..., :C], h[..., C:])                  # pool along W
    if H % 2:
        h = jnp.concatenate([h, jnp.zeros((Bb, 1, Wo, C), h.dtype)], axis=1)
    h = h.reshape(Bb, Ho, 2, Wo, C)
    return jnp.max(h, axis=2)                                # pool along H


# --------------------------------------------------------------------------
# Fused kernel: whole VggSubsample forward for one (Bb, T, D) batch block
# --------------------------------------------------------------------------

def _make_fused_kernel(sampling_num, compute_dtype):
    def kernel(x_ref, *refs):
        # refs = [w1,b1,w2,b2] * sampling_num + [lin_w, lin_b] + [o_ref]
        o_ref = refs[-1]
        p = refs[:-1]

        x = x_ref[...]                                       # (Bb, T, D) f32
        Bb, T, D = x.shape
        # F.pad(x, (1, 1, 2, 0)): 2 leading zeros on time, 1/1 on features.
        h = jnp.concatenate([jnp.zeros((Bb, 2, D), x.dtype), x], axis=1)
        zc = jnp.zeros((Bb, T + 2, 1), x.dtype)
        h = jnp.concatenate([zc, h, zc], axis=2)             # (Bb, T+2, D+2)
        h = h.reshape(Bb, T + 2, D + 2, 1)                   # Cin = 1

        k = 0
        for s in range(sampling_num):
            h = _conv3x3_relu(h, p[k], p[k + 1], 0 if s == 0 else 1, compute_dtype)
            h = _conv3x3_relu(h, p[k + 2], p[k + 3], 1, compute_dtype)
            h = _maxpool2x2_ceil(h)
            k += 4

        lin_w = p[k][...]                                    # (F2*Cpad, fpad), compute_dtype
        lin_b = p[k + 1][...]                                # (1, fpad) f32
        _, T2, F2, C = h.shape
        # lin_w was pre-permuted (and zero-padded) for this (f, c)-minor flatten.
        flat = h.reshape(Bb * T2, F2 * C).astype(compute_dtype)
        y = jnp.dot(flat, lin_w, preferred_element_type=jnp.float32) + lin_b
        o_ref[...] = y.reshape(Bb, T2, -1).astype(o_ref.dtype)
    return kernel


# --------------------------------------------------------------------------
# Parameters (PyTorch shapes) + one-time layout preparation
# --------------------------------------------------------------------------

POOL_K, POOL_S, POOL_P = 2, 2, 0


def calc_length(in_length):
    return math.ceil((int(in_length) + 2 * POOL_P - (POOL_K - 1) - 1)
                     / float(POOL_S) + 1)


def _round_up(n, m):
    return ((n + m - 1) // m) * m


def init_params(key, sampling_num, conv_channels, feat_in, feat_out):
    """Deterministic synthetic parameters with the PyTorch module's shapes."""
    keys = jax.random.split(key, 4 * sampling_num + 2)
    params = {"convs": []}
    in_ch, idx = 1, 0
    for _ in range(sampling_num):
        w1 = 0.1 * jax.random.normal(keys[idx], (conv_channels, in_ch, 3, 3),
                                     jnp.float32); idx += 1
        b1 = 0.1 * jax.random.normal(keys[idx], (conv_channels,),
                                     jnp.float32); idx += 1
        w2 = 0.1 * jax.random.normal(keys[idx], (conv_channels, conv_channels, 3, 3),
                                     jnp.float32); idx += 1
        b2 = 0.1 * jax.random.normal(keys[idx], (conv_channels,),
                                     jnp.float32); idx += 1
        params["convs"].append(((w1, b1), (w2, b2)))
        in_ch = conv_channels
    out_length = feat_in
    for _ in range(sampling_num):
        out_length = calc_length(out_length)
    K = conv_channels * out_length
    params["out_w"] = 0.1 * jax.random.normal(keys[idx], (feat_out, K),
                                              jnp.float32); idx += 1
    params["out_b"] = 0.1 * jax.random.normal(keys[idx], (feat_out,), jnp.float32)
    return params


def prepare_params(params, conv_channels, compute_dtype=jnp.float32, lane_pad=128):
    """One-time conversion to kernel layouts (no per-forward transposes).

    * conv weights OIHW -> im2col (9*Cin_pad, Cout_pad), rows (kh, kw, cin),
      with channels zero-padded to a multiple of `lane_pad` (lane-dense tiles).
    * Linear weight pre-permuted for the kernel's (f, c)-minor flatten and
      zero-padded to (F*Cpad, feat_out_pad).
    * matmul operands cast once to compute_dtype (bf16 for v6e/v7x MXU);
      biases stay f32 (elementwise math stays f32).
    """
    cpad = _round_up(conv_channels, lane_pad)

    def im2col(w, cin_pad, cout_pad):
        cout, cin, kh, kw = w.shape
        wt = jnp.transpose(w, (2, 3, 1, 0))                  # (kh, kw, cin, cout)
        wt = jnp.pad(wt, ((0, 0), (0, 0),
                          (0, cin_pad - cin), (0, cout_pad - cout)))
        return wt.reshape(kh * kw * cin_pad, cout_pad).astype(compute_dtype)

    def pad_bias(b, n_pad):
        return jnp.pad(b, (0, n_pad - b.shape[0])).reshape(1, n_pad).astype(jnp.float32)

    prep = {"convs": []}
    for s, ((w1, b1), (w2, b2)) in enumerate(params["convs"]):
        cin1 = w1.shape[1]
        cin1_pad = cin1 if s == 0 else cpad                  # raw input has 1 channel
        prep["convs"].append((im2col(w1, cin1_pad, cpad), pad_bias(b1, cpad),
                              im2col(w2, cpad, cpad), pad_bias(b2, cpad)))

    out_w, out_b = params["out_w"], params["out_b"]
    feat_out, K = out_w.shape
    C = conv_channels
    F = K // C
    fpad = _round_up(feat_out, lane_pad)
    # torch flattens (c, f) f-minor; the kernel flattens (f, c) c-minor:
    #   lin_w[f*Cpad + c, n] = out_w[n, c*F + f]   (zero for padded c / n)
    w3 = jnp.transpose(out_w.reshape(feat_out, C, F), (2, 1, 0))   # (f, c, n)
    w3 = jnp.pad(w3, ((0, 0), (0, cpad - C), (0, fpad - feat_out)))
    prep["lin_w"] = w3.reshape(F * cpad, fpad).astype(compute_dtype)
    prep["lin_b"] = pad_bias(out_b, fpad)
    prep["feat_out"] = feat_out
    return prep


def _pick_batch_block(B, max_bb=8):
    """Largest divisor of B <= max_bb, keeping >= 2 grid steps for megacore."""
    divs = [d for d in range(1, B + 1) if B % d == 0]
    bb = max([d for d in divs if d <= max_bb] or [1])
    if B // bb < 2 and B >= 2:
        bb = max([d for d in divs if d <= B // 2] or [1])
    return bb


# --------------------------------------------------------------------------
# Forward
# --------------------------------------------------------------------------

def vgg_subsample_forward(x, lengths, prep, sampling_num,
                          compute_dtype=jnp.float32, batch_block=None):
    """x: [B, Tmax, D] f32, lengths: [B] int32 -> ([B, T', feat_out], [B])."""
    B, T, D = x.shape
    feat_out = prep["feat_out"]
    fpad = prep["lin_w"].shape[-1]

    bb = batch_block if batch_block is not None else _pick_batch_block(B)
    assert B % bb == 0, (B, bb)

    # Static output geometry (first conv's pad=0 exactly consumes the causal pad).
    t_out = T
    for _ in range(sampling_num):
        t_out = (t_out + 1) // 2

    flat_params = []
    for (w1, b1, w2, b2) in prep["convs"]:
        flat_params += [w1, b1, w2, b2]
    flat_params += [prep["lin_w"], prep["lin_b"]]

    in_specs = [pl.BlockSpec((bb, T, D), lambda b: (b, 0, 0))]
    for prm in flat_params:                                  # all params are 2-D
        in_specs.append(pl.BlockSpec(prm.shape, lambda b: (0, 0)))

    # Explicit scoped-VMEM budget (capacity-aware: ~64 MiB v5e/v6e, ~48 MiB v7x).
    vmem_limit = 64 * 1024 * 1024
    try:
        cap = pltpu.get_tpu_info().vmem_capacity_bytes
        vmem_limit = min(vmem_limit, int(cap * 3 // 4))
    except Exception:
        pass

    # NOTE: for very long sequences (v7x 64 MiB VMEM) the time axis should
    # additionally be tiled with a conv/pool halo; at these shapes one
    # (bb, T, D) block per grid step fits comfortably.
    y = pl.pallas_call(
        _make_fused_kernel(sampling_num, compute_dtype),
        out_shape=jax.ShapeDtypeStruct((B, t_out, fpad), jnp.float32),
        grid=(B // bb,),
        in_specs=in_specs,
        out_specs=pl.BlockSpec((bb, t_out, fpad), lambda b: (b, 0, 0)),
        compiler_params=pltpu.CompilerParams(
            dimension_semantics=("parallel",),
            vmem_limit_bytes=vmem_limit),
    )(x, *flat_params)

    y = y[..., :feat_out]            # drop lane padding outside the kernel

    # TODO(synk): PyTorch mutates the `lengths` python list in place; here we
    # return a new integer array with the same values instead.
    new_lengths = lengths
    for _ in range(sampling_num):
        new_lengths = (new_lengths + 1) // 2                 # == calc_length elementwise
    return y, new_lengths


# --------------------------------------------------------------------------
# Pure-JAX reference (correctness check only; uses the original torch-layout params)
# --------------------------------------------------------------------------

def reference_forward(x, lengths, params, sampling_num):
    h = jnp.pad(x, ((0, 0), (2, 0), (1, 1)))[..., None]
    for i, ((w1, b1), (w2, b2)) in enumerate(params["convs"]):
        pad1 = 0 if i == 0 else 1
        for (w, b, p) in ((w1, b1, pad1), (w2, b2, 1)):
            h = jax.lax.conv_general_dilated(
                h, jnp.transpose(w, (2, 3, 1, 0)), (1, 1), [(p, p), (p, p)],
                dimension_numbers=("NHWC", "HWIO", "NHWC"),
                precision=jax.lax.Precision.HIGHEST) + b
            h = jnp.maximum(h, 0.0)
        H, W = h.shape[1], h.shape[2]
        h = jax.lax.reduce_window(h, -jnp.inf, jax.lax.max,
                                  (1, 2, 2, 1), (1, 2, 2, 1),
                                  [(0, 0), (0, H % 2), (0, W % 2), (0, 0)])
    B, T, F, C = h.shape
    flat = jnp.transpose(h, (0, 1, 3, 2)).reshape(B * T, C * F)
    y = (flat @ params["out_w"].T + params["out_b"]).reshape(B, T, -1)
    new_lengths = lengths
    for _ in range(sampling_num):
        new_lengths = (new_lengths + 1) // 2
    return y, new_lengths


# --------------------------------------------------------------------------

if __name__ == "__main__":
    subsampling_factor = 4
    sampling_num = int(math.log(subsampling_factor, 2))     # 2 stages
    feat_in, feat_out, conv_channels = 16, 32, 4
    B, Tmax = 4, 8

    key = jax.random.PRNGKey(0)
    kx, kp = jax.random.split(key)
    x = jax.random.normal(kx, (B, Tmax, feat_in), jnp.float32)
    lengths = jnp.array([8, 6, 7, 5], jnp.int32)

    params = init_params(kp, sampling_num, conv_channels, feat_in, feat_out)
    y_ref, len_ref = reference_forward(x, lengths, params, sampling_num)

    # ---- f32 matmul operands: tight numerical check of the fused kernel ----
    prep32 = prepare_params(params, conv_channels, compute_dtype=jnp.float32)
    y32, new_lengths = vgg_subsample_forward(x, lengths, prep32, sampling_num,
                                             compute_dtype=jnp.float32,
                                             batch_block=2)
    y32 = jax.block_until_ready(y32)
    new_lengths = jax.block_until_ready(new_lengths)
    assert y32.shape == y_ref.shape, (y32.shape, y_ref.shape)
    np.testing.assert_allclose(np.asarray(y32), np.asarray(y_ref),
                               atol=5e-4, rtol=2e-3)
    np.testing.assert_array_equal(np.asarray(new_lengths), np.asarray(len_ref))

    # ---- bf16 matmul operands (v6e/v7x MXU path), f32 accumulation ----
    prep16 = prepare_params(params, conv_channels, compute_dtype=jnp.bfloat16)
    y16, _ = vgg_subsample_forward(x, lengths, prep16, sampling_num,
                                   compute_dtype=jnp.bfloat16, batch_block=2)
    y16 = jax.block_until_ready(y16)
    np.testing.assert_allclose(np.asarray(y16), np.asarray(y_ref),
                               atol=5e-2, rtol=5e-2)

    print("KERNEL_OK")
</pallas_src>

<mosaic_0001>
module attributes {stable_mosaic.version = 11 : i64} {
  func.func @kernel(%arg0: i32, %arg1: memref<2x8x16xf32, #tpu.memory_space<vmem>>, %arg2: memref<9x128xf32, #tpu.memory_space<vmem>>, %arg3: memref<1x128xf32, #tpu.memory_space<vmem>>, %arg4: memref<1152x128xf32, #tpu.memory_space<vmem>>, %arg5: memref<1x128xf32, #tpu.memory_space<vmem>>, %arg6: memref<1152x128xf32, #tpu.memory_space<vmem>>, %arg7: memref<1x128xf32, #tpu.memory_space<vmem>>, %arg8: memref<1152x128xf32, #tpu.memory_space<vmem>>, %arg9: memref<1x128xf32, #tpu.memory_space<vmem>>, %arg10: memref<512x128xf32, #tpu.memory_space<vmem>>, %arg11: memref<1x128xf32, #tpu.memory_space<vmem>>, %arg12: memref<2x2x128xf32, #tpu.memory_space<vmem>>) attributes {dimension_semantics = [#tpu.dimension_semantics<parallel>], iteration_bounds = array<i64: 2>, scalar_prefetch = 0 : i64, scratch_operands = 0 : i64, tpu.core_type = #tpu.core_type<tc>, window_params = [{transform_indices = @transform_0, window_bounds = array<i64: 2, 8, 16>}, {pipeline_mode = #tpu.pipeline_mode<synchronous>, transform_indices = @transform_1, window_bounds = array<i64: 9, 128>}, {pipeline_mode = #tpu.pipeline_mode<synchronous>, transform_indices = @transform_2, window_bounds = array<i64: 1, 128>}, {pipeline_mode = #tpu.pipeline_mode<synchronous>, transform_indices = @transform_3, window_bounds = array<i64: 1152, 128>}, {pipeline_mode = #tpu.pipeline_mode<synchronous>, transform_indices = @transform_4, window_bounds = array<i64: 1, 128>}, {pipeline_mode = #tpu.pipeline_mode<synchronous>, transform_indices = @transform_5, window_bounds = array<i64: 1152, 128>}, {pipeline_mode = #tpu.pipeline_mode<synchronous>, transform_indices = @transform_6, window_bounds = array<i64: 1, 128>}, {pipeline_mode = #tpu.pipeline_mode<synchronous>, transform_indices = @transform_7, window_bounds = array<i64: 1152, 128>}, {pipeline_mode = #tpu.pipeline_mode<synchronous>, transform_indices = @transform_8, window_bounds = array<i64: 1, 128>}, {pipeline_mode = #tpu.pipeline_mode<synchronous>, transform_indices = @transform_9, window_bounds = array<i64: 512, 128>}, {pipeline_mode = #tpu.pipeline_mode<synchronous>, transform_indices = @transform_10, window_bounds = array<i64: 1, 128>}, {transform_indices = @transform_11, window_bounds = array<i64: 2, 2, 128>}]} {
    %c0 = arith.constant 0 : index
    %c0_0 = arith.constant 0 : index
    %c0_1 = arith.constant 0 : index
    %0 = vector.load %arg1[%c0, %c0_0, %c0_1] : memref<2x8x16xf32, #tpu.memory_space<vmem>>, vector<2x8x16xf32>
    %cst = arith.constant 0.000000e+00 : f32
    %1 = vector.broadcast %cst : f32 to vector<2x2x16xf32>
    %2 = tpu.concatenate %1, %0 in 1 : vector<2x2x16xf32>, vector<2x8x16xf32> -> vector<2x10x16xf32>
    %cst_2 = arith.constant 0.000000e+00 : f32
    %3 = vector.broadcast %cst_2 : f32 to vector<2x10x1xf32>
    %4 = tpu.concatenate %3, %2, %3 in 2 : vector<2x10x1xf32>, vector<2x10x16xf32>, vector<2x10x1xf32> -> vector<2x10x18xf32>
    %5 = vector.shape_cast %4 : vector<2x10x18xf32> to vector<2x10x18x1xf32>
    %6 = vector.extract_strided_slice %5 {offsets = [0, 0, 0, 0], sizes = [2, 8, 16, 1], strides = [1, 1, 1, 1]} : vector<2x10x18x1xf32> to vector<2x8x16x1xf32>
    %7 = vector.extract_strided_slice %5 {offsets = [0, 0, 1, 0], sizes = [2, 8, 16, 1], strides = [1, 1, 1, 1]} : vector<2x10x18x1xf32> to vector<2x8x16x1xf32>
    %8 = vector.extract_strided_slice %5 {offsets = [0, 0, 2, 0], sizes = [2, 8, 16, 1], strides = [1, 1, 1, 1]} : vector<2x10x18x1xf32> to vector<2x8x16x1xf32>
    %9 = tpu.concatenate %6, %7, %8 in 3 : vector<2x8x16x1xf32>, vector<2x8x16x1xf32>, vector<2x8x16x1xf32> -> vector<2x8x16x3xf32>
    %10 = vector.shape_cast %9 : vector<2x8x16x3xf32> to vector<256x3xf32>
    %c0_3 = arith.constant 0 : index
    %c0_4 = arith.constant 0 : index
    %11 = vector.load %arg2[%c0_3, %c0_4] : memref<9x128xf32, #tpu.memory_space<vmem>>, vector<3x128xf32>
    %cst_5 = arith.constant dense<0.000000e+00> : vector<256x128xf32>
    %12 = tpu.matmul %10, %11, %cst_5 {dimension_numbers = #tpu.dot_dimension_numbers<[1], [0], [0], [1], [0, 0, 1, 1], [], []>} : vector<256x3xf32>, vector<3x128xf32>, vector<256x128xf32> -> vector<256x128xf32>
    %13 = vector.extract_strided_slice %5 {offsets = [0, 1, 0, 0], sizes = [2, 8, 16, 1], strides = [1, 1, 1, 1]} : vector<2x10x18x1xf32> to vector<2x8x16x1xf32>
    %14 = vector.extract_strided_slice %5 {offsets = [0, 1, 1, 0], sizes = [2, 8, 16, 1], strides = [1, 1, 1, 1]} : vector<2x10x18x1xf32> to vector<2x8x16x1xf32>
    %15 = vector.extract_strided_slice %5 {offsets = [0, 1, 2, 0], sizes = [2, 8, 16, 1], strides = [1, 1, 1, 1]} : vector<2x10x18x1xf32> to vector<2x8x16x1xf32>
    %16 = tpu.concatenate %13, %14, %15 in 3 : vector<2x8x16x1xf32>, vector<2x8x16x1xf32>, vector<2x8x16x1xf32> -> vector<2x8x16x3xf32>
    %17 = vector.shape_cast %16 : vector<2x8x16x3xf32> to vector<256x3xf32>
    %c3 = arith.constant 3 : index
    %c0_6 = arith.constant 0 : index
    %18 = vector.load %arg2[%c3, %c0_6] : memref<9x128xf32, #tpu.memory_space<vmem>>, vector<3x128xf32>
    %cst_7 = arith.constant dense<0.000000e+00> : vector<256x128xf32>
    %19 = tpu.matmul %17, %18, %cst_7 {dimension_numbers = #tpu.dot_dimension_numbers<[1], [0], [0], [1], [0, 0, 1, 1], [], []>} : vector<256x3xf32>, vector<3x128xf32>, vector<256x128xf32> -> vector<256x128xf32>
    %20 = arith.addf %12, %19 : vector<256x128xf32>
    %21 = vector.extract_strided_slice %5 {offsets = [0, 2, 0, 0], sizes = [2, 8, 16, 1], strides = [1, 1, 1, 1]} : vector<2x10x18x1xf32> to vector<2x8x16x1xf32>
    %22 = vector.extract_strided_slice %5 {offsets = [0, 2, 1, 0], sizes = [2, 8, 16, 1], strides = [1, 1, 1, 1]} : vector<2x10x18x1xf32> to vector<2x8x16x1xf32>
    %23 = vector.extract_strided_slice %5 {offsets = [0, 2, 2, 0], sizes = [2, 8, 16, 1], strides = [1, 1, 1, 1]} : vector<2x10x18x1xf32> to vector<2x8x16x1xf32>
    %24 = tpu.concatenate %21, %22, %23 in 3 : vector<2x8x16x1xf32>, vector<2x8x16x1xf32>, vector<2x8x16x1xf32> -> vector<2x8x16x3xf32>
    %25 = vector.shape_cast %24 : vector<2x8x16x3xf32> to vector<256x3xf32>
    %c6 = arith.constant 6 : index
    %c0_8 = arith.constant 0 : index
    %26 = vector.load %arg2[%c6, %c0_8] : memref<9x128xf32, #tpu.memory_space<vmem>>, vector<3x128xf32>
    %cst_9 = arith.constant dense<0.000000e+00> : vector<256x128xf32>
    %27 = tpu.matmul %25, %26, %cst_9 {dimension_numbers = #tpu.dot_dimension_numbers<[1], [0], [0], [1], [0, 0, 1, 1], [], []>} : vector<256x3xf32>, vector<3x128xf32>, vector<256x128xf32> -> vector<256x128xf32>
    %28 = arith.addf %20, %27 : vector<256x128xf32>
    %c0_10 = arith.constant 0 : index
    %c0_11 = arith.constant 0 : index
    %29 = vector.load %arg3[%c0_10, %c0_11] : memref<1x128xf32, #tpu.memory_space<vmem>>, vector<1x128xf32>
    %30 = vector.broadcast %29 : vector<1x128xf32> to vector<256x128xf32>
    %31 = arith.addf %28, %30 : vector<256x128xf32>
    %cst_12 = arith.constant 0.000000e+00 : f32
    %32 = vector.broadcast %cst_12 : f32 to vector<256x128xf32>
    %33 = arith.maximumf %31, %32 : vector<256x128xf32>
    %34 = vector.shape_cast %33 : vector<256x128xf32> to vector<2x8x16x128xf32>
    %cst_13 = arith.constant 0.000000e+00 : f32
    %35 = vector.broadcast %cst_13 : f32 to vector<2x1x16x128xf32>
    %36 = tpu.concatenate %35, %34, %35 in 1 : vector<2x1x16x128xf32>, vector<2x8x16x128xf32>, vector<2x1x16x128xf32> -> vector<2x10x16x128xf32>
    %cst_14 = arith.constant 0.000000e+00 : f32
    %37 = vector.broadcast %cst_14 : f32 to vector<2x10x1x128xf32>
    %38 = tpu.concatenate %37, %36, %37 in 2 : vector<2x10x1x128xf32>, vector<2x10x16x128xf32>, vector<2x10x1x128xf32> -> vector<2x10x18x128xf32>
    %39 = vector.extract_strided_slice %38 {offsets = [0, 0, 0, 0], sizes = [2, 8, 16, 128], strides = [1, 1, 1, 1]} : vector<2x10x18x128xf32> to vector<2x8x16x128xf32>
    %40 = vector.extract_strided_slice %38 {offsets = [0, 0, 1, 0], sizes = [2, 8, 16, 128], strides = [1, 1, 1, 1]} : vector<2x10x18x128xf32> to vector<2x8x16x128xf32>
    %41 = vector.extract_strided_slice %38 {offsets = [0, 0, 2, 0], sizes = [2, 8, 16, 128], strides = [1, 1, 1, 1]} : vector<2x10x18x128xf32> to vector<2x8x16x128xf32>
    %42 = tpu.concatenate %39, %40, %41 in 3 : vector<2x8x16x128xf32>, vector<2x8x16x128xf32>, vector<2x8x16x128xf32> -> vector<2x8x16x384xf32>
    %43 = vector.shape_cast %42 : vector<2x8x16x384xf32> to vector<256x384xf32>
    %c0_15 = arith.constant 0 : index
    %c0_16 = arith.constant 0 : index
    %44 = vector.load %arg4[%c0_15, %c0_16] : memref<1152x128xf32, #tpu.memory_space<vmem>>, vector<384x128xf32>
    %cst_17 = arith.constant dense<0.000000e+00> : vector<256x128xf32>
    %45 = tpu.matmul %43, %44, %cst_17 {dimension_numbers = #tpu.dot_dimension_numbers<[1], [0], [0], [1], [0, 0, 1, 1], [], []>} : vector<256x384xf32>, vector<384x128xf32>, vector<256x128xf32> -> vector<256x128xf32>
    %46 = vector.extract_strided_slice %38 {offsets = [0, 1, 0, 0], sizes = [2, 8, 16, 128], strides = [1, 1, 1, 1]} : vector<2x10x18x128xf32> to vector<2x8x16x128xf32>
    %47 = vector.extract_strided_slice %38 {offsets = [0, 1, 1, 0], sizes = [2, 8, 16, 128], strides = [1, 1, 1, 1]} : vector<2x10x18x128xf32> to vector<2x8x16x128xf32>
    %48 = vector.extract_strided_slice %38 {offsets = [0, 1, 2, 0], sizes = [2, 8, 16, 128], strides = [1, 1, 1, 1]} : vector<2x10x18x128xf32> to vector<2x8x16x128xf32>
    %49 = tpu.concatenate %46, %47, %48 in 3 : vector<2x8x16x128xf32>, vector<2x8x16x128xf32>, vector<2x8x16x128xf32> -> vector<2x8x16x384xf32>
    %50 = vector.shape_cast %49 : vector<2x8x16x384xf32> to vector<256x384xf32>
    %c384 = arith.constant 384 : index
    %c0_18 = arith.constant 0 : index
    %51 = vector.load %arg4[%c384, %c0_18] : memref<1152x128xf32, #tpu.memory_space<vmem>>, vector<384x128xf32>
    %cst_19 = arith.constant dense<0.000000e+00> : vector<256x128xf32>
    %52 = tpu.matmul %50, %51, %cst_19 {dimension_numbers = #tpu.dot_dimension_numbers<[1], [0], [0], [1], [0, 0, 1, 1], [], []>} : vector<256x384xf32>, vector<384x128xf32>, vector<256x128xf32> -> vector<256x128xf32>
    %53 = arith.addf %45, %52 : vector<256x128xf32>
    %54 = vector.extract_strided_slice %38 {offsets = [0, 2, 0, 0], sizes = [2, 8, 16, 128], strides = [1, 1, 1, 1]} : vector<2x10x18x128xf32> to vector<2x8x16x128xf32>
    %55 = vector.extract_strided_slice %38 {offsets = [0, 2, 1, 0], sizes = [2, 8, 16, 128], strides = [1, 1, 1, 1]} : vector<2x10x18x128xf32> to vector<2x8x16x128xf32>
    %56 = vector.extract_strided_slice %38 {offsets = [0, 2, 2, 0], sizes = [2, 8, 16, 128], strides = [1, 1, 1, 1]} : vector<2x10x18x128xf32> to vector<2x8x16x128xf32>
    %57 = tpu.concatenate %54, %55, %56 in 3 : vector<2x8x16x128xf32>, vector<2x8x16x128xf32>, vector<2x8x16x128xf32> -> vector<2x8x16x384xf32>
    %58 = vector.shape_cast %57 : vector<2x8x16x384xf32> to vector<256x384xf32>
    %c768 = arith.constant 768 : index
    %c0_20 = arith.constant 0 : index
    %59 = vector.load %arg4[%c768, %c0_20] : memref<1152x128xf32, #tpu.memory_space<vmem>>, vector<384x128xf32>
    %cst_21 = arith.constant dense<0.000000e+00> : vector<256x128xf32>
    %60 = tpu.matmul %58, %59, %cst_21 {dimension_numbers = #tpu.dot_dimension_numbers<[1], [0], [0], [1], [0, 0, 1, 1], [], []>} : vector<256x384xf32>, vector<384x128xf32>, vector<256x128xf32> -> vector<256x128xf32>
    %61 = arith.addf %53, %60 : vector<256x128xf32>
    %c0_22 = arith.constant 0 : index
    %c0_23 = arith.constant 0 : index
    %62 = vector.load %arg5[%c0_22, %c0_23] : memref<1x128xf32, #tpu.memory_space<vmem>>, vector<1x128xf32>
    %63 = vector.broadcast %62 : vector<1x128xf32> to vector<256x128xf32>
    %64 = arith.addf %61, %63 : vector<256x128xf32>
    %cst_24 = arith.constant 0.000000e+00 : f32
    %65 = vector.broadcast %cst_24 : f32 to vector<256x128xf32>
    %66 = arith.maximumf %64, %65 : vector<256x128xf32>
    %67 = vector.shape_cast %66 : vector<256x128xf32> to vector<2x8x16x128xf32>
    %68 = vector.shape_cast %67 : vector<2x8x16x128xf32> to vector<2x8x8x256xf32>
    %69 = vector.extract_strided_slice %68 {offsets = [0, 0, 0, 0], sizes = [2, 8, 8, 128], strides = [1, 1, 1, 1]} : vector<2x8x8x256xf32> to vector<2x8x8x128xf32>
    %70 = vector.extract_strided_slice %68 {offsets = [0, 0, 0, 128], sizes = [2, 8, 8, 128], strides = [1, 1, 1, 1]} : vector<2x8x8x256xf32> to vector<2x8x8x128xf32>
    %71 = arith.maximumf %69, %70 : vector<2x8x8x128xf32>
    %72 = vector.shape_cast %71 : vector<2x8x8x128xf32> to vector<2x4x2x8x128xf32>
    %cst_25 = arith.constant dense<0xFF800000> : vector<2x4x8x128xf32>
    %73 = vector.multi_reduction <maximumf>, %72, %cst_25 [2] : vector<2x4x2x8x128xf32> to vector<2x4x8x128xf32>
    %cst_26 = arith.constant 0.000000e+00 : f32
    %74 = vector.broadcast %cst_26 : f32 to vector<2x1x8x128xf32>
    %75 = tpu.concatenate %74, %73, %74 in 1 : vector<2x1x8x128xf32>, vector<2x4x8x128xf32>, vector<2x1x8x128xf32> -> vector<2x6x8x128xf32>
    %cst_27 = arith.constant 0.000000e+00 : f32
    %76 = vector.broadcast %cst_27 : f32 to vector<2x6x1x128xf32>
    %77 = tpu.concatenate %76, %75, %76 in 2 : vector<2x6x1x128xf32>, vector<2x6x8x128xf32>, vector<2x6x1x128xf32> -> vector<2x6x10x128xf32>
    %78 = vector.extract_strided_slice %77 {offsets = [0, 0, 0, 0], sizes = [2, 4, 8, 128], strides = [1, 1, 1, 1]} : vector<2x6x10x128xf32> to vector<2x4x8x128xf32>
    %79 = vector.extract_strided_slice %77 {offsets = [0, 0, 1, 0], sizes = [2, 4, 8, 128], strides = [1, 1, 1, 1]} : vector<2x6x10x128xf32> to vector<2x4x8x128xf32>
    %80 = vector.extract_strided_slice %77 {offsets = [0, 0, 2, 0], sizes = [2, 4, 8, 128], strides = [1, 1, 1, 1]} : vector<2x6x10x128xf32> to vector<2x4x8x128xf32>
    %81 = tpu.concatenate %78, %79, %80 in 3 : vector<2x4x8x128xf32>, vector<2x4x8x128xf32>, vector<2x4x8x128xf32> -> vector<2x4x8x384xf32>
    %82 = vector.shape_cast %81 : vector<2x4x8x384xf32> to vector<64x384xf32>
    %c0_28 = arith.constant 0 : index
    %c0_29 = arith.constant 0 : index
    %83 = vector.load %arg6[%c0_28, %c0_29] : memref<1152x128xf32, #tpu.memory_space<vmem>>, vector<384x128xf32>
    %cst_30 = arith.constant dense<0.000000e+00> : vector<64x128xf32>
    %84 = tpu.matmul %82, %83, %cst_30 {dimension_numbers = #tpu.dot_dimension_numbers<[1], [0], [0], [1], [0, 0, 1, 1], [], []>} : vector<64x384xf32>, vector<384x128xf32>, vector<64x128xf32> -> vector<64x128xf32>
    %85 = vector.extract_strided_slice %77 {offsets = [0, 1, 0, 0], sizes = [2, 4, 8, 128], strides = [1, 1, 1, 1]} : vector<2x6x10x128xf32> to vector<2x4x8x128xf32>
    %86 = vector.extract_strided_slice %77 {offsets = [0, 1, 1, 0], sizes = [2, 4, 8, 128], strides = [1, 1, 1, 1]} : vector<2x6x10x128xf32> to vector<2x4x8x128xf32>
    %87 = vector.extract_strided_slice %77 {offsets = [0, 1, 2, 0], sizes = [2, 4, 8, 128], strides = [1, 1, 1, 1]} : vector<2x6x10x128xf32> to vector<2x4x8x128xf32>
    %88 = tpu.concatenate %85, %86, %87 in 3 : vector<2x4x8x128xf32>, vector<2x4x8x128xf32>, vector<2x4x8x128xf32> -> vector<2x4x8x384xf32>
    %89 = vector.shape_cast %88 : vector<2x4x8x384xf32> to vector<64x384xf32>
    %c384_31 = arith.constant 384 : index
    %c0_32 = arith.constant 0 : index
    %90 = vector.load %arg6[%c384_31, %c0_32] : memref<1152x128xf32, #tpu.memory_space<vmem>>, vector<384x128xf32>
    %cst_33 = arith.constant dense<0.000000e+00> : vector<64x128xf32>
    %91 = tpu.matmul %89, %90, %cst_33 {dimension_numbers = #tpu.dot_dimension_numbers<[1], [0], [0], [1], [0, 0, 1, 1], [], []>} : vector<64x384xf32>, vector<384x128xf32>, vector<64x128xf32> -> vector<64x128xf32>
    %92 = arith.addf %84, %91 : vector<64x128xf32>
    %93 = vector.extract_strided_slice %77 {offsets = [0, 2, 0, 0], sizes = [2, 4, 8, 128], strides = [1, 1, 1, 1]} : vector<2x6x10x128xf32> to vector<2x4x8x128xf32>
    %94 = vector.extract_strided_slice %77 {offsets = [0, 2, 1, 0], sizes = [2, 4, 8, 128], strides = [1, 1, 1, 1]} : vector<2x6x10x128xf32> to vector<2x4x8x128xf32>
    %95 = vector.extract_strided_slice %77 {offsets = [0, 2, 2, 0], sizes = [2, 4, 8, 128], strides = [1, 1, 1, 1]} : vector<2x6x10x128xf32> to vector<2x4x8x128xf32>
    %96 = tpu.concatenate %93, %94, %95 in 3 : vector<2x4x8x128xf32>, vector<2x4x8x128xf32>, vector<2x4x8x128xf32> -> vector<2x4x8x384xf32>
    %97 = vector.shape_cast %96 : vector<2x4x8x384xf32> to vector<64x384xf32>
    %c768_34 = arith.constant 768 : index
    %c0_35 = arith.constant 0 : index
    %98 = vector.load %arg6[%c768_34, %c0_35] : memref<1152x128xf32, #tpu.memory_space<vmem>>, vector<384x128xf32>
    %cst_36 = arith.constant dense<0.000000e+00> : vector<64x128xf32>
    %99 = tpu.matmul %97, %98, %cst_36 {dimension_numbers = #tpu.dot_dimension_numbers<[1], [0], [0], [1], [0, 0, 1, 1], [], []>} : vector<64x384xf32>, vector<384x128xf32>, vector<64x128xf32> -> vector<64x128xf32>
    %100 = arith.addf %92, %99 : vector<64x128xf32>
    %c0_37 = arith.constant 0 : index
    %c0_38 = arith.constant 0 : index
    %101 = vector.load %arg7[%c0_37, %c0_38] : memref<1x128xf32, #tpu.memory_space<vmem>>, vector<1x128xf32>
    %102 = vector.broadcast %101 : vector<1x128xf32> to vector<64x128xf32>
    %103 = arith.addf %100, %102 : vector<64x128xf32>
    %cst_39 = arith.constant 0.000000e+00 : f32
    %104 = vector.broadcast %cst_39 : f32 to vector<64x128xf32>
    %105 = arith.maximumf %103, %104 : vector<64x128xf32>
    %106 = vector.shape_cast %105 : vector<64x128xf32> to vector<2x4x8x128xf32>
    %cst_40 = arith.constant 0.000000e+00 : f32
    %107 = vector.broadcast %cst_40 : f32 to vector<2x1x8x128xf32>
    %108 = tpu.concatenate %107, %106, %107 in 1 : vector<2x1x8x128xf32>, vector<2x4x8x128xf32>, vector<2x1x8x128xf32> -> vector<2x6x8x128xf32>
    %cst_41 = arith.constant 0.000000e+00 : f32
    %109 = vector.broadcast %cst_41 : f32 to vector<2x6x1x128xf32>
    %110 = tpu.concatenate %109, %108, %109 in 2 : vector<2x6x1x128xf32>, vector<2x6x8x128xf32>, vector<2x6x1x128xf32> -> vector<2x6x10x128xf32>
    %111 = vector.extract_strided_slice %110 {offsets = [0, 0, 0, 0], sizes = [2, 4, 8, 128], strides = [1, 1, 1, 1]} : vector<2x6x10x128xf32> to vector<2x4x8x128xf32>
    %112 = vector.extract_strided_slice %110 {offsets = [0, 0, 1, 0], sizes = [2, 4, 8, 128], strides = [1, 1, 1, 1]} : vector<2x6x10x128xf32> to vector<2x4x8x128xf32>
    %113 = vector.extract_strided_slice %110 {offsets = [0, 0, 2, 0], sizes = [2, 4, 8, 128], strides = [1, 1, 1, 1]} : vector<2x6x10x128xf32> to vector<2x4x8x128xf32>
    %114 = tpu.concatenate %111, %112, %113 in 3 : vector<2x4x8x128xf32>, vector<2x4x8x128xf32>, vector<2x4x8x128xf32> -> vector<2x4x8x384xf32>
    %115 = vector.shape_cast %114 : vector<2x4x8x384xf32> to vector<64x384xf32>
    %c0_42 = arith.constant 0 : index
    %c0_43 = arith.constant 0 : index
    %116 = vector.load %arg8[%c0_42, %c0_43] : memref<1152x128xf32, #tpu.memory_space<vmem>>, vector<384x128xf32>
    %cst_44 = arith.constant dense<0.000000e+00> : vector<64x128xf32>
    %117 = tpu.matmul %115, %116, %cst_44 {dimension_numbers = #tpu.dot_dimension_numbers<[1], [0], [0], [1], [0, 0, 1, 1], [], []>} : vector<64x384xf32>, vector<384x128xf32>, vector<64x128xf32> -> vector<64x128xf32>
    %118 = vector.extract_strided_slice %110 {offsets = [0, 1, 0, 0], sizes = [2, 4, 8, 128], strides = [1, 1, 1, 1]} : vector<2x6x10x128xf32> to vector<2x4x8x128xf32>
    %119 = vector.extract_strided_slice %110 {offsets = [0, 1, 1, 0], sizes = [2, 4, 8, 128], strides = [1, 1, 1, 1]} : vector<2x6x10x128xf32> to vector<2x4x8x128xf32>
    %120 = vector.extract_strided_slice %110 {offsets = [0, 1, 2, 0], sizes = [2, 4, 8, 128], strides = [1, 1, 1, 1]} : vector<2x6x10x128xf32> to vector<2x4x8x128xf32>
    %121 = tpu.concatenate %118, %119, %120 in 3 : vector<2x4x8x128xf32>, vector<2x4x8x128xf32>, vector<2x4x8x128xf32> -> vector<2x4x8x384xf32>
    %122 = vector.shape_cast %121 : vector<2x4x8x384xf32> to vector<64x384xf32>
    %c384_45 = arith.constant 384 : index
    %c0_46 = arith.constant 0 : index
    %123 = vector.load %arg8[%c384_45, %c0_46] : memref<1152x128xf32, #tpu.memory_space<vmem>>, vector<384x128xf32>
    %cst_47 = arith.constant dense<0.000000e+00> : vector<64x128xf32>
    %124 = tpu.matmul %122, %123, %cst_47 {dimension_numbers = #tpu.dot_dimension_numbers<[1], [0], [0], [1], [0, 0, 1, 1], [], []>} : vector<64x384xf32>, vector<384x128xf32>, vector<64x128xf32> -> vector<64x128xf32>
    %125 = arith.addf %117, %124 : vector<64x128xf32>
    %126 = vector.extract_strided_slice %110 {offsets = [0, 2, 0, 0], sizes = [2, 4, 8, 128], strides = [1, 1, 1, 1]} : vector<2x6x10x128xf32> to vector<2x4x8x128xf32>
    %127 = vector.extract_strided_slice %110 {offsets = [0, 2, 1, 0], sizes = [2, 4, 8, 128], strides = [1, 1, 1, 1]} : vector<2x6x10x128xf32> to vector<2x4x8x128xf32>
    %128 = vector.extract_strided_slice %110 {offsets = [0, 2, 2, 0], sizes = [2, 4, 8, 128], strides = [1, 1, 1, 1]} : vector<2x6x10x128xf32> to vector<2x4x8x128xf32>
    %129 = tpu.concatenate %126, %127, %128 in 3 : vector<2x4x8x128xf32>, vector<2x4x8x128xf32>, vector<2x4x8x128xf32> -> vector<2x4x8x384xf32>
    %130 = vector.shape_cast %129 : vector<2x4x8x384xf32> to vector<64x384xf32>
    %c768_48 = arith.constant 768 : index
    %c0_49 = arith.constant 0 : index
    %131 = vector.load %arg8[%c768_48, %c0_49] : memref<1152x128xf32, #tpu.memory_space<vmem>>, vector<384x128xf32>
    %cst_50 = arith.constant dense<0.000000e+00> : vector<64x128xf32>
    %132 = tpu.matmul %130, %131, %cst_50 {dimension_numbers = #tpu.dot_dimension_numbers<[1], [0], [0], [1], [0, 0, 1, 1], [], []>} : vector<64x384xf32>, vector<384x128xf32>, vector<64x128xf32> -> vector<64x128xf32>
    %133 = arith.addf %125, %132 : vector<64x128xf32>
    %c0_51 = arith.constant 0 : index
    %c0_52 = arith.constant 0 : index
    %134 = vector.load %arg9[%c0_51, %c0_52] : memref<1x128xf32, #tpu.memory_space<vmem>>, vector<1x128xf32>
    %135 = vector.broadcast %134 : vector<1x128xf32> to vector<64x128xf32>
    %136 = arith.addf %133, %135 : vector<64x128xf32>
    %cst_53 = arith.constant 0.000000e+00 : f32
    %137 = vector.broadcast %cst_53 : f32 to vector<64x128xf32>
    %138 = arith.maximumf %136, %137 : vector<64x128xf32>
    %139 = vector.shape_cast %138 : vector<64x128xf32> to vector<2x4x8x128xf32>
    %140 = vector.shape_cast %139 : vector<2x4x8x128xf32> to vector<2x4x4x256xf32>
    %141 = vector.extract_strided_slice %140 {offsets = [0, 0, 0, 0], sizes = [2, 4, 4, 128], strides = [1, 1, 1, 1]} : vector<2x4x4x256xf32> to vector<2x4x4x128xf32>
    %142 = vector.extract_strided_slice %140 {offsets = [0, 0, 0, 128], sizes = [2, 4, 4, 128], strides = [1, 1, 1, 1]} : vector<2x4x4x256xf32> to vector<2x4x4x128xf32>
    %143 = arith.maximumf %141, %142 : vector<2x4x4x128xf32>
    %144 = vector.shape_cast %143 : vector<2x4x4x128xf32> to vector<2x2x2x4x128xf32>
    %cst_54 = arith.constant dense<0xFF800000> : vector<2x2x4x128xf32>
    %145 = vector.multi_reduction <maximumf>, %144, %cst_54 [2] : vector<2x2x2x4x128xf32> to vector<2x2x4x128xf32>
    %c0_55 = arith.constant 0 : index
    %c0_56 = arith.constant 0 : index
    %146 = vector.load %arg10[%c0_55, %c0_56] : memref<512x128xf32, #tpu.memory_space<vmem>>, vector<512x128xf32>
    %c0_57 = arith.constant 0 : index
    %c0_58 = arith.constant 0 : index
    %147 = vector.load %arg11[%c0_57, %c0_58] : memref<1x128xf32, #tpu.memory_space<vmem>>, vector<1x128xf32>
    %148 = vector.shape_cast %145 : vector<2x2x4x128xf32> to vector<4x512xf32>
    %cst_59 = arith.constant dense<0.000000e+00> : vector<4x128xf32>
    %149 = tpu.matmul %148, %146, %cst_59 {dimension_numbers = #tpu.dot_dimension_numbers<[1], [0], [0], [1], [0, 0, 1, 1], [], []>} : vector<4x512xf32>, vector<512x128xf32>, vector<4x128xf32> -> vector<4x128xf32>
    %150 = vector.broadcast %147 : vector<1x128xf32> to vector<4x128xf32>
    %151 = arith.addf %149, %150 : vector<4x128xf32>
    %152 = vector.shape_cast %151 : vector<4x128xf32> to vector<2x2x128xf32>
    %c0_60 = arith.constant 0 : index
    %c0_61 = arith.constant 0 : index
    %c0_62 = arith.constant 0 : index
    %153 = vector.load %arg12[%c0_60, %c0_61, %c0_62] : memref<2x2x128xf32, #tpu.memory_space<vmem>>, vector<2x2x128xf32>
    tpu.vector_store %arg12[%c0_60, %c0_61, %c0_62], %152 {strides = array<i32>} : memref<2x2x128xf32, #tpu.memory_space<vmem>>, vector<2x2x128xf32>,
    return
  }
  func.func @transform_0(%arg0: i32) -> (i32, i32, i32) {
    %c0_i32 = arith.constant 0 : i32
    %c0_i32_0 = arith.constant 0 : i32
    %c0_i32_1 = arith.constant 0 : i32
    return %arg0, %c0_i32, %c0_i32_0 : i32, i32, i32
  }
  func.func @transform_1(%arg0: i32) -> (i32, i32) {
    %c0_i32 = arith.constant 0 : i32
    %c0_i32_0 = arith.constant 0 : i32
    %c0_i32_1 = arith.constant 0 : i32
    return %c0_i32, %c0_i32_0 : i32, i32
  }
  func.func @transform_2(%arg0: i32) -> (i32, i32) {
    %c0_i32 = arith.constant 0 : i32
    %c0_i32_0 = arith.constant 0 : i32
    %c0_i32_1 = arith.constant 0 : i32
    return %c0_i32, %c0_i32_0 : i32, i32
  }
  func.func @transform_3(%arg0: i32) -> (i32, i32) {
    %c0_i32 = arith.constant 0 : i32
    %c0_i32_0 = arith.constant 0 : i32
    %c0_i32_1 = arith.constant 0 : i32
    return %c0_i32, %c0_i32_0 : i32, i32
  }
  func.func @transform_4(%arg0: i32) -> (i32, i32) {
    %c0_i32 = arith.constant 0 : i32
    %c0_i32_0 = arith.constant 0 : i32
    %c0_i32_1 = arith.constant 0 : i32
    return %c0_i32, %c0_i32_0 : i32, i32
  }
  func.func @transform_5(%arg0: i32) -> (i32, i32) {
    %c0_i32 = arith.constant 0 : i32
    %c0_i32_0 = arith.constant 0 : i32
    %c0_i32_1 = arith.constant 0 : i32
    return %c0_i32, %c0_i32_0 : i32, i32
  }
  func.func @transform_6(%arg0: i32) -> (i32, i32) {
    %c0_i32 = arith.constant 0 : i32
    %c0_i32_0 = arith.constant 0 : i32
    %c0_i32_1 = arith.constant 0 : i32
    return %c0_i32, %c0_i32_0 : i32, i32
  }
  func.func @transform_7(%arg0: i32) -> (i32, i32) {
    %c0_i32 = arith.constant 0 : i32
    %c0_i32_0 = arith.constant 0 : i32
    %c0_i32_1 = arith.constant 0 : i32
    return %c0_i32, %c0_i32_0 : i32, i32
  }
  func.func @transform_8(%arg0: i32) -> (i32, i32) {
    %c0_i32 = arith.constant 0 : i32
    %c0_i32_0 = arith.constant 0 : i32
    %c0_i32_1 = arith.constant 0 : i32
    return %c0_i32, %c0_i32_0 : i32, i32
  }
  func.func @transform_9(%arg0: i32) -> (i32, i32) {
    %c0_i32 = arith.constant 0 : i32
    %c0_i32_0 = arith.constant 0 : i32
    %c0_i32_1 = arith.constant 0 : i32
    return %c0_i32, %c0_i32_0 : i32, i32
  }
  func.func @transform_10(%arg0: i32) -> (i32, i32) {
    %c0_i32 = arith.constant 0 : i32
    %c0_i32_0 = arith.constant 0 : i32
    %c0_i32_1 = arith.constant 0 : i32
    return %c0_i32, %c0_i32_0 : i32, i32
  }
  func.func @transform_11(%arg0: i32) -> (i32, i32, i32) {
    %c0_i32 = arith.constant 0 : i32
    %c0_i32_0 = arith.constant 0 : i32
    %c0_i32_1 = arith.constant 0 : i32
    return %arg0, %c0_i32, %c0_i32_0 : i32, i32, i32
  }
}

</mosaic_0001>

<bundles_post_ra>
// kernel: tpu_custom_call.1
= control target key start
LH: loop header
LB: loop body
LE: loop exit
PB: predicated region body
PF: predicated region fallthrough
CT: control target
= control target key end

     0   :  { %s9388_s0 = inlined_call_operand.hbm [shape: f32[4,8,16], index: 0, kind: input, shape index: {}]   ;;  %s9389_s1 = inlined_call_operand.hbm [shape: f32[9,128], index: 1, kind: input, shape index: {}]   ;;  %s9390_s2 = inlined_call_operand.vmem [shape: f32[1,128], index: 2, kind: input, shape index: {}]   ;;  %s9391_s3 = inlined_call_operand.hbm [shape: f32[1152,128], index: 3, kind: input, shape index: {}]   ;;  %s9392_s4 = inlined_call_operand.vmem [shape: f32[1,128], index: 4, kind: input, shape index: {}]   ;;  %s9393_s5 = inlined_call_operand.hbm [shape: f32[1152,128], index: 5, kind: input, shape index: {}]   ;;  %s9394_s6 = inlined_call_operand.vmem [shape: f32[1,128], index: 6, kind: input, shape index: {}]   ;;  %s9395_s7 = inlined_call_operand.hbm [shape: f32[1152,128], index: 7, kind: input, shape index: {}]   ;;  %s9396_s8 = inlined_call_operand.vmem [shape: f32[1,128], index: 8, kind: input, shape index: {}]   ;;  %s9397_s9 = inlined_call_operand.hbm [shape: f32[512,128], index: 9, kind: input, shape index: {}]   ;;  %s9398_s10 = inlined_call_operand.vmem [shape: f32[1,128], index: 10, kind: input, shape index: {}]   ;;  %s9399_s11 = inlined_call_operand.hbm [shape: f32[4,2,128], index: 11, kind: output, shape index: {}]  }
   0x1   :  { %9533 = sst [smem:[#allocation106_spill]] %s9389_s1 }
   0x2   :  { %9534 = sst [smem:[#allocation107_spill]] %s9391_s3 }
   0x3   :  { %9535 = sst [smem:[#allocation108_spill]] %s9393_s5 }
   0x4   :  { %9536 = sst [smem:[#allocation109_spill]] %s9395_s7 }
   0x5   :  { %9537 = sst [smem:[#allocation110_spill]] %s9397_s9 }
   0x6   :  { %16 = vsyncpa [#allocation3], 0 }
   0x7   :  { %18 = vsyncpa [#allocation3 + $0x1], 0 }
   0x8   :  { %19 = vsyncpa [#allocation6], 0 }
   0x9   :  { %20 = vsyncpa [#allocation9], 0 }
   0xa   :  { %21 = vsyncpa [#allocation12], 0 }
   0xb   :  { %22 = vsyncpa [#allocation4], 0 }
   0xc   :  { %24 = vsyncpa [#allocation4 + $0x1], 0  ;;  %s6479_s17 = smov 0   ;;  %s6481_s18 = smov 0  }
   0xd   :  { %s6483_s19 = smov 0   ;;  %s6485_s20 = smov 0  }
   0xe LB: > { %s9538_s1 = sld [smem:[#allocation106_spill]]  ;;  %s6503_s24 = sadd.s32 4294967295, %s6403_s20   ;;  %s6403_s20 = sphi %s6485_s20, %s9790_s20   ;;  %s6399_s19 = sphi %s6483_s19, %s9789_s19   ;;  %s6395_s18 = sphi %s6481_s18, %s9788_s18   ;;  %s6391_s17 = sphi %s6479_s17, %s9787_s17  }
   0xf   : > { %p5670_p0 = scmp.ge.s32.totalorder %s6403_s20, 1  ;;  %p51_p1 = scmp.eq.s32.totalorder %s6503_s24, 0 }
  0x10   : > { %p297_p2 = scmp.lt.s32.totalorder %s6403_s20, 3  ;;  %s6405_s26 = smov [#allocation5]  }
  0x11   : > { %s310_s27 = sshll.u32 %s6405_s26, 4  ;;  %s9540_s5 = sld [smem:[#allocation108_spill]]  ;;  %s311_s27 = int_to_ptr.vmem [resolvable:$true] %s310_s27 }
  0x12   : > { %p6508_p3 = pnand %p5670_p0, %p297_p2  ;;  %s9542_s3 = sld [smem:[#allocation107_spill]] }
  0x13   : > { %s6406_s16 = smov [#allocation8]   ;;  %s9400_s22 = smov 128  }
  0x14   : > { %s308_s23 = sshll.u32 %s9538_s1, 4  ;;  %p6014_p4 = pneg %p6508_p3  ;;  %s309_s23 = int_to_ptr.hbm [resolvable:$true] %s308_s23 }
  0x15   : > { %s344_s21 = sshll.u32 %s6406_s16, 4  ;;  %s9401_s26 = smov 8   ;;  %s345_s21 = int_to_ptr.vmem [resolvable:$true] %s344_s21 }
  0x16   : > { %p6520_p6 = pnand %p6014_p4, %p51_p1  ;;  %s9543_s7 = sld [smem:[#allocation109_spill]] }
  0x17   : > { %s342_s30 = sshll.u32 %s9540_s5, 4  ;;  %s6409_s14 = smov [#allocation7]   ;;  %s343_s30 = int_to_ptr.hbm [resolvable:$true] %s342_s30 }
  0x18   : > { %s325_s15 = sshll.u32 %s9542_s3, 4  ;;  %s327_s16 = sshll.u32 %s6409_s14, 4  ;;  %s326_s15 = int_to_ptr.hbm [resolvable:$true] %s325_s15  ;;  %s328_s16 = int_to_ptr.vmem [resolvable:$true] %s327_s16 }
  0x19   : > { %6017 = dma.hbm_to_vmem [thread:$0]  (!%p6520_p6), %s309_s23, 256, %s311_s27, [#allocation6], %s9400_s22, %s9400_s22, %s9401_s26  }
  0x1a   : > { %6023 = dma.hbm_to_vmem [thread:$0]  (!%p6520_p6), %s343_s30, 18432, %s345_s21, [#allocation9], %s9400_s22, %s9400_s22, %s9401_s26  }
  0x1b   : > { %6020 = dma.hbm_to_vmem [thread:$0]  (!%p6520_p6), %s326_s15, 18432, %s328_s16, [#allocation6], %s9400_s22, %s9400_s22, %s9401_s26  }
  0x1c   : > { %s359_s13 = sshll.u32 %s9543_s7, 4  ;;  %s6410_s23 = smov [#allocation10]   ;;  %s360_s13 = int_to_ptr.hbm [resolvable:$true] %s359_s13 }
  0x1d   : > { %s361_s27 = sshll.u32 %s6410_s23, 4  ;;  %s9544_s9 = sld [smem:[#allocation110_spill]]  ;;  %s362_s27 = int_to_ptr.vmem [resolvable:$true] %s361_s27 }
  0x1e   : > { %6026 = dma.hbm_to_vmem [thread:$0]  (!%p6520_p6), %s360_s13, 18432, %s362_s27, [#allocation9], %s9400_s22, %s9400_s22, %s9401_s26  }
  0x1f   : > { %s6411_s15 = smov [#allocation11]   ;;  %s5669_s14 = sadd.s32 4294967294, %s6403_s20  }
  0x20   : > { %s378_s29 = sshll.u32 %s6411_s15, 4  ;;  %s6560_s16 = sadd.s32 1, %s6403_s20   ;;  %s379_s29 = int_to_ptr.vmem [resolvable:$true] %s378_s29 }
  0x21   : > { %s37_s23 = sadd.s32 1, %s6399_s19  ;;  %s34_s30 = ssub.s32 %s6403_s20, %s6560_s16 }
  0x22   : > { %p44_p7 = scmp.ne.s32.totalorder %s6399_s19, %s6395_s18  ;;  %p35_p8 = scmp.eq.s32.totalorder %s34_s30, 0 }
  0x23   : > { %s376_s28 = sshll.u32 %s9544_s9, 4  ;;  %p45_p9 = scmp.eq.s32.totalorder %s6403_s20, 0  ;;  %s377_s28 = int_to_ptr.hbm [resolvable:$true] %s376_s28 }
  0x24   : > { %6029 = dma.hbm_to_vmem [thread:$0]  (!%p6520_p6), %s377_s28, 8192, %s379_s29, [#allocation12], %s9400_s22, %s9400_s22, %s9401_s26  }
  0x25   : > { %p50_p10 = scmp.ne.s32.totalorder %s6395_s18, %s6391_s17  ;;  %p284_p11 = scmp.eq.s32.totalorder %s6503_s24, 1 }
  0x26   : > { %s6572_s13 = scalar_select %p35_p8, %s6399_s19, %s37_s23  }
  0x27   : > { %p6576_p12 = por %p51_p1, %p50_p10  ;;  %p6580_p13 = por %p284_p11, %p44_p7 }
  0x28   : > { %p290_p0 = scmp.eq.s32.totalorder %s5669_s14, 1  ;;  %p46_p2 = por %p45_p9, %p44_p7 }
  0x29   : > { %s395_s21 = sand.u32 1, %s6399_s19   ;;  %p6043_p6 = scmp.lt.s32.totalorder %s6403_s20, 2 }
  0x2a   : > { %p6585_p4 = por %p290_p0, %p50_p10  ;;  %s5677_s15 = sshll.u32 %s395_s21, 4 }
  0x2b   : > { %s5988_s29 = sshll.u32 %s6403_s20, 4  ;;  %s399_s1 = scalar_lea.vmem [#allocation2], %s5677_s15 }
  0x2c   : > { %s404_s22 = scalar_lea.hbm %s9388_s0, %s5988_s29  ;;  %s407_s3 = sshll.u32 %s399_s1, 4  ;;  %s408_s3 = int_to_ptr.vmem [resolvable:$true] %s407_s3 }
  0x2d   : > { %s405_s26 = sshll.u32 %s404_s22, 4  ;;  %p6594_p8 = pnand %p6043_p6, %p46_p2  ;;  %s406_s26 = int_to_ptr.hbm [resolvable:$true] %s405_s26 }
  0x2e   : > { %s396_s5 = scalar_lea.sflag [#allocation3], %s395_s21  ;;  %s6295_s7 = sshra.s32 %s406_s26, 4  ;;  %s6296_s7 = int_to_ptr.hbm [resolvable:$true] %s6295_s7 }
  0x2f   : > { %s6297_s9 = scalar_lea.hbm %s6296_s7, 16  ;;  %p6299_p9 = pneg %p6594_p8 }
  0x30   : > { %p6298_p7 = scmp.ne.s32.totalorder %s6296_s7, %s6297_s9  ;;  %s6302_s1 = scalar_lea.hbm %s9388_s0, 32 }
  0x31   : > { %p6303_p0 = scmp.lt.s32.totalorder %s6296_s7, %s9388_s0  ;;  %p6304_p2 = scmp.lt.s32.totalorder %s6302_s1, %s6297_s9 }
  0x32   : > { %p6300_p10 = pnand %p6299_p9, %p6298_p7 }
  0x33   : > { %p6305_p6 = por %p6304_p2, %p6303_p0 }
  0x34   : > { %p6301_p11 = pneg %p6300_p10 }
  0x36   : > { %p6306_p5 = pnand %p6305_p6, %p6301_p11 }
  0x38   : > { %6309 = shalt.err (!%p6306_p5)
}
  0x39   : > { %s9549_s21 = smov 8   ;;  %s9550_s30 = smov 128  }
  0x3a   : > { %6033 = dma.hbm_to_vmem [thread:$0]  (!%p6594_p8), %s406_s26, 256, %s408_s3, %s396_s5, %s9550_s30, %s9550_s30, %s9549_s21  }
  0x3b   : > { %419 = sbr.rel (%p6508_p3) target bundleno = 2226 (0x8b2), region = 64 }
  0x40   : > { %s6614_s29 = sand.u32 1, %s6395_s18  }
  0x41   : > { %s5681_s7 = sshll.u32 %s6614_s29, 4  ;;  %s422_s9 = scalar_lea.sflag [#allocation3], %s6614_s29 }
  0x42   : > { %s6618_s22 = scalar_lea.vmem [#allocation2], %s5681_s7 }
  0x43   : > { %6370 = dma.done.wait (%p6576_p12), %s422_s9, 256  }
  0x44   : > { %6372 = vsyncadd (%p6576_p12), %s422_s9, 4294967040 }
  0x45   : > { %6374 = dma.done.wait (%p51_p1), [#allocation6], 18688  }
  0x46   : > { %6376 = vsyncadd (%p51_p1), [#allocation6], 4294948608 }
  0x47   : > { %6378 = dma.done.wait (%p51_p1), [#allocation9], 36864  }
  0x48   : > { %6380 = vsyncadd (%p51_p1), [#allocation9], 4294930432 }
  0x49   : > { %6382 = dma.done.wait (%p51_p1), [#allocation12], 8192  }
  0x4a   : > { %6384 = vsyncadd (%p51_p1), [#allocation12], 4294959104  ;;  %v528_v0 = vlaneseq  ;;  %v492_v3 = vld [vmem:[%s6618_s22] sm:$0xff]  ;;  %vm500_vm0 = vcmask 1041408   ;;  %s6412_s3 = smov 1   ;;  %vm517_vm1 = vcmask 7168  }
  0x4b   : > { %v496_v4 = vrot.slane %v492_v3, 6  ;;  %vm522_vm2 = vcmask 138240   ;;  %vm1387_vm3 = vcmask 1042432   ;;  %v1674_v18 = vld [vmem:[#allocation5 + $0x6] sm:$0x7]  ;;  %vm955_vm4 = vcmask 1046528  }
  0x4c   : > { %v6636_v1 = vshrl.u32 %v528_v0, 7  ;;  %5754 = vmatpush.msk.msra.mxu2 %vm1387_vm3, %v1674_v18  ;;  %v1246_v19 = vld [vmem:[#allocation5] sm:$0x7]  ;;  %v6673_v21 = vld [vmem:[%s6618_s22 + $0x8] sm:$0xff]  ;;  %vm1068_vm5 = vcmask 1045504   ;;  %vm1213_vm6 = vcmask 15360  }
  0x4d   : > { %v501_v5 = vsel %vm500_vm0, 0.0, %v496_v4  ;;  %5721 = vmatpush.msk.msra.mxu1 %vm1387_vm3, %v1246_v19  ;;  %v497_v24 = vrot.slane %v6673_v21, 6  ;;  %v1289_v30 = vld [vmem:[#allocation5 + $0x3] sm:$0x7]  ;;  %vm1290_vm7 = vcmask 23552   ;;  %v2392_v21 = vld [vmem:[#allocation7 + $0x188] sm:$0xff] }
  0x4e   : > { %6096 = vset.pattern.permute.xlu0 %v6636_v1  ;;  %v6640_v2 = vadd.s32 8, %v6636_v1  ;;  %v6650_v11 = vadd.s32 16, %v6636_v1  ;;  %5688 = vmatpush.msk.msra.mxu0 %vm1387_vm3, %v1289_v30  ;;  %vm1936_vm8 = vcmask 1040384   ;;  %vm3860_vm10 = vcmask 1043456   ;;  %s5687_s5 = sshll.u32 %s6614_s29, 2  ;;  %s5989_s25 = sshll.u32 %s6503_s24, 2 }
  0x4f   : > { %505 = vrot.lane.b32.xlu0 %v501_v5, %s6412_s3  ;;  %v502_v34 = vsel %vm500_vm0, 0.0, %v497_v24  ;;  %vm6874_vm9 = vmneg %vm1936_vm8  ;;  %vm5416_vm11 = vcmask 1047556   ;;  %s5544_s14 = scalar_lea.hbm %s9399_s11, %s5989_s25  ;;  %s489_s1 = scalar_lea.vmem [#allocation13], %s5687_s5 }
  0x50   : > { %6099 = vset.pattern.permute.xlu2 %v6640_v2  ;;  %6097 = vset.pattern.permute.xlu1 %v6640_v2  ;;  %vm5979_vm12 = vmneg %vm5416_vm11  ;;  %s5545_s15 = sshll.u32 %s489_s1, 4  ;;  %s5547_s23 = sshll.u32 %s5544_s14, 4  ;;  %s5546_s15 = int_to_ptr.vmem [resolvable:$true] %s5545_s15  ;;  %s5548_s23 = int_to_ptr.hbm [resolvable:$true] %s5547_s23 }
  0x51   : > { %s5533_s21 = scalar_lea.sflag [#allocation4], %s6614_s29  ;;  %s6339_s24 = sshra.s32 %s5548_s23, 4  ;;  %s6340_s24 = int_to_ptr.hbm [resolvable:$true] %s6339_s24 }
  0x52   : > { %s6341_s30 = scalar_lea.hbm %s6340_s24, 4  ;;  %s6345_s22 = scalar_lea.hbm %s9399_s11, 8 }
  0x53   : > { %p6342_p1 = scmp.ne.s32.totalorder %s6340_s24, %s6341_s30  ;;  %p6346_p12 = scmp.lt.s32.totalorder %s6340_s24, %s9399_s11 }
  0x54   : > { %p6347_p8 = scmp.lt.s32.totalorder %s6345_s22, %s6341_s30 }
  0x55   : > { %p6343_p3 = pnand %p6342_p1, %p6580_p13 }
  0x56   : > { %p6348_p7 = por %p6347_p8, %p6346_p12 }
  0x57   : > { %p6344_p5 = pneg %p6343_p3 }
  0x59   : > { %p6349_p9 = pnand %p6348_p7, %p6344_p5 }
  0xc1   : > { %v506_v6 = vpop.permute.xlu0 %505 }
  0xc2   : > { %v518_v7 = vsel %vm517_vm1, 0.0, %v506_v6 }
  0xc3   : > { %v523_v8 = vsel %vm522_vm2, %v518_v7, 0.0 }
  0xc4   : > { %v565_v9 = vperm.slane %v523_v8, 2  ;;  %v527_v10 = vperm.slane %v523_v8, 0  ;;  %v546_v12 = vperm.slane %v523_v8, 1  ;;  %v603_v13 = vperm.slane %v523_v8, 4 }
  0xc5   : > { %v641_v14 = vperm.slane %v523_v8, 6  ;;  %v584_v15 = vperm.slane %v523_v8, 3  ;;  %v660_v16 = vperm.slane %v523_v8, 7  ;;  %v622_v17 = vperm.slane %v523_v8, 5 }
  0xc6   : > { %576 = vperm.xlu1 %6097, %v565_v9   ;;  %570 = vperm.xlu0 %6096, %v565_v9  }
  0xc7   : > { %538 = vperm.xlu2 %6099, %v527_v10  }
  0xce   : > { %6098 = vset.pattern.permute.xlu1 %v6636_v1  ;;  %6103 = vset.pattern.permute.xlu0 %v6650_v11 }
  0xcf   : > { %6100 = vset.pattern.permute.xlu2 %v6636_v1 }
  0xd6   : > { %544 = vperm.xlu0 %6103, %v527_v10   ;;  %532 = vperm.xlu1 %6098, %v527_v10  }
  0xd7   : > { %551 = vperm.xlu2 %6100, %v546_v12  }
  0xde   : > { %6108 = vset.pattern.permute.xlu0 %v6636_v1  ;;  %6101 = vset.pattern.permute.xlu1 %v6640_v2 }
  0xdf   : > { %6102 = vset.pattern.permute.xlu2 %v6650_v11 }
  0xe6   : > { %608 = vperm.xlu0 %6108, %v603_v13   ;;  %557 = vperm.xlu1 %6101, %v546_v12  }
  0xe7   : > { %582 = vperm.xlu2 %6102, %v565_v9  }
  0xee   : > { %6113 = vset.pattern.permute.xlu0 %v6640_v2  ;;  %6104 = vset.pattern.permute.xlu1 %v6650_v11 }
  0xef   : > { %507 = vrot.lane.b32.xlu0 %v496_v4, %s6412_s3  ;;  %6105 = vset.pattern.permute.xlu2 %v6636_v1 }
  0xf6   : > { %563 = vperm.xlu1 %6104, %v546_v12  }
  0xf7   : > { %652 = vperm.xlu0 %6113, %v641_v14   ;;  %589 = vperm.xlu2 %6105, %v584_v15  }
  0xfe   : > { %6106 = vset.pattern.permute.xlu1 %v6640_v2 }
  0xff   : > { %6115 = vset.pattern.permute.xlu0 %v6650_v11  ;;  %6107 = vset.pattern.permute.xlu2 %v6650_v11 }
 0x106   : > { %595 = vperm.xlu1 %6106, %v584_v15  }
 0x107   : > { %677 = vperm.xlu0 %6115, %v660_v16   ;;  %601 = vperm.xlu2 %6107, %v584_v15  }
 0x10e   : > { %614 = vperm.xlu1 %6106, %v603_v13  }
 0x10f   : > { %620 = vperm.xlu2 %6107, %v603_v13   ;;  %6120 = vset.pattern.permute.xlu0 %v6640_v2 }
 0x116   : > { %6109 = vset.pattern.permute.xlu1 %v6636_v1 }
 0x117   : > { %6110 = vset.pattern.permute.xlu2 %v6640_v2 }
 0x11e   : > { %627 = vperm.xlu1 %6109, %v622_v17  }
 0x11f   : > { %633 = vperm.xlu2 %6110, %v622_v17  }
 0x121   : > { %v539_v20 = vpop.permute.xlu2 %538 }
 0x122   : > { %v957_v45 = vrot.slane %v539_v20, 1  ;;  %v1070_v46 = vrot.slane %v539_v20, 2 }
 0x126   : > { %6111 = vset.pattern.permute.xlu1 %v6650_v11 }
 0x127   : > { %6112 = vset.pattern.permute.xlu2 %v6636_v1 }
 0x12e   : > { %639 = vperm.xlu1 %6111, %v622_v17  }
 0x12f   : > { %646 = vperm.xlu2 %6112, %v641_v14  }
 0x131   : > { %v552_v25 = vpop.permute.xlu2 %551 }
 0x132   : > { %v961_v61 = vrot.slane %v552_v25, 1  ;;  %v1074_v62 = vrot.slane %v552_v25, 2 }
 0x136   : > { %658 = vperm.xlu1 %6111, %v641_v14  }
 0x137   : > { %665 = vperm.xlu2 %6112, %v660_v16  }
 0x138   : > { %v577_v22 = vpop.permute.xlu1 %576  ;;  %v571_v23 = vpop.permute.xlu0 %570 }
 0x139   : > { %v967_v26 = vrot.slane %v577_v22, 1  ;;  %v1080_v27 = vrot.slane %v577_v22, 2  ;;  %v966_v28 = vrot.slane %v571_v23, 1  ;;  %v1079_v29 = vrot.slane %v571_v23, 2 }
 0x13b   : > { %v968_v31 = vsel %vm955_vm4, %v966_v28, %v967_v26  ;;  %v1081_v32 = vsel %vm1068_vm5, %v1079_v29, %v1080_v27 }
 0x13c   : > { %v1185_v33 = vsel %vm517_vm1, %v571_v23, %v968_v31 }
 0x13d   : > { %v6684_v35 = vsel %vm1213_vm6, %v1185_v33, %v1081_v32 }
 0x13e   : > { %5755 = vmatmul.msk.f32.vlgmr.msra.gmra.mxu2 %vm1290_vm7, %v6684_v35  ;;  %6114 = vset.pattern.permute.xlu1 %v6640_v2 }
 0x13f   : > { %509 = vrot.lane.b32.xlu2 %v502_v34, %s6412_s3 }
 0x140   : > { %6117 = vset.pattern.permute.xlu2 %v6640_v2 }
 0x141   : > { %v583_v36 = vpop.permute.xlu2 %582 }
 0x142   : > { %v969_v37 = vrot.slane %v583_v36, 1  ;;  %v1082_v38 = vrot.slane %v583_v36, 2 }
 0x144   : > { %v970_v39 = vsel %vm955_vm4, %v967_v26, %v969_v37  ;;  %v1083_v40 = vsel %vm1068_vm5, %v1080_v27, %v1082_v38 }
 0x145   : > { %v1186_v41 = vsel %vm517_vm1, %v577_v22, %v970_v39 }
 0x146   : > { %v6695_v42 = vsel %vm1213_vm6, %v1186_v41, %v1083_v40  ;;  %671 = vperm.xlu1 %6114, %v660_v16  }
 0x147   : > { %5756 = vmatmul.msk.f32.gmra.mxu2 %vm1290_vm7, %v6695_v42 }
 0x148   : > { %v545_v43 = vpop.permute.xlu0 %544  ;;  %v533_v44 = vpop.permute.xlu1 %532 }
 0x149   : > { %v956_v47 = vrot.slane %v533_v44, 1  ;;  %v1069_v48 = vrot.slane %v533_v44, 2  ;;  %v959_v49 = vrot.slane %v545_v43, 1  ;;  %v1072_v54 = vrot.slane %v545_v43, 2 }
 0x14b   : > { %v958_v50 = vsel %vm955_vm4, %v956_v47, %v957_v45  ;;  %v1071_v51 = vsel %vm1068_vm5, %v1069_v48, %v1070_v46  ;;  %v960_v55 = vsel %vm955_vm4, %v957_v45, %v959_v49  ;;  %v1073_v56 = vsel %vm1068_vm5, %v1070_v46, %v1072_v54 }
 0x14c   : > { %v1181_v52 = vsel %vm517_vm1, %v533_v44, %v958_v50  ;;  %v1182_v57 = vsel %vm517_vm1, %v539_v20, %v960_v55 }
 0x14d   : > { %v1214_v53 = vsel %vm1213_vm6, %v1181_v52, %v1071_v51  ;;  %v1215_v58 = vsel %vm1213_vm6, %v1182_v57, %v1073_v56 }
 0x14e   : > { %5722 = vmatmul.msk.f32.vlgmr.msra.gmra.mxu1 %vm1290_vm7, %v1214_v53  ;;  %6116 = vset.pattern.permute.xlu1 %v6636_v1 }
 0x151   : > { %v590_v13 = vpop.permute.xlu2 %589 }
 0x152   : > { %v1084_v26 = vrot.slane %v590_v13, 2 }
 0x156   : > { %5723 = vmatmul.msk.f32.gmra.mxu1 %vm1290_vm7, %v1215_v58 }
 0x158   : > { %v6710_v59 = vpop.permute.xlu0 %608  ;;  %v558_v60 = vpop.permute.xlu1 %557 }
 0x159   : > { %v962_v63 = vrot.slane %v558_v60, 1  ;;  %v1075_v0 = vrot.slane %v558_v60, 2  ;;  %v976_v43 = vrot.slane %v6710_v59, 1  ;;  %v1089_v46 = vrot.slane %v6710_v59, 2 }
 0x15b   : > { %v963_v3 = vsel %vm955_vm4, %v961_v61, %v962_v63  ;;  %v1076_v4 = vsel %vm1068_vm5, %v1074_v62, %v1075_v0 }
 0x15c   : > { %v1183_v5 = vsel %vm517_vm1, %v552_v25, %v963_v3  ;;  %v971_v25 = vrot.slane %v590_v13, 1 }
 0x15d   : > { %v1216_v6 = vsel %vm1213_vm6, %v1183_v5, %v1076_v4 }
 0x15e   : > { %5689 = vmatmul.msk.f32.vlgmr.msra.gmra.mxu0 %vm1290_vm7, %v1216_v6  ;;  %5724 = vmatmul.msk.f32.gmra.mxu1 %vm1290_vm7, %v1216_v6 }
 0x161   : > { %v508_v7 = vpop.permute.xlu0 %507  ;;  %v602_v22 = vpop.permute.xlu2 %601 }
 0x162   : > { %v519_v8 = vsel %vm517_vm1, 0.0, %v508_v7  ;;  %v974_v33 = vrot.slane %v602_v22, 1  ;;  %v1087_v36 = vrot.slane %v602_v22, 2 }
 0x163   : > { %v524_v9 = vsel %vm522_vm2, %v519_v8, 0.0 }
 0x164   : > { %v679_v10 = vperm.slane %v524_v9, 0  ;;  %v698_v12 = vperm.slane %v524_v9, 1 }
 0x166   : > { %684 = vperm.xlu1 %6116, %v679_v10   ;;  %709 = vperm.xlu0 %6120, %v698_v12  }
 0x167   : > { %690 = vperm.xlu2 %6117, %v679_v10  }
 0x168   : > { %v564_v14 = vpop.permute.xlu1 %563 }
 0x169   : > { %v964_v15 = vrot.slane %v564_v14, 1  ;;  %v1077_v16 = vrot.slane %v564_v14, 2  ;;  %v621_v27 = vpop.permute.xlu2 %620 }
 0x16a   : > { %v979_v50 = vrot.slane %v621_v27, 1  ;;  %v1092_v53 = vrot.slane %v621_v27, 2 }
 0x16b   : > { %v965_v17 = vsel %vm955_vm4, %v962_v63, %v964_v15  ;;  %v1078_v18 = vsel %vm1068_vm5, %v1075_v0, %v1077_v16  ;;  %v653_v16 = vpop.permute.xlu0 %652 }
 0x16c   : > { %v1184_v19 = vsel %vm517_vm1, %v558_v60, %v965_v17 }
 0x16d   : > { %v1217_v20 = vsel %vm1213_vm6, %v1184_v19, %v1078_v18 }
 0x16e   : > { %6118 = vset.pattern.permute.xlu1 %v6650_v11  ;;  %5690 = vmatmul.msk.f32.gmra.mxu0 %vm1290_vm7, %v1217_v20 }
 0x16f   : > { %5725 = vmatmul.msk.f32.gmra.mxu1 %vm1290_vm7, %v1217_v20  ;;  %6119 = vset.pattern.permute.xlu2 %v6636_v1  ;;  %v987_v20 = vrot.slane %v653_v16, 1 }
 0x176   : > { %696 = vperm.xlu1 %6118, %v679_v10   ;;  %5691 = vmatmul.msk.f32.gmra.mxu0 %vm1290_vm7, %v6684_v35 }
 0x177   : > { %5726 = vmatmul.msk.f32.gmra.mxu1 %vm1290_vm7, %v6684_v35  ;;  %703 = vperm.xlu2 %6119, %v698_v12  }
 0x178   : > { %v596_v23 = vpop.permute.xlu1 %595 }
 0x179   : > { %v972_v28 = vrot.slane %v596_v23, 1  ;;  %v1085_v29 = vrot.slane %v596_v23, 2  ;;  %v634_v38 = vpop.permute.xlu2 %633 }
 0x17a   : > { %v982_v60 = vrot.slane %v634_v38, 1  ;;  %v1095_v0 = vrot.slane %v634_v38, 2 }
 0x17b   : > { %v973_v30 = vsel %vm955_vm4, %v971_v25, %v972_v28  ;;  %v1086_v31 = vsel %vm1068_vm5, %v1084_v26, %v1085_v29  ;;  %v975_v35 = vsel %vm955_vm4, %v972_v28, %v974_v33  ;;  %v1088_v40 = vsel %vm1068_vm5, %v1085_v29, %v1087_v36  ;;  %v2406_v25 = vld [vmem:[#allocation7 + $0x1f8] sm:$0xff]  ;;  %v2405_v28 = vld [vmem:[#allocation7 + $0x1f0] sm:$0xff]  ;;  %v2404_v33 = vld [vmem:[#allocation7 + $0x1e8] sm:$0xff] }
 0x17c   : > { %v1187_v32 = vsel %vm517_vm1, %v590_v13, %v973_v30  ;;  %v1188_v39 = vsel %vm517_vm1, %v596_v23, %v975_v35  ;;  %v1100_v26 = vrot.slane %v653_v16, 2  ;;  %2439 = vmatpush.msra.mxu3 %v2406_v25  ;;  %v2403_v36 = vld [vmem:[#allocation7 + $0x1e0] sm:$0xff] }
 0x17d   : > { %v1220_v34 = vsel %vm1213_vm6, %v1187_v32, %v1086_v31  ;;  %v1221_v44 = vsel %vm1213_vm6, %v1188_v39, %v1088_v40 }
 0x17e   : > { %5692 = vmatmul.msk.f32.gmra.mxu0 %vm1290_vm7, %v6695_v42  ;;  %5757 = vmatmul.msk.f32.gmra.mxu2 %vm1290_vm7, %v1220_v34 }
 0x17f   : > { %5727 = vmatmul.msk.f32.gmra.mxu1 %vm1290_vm7, %v6695_v42  ;;  %715 = vperm.xlu1 %6118, %v698_v12  }
 0x180   : > { %v615_v37 = vpop.permute.xlu1 %614  ;;  %2440 = vmatpush.msra.mxu3 %v2405_v28 }
 0x181   : > { %v977_v41 = vrot.slane %v615_v37, 1  ;;  %v1090_v45 = vrot.slane %v615_v37, 2 }
 0x182   : > { %2441 = vmatpush.msra.mxu3 %v2404_v33 }
 0x183   : > { %v978_v42 = vsel %vm955_vm4, %v976_v43, %v977_v41  ;;  %v1091_v48 = vsel %vm1068_vm5, %v1089_v46, %v1090_v45  ;;  %v980_v52 = vsel %vm955_vm4, %v977_v41, %v979_v50  ;;  %v1093_v57 = vsel %vm1068_vm5, %v1090_v45, %v1092_v53  ;;  %v2401_v43 = vld [vmem:[#allocation7 + $0x1d0] sm:$0xff]  ;;  %v2399_v50 = vld [vmem:[#allocation7 + $0x1c0] sm:$0xff] }
 0x184   : > { %v1189_v49 = vsel %vm517_vm1, %v6710_v59, %v978_v42  ;;  %v1190_v55 = vsel %vm517_vm1, %v615_v37, %v980_v52  ;;  %2442 = vmatpush.msra.mxu3 %v2403_v36  ;;  %v2400_v42 = vld [vmem:[#allocation7 + $0x1c8] sm:$0xff] }
 0x185   : > { %v1222_v51 = vsel %vm1213_vm6, %v1189_v49, %v1091_v48  ;;  %v1223_v59 = vsel %vm1213_vm6, %v1190_v55, %v1093_v57 }
 0x186   : > { %5693 = vmatmul.msk.f32.gmra.mxu0 %vm1290_vm7, %v1220_v34  ;;  %5758 = vmatmul.msk.f32.gmra.mxu2 %vm1290_vm7, %v1221_v44 }
 0x187   : > { %5728 = vmatmul.msk.f32.gmra.mxu1 %vm1290_vm7, %v1220_v34  ;;  %6121 = vset.pattern.permute.xlu1 %v6640_v2 }
 0x189   : > { %v6752_v47 = vpop.permute.xlu2 %646 }
 0x18a   : > { %v986_v18 = vrot.slane %v6752_v47, 1  ;;  %v1099_v22 = vrot.slane %v6752_v47, 2 }
 0x18c   : > { %v988_v23 = vsel %vm955_vm4, %v986_v18, %v987_v20  ;;  %v1101_v30 = vsel %vm1068_vm5, %v1099_v22, %v1100_v26 }
 0x18d   : > { %v1193_v29 = vsel %vm517_vm1, %v6752_v47, %v988_v23  ;;  %v6865_v23 = vld [vmem:[%s9390_s2] ss:$0 sm:$0xff] }
 0x18e   : > { %5694 = vmatmul.msk.f32.gmra.mxu0 %vm1290_vm7, %v1221_v44  ;;  %5759 = vmatmul.msk.f32.gmra.mxu2 %vm1290_vm7, %v1222_v51  ;;  %v1226_v34 = vsel %vm1213_vm6, %v1193_v29, %v1101_v30 }
 0x18f   : > { %5729 = vmatmul.msk.f32.gmra.mxu1 %vm1290_vm7, %v1221_v44 }
 0x190   : > { %v628_v56 = vpop.permute.xlu1 %627 }
 0x191   : > { %v6762_v54 = vpop.permute.xlu2 %665  ;;  %v981_v58 = vrot.slane %v628_v56, 1  ;;  %v1094_v61 = vrot.slane %v628_v56, 2 }
 0x192   : > { %v991_v46 = vrot.slane %v6762_v54, 1  ;;  %v1104_v47 = vrot.slane %v6762_v54, 2 }
 0x193   : > { %v983_v62 = vsel %vm955_vm4, %v981_v58, %v982_v60  ;;  %v1096_v8 = vsel %vm1068_vm5, %v1094_v61, %v1095_v0  ;;  %v2398_v58 = vld [vmem:[#allocation7 + $0x1b8] sm:$0xff]  ;;  %v2396_v61 = vld [vmem:[#allocation7 + $0x1a8] sm:$0xff] }
 0x194   : > { %v1191_v5 = vsel %vm517_vm1, %v628_v56, %v983_v62  ;;  %v678_v56 = vpop.permute.xlu0 %677 }
 0x195   : > { %v1224_v9 = vsel %vm1213_vm6, %v1191_v5, %v1096_v8  ;;  %v1107_v62 = vrot.slane %v678_v56, 2 }
 0x196   : > { %5695 = vmatmul.msk.f32.gmra.mxu0 %vm1290_vm7, %v1222_v51  ;;  %5760 = vmatmul.msk.f32.gmra.mxu2 %vm1290_vm7, %v1223_v59 }
 0x197   : > { %5730 = vmatmul.msk.f32.gmra.mxu1 %vm1290_vm7, %v1222_v51 }
 0x199   : > { %v510_v63 = vpop.permute.xlu2 %509 }
 0x19a   : > { %v520_v3 = vsel %vm517_vm1, 0.0, %v510_v63 }
 0x19b   : > { %v6773_v4 = vsel %vm522_vm2, %v520_v3, 0.0  ;;  %v2395_v3 = vld [vmem:[#allocation7 + $0x1a0] sm:$0xff] }
 0x19c   : > { %v755_v6 = vperm.slane %v6773_v4, 2  ;;  %v6778_v7 = vperm.slane %v6773_v4, 0  ;;  %v736_v32 = vperm.slane %v6773_v4, 1  ;;  %v6810_v39 = vperm.slane %v6773_v4, 3 }
 0x19d   : > { %v6825_v53 = vperm.slane %v6773_v4, 4  ;;  %v6849_v8 = vperm.slane %v6773_v4, 6 }
 0x19e   : > { %760 = vperm.xlu2 %6119, %v755_v6   ;;  %728 = vperm.xlu0 %6120, %v6778_v7  }
 0x19f   : > { %766 = vperm.xlu1 %6121, %v755_v6   ;;  %5696 = vmatmul.msk.f32.gmra.mxu0 %vm1290_vm7, %v1223_v59 }
 0x1a0   : > { %5731 = vmatmul.msk.f32.gmra.mxu1 %vm1290_vm7, %v1223_v59  ;;  %5761 = vmatmul.msk.f32.gmra.mxu2 %vm1290_vm7, %v1224_v9  ;;  %v640_v10 = vpop.permute.xlu1 %639  ;;  %v994_v59 = vrot.slane %v678_v56, 1 }
 0x1a1   : > { %v984_v12 = vrot.slane %v640_v10, 1  ;;  %v1097_v13 = vrot.slane %v640_v10, 2 }
 0x1a3   : > { %v985_v14 = vsel %vm955_vm4, %v982_v60, %v984_v12  ;;  %v1098_v15 = vsel %vm1068_vm5, %v1095_v0, %v1097_v13  ;;  %v2397_v60 = vld [vmem:[#allocation7 + $0x1b0] sm:$0xff] }
 0x1a4   : > { %v1192_v17 = vsel %vm517_vm1, %v634_v38, %v985_v14  ;;  %v2402_v38 = vld [vmem:[#allocation7 + $0x1d8] sm:$0xff] }
 0x1a5   : > { %v1225_v19 = vsel %vm1213_vm6, %v1192_v17, %v1098_v15  ;;  %2443 = vmatpush.msra.mxu3 %v2402_v38 }
 0x1a6   : > { %6124 = vset.pattern.permute.xlu0 %v6650_v11  ;;  %722 = vperm.xlu2 %6119, %v6778_v7  }
 0x1a7   : > { %6122 = vset.pattern.permute.xlu1 %v6636_v1  ;;  %5697 = vmatmul.msk.f32.gmra.mxu0 %vm1290_vm7, %v1224_v9 }
 0x1a8   : > { %5732 = vmatmul.msk.f32.gmra.mxu1 %vm1290_vm7, %v1224_v9  ;;  %5762 = vmatmul.msk.f32.gmra.mxu2 %vm1290_vm7, %v1225_v19  ;;  %v659_v27 = vpop.permute.xlu1 %658 }
 0x1a9   : > { %v989_v31 = vrot.slane %v659_v27, 1  ;;  %v1102_v35 = vrot.slane %v659_v27, 2  ;;  %2444 = vmatpush.msra.mxu3 %v2401_v43 }
 0x1ab   : > { %v990_v37 = vsel %vm955_vm4, %v987_v20, %v989_v31  ;;  %v1103_v40 = vsel %vm1068_vm5, %v1100_v26, %v1102_v35  ;;  %2445 = vmatpush.msra.mxu3 %v2400_v42  ;;  %v812_v26 = vperm.slane %v6773_v4, 5 }
 0x1ac   : > { %v1194_v41 = vsel %vm517_vm1, %v653_v16, %v990_v37 }
 0x1ad   : > { %v1227_v44 = vsel %vm1213_vm6, %v1194_v41, %v1103_v40  ;;  %2446 = vmatpush.msra.mxu3 %v2399_v50 }
 0x1ae   : > { %772 = vperm.xlu0 %6124, %v755_v6   ;;  %6123 = vset.pattern.permute.xlu2 %v6640_v2  ;;  %v2394_v6 = vld [vmem:[#allocation7 + $0x198] sm:$0xff] }
 0x1af   : > { %741 = vperm.xlu1 %6122, %v736_v32   ;;  %5698 = vmatmul.msk.f32.gmra.mxu0 %vm1290_vm7, %v1225_v19 }
 0x1b0   : > { %5733 = vmatmul.msk.f32.gmra.mxu1 %vm1290_vm7, %v1225_v19  ;;  %5763 = vmatmul.msk.f32.gmra.mxu2 %vm1290_vm7, %v1226_v34 }
 0x1b1   : > { %2447 = vmatpush.msra.mxu3 %v2398_v58 }
 0x1b3   : > { %2448 = vmatpush.msra.mxu3 %v2397_v60 }
 0x1b5   : > { %2449 = vmatpush.msra.mxu3 %v2396_v61 }
 0x1b6   : > { %791 = vperm.xlu0 %6124, %v6810_v39   ;;  %747 = vperm.xlu2 %6123, %v736_v32  }
 0x1b7   : > { %6125 = vset.pattern.permute.xlu1 %v6650_v11  ;;  %5699 = vmatmul.msk.f32.gmra.mxu0 %vm1290_vm7, %v1226_v34 }
 0x1b8   : > { %5734 = vmatmul.msk.f32.gmra.mxu1 %vm1290_vm7, %v1226_v34  ;;  %5764 = vmatmul.msk.f32.gmra.mxu2 %vm1290_vm7, %v1227_v44  ;;  %v672_v45 = vpop.permute.xlu1 %671 }
 0x1b9   : > { %v992_v48 = vrot.slane %v672_v45, 1  ;;  %v1105_v49 = vrot.slane %v672_v45, 2  ;;  %2450 = vmatpush.msra.mxu3 %v2395_v3 }
 0x1bb   : > { %v993_v51 = vsel %vm955_vm4, %v991_v46, %v992_v48  ;;  %v1106_v52 = vsel %vm1068_vm5, %v1104_v47, %v1105_v49  ;;  %v1108_v0 = vsel %vm1068_vm5, %v1105_v49, %v1107_v62  ;;  %2451 = vmatpush.msra.mxu3 %v2394_v6 }
 0x1bc   : > { %v1195_v55 = vsel %vm517_vm1, %v6762_v54, %v993_v51  ;;  %v995_v54 = vsel %vm955_vm4, %v992_v48, %v994_v59 }
 0x1bd   : > { %v1228_v57 = vsel %vm1213_vm6, %v1195_v55, %v1106_v52  ;;  %v1196_v63 = vsel %vm517_vm1, %v672_v45, %v995_v54 }
 0x1be   : > { %810 = vperm.xlu0 %6124, %v6825_v53   ;;  %6126 = vset.pattern.permute.xlu2 %v6650_v11  ;;  %v1229_v5 = vsel %vm1213_vm6, %v1196_v63, %v1108_v0 }
 0x1bf   : > { %734 = vperm.xlu1 %6125, %v6778_v7   ;;  %5700 = vmatmul.msk.f32.gmra.mxu0 %vm1290_vm7, %v1227_v44  ;;  %v2393_v7 = vld [vmem:[#allocation7 + $0x190] sm:$0xff] }
 0x1c0   : > { %5735 = vmatmul.msk.f32.gmra.mxu1 %vm1290_vm7, %v1227_v44  ;;  %5765 = vmatmul.msk.f32.gmra.mxu2 %vm1290_vm7, %v1228_v57 }
 0x1c1   : > { %2452 = vmatpush.msra.mxu3 %v2393_v7  ;;  %v691_v9 = vpop.permute.xlu2 %690  ;;  %v1707_v25 = vpop.f32.mrf.mxu2 }
 0x1c2   : > { %v1254_v10 = vrot.slane %v691_v9, 1  ;;  %v1268_v12 = vrot.slane %v691_v9, 2 }
 0x1c3   : > { %2453 = vmatpush.msra.mxu3 %v2392_v21  ;;  %v850_v21 = vperm.slane %v6773_v4, 7 }
 0x1c6   : > { %6131 = vset.pattern.permute.xlu0 %v6640_v2  ;;  %753 = vperm.xlu2 %6126, %v736_v32  }
 0x1c7   : > { %511 = vrot.lane.b32.xlu0 %v497_v24, %s6412_s3  ;;  %6127 = vset.pattern.permute.xlu1 %v6636_v1  ;;  %v2391_v24 = vld [vmem:[#allocation7 + $0x180] sm:$0xff] }
 0x1c8   : > { %5701 = vmatmul.msk.f32.gmra.mxu0 %vm1290_vm7, %v1228_v57  ;;  %5736 = vmatmul.msk.f32.gmra.mxu1 %vm1290_vm7, %v1228_v57 }
 0x1c9   : > { %5766 = vmatmul.msk.f32.gmra.mxu2 %vm1290_vm7, %v1229_v5  ;;  %2454 = vmatpush.msra.mxu3 %v2391_v24 }
 0x1ca   : > { %v1710_v46 = vpop.f32.mrf.mxu2 }
 0x1cb   : > { %v1536_v16 = vpop.f32.mrf.mxu1 }
 0x1ce   : > { %6128 = vset.pattern.permute.xlu2 %v6640_v2 }
 0x1cf   : > { %842 = vperm.xlu0 %6131, %v6849_v8   ;;  %779 = vperm.xlu1 %6127, %v6810_v39  }
 0x1d0   : > { %5702 = vmatmul.msk.f32.gmra.mxu0 %vm1290_vm7, %v1229_v5  ;;  %5737 = vmatmul.msk.f32.gmra.mxu1 %vm1290_vm7, %v1229_v5 }
 0x1d1   : > { %v704_v38 = vpop.permute.xlu2 %703 }
 0x1d2   : > { %v1638_v44 = vrot.slane %v704_v38, 1  ;;  %v1652_v50 = vrot.slane %v704_v38, 2 }
 0x1d3   : > { %v1539_v33 = vpop.f32.mrf.mxu1 }
 0x1d6   : > { %785 = vperm.xlu2 %6128, %v6810_v39  }
 0x1d7   : > { %798 = vperm.xlu1 %6127, %v6825_v53   ;;  %6134 = vset.pattern.permute.xlu0 %v6636_v1 }
 0x1d8   : > { %v685_v13 = vpop.permute.xlu1 %684  ;;  %v710_v37 = vpop.permute.xlu0 %709 }
 0x1d9   : > { %v1253_v14 = vrot.slane %v685_v13, 1  ;;  %v1267_v15 = vrot.slane %v685_v13, 2  ;;  %v1639_v43 = vrot.slane %v710_v37, 1  ;;  %v1653_v49 = vrot.slane %v710_v37, 2 }
 0x1db   : > { %v1255_v17 = vsel %vm955_vm4, %v1253_v14, %v1254_v10  ;;  %v1408_v18 = vpop.f32.mrf.mxu0  ;;  %v1269_v19 = vsel %vm1068_vm5, %v1267_v15, %v1268_v12  ;;  %v1640_v51 = vsel %vm955_vm4, %v1638_v44, %v1639_v43  ;;  %v1542_v55 = vpop.f32.mrf.mxu1  ;;  %v1654_v60 = vsel %vm1068_vm5, %v1652_v50, %v1653_v49 }
 0x1dc   : > { %v1281_v20 = vsel %vm517_vm1, %v685_v13, %v1255_v17  ;;  %v1537_v22 = vadd.f32 %v1536_v16, %v1408_v18  ;;  %v1666_v58 = vsel %vm517_vm1, %v704_v38, %v1640_v51 }
 0x1dd   : > { %v1285_v27 = vsel %vm1213_vm6, %v1281_v20, %v1269_v19  ;;  %v1670_v62 = vsel %vm1213_vm6, %v1666_v58, %v1654_v60 }
 0x1de   : > { %v1803_v28 = vadd.f32 %v1707_v25, %v1537_v22  ;;  %804 = vperm.xlu2 %6128, %v6825_v53   ;;  %5703 = vmatmul.msk.f32.gmra.mxu0 %vm1290_vm7, %v1285_v27 }
 0x1df   : > { %817 = vperm.xlu1 %6127, %v812_v26   ;;  %5767 = vmatmul.msk.f32.gmra.mxu2 %vm1290_vm7, %v1285_v27 }
 0x1e0   : > { %v1839_v29 = vadd.f32 %v6865_v23, %v1803_v28 }
 0x1e2   : > { %v1871_v30 = vmax.f32 %v1839_v29, 0.0 }
 0x1e4   : > { %v6878_v32 = vrot.slane %v1871_v30, 7 }
 0x1e6   : > { %823 = vperm.xlu2 %6128, %v812_v26   ;;  %5788 = vmatmul.msk.f32.vlgmr.msra.gmra.mxu3 %vm6874_vm9, %v6878_v32 }
 0x1e7   : > { %6129 = vset.pattern.permute.xlu1 %v6650_v11 }
 0x1e8   : > { %v697_v34 = vpop.permute.xlu1 %696 }
 0x1e9   : > { %v1256_v35 = vrot.slane %v697_v34, 1  ;;  %v1270_v36 = vrot.slane %v697_v34, 2 }
 0x1eb   : > { %v1411_v39 = vpop.f32.mrf.mxu0  ;;  %v1257_v40 = vsel %vm955_vm4, %v1254_v10, %v1256_v35  ;;  %v1271_v41 = vsel %vm1068_vm5, %v1268_v12, %v1270_v36 }
 0x1ec   : > { %v1540_v45 = vadd.f32 %v1539_v33, %v1411_v39  ;;  %v1282_v42 = vsel %vm517_vm1, %v691_v9, %v1257_v40  ;;  %v1545_v6 = vpop.f32.mrf.mxu1 }
 0x1ed   : > { %v1286_v47 = vsel %vm1213_vm6, %v1282_v42, %v1271_v41 }
 0x1ee   : > { %v1804_v48 = vadd.f32 %v1710_v46, %v1540_v45  ;;  %6130 = vset.pattern.permute.xlu2 %v6636_v1  ;;  %5704 = vmatmul.msk.f32.gmra.mxu0 %vm1290_vm7, %v1286_v47 }
 0x1ef   : > { %829 = vperm.xlu1 %6129, %v812_v26   ;;  %5768 = vmatmul.msk.f32.gmra.mxu2 %vm1290_vm7, %v1286_v47 }
 0x1f0   : > { %v1840_v52 = vadd.f32 %v6865_v23, %v1804_v48 }
 0x1f1   : > { %v716_v53 = vpop.permute.xlu1 %715 }
 0x1f2   : > { %v1872_v56 = vmax.f32 %v1840_v52, 0.0  ;;  %v1641_v57 = vrot.slane %v716_v53, 1  ;;  %v1655_v61 = vrot.slane %v716_v53, 2 }
 0x1f3   : > { %v1414_v59 = vpop.f32.mrf.mxu0 }
 0x1f4   : > { %v6895_v54 = vrot.slane %v1872_v56, 7  ;;  %v1642_v0 = vsel %vm955_vm4, %v1639_v43, %v1641_v57  ;;  %v1656_v3 = vsel %vm1068_vm5, %v1653_v49, %v1655_v61  ;;  %v1548_v13 = vpop.f32.mrf.mxu1 }
 0x1f5   : > { %v1667_v5 = vsel %vm517_vm1, %v710_v37, %v1642_v0 }
 0x1f6   : > { %836 = vperm.xlu2 %6130, %v6849_v8   ;;  %v6902_v63 = vsel %vm1936_vm8, %v6878_v32, %v6895_v54  ;;  %v1671_v24 = vsel %vm1213_vm6, %v1667_v5, %v1656_v3 }
 0x1f7   : > { %848 = vperm.xlu1 %6129, %v6849_v8   ;;  %5769 = vmatmul.msk.f32.gmra.mxu2 %vm1290_vm7, %v1670_v62  ;;  %v1543_v8 = vadd.f32 %v1542_v55, %v1414_v59 }
 0x1f8   : > { %2458 = vmatmul.f32.gmra.mxu3 %v6902_v63  ;;  %v761_v14 = vpop.permute.xlu2 %760 }
 0x1f9   : > { %v1006_v39 = vrot.slane %v761_v14, 1  ;;  %v1119_v44 = vrot.slane %v761_v14, 2 }
 0x1fb   : > { %v1417_v7 = vpop.f32.mrf.mxu0 }
 0x1fc   : > { %v1546_v4 = vadd.f32 %v1545_v6, %v1417_v7  ;;  %v1551_v25 = vpop.f32.mrf.mxu1 }
 0x1fe   : > { %855 = vperm.xlu2 %6130, %v850_v21  }
 0x1ff   : > { %6132 = vset.pattern.permute.xlu1 %v6640_v2  ;;  %5770 = vmatmul.msk.f32.gmra.mxu2 %vm1290_vm7, %v1671_v24 }
 0x200   : > { %v723_v26 = vpop.permute.xlu2 %722 }
 0x201   : > { %v1713_v9 = vpop.f32.mrf.mxu2  ;;  %v996_v33 = vrot.slane %v723_v26, 1  ;;  %v1109_v34 = vrot.slane %v723_v26, 2 }
 0x202   : > { %v1805_v10 = vadd.f32 %v1713_v9, %v1543_v8 }
 0x203   : > { %v1420_v12 = vpop.f32.mrf.mxu0 }
 0x204   : > { %v1841_v15 = vadd.f32 %v6865_v23, %v1805_v10  ;;  %v1549_v28 = vadd.f32 %v1548_v13, %v1420_v12  ;;  %v1554_v57 = vpop.f32.mrf.mxu1 }
 0x206   : > { %v1873_v16 = vmax.f32 %v1841_v15, 0.0  ;;  %6133 = vset.pattern.permute.xlu2 %v6650_v11 }
 0x207   : > { %861 = vperm.xlu1 %6132, %v850_v21  }
 0x208   : > { %v6916_v17 = vrot.slane %v1873_v16, 7 }
 0x209   : > { %v1716_v18 = vpop.f32.mrf.mxu2 }
 0x20a   : > { %9553 = vst [vmem:[#allocation19_spill] sm:$0xff] %v6916_v17  ;;  %v1806_v19 = vadd.f32 %v1716_v18, %v1546_v4  ;;  %5790 = vmatmul.msk.f32.gmra.mxu3 %vm6874_vm9, %v6916_v17 }
 0x20b   : > { %v1423_v20 = vpop.f32.mrf.mxu0 }
 0x20c   : > { %v1842_v22 = vadd.f32 %v6865_v23, %v1806_v19  ;;  %v1552_v58 = vadd.f32 %v1551_v25, %v1423_v20  ;;  %v1557_v13 = vpop.f32.mrf.mxu1 }
 0x20e   : > { %v1874_v27 = vmax.f32 %v1842_v22, 0.0  ;;  %867 = vperm.xlu2 %6133, %v850_v21  }
 0x210   : > { %v6922_v29 = vrot.slane %v1874_v27, 7  ;;  %v6924_v30 = vpop.permute.xlu0 %728  ;;  %v748_v59 = vpop.permute.xlu2 %747 }
 0x211   : > { %v997_v35 = vrot.slane %v6924_v30, 1  ;;  %v1110_v36 = vrot.slane %v6924_v30, 2  ;;  %v767_v37 = vpop.permute.xlu1 %766  ;;  %v1719_v38 = vpop.f32.mrf.mxu2  ;;  %v1002_v24 = vrot.slane %v748_v59, 1  ;;  %v1115_v8 = vrot.slane %v748_v59, 2 }
 0x212   : > { %v1007_v40 = vrot.slane %v767_v37, 1  ;;  %v1120_v41 = vrot.slane %v767_v37, 2  ;;  %v1807_v43 = vadd.f32 %v1719_v38, %v1549_v28  ;;  %v6931_v45 = vsel %vm1936_vm8, %v6916_v17, %v6922_v29 }
 0x213   : > { %9554 = vst [vmem:[#allocation20_spill] sm:$0xff] %v6931_v45  ;;  %v998_v42 = vsel %vm955_vm4, %v996_v33, %v997_v35  ;;  %v1111_v46 = vsel %vm1068_vm5, %v1109_v34, %v1110_v36  ;;  %2464 = vmatmul.f32.gmra.mxu3 %v6931_v45  ;;  %v1426_v50 = vpop.f32.mrf.mxu0 }
 0x214   : > { %v1843_v47 = vadd.f32 %v6865_v23, %v1807_v43  ;;  %v1197_v48 = vsel %vm517_vm1, %v723_v26, %v998_v42  ;;  %v1008_v49 = vsel %vm955_vm4, %v1006_v39, %v1007_v40  ;;  %v1121_v52 = vsel %vm1068_vm5, %v1119_v44, %v1120_v41 }
 0x215   : > { %v1230_v51 = vsel %vm1213_vm6, %v1197_v48, %v1111_v46  ;;  %v1201_v53 = vsel %vm517_vm1, %v761_v14, %v1008_v49  ;;  %v1555_v14 = vadd.f32 %v1554_v57, %v1426_v50  ;;  %v1560_v50 = vpop.f32.mrf.mxu1 }
 0x216   : > { %v1875_v55 = vmax.f32 %v1843_v47, 0.0  ;;  %5738 = vmatmul.msk.f32.gmra.mxu1 %vm1290_vm7, %v1230_v51  ;;  %v6948_v56 = vsel %vm1213_vm6, %v1201_v53, %v1121_v52 }
 0x217   : > { %5771 = vmatmul.msk.f32.gmra.mxu2 %vm1290_vm7, %v6948_v56 }
 0x218   : > { %v6952_v60 = vrot.slane %v1875_v55, 7 }
 0x219   : > { %v1722_v61 = vpop.f32.mrf.mxu2 }
 0x21a   : > { %9555 = vst [vmem:[#allocation21_spill] sm:$0xff] %v6952_v60  ;;  %v1808_v62 = vadd.f32 %v1722_v61, %v1552_v58 }
 0x21b   : > { %5792 = vmatmul.msk.f32.gmra.mxu3 %vm6874_vm9, %v6952_v60 }
 0x21c   : > { %v1844_v0 = vadd.f32 %v6865_v23, %v1808_v62  ;;  %v1429_v5 = vpop.f32.mrf.mxu0 }
 0x21d   : > { %v1558_v44 = vadd.f32 %v1557_v13, %v1429_v5 }
 0x21e   : > { %v1876_v3 = vmax.f32 %v1844_v0, 0.0 }
 0x220   : > { %v6958_v6 = vrot.slane %v1876_v3, 7  ;;  %v773_v7 = vpop.permute.xlu0 %772  ;;  %v754_v21 = vpop.permute.xlu2 %753 }
 0x221   : > { %v1009_v9 = vrot.slane %v773_v7, 1  ;;  %v1122_v10 = vrot.slane %v773_v7, 2  ;;  %v742_v12 = vpop.permute.xlu1 %741  ;;  %v1004_v18 = vrot.slane %v754_v21, 1 }
 0x222   : > { %v1001_v15 = vrot.slane %v742_v12, 1  ;;  %v1114_v16 = vrot.slane %v742_v12, 2  ;;  %v6963_v4 = vsel %vm1936_vm8, %v6952_v60, %v6958_v6 }
 0x223   : > { %9556 = vst [vmem:[#allocation22_spill] sm:$0xff] %v6963_v4  ;;  %v1725_v19 = vpop.f32.mrf.mxu2  ;;  %v1010_v20 = vsel %vm955_vm4, %v1007_v40, %v1009_v9  ;;  %v1123_v22 = vsel %vm1068_vm5, %v1120_v41, %v1122_v10  ;;  %2470 = vmatmul.f32.gmra.mxu3 %v6963_v4  ;;  %v1117_v40 = vrot.slane %v754_v21, 2  ;;  %v1563_v9 = vpop.f32.mrf.mxu1 }
 0x224   : > { %v1003_v25 = vsel %vm955_vm4, %v1001_v15, %v1002_v24  ;;  %v1809_v26 = vadd.f32 %v1725_v19, %v1555_v14  ;;  %v1116_v27 = vsel %vm1068_vm5, %v1114_v16, %v1115_v8  ;;  %v1202_v28 = vsel %vm517_vm1, %v767_v37, %v1010_v20  ;;  %v1432_v46 = vpop.f32.mrf.mxu0 }
 0x225   : > { %v1199_v33 = vsel %vm517_vm1, %v742_v12, %v1003_v25  ;;  %v6973_v34 = vsel %vm1213_vm6, %v1202_v28, %v1123_v22  ;;  %v1005_v37 = vsel %vm955_vm4, %v1002_v24, %v1004_v18  ;;  %v1118_v48 = vsel %vm1068_vm5, %v1115_v8, %v1117_v40 }
 0x226   : > { %v1845_v38 = vadd.f32 %v6865_v23, %v1809_v26  ;;  %v1232_v39 = vsel %vm1213_vm6, %v1199_v33, %v1116_v27  ;;  %5772 = vmatmul.msk.f32.gmra.mxu2 %vm1290_vm7, %v6973_v34  ;;  %v1200_v49 = vsel %vm517_vm1, %v748_v59, %v1005_v37  ;;  %v1561_v61 = vadd.f32 %v1560_v50, %v1432_v46  ;;  %v2326_v33 = vld [vmem:[#allocation7 + $0x78] sm:$0xff] }
 0x227   : > { %5705 = vmatmul.msk.f32.gmra.mxu0 %vm1290_vm7, %v1232_v39  ;;  %v6992_v53 = vsel %vm1213_vm6, %v1200_v49, %v1118_v48  ;;  %2778 = vmatpush.msrb.mxu2 %v2326_v33 }
 0x228   : > { %v1877_v41 = vmax.f32 %v1845_v38, 0.0  ;;  %v6980_v43 = vpop.permute.xlu0 %791 }
 0x22a   : > { %v6983_v42 = vrot.slane %v1877_v41, 7 }
 0x22b   : > { %v1728_v47 = vpop.f32.mrf.mxu2  ;;  %v1566_v27 = vpop.f32.mrf.mxu1 }
 0x22c   : > { %9557 = vst [vmem:[#allocation23_spill] sm:$0xff] %v6983_v42  ;;  %v1810_v51 = vadd.f32 %v1728_v47, %v1558_v44  ;;  %5794 = vmatmul.msk.f32.gmra.mxu3 %vm6874_vm9, %v6983_v42  ;;  %v1435_v5 = vpop.f32.mrf.mxu0 }
 0x22e   : > { %v1846_v52 = vadd.f32 %v6865_v23, %v1810_v51 }
 0x22f   : > { %5706 = vmatmul.msk.f32.gmra.mxu0 %vm1290_vm7, %v6992_v53 }
 0x230   : > { %v1878_v55 = vmax.f32 %v1846_v52, 0.0  ;;  %v6996_v57 = vpop.permute.xlu0 %810  ;;  %v786_v26 = vpop.permute.xlu2 %785 }
 0x231   : > { %v735_v58 = vpop.permute.xlu1 %734  ;;  %v1012_v40 = vrot.slane %v786_v26, 1  ;;  %v1125_v46 = vrot.slane %v786_v26, 2 }
 0x232   : > { %v6998_v59 = vrot.slane %v1878_v55, 7  ;;  %v999_v62 = vrot.slane %v735_v58, 1  ;;  %v1112_v0 = vrot.slane %v735_v58, 2  ;;  %v1014_v55 = vrot.slane %v6980_v43, 1 }
 0x233   : > { %v1731_v3 = vpop.f32.mrf.mxu2 }
 0x234   : > { %v1811_v7 = vadd.f32 %v1731_v3, %v1561_v61  ;;  %v7003_v21 = vsel %vm1936_vm8, %v6983_v42, %v6998_v59  ;;  %v1000_v24 = vsel %vm955_vm4, %v997_v35, %v999_v62  ;;  %v1113_v8 = vsel %vm1068_vm5, %v1110_v36, %v1112_v0 }
 0x235   : > { %9558 = vst [vmem:[#allocation24_spill] sm:$0xff] %v7003_v21  ;;  %2476 = vmatmul.f32.gmra.mxu3 %v7003_v21  ;;  %v1198_v12 = vsel %vm517_vm1, %v6924_v30, %v1000_v24  ;;  %v1564_v35 = vadd.f32 %v1563_v9, %v1435_v5  ;;  %v1438_v30 = vpop.f32.mrf.mxu0  ;;  %v1015_v62 = vsel %vm955_vm4, %v1012_v40, %v1014_v55  ;;  %v2342_v5 = vld [vmem:[#allocation7 + $0xf8] sm:$0xff] }
 0x236   : > { %v1847_v10 = vadd.f32 %v6865_v23, %v1811_v7  ;;  %v1231_v13 = vsel %vm1213_vm6, %v1198_v12, %v1113_v8  ;;  %v1567_v41 = vadd.f32 %v1566_v27, %v1438_v30  ;;  %v2438_v7 = vld [vmem:[#allocation7 + $0x2f8] sm:$0xff]  ;;  %2891 = vmatpush.msrb.mxu3 %v2342_v5  ;;  %v1204_v9 = vsel %vm517_vm1, %v786_v26, %v1015_v62  ;;  %v2324_v5 = vld [vmem:[#allocation7 + $0x68] sm:$0xff] }
 0x237   : > { %5707 = vmatmul.msk.f32.gmra.mxu0 %vm1290_vm7, %v6948_v56  ;;  %5739 = vmatmul.msk.f32.gmra.mxu1 %vm1290_vm7, %v1231_v13  ;;  %v2422_v24 = vld [vmem:[#allocation7 + $0x278] sm:$0xff] }
 0x238   : > { %v1879_v14 = vmax.f32 %v1847_v10, 0.0  ;;  %2665 = vmatpush.msrb.mxu1 %v2438_v7  ;;  %v805_v10 = vpop.permute.xlu2 %804  ;;  %2552 = vmatpush.msrb.mxu0 %v2422_v24 }
 0x239   : > { %v512_v15 = vpop.permute.xlu0 %511  ;;  %v1130_v30 = vrot.slane %v805_v10, 2 }
 0x23a   : > { %v7019_v16 = vrot.slane %v1879_v14, 7  ;;  %v521_v36 = vsel %vm517_vm1, 0.0, %v512_v15 }
 0x23b   : > { %v526_v18 = vsel %vm522_vm2, %v521_v36, 0.0  ;;  %v1734_v19 = vpop.f32.mrf.mxu2 }
 0x23c   : > { %9559 = vst [vmem:[#allocation25_spill] sm:$0xff] %v7019_v16  ;;  %v869_v20 = vperm.slane %v526_v18, 0  ;;  %v1812_v22 = vadd.f32 %v1734_v19, %v1564_v35  ;;  %v888_v13 = vperm.slane %v526_v18, 1  ;;  %v1017_v35 = vrot.slane %v805_v10, 1 }
 0x23d   : > { %5796 = vmatmul.msk.f32.gmra.mxu3 %vm6874_vm9, %v7019_v16  ;;  %v1441_v0 = vpop.f32.mrf.mxu0 }
 0x23e   : > { %v1848_v25 = vadd.f32 %v6865_v23, %v1812_v22  ;;  %874 = vperm.xlu0 %6134, %v869_v20   ;;  %886 = vperm.xlu2 %6133, %v869_v20   ;;  %v2325_v22 = vld [vmem:[#allocation7 + $0x70] sm:$0xff] }
 0x23f   : > { %880 = vperm.xlu1 %6132, %v869_v20   ;;  %5708 = vmatmul.msk.f32.gmra.mxu0 %vm1290_vm7, %v6973_v34 }
 0x240   : > { %v1880_v28 = vmax.f32 %v1848_v25, 0.0  ;;  %5740 = vmatmul.msk.f32.gmra.mxu1 %vm1290_vm7, %v1232_v39  ;;  %2779 = vmatpush.msrb.mxu2 %v2325_v22  ;;  %v2436_v22 = vld [vmem:[#allocation7 + $0x2e8] sm:$0xff] }
 0x241   : > { %v780_v38 = vpop.permute.xlu1 %779 }
 0x242   : > { %v7030_v37 = vrot.slane %v1880_v28, 7  ;;  %v1011_v44 = vrot.slane %v780_v38, 1  ;;  %v1124_v47 = vrot.slane %v780_v38, 2  ;;  %2780 = vmatpush.msrb.mxu2 %v2324_v5 }
 0x243   : > { %v1737_v48 = vpop.f32.mrf.mxu2 }
 0x244   : > { %v1013_v49 = vsel %vm955_vm4, %v1011_v44, %v1012_v40  ;;  %v1813_v50 = vadd.f32 %v1737_v48, %v1567_v41  ;;  %v7036_v51 = vsel %vm1936_vm8, %v7019_v16, %v7030_v37  ;;  %v1126_v52 = vsel %vm1068_vm5, %v1124_v47, %v1125_v46  ;;  %v824_v47 = vpop.permute.xlu2 %823 }
 0x245   : > { %9560 = vst [vmem:[#allocation26_spill] sm:$0xff] %v7036_v51  ;;  %v1203_v39 = vsel %vm517_vm1, %v780_v38, %v1013_v49  ;;  %2482 = vmatmul.f32.gmra.mxu3 %v7036_v51  ;;  %v1019_v38 = vrot.slane %v6996_v57, 1  ;;  %v1132_v41 = vrot.slane %v6996_v57, 2  ;;  %v2341_v49 = vld [vmem:[#allocation7 + $0xf0] sm:$0xff]  ;;  %v1022_v55 = vrot.slane %v824_v47, 1 }
 0x246   : > { %v1849_v58 = vadd.f32 %v6865_v23, %v1813_v50  ;;  %6137 = vset.pattern.permute.xlu0 %v6650_v11  ;;  %6136 = vset.pattern.permute.xlu2 %v6640_v2  ;;  %v7046_v61 = vsel %vm1213_vm6, %v1203_v39, %v1126_v52  ;;  %v1127_v2 = vrot.slane %v6980_v43, 2  ;;  %v2437_v50 = vld [vmem:[#allocation7 + $0x2f0] sm:$0xff] }
 0x247   : > { %6135 = vset.pattern.permute.xlu1 %v6636_v1  ;;  %5709 = vmatmul.msk.f32.gmra.mxu0 %vm1290_vm7, %v7046_v61  ;;  %v1569_v1 = vpop.f32.mrf.mxu1  ;;  %v1020_v40 = vsel %vm955_vm4, %v1017_v35, %v1019_v38  ;;  %v1133_v48 = vsel %vm1068_vm5, %v1130_v30, %v1132_v41  ;;  %v2421_v39 = vld [vmem:[#allocation7 + $0x270] sm:$0xff] }
 0x248   : > { %v1881_v3 = vmax.f32 %v1849_v58, 0.0  ;;  %5741 = vmatmul.msk.f32.gmra.mxu1 %vm1290_vm7, %v6992_v53  ;;  %5773 = vmatmul.msk.f32.gmra.mxu2 %vm1290_vm7, %v7046_v61  ;;  %v1570_v12 = vadd.f32 %v1569_v1, %v1441_v0  ;;  %v1128_v53 = vsel %vm1068_vm5, %v1125_v46, %v1127_v2  ;;  %v1206_v46 = vsel %vm517_vm1, %v805_v10, %v1020_v40 }
 0x249   : > { %v799_v11 = vpop.permute.xlu1 %798  ;;  %v1237_v36 = vsel %vm1213_vm6, %v1204_v9, %v1128_v53  ;;  %2892 = vmatpush.msrb.mxu3 %v2341_v49  ;;  %2666 = vmatpush.msrb.mxu1 %v2437_v50  ;;  %v7096_v58 = vsel %vm1213_vm6, %v1206_v46, %v1133_v48  ;;  %v2339_v46 = vld [vmem:[#allocation7 + $0xe0] sm:$0xff] }
 0x24a   : > { %v7057_v8 = vrot.slane %v1881_v3, 7  ;;  %v1016_v14 = vrot.slane %v799_v11, 1  ;;  %v1129_v19 = vrot.slane %v799_v11, 2  ;;  %2553 = vmatpush.msrb.mxu0 %v2421_v39  ;;  %v1135_v3 = vrot.slane %v824_v47, 2 }
 0x24b   : > { %2667 = vmatpush.msrb.mxu1 %v2436_v22  ;;  %v2431_v22 = vld [vmem:[#allocation7 + $0x2c0] sm:$0xff] }
 0x24c   : > { %9561 = vst [vmem:[#allocation27_spill] sm:$0xff] %v7057_v8  ;;  %v1740_v15 = vpop.f32.mrf.mxu2  ;;  %v1018_v18 = vsel %vm955_vm4, %v1016_v14, %v1017_v35  ;;  %v1131_v28 = vsel %vm1068_vm5, %v1129_v19, %v1130_v30  ;;  %v843_v35 = vpop.permute.xlu0 %842  ;;  %v2420_v30 = vld [vmem:[#allocation7 + $0x268] sm:$0xff] }
 0x24d   : > { %v1814_v43 = vadd.f32 %v1740_v15, %v1570_v12  ;;  %5798 = vmatmul.msk.f32.gmra.mxu3 %vm6874_vm9, %v7057_v8  ;;  %v1205_v26 = vsel %vm517_vm1, %v799_v11, %v1018_v18  ;;  %v2340_v18 = vld [vmem:[#allocation7 + $0xe8] sm:$0xff]  ;;  %2554 = vmatpush.msrb.mxu0 %v2420_v30 }
 0x24e   : > { %905 = vperm.xlu0 %6137, %v888_v13   ;;  %899 = vperm.xlu2 %6136, %v888_v13  }
 0x24f   : > { %v1850_v20 = vadd.f32 %v6865_v23, %v1814_v43  ;;  %893 = vperm.xlu1 %6135, %v888_v13   ;;  %5710 = vmatmul.msk.f32.gmra.mxu0 %vm1290_vm7, %v1237_v36  ;;  %v1572_v57 = vpop.f32.mrf.mxu1 }
 0x250   : > { %5742 = vmatmul.msk.f32.gmra.mxu1 %vm1290_vm7, %v6948_v56  ;;  %5774 = vmatmul.msk.f32.gmra.mxu2 %vm1290_vm7, %v1237_v36  ;;  %v7083_v56 = vsel %vm1213_vm6, %v1205_v26, %v1131_v28  ;;  %v837_v15 = vpop.permute.xlu2 %836  ;;  %v1027_v26 = vrot.slane %v843_v35, 1 }
 0x251   : > { %v1882_v25 = vmax.f32 %v1850_v20, 0.0  ;;  %v818_v44 = vpop.permute.xlu1 %817  ;;  %2893 = vmatpush.msrb.mxu3 %v2340_v18  ;;  %v1139_v40 = vrot.slane %v837_v15, 2 }
 0x252   : > { %v1021_v52 = vrot.slane %v818_v44, 1  ;;  %v1134_v62 = vrot.slane %v818_v44, 2 }
 0x253   : > { %v7072_v27 = vrot.slane %v1882_v25, 7  ;;  %2894 = vmatpush.msrb.mxu3 %v2339_v46  ;;  %v2322_v46 = vld [vmem:[#allocation7 + $0x58] sm:$0xff] }
 0x254   : > { %v1023_v0 = vsel %vm955_vm4, %v1021_v52, %v1022_v55  ;;  %v1136_v9 = vsel %vm1068_vm5, %v1134_v62, %v1135_v3 }
 0x255   : > { %v7078_v33 = vsel %vm1936_vm8, %v7057_v8, %v7072_v27  ;;  %v1207_v24 = vsel %vm517_vm1, %v818_v44, %v1023_v0  ;;  %v2323_v44 = vld [vmem:[#allocation7 + $0x60] sm:$0xff] }
 0x256   : > { %9562 = vst [vmem:[#allocation28_spill] sm:$0xff] %v7078_v33  ;;  %2488 = vmatmul.f32.gmra.mxu3 %v7078_v33  ;;  %v7109_v53 = vsel %vm1213_vm6, %v1207_v24, %v1136_v9  ;;  %2781 = vmatpush.msrb.mxu2 %v2323_v44  ;;  %v2430_v44 = vld [vmem:[#allocation7 + $0x2b8] sm:$0xff] }
 0x257   : > { %5711 = vmatmul.msk.f32.gmra.mxu0 %vm1290_vm7, %v7083_v56  ;;  %v1575_v25 = vpop.f32.mrf.mxu1 }
 0x258   : > { %5743 = vmatmul.msk.f32.gmra.mxu1 %vm1290_vm7, %v6973_v34  ;;  %5775 = vmatmul.msk.f32.gmra.mxu2 %vm1290_vm7, %v7083_v56  ;;  %v1444_v34 = vpop.f32.mrf.mxu0 }
 0x259   : > { %v1573_v2 = vadd.f32 %v1572_v57, %v1444_v34  ;;  %v2435_v34 = vld [vmem:[#allocation7 + $0x2e0] sm:$0xff]  ;;  %2782 = vmatpush.msrb.mxu2 %v2322_v46  ;;  %v2320_v46 = vld [vmem:[#allocation7 + $0x48] sm:$0xff] }
 0x25a   : > { %2668 = vmatpush.msrb.mxu1 %v2435_v34 }
 0x25f   : > { %5712 = vmatmul.msk.f32.gmra.mxu0 %vm1290_vm7, %v7096_v58  ;;  %v1578_v57 = vpop.f32.mrf.mxu1 }
 0x260   : > { %5744 = vmatmul.msk.f32.gmra.mxu1 %vm1290_vm7, %v7046_v61  ;;  %5776 = vmatmul.msk.f32.gmra.mxu2 %vm1290_vm7, %v7096_v58  ;;  %v1447_v28 = vpop.f32.mrf.mxu0 }
 0x261   : > { %v830_v11 = vpop.permute.xlu1 %829  ;;  %v1576_v48 = vadd.f32 %v1575_v25, %v1447_v28 }
 0x262   : > { %v1743_v7 = vpop.f32.mrf.mxu2  ;;  %v1024_v10 = vrot.slane %v830_v11, 1  ;;  %v1137_v61 = vrot.slane %v830_v11, 2 }
 0x263   : > { %v1815_v1 = vadd.f32 %v1743_v7, %v1573_v2  ;;  %v2434_v7 = vld [vmem:[#allocation7 + $0x2d8] sm:$0xff] }
 0x264   : > { %v1025_v14 = vsel %vm955_vm4, %v1022_v55, %v1024_v10  ;;  %v1138_v19 = vsel %vm1068_vm5, %v1135_v3, %v1137_v61  ;;  %2669 = vmatpush.msrb.mxu1 %v2434_v7  ;;  %v2419_v10 = vld [vmem:[#allocation7 + $0x260] sm:$0xff]  ;;  %v2433_v61 = vld [vmem:[#allocation7 + $0x2d0] sm:$0xff] }
 0x265   : > { %v1851_v12 = vadd.f32 %v6865_v23, %v1815_v1  ;;  %v1208_v20 = vsel %vm517_vm1, %v824_v47, %v1025_v14  ;;  %v1140_v47 = vrot.slane %v843_v35, 2  ;;  %2555 = vmatpush.msrb.mxu0 %v2419_v10  ;;  %v856_v14 = vpop.permute.xlu2 %855 }
 0x266   : > { %v7125_v38 = vsel %vm1213_vm6, %v1208_v20, %v1138_v19  ;;  %2670 = vmatpush.msrb.mxu1 %v2433_v61  ;;  %v1031_v25 = vrot.slane %v856_v14, 1  ;;  %v2425_v61 = vld [vmem:[#allocation7 + $0x290] sm:$0xff] }
 0x267   : > { %v1883_v13 = vmax.f32 %v1851_v12, 0.0  ;;  %5713 = vmatmul.msk.f32.gmra.mxu0 %vm1290_vm7, %v7109_v53  ;;  %v1141_v55 = vsel %vm1068_vm5, %v1139_v40, %v1140_v47 }
 0x268   : > { %5745 = vmatmul.msk.f32.gmra.mxu1 %vm1290_vm7, %v1237_v36  ;;  %5777 = vmatmul.msk.f32.gmra.mxu2 %vm1290_vm7, %v7109_v53  ;;  %v1026_v36 = vrot.slane %v837_v15, 1  ;;  %v1450_v0 = vpop.f32.mrf.mxu0 }
 0x269   : > { %v7117_v43 = vrot.slane %v1883_v13, 7  ;;  %v849_v49 = vpop.permute.xlu1 %848  ;;  %v1579_v24 = vadd.f32 %v1578_v57, %v1450_v0  ;;  %v2432_v13 = vld [vmem:[#allocation7 + $0x2c8] sm:$0xff] }
 0x26a   : > { %v1028_v41 = vsel %vm955_vm4, %v1026_v36, %v1027_v26  ;;  %v1029_v62 = vrot.slane %v849_v49, 1  ;;  %v1142_v2 = vrot.slane %v849_v49, 2  ;;  %2671 = vmatpush.msrb.mxu1 %v2432_v13 }
 0x26b   : > { %9563 = vst [vmem:[#allocation29_spill] sm:$0xff] %v7117_v43  ;;  %5800 = vmatmul.msk.f32.gmra.mxu3 %vm6874_vm9, %v7117_v43  ;;  %v1209_v39 = vsel %vm517_vm1, %v837_v15, %v1028_v41 }
 0x26c   : > { %v7138_v3 = vsel %vm1213_vm6, %v1209_v39, %v1141_v55  ;;  %v1030_v5 = vsel %vm955_vm4, %v1027_v26, %v1029_v62  ;;  %v1143_v19 = vsel %vm1068_vm5, %v1140_v47, %v1142_v2  ;;  %2672 = vmatpush.msrb.mxu1 %v2431_v22  ;;  %v2429_v47 = vld [vmem:[#allocation7 + $0x2b0] sm:$0xff]  ;;  %v2338_v39 = vld [vmem:[#allocation7 + $0xd8] sm:$0xff]  ;;  %v2416_v22 = vld [vmem:[#allocation7 + $0x248] sm:$0xff] }
 0x26d   : > { %v1210_v20 = vsel %vm517_vm1, %v843_v35, %v1030_v5  ;;  %v1581_v35 = vpop.f32.mrf.mxu1  ;;  %2895 = vmatpush.msrb.mxu3 %v2338_v39  ;;  %v868_v55 = vpop.permute.xlu2 %867 }
 0x26e   : > { %v7162_v26 = vsel %vm1213_vm6, %v1210_v20, %v1143_v19  ;;  %2673 = vmatpush.msrb.mxu1 %v2430_v44  ;;  %v1034_v0 = vrot.slane %v868_v55, 1  ;;  %v1147_v10 = vrot.slane %v868_v55, 2  ;;  %v2418_v19 = vld [vmem:[#allocation7 + $0x258] sm:$0xff]  ;;  %v2423_v20 = vld [vmem:[#allocation7 + $0x280] sm:$0xff]  ;;  %v2409_v44 = vld [vmem:[#allocation7 + $0x210] sm:$0xff] }
 0x26f   : > { %5714 = vmatmul.msk.f32.gmra.mxu0 %vm1290_vm7, %v7125_v38  ;;  %v2319_v55 = vld [vmem:[#allocation7 + $0x40] sm:$0xff] }
 0x270   : > { %5746 = vmatmul.msk.f32.gmra.mxu1 %vm1290_vm7, %v7083_v56  ;;  %5778 = vmatmul.msk.f32.gmra.mxu2 %vm1290_vm7, %v7125_v38  ;;  %v1453_v36 = vpop.f32.mrf.mxu0 }
 0x271   : > { %v1582_v49 = vadd.f32 %v1581_v35, %v1453_v36  ;;  %2674 = vmatpush.msrb.mxu1 %v2429_v47  ;;  %2556 = vmatpush.msrb.mxu0 %v2418_v19  ;;  %v2415_v36 = vld [vmem:[#allocation7 + $0x240] sm:$0xff]  ;;  %v2408_v47 = vld [vmem:[#allocation7 + $0x208] sm:$0xff] }
 0x272   : > { %v1746_v50 = vpop.f32.mrf.mxu2  ;;  %v2411_v35 = vld [vmem:[#allocation7 + $0x220] sm:$0xff] }
 0x273   : > { %v1816_v52 = vadd.f32 %v1746_v50, %v1576_v48  ;;  %v1144_v48 = vrot.slane %v856_v14, 2 }
 0x275   : > { %v1852_v56 = vadd.f32 %v6865_v23, %v1816_v52 }
 0x277   : > { %v1884_v11 = vmax.f32 %v1852_v56, 0.0  ;;  %5715 = vmatmul.msk.f32.gmra.mxu0 %vm1290_vm7, %v7138_v3  ;;  %v2428_v56 = vld [vmem:[#allocation7 + $0x2a8] sm:$0xff] }
 0x278   : > { %5747 = vmatmul.msk.f32.gmra.mxu1 %vm1290_vm7, %v7096_v58  ;;  %5779 = vmatmul.msk.f32.gmra.mxu2 %vm1290_vm7, %v7138_v3 }
 0x279   : > { %v7147_v1 = vrot.slane %v1884_v11, 7  ;;  %v7149_v9 = vpop.permute.xlu1 %861  ;;  %2675 = vmatpush.msrb.mxu1 %v2428_v56  ;;  %v2427_v11 = vld [vmem:[#allocation7 + $0x2a0] sm:$0xff]  ;;  %v2317_v56 = vld [vmem:[#allocation7 + $0x30] sm:$0xff] }
 0x27a   : > { %v1749_v12 = vpop.f32.mrf.mxu2  ;;  %v1032_v18 = vrot.slane %v7149_v9, 1  ;;  %v1145_v28 = vrot.slane %v7149_v9, 2 }
 0x27b   : > { %v1817_v15 = vadd.f32 %v1749_v12, %v1579_v24  ;;  %v7154_v58 = vsel %vm1936_vm8, %v7117_v43, %v7147_v1  ;;  %2676 = vmatpush.msrb.mxu1 %v2427_v11  ;;  %v2426_v24 = vld [vmem:[#allocation7 + $0x298] sm:$0xff] }
 0x27c   : > { %9564 = vst [vmem:[#allocation30_spill] sm:$0xff] %v7154_v58  ;;  %2494 = vmatmul.f32.gmra.mxu3 %v7154_v58  ;;  %v1033_v41 = vsel %vm955_vm4, %v1031_v25, %v1032_v18  ;;  %v1035_v7 = vsel %vm955_vm4, %v1032_v18, %v1034_v0  ;;  %v2337_v25 = vld [vmem:[#allocation7 + $0xd0] sm:$0xff]  ;;  %v7209_v0 = vsel %vm1936_vm8, 0.0, %v6878_v32 }
 0x27d   : > { %v1853_v30 = vadd.f32 %v6865_v23, %v1817_v15  ;;  %v1211_v62 = vsel %vm517_vm1, %v856_v14, %v1033_v41  ;;  %2677 = vmatpush.msrb.mxu1 %v2426_v24  ;;  %v1212_v13 = vsel %vm517_vm1, %v7149_v9, %v1035_v7  ;;  %v1148_v15 = vsel %vm1068_vm5, %v1145_v28, %v1147_v10  ;;  %v2417_v9 = vld [vmem:[#allocation7 + $0x250] sm:$0xff]  ;;  %v2410_v41 = vld [vmem:[#allocation7 + $0x218] sm:$0xff] }
 0x27e   : > { %v1245_v18 = vsel %vm1213_vm6, %v1212_v13, %v1148_v15  ;;  %2557 = vmatpush.msrb.mxu0 %v2417_v9  ;;  %2896 = vmatpush.msrb.mxu3 %v2337_v25  ;;  %v2211_v10 = vrot.slane %v7209_v0, 2  ;;  %v2314_v13 = vld [vmem:[#allocation7 + $0x18] sm:$0xff]  ;;  %v2313_v9 = vld [vmem:[#allocation7 + $0x10] sm:$0xff] }
 0x27f   : > { %v1885_v40 = vmax.f32 %v1853_v30, 0.0  ;;  %5716 = vmatmul.msk.f32.gmra.mxu0 %vm1290_vm7, %v7162_v26  ;;  %2678 = vmatpush.msrb.mxu1 %v2425_v61  ;;  %v2321_v30 = vld [vmem:[#allocation7 + $0x50] sm:$0xff]  ;;  %v2315_v61 = vld [vmem:[#allocation7 + $0x20] sm:$0xff] }
 0x280   : > { %5748 = vmatmul.msk.f32.gmra.mxu1 %vm1290_vm7, %v7109_v53  ;;  %5780 = vmatmul.msk.f32.gmra.mxu2 %vm1290_vm7, %v7162_v26  ;;  %v1146_v53 = vsel %vm1068_vm5, %v1144_v48, %v1145_v28  ;;  %v2414_v28 = vld [vmem:[#allocation7 + $0x238] sm:$0xff] }
 0x281   : > { %v7172_v50 = vrot.slane %v1885_v40, 7  ;;  %v1244_v2 = vsel %vm1213_vm6, %v1211_v62, %v1146_v53  ;;  %2558 = vmatpush.msrb.mxu0 %v2416_v22  ;;  %2783 = vmatpush.msrb.mxu2 %v2321_v30  ;;  %v2413_v40 = vld [vmem:[#allocation7 + $0x230] sm:$0xff]  ;;  %v2318_v62 = vld [vmem:[#allocation7 + $0x38] sm:$0xff] }
 0x282   : > { %v1752_v52 = vpop.f32.mrf.mxu2 }
 0x283   : > { %9565 = vst [vmem:[#allocation31_spill] sm:$0xff] %v7172_v50  ;;  %v1818_v34 = vadd.f32 %v1752_v52, %v1582_v49  ;;  %2559 = vmatpush.msrb.mxu0 %v2415_v36  ;;  %2784 = vmatpush.msrb.mxu2 %v2320_v46  ;;  %v2407_v52 = vld [vmem:[#allocation7 + $0x200] sm:$0xff] }
 0x284   : > { %5802 = vmatmul.msk.f32.gmra.mxu3 %vm6874_vm9, %v7172_v50 }
 0x285   : > { %v1854_v57 = vadd.f32 %v6865_v23, %v1818_v34  ;;  %2560 = vmatpush.msrb.mxu0 %v2414_v28  ;;  %2785 = vmatpush.msrb.mxu2 %v2319_v55  ;;  %v2312_v28 = vld [vmem:[#allocation7 + $0x8] sm:$0xff] }
 0x287   : > { %v1886_v5 = vmax.f32 %v1854_v57, 0.0  ;;  %5717 = vmatmul.msk.f32.gmra.mxu0 %vm1290_vm7, %v1244_v2  ;;  %2786 = vmatpush.msrb.mxu2 %v2318_v62  ;;  %v7246_v62 = vsel %vm1936_vm8, 0.0, %v6916_v17 }
 0x288   : > { %5749 = vmatmul.msk.f32.gmra.mxu1 %vm1290_vm7, %v7125_v38  ;;  %5781 = vmatmul.msk.f32.gmra.mxu2 %vm1290_vm7, %v1244_v2  ;;  %v2424_v38 = vld [vmem:[#allocation7 + $0x288] sm:$0xff] }
 0x289   : > { %v7186_v12 = vrot.slane %v1886_v5, 7  ;;  %2679 = vmatpush.msrb.mxu1 %v2424_v38  ;;  %2561 = vmatpush.msrb.mxu0 %v2413_v40  ;;  %v2316_v5 = vld [vmem:[#allocation7 + $0x28] sm:$0xff]  ;;  %v7224_v38 = vsel %vm1936_vm8, %v6895_v54, 0.0 }
 0x28a   : > { %2787 = vmatpush.msrb.mxu2 %v2317_v56  ;;  %v2214_v36 = vrot.slane %v7224_v38, 2 }
 0x28b   : > { %v7193_v14 = vsel %vm1936_vm8, %v7172_v50, %v7186_v12  ;;  %2680 = vmatpush.msrb.mxu1 %v2423_v20 }
 0x28c   : > { %9566 = vst [vmem:[#allocation32_spill] sm:$0xff] %v7193_v14  ;;  %2500 = vmatmul.f32.gmra.mxu3 %v7193_v14  ;;  %2788 = vmatpush.msrb.mxu2 %v2316_v5  ;;  %v2335_v5 = vld [vmem:[#allocation7 + $0xc0] sm:$0xff] }
 0x28e   : > { %2789 = vmatpush.msrb.mxu2 %v2315_v61  ;;  %v7252_v61 = vpop.f32.mrf.mxu3 }
 0x28f   : > { %5718 = vmatmul.msk.f32.gmra.mxu0 %vm1290_vm7, %v1245_v18 }
 0x290   : > { %5750 = vmatmul.msk.f32.gmra.mxu1 %vm1290_vm7, %v7138_v3  ;;  %5782 = vmatmul.msk.f32.gmra.mxu2 %vm1290_vm7, %v1245_v18  ;;  %v2412_v3 = vld [vmem:[#allocation7 + $0x228] sm:$0xff] }
 0x291   : > { %2562 = vmatpush.msrb.mxu0 %v2412_v3  ;;  %2790 = vmatpush.msrb.mxu2 %v2314_v13 }
 0x293   : > { %2563 = vmatpush.msrb.mxu0 %v2411_v35  ;;  %v1584_v48 = vpop.f32.mrf.mxu1  ;;  %2791 = vmatpush.msrb.mxu2 %v2313_v9 }
 0x295   : > { %2564 = vmatpush.msrb.mxu0 %v2410_v41  ;;  %2792 = vmatpush.msrb.mxu2 %v2312_v28  ;;  %v2311_v41 = vld [vmem:[#allocation7] sm:$0xff] }
 0x297   : > { %2565 = vmatpush.msrb.mxu0 %v2409_v44  ;;  %2793 = vmatpush.msrb.mxu2 %v2311_v41 }
 0x298   : > { %5751 = vmatmul.msk.f32.gmra.mxu1 %vm1290_vm7, %v7162_v26  ;;  %v2336_v26 = vld [vmem:[#allocation7 + $0xc8] sm:$0xff]  ;;  %v887_v25 = vpop.permute.xlu2 %886 }
 0x299   : > { %2566 = vmatpush.msrb.mxu0 %v2408_v47  ;;  %2897 = vmatpush.msrb.mxu3 %v2336_v26  ;;  %v1261_v44 = vrot.slane %v887_v25, 1  ;;  %v1275_v55 = vrot.slane %v887_v25, 2 }
 0x29a   : > { %v1755_v34 = vpop.f32.mrf.mxu2 }
 0x29b   : > { %2567 = vmatpush.msrb.mxu0 %v2407_v52  ;;  %2898 = vmatpush.msrb.mxu3 %v2335_v5  ;;  %v7295_v5 = vsel %vm1936_vm8, 0.0, %v6952_v60 }
 0x2a0   : > { %5752 = vmatmul.msk.f32.gmra.mxu1 %vm1290_vm7, %v1244_v2  ;;  %v2212_v2 = vrot.slane %v6902_v63, 2 }
 0x2a4   : > { %v1456_v49 = vpop.f32.mrf.mxu0 }
 0x2a5   : > { %v1585_v39 = vadd.f32 %v1584_v48, %v1456_v49 }
 0x2a7   : > { %v1819_v53 = vadd.f32 %v1755_v34, %v1585_v39  ;;  %v7234_v39 = vsel %vm1068_vm5, %v2212_v2, %v2214_v36  ;;  %v7241_v34 = vld [vmem:[%s9390_s2] ss:$0 sm:$0xff] }
 0x2a8   : > { %5753 = vmatmul.msk.f32.gmra.mxu1 %vm1290_vm7, %v1245_v18  ;;  %9568 = vst [vmem:[#allocation34_spill] sm:$0xff] %v7234_v39 }
 0x2a9   : > { %v1855_v57 = vadd.f32 %v6865_v23, %v1819_v53  ;;  %v7219_v23 = vsel %vm1068_vm5, %v2211_v10, %v2212_v2  ;;  %v1758_v49 = vpop.f32.mrf.mxu2  ;;  %v2217_v2 = vrot.slane %v6931_v45, 2  ;;  %v2216_v10 = vrot.slane %v7246_v62, 2 }
 0x2aa   : > { %9567 = vst [vmem:[#allocation33_spill] sm:$0xff] %v7219_v23 }
 0x2ab   : > { %v1887_v11 = vmax.f32 %v1855_v57, 0.0 }
 0x2ac   : > { %v1459_v7 = vpop.f32.mrf.mxu0 }
 0x2ad   : > { %v7212_v24 = vrot.slane %v1887_v11, 7 }
 0x2af   : > { %5804 = vmatmul.msk.f32.gmra.mxu3 %vm6874_vm9, %v7212_v24 }
 0x2b0   : > { %2681 = vmatmul.f32.vlgmr.msrb.gmra.mxu1 %v7219_v23  ;;  %v875_v15 = vpop.permute.xlu0 %874 }
 0x2b1   : > { %v1258_v19 = vrot.slane %v875_v15, 1  ;;  %v1272_v20 = vrot.slane %v875_v15, 2  ;;  %v881_v18 = vpop.permute.xlu1 %880 }
 0x2b2   : > { %v1259_v22 = vrot.slane %v881_v18, 1  ;;  %v1273_v30 = vrot.slane %v881_v18, 2 }
 0x2b4   : > { %v1260_v40 = vsel %vm955_vm4, %v1258_v19, %v1259_v22  ;;  %v1274_v3 = vsel %vm1068_vm5, %v1272_v20, %v1273_v30  ;;  %v1587_v35 = vpop.f32.mrf.mxu1  ;;  %v1462_v46 = vpop.f32.mrf.mxu0  ;;  %v1262_v26 = vsel %vm955_vm4, %v1259_v22, %v1261_v44  ;;  %v1276_v57 = vsel %vm1068_vm5, %v1273_v30, %v1275_v55 }
 0x2b5   : > { %v1283_v54 = vsel %vm517_vm1, %v875_v15, %v1260_v40  ;;  %v1588_v47 = vadd.f32 %v1587_v35, %v1459_v7  ;;  %v1284_v56 = vsel %vm517_vm1, %v881_v18, %v1262_v26  ;;  %v900_v19 = vpop.permute.xlu2 %899  ;;  %v7260_v20 = vsel %vm1068_vm5, %v2216_v10, %v2217_v2  ;;  %v7279_v26 = vpop.f32.mrf.mxu3 }
 0x2b6   : > { %v1287_v48 = vsel %vm1213_vm6, %v1283_v54, %v1274_v3  ;;  %v1288_v15 = vsel %vm1213_vm6, %v1284_v56, %v1276_v57  ;;  %9569 = vst [vmem:[#allocation35_spill] sm:$0xff] %v7260_v20  ;;  %v7264_v18 = vsel %vm1936_vm8, %v6922_v29, 0.0  ;;  %v2107_v30 = vrot.slane %v6902_v63, 1 }
 0x2b7   : > { %5719 = vmatmul.msk.f32.gmra.mxu0 %vm1290_vm7, %v1287_v48  ;;  %5783 = vmatmul.msk.f32.gmra.mxu2 %vm1290_vm7, %v1287_v48  ;;  %v1820_v52 = vadd.f32 %v1758_v49, %v1588_v47  ;;  %v1644_v28 = vrot.slane %v900_v19, 1  ;;  %v1658_v40 = vrot.slane %v900_v19, 2  ;;  %v2219_v29 = vrot.slane %v7264_v18, 2 }
 0x2b8   : > { %2684 = vmatmul.f32.gmra.mxu1 %v7234_v39  ;;  %v2106_v47 = vrot.slane %v7209_v0, 1 }
 0x2b9   : > { %v1856_v53 = vadd.f32 %v7241_v34, %v1820_v52  ;;  %v7288_v56 = vsel %vm1068_vm5, %v2217_v2, %v2219_v29  ;;  %v2222_v2 = vrot.slane %v6963_v4, 2  ;;  %v2221_v29 = vrot.slane %v7295_v5, 2 }
 0x2ba   : > { %v7283_v55 = vsel %vm955_vm4, %v2106_v47, %v2107_v30  ;;  %9570 = vst [vmem:[#allocation36_spill] sm:$0xff] %v7288_v56 }
 0x2bb   : > { %v1888_v11 = vmax.f32 %v1856_v53, 0.0 }
 0x2bc   : > { %v1465_v9 = vpop.f32.mrf.mxu0 }
 0x2bd   : > { %v1590_v7 = vpop.f32.mrf.mxu1  ;;  %v7254_v13 = vrot.slane %v1888_v11, 7  ;;  %v2109_v11 = vrot.slane %v7224_v38, 1 }
 0x2be   : > { %v1591_v57 = vadd.f32 %v1590_v7, %v1462_v46  ;;  %v7301_v46 = vpop.f32.mrf.mxu3 }
 0x2bf   : > { %5720 = vmatmul.msk.f32.gmra.mxu0 %vm1290_vm7, %v1288_v15  ;;  %5784 = vmatmul.msk.f32.gmra.mxu2 %vm1290_vm7, %v1288_v15  ;;  %v7270_v22 = vsel %vm1936_vm8, %v7212_v24, %v7254_v13 }
 0x2c0   : > { %2687 = vmatmul.f32.gmra.mxu1 %v7260_v20  ;;  %v906_v25 = vpop.permute.xlu0 %905  ;;  %2506 = vmatmul.f32.gmra.mxu3 %v7270_v22 }
 0x2c1   : > { %v894_v36 = vpop.permute.xlu1 %893  ;;  %v1646_v54 = vrot.slane %v906_v25, 1  ;;  %v1660_v53 = vrot.slane %v906_v25, 2 }
 0x2c2   : > { %v1643_v3 = vrot.slane %v894_v36, 1  ;;  %v1657_v35 = vrot.slane %v894_v36, 2 }
 0x2c3   : > { %v1647_v0 = vsel %vm955_vm4, %v1644_v28, %v1646_v54  ;;  %v1661_v10 = vsel %vm1068_vm5, %v1658_v40, %v1660_v53  ;;  %v7315_v54 = vsel %vm1936_vm8, %v6958_v6, 0.0  ;;  %v2111_v6 = vrot.slane %v7246_v62, 1 }
 0x2c4   : > { %v1645_v41 = vsel %vm955_vm4, %v1643_v3, %v1644_v28  ;;  %v1659_v44 = vsel %vm1068_vm5, %v1657_v35, %v1658_v40  ;;  %v1468_v15 = vpop.f32.mrf.mxu0  ;;  %v2334_v35 = vld [vmem:[#allocation7 + $0xb8] sm:$0xff]  ;;  %v7306_v40 = vsel %vm955_vm4, %v2107_v30, %v2109_v11  ;;  %v2112_v30 = vrot.slane %v6931_v45, 1 }
 0x2c5   : > { %v1668_v48 = vsel %vm517_vm1, %v894_v36, %v1645_v41  ;;  %v1593_v49 = vpop.f32.mrf.mxu1  ;;  %v1669_v36 = vsel %vm517_vm1, %v900_v19, %v1647_v0  ;;  %2899 = vmatpush.msrb.mxu3 %v2334_v35  ;;  %v7311_v19 = vsel %vm1068_vm5, %v2221_v29, %v2222_v2  ;;  %v2224_v0 = vrot.slane %v7315_v54, 2 }
 0x2c6   : > { %v1672_v52 = vsel %vm1213_vm6, %v1668_v48, %v1659_v44  ;;  %v1673_v7 = vsel %vm1213_vm6, %v1669_v36, %v1661_v10  ;;  %9571 = vst [vmem:[#allocation37_spill] sm:$0xff] %v7311_v19  ;;  %v1594_v44 = vadd.f32 %v1593_v49, %v1465_v9  ;;  %v7330_v49 = vsel %vm955_vm4, %v2111_v6, %v2112_v30  ;;  %v7339_v36 = vpop.f32.mrf.mxu3 }
 0x2c7   : > { %5785 = vmatmul.msk.f32.gmra.mxu2 %vm1290_vm7, %v1672_v52  ;;  %2568 = vmatmul.f32.vlgmr.msrb.gmra.mxu0 %v7283_v55  ;;  %v6413_v52 = vmov 0.0   ;;  %v2114_v29 = vrot.slane %v7264_v18, 1  ;;  %v7368_v6 = vsel %vm1936_vm8, %v6998_v59, 0.0 }
 0x2c8   : > { %2690 = vmatmul.f32.gmra.mxu1 %v7288_v56  ;;  %v7321_v53 = vrot.slane %v6413_v52, 7 }
 0x2cb   : > { %v1761_v25 = vpop.f32.mrf.mxu2 }
 0x2cc   : > { %v1821_v3 = vadd.f32 %v1761_v25, %v1591_v57  ;;  %v1471_v11 = vpop.f32.mrf.mxu0  ;;  %v7337_v25 = vsel %vm1068_vm5, %v2222_v2, %v2224_v0 }
 0x2cd   : > { %v1596_v28 = vpop.f32.mrf.mxu1  ;;  %9573 = vst [vmem:[#allocation39_spill] sm:$0xff] %v7337_v25 }
 0x2ce   : > { %v1857_v38 = vadd.f32 %v7241_v34, %v1821_v3  ;;  %v1597_v62 = vadd.f32 %v1596_v28, %v1468_v15  ;;  %v7359_v28 = vsel %vm955_vm4, %v2112_v30, %v2114_v29  ;;  %v2117_v29 = vrot.slane %v6963_v4, 1 }
 0x2cf   : > { %5786 = vmatmul.msk.f32.gmra.mxu2 %vm1290_vm7, %v1673_v7  ;;  %2571 = vmatmul.f32.gmra.mxu0 %v7306_v40 }
 0x2d0   : > { %v1889_v41 = vmax.f32 %v1857_v38, 0.0  ;;  %2693 = vmatmul.f32.gmra.mxu1 %v7311_v19  ;;  %v7347_v38 = vsel %vm1936_vm8, 0.0, %v6983_v42 }
 0x2d1   : > { %v2226_v15 = vrot.slane %v7347_v38, 2 }
 0x2d2   : > { %v7318_v47 = vrot.slane %v1889_v41, 7  ;;  %v2227_v41 = vrot.slane %v7003_v21, 2 }
 0x2d3   : > { %v1764_v48 = vpop.f32.mrf.mxu2 }
 0x2d4   : > { %9572 = vst [vmem:[#allocation38_spill] sm:$0xff] %v7318_v47  ;;  %v1822_v57 = vadd.f32 %v1764_v48, %v1594_v44  ;;  %5806 = vmatmul.msk.f32.gmra.mxu3 %vm6874_vm9, %v7318_v47  ;;  %v2333_v48 = vld [vmem:[#allocation7 + $0xb0] sm:$0xff]  ;;  %v1474_v0 = vpop.f32.mrf.mxu0 }
 0x2d5   : > { %v1599_v10 = vpop.f32.mrf.mxu1  ;;  %2900 = vmatpush.msrb.mxu3 %v2333_v48 }
 0x2d6   : > { %v1858_v9 = vadd.f32 %v7241_v34, %v1822_v57  ;;  %v7364_v57 = vsel %vm1068_vm5, %v2226_v15, %v2227_v41  ;;  %v1600_v30 = vadd.f32 %v1599_v10, %v1471_v11  ;;  %v2116_v15 = vrot.slane %v7295_v5, 1 }
 0x2d7   : > { %2574 = vmatmul.f32.gmra.mxu0 %v7330_v49  ;;  %5820 = vmatmul.msk.f32.vlgmr.msrb.gmra.mxu2 %vm6874_vm9, %v7321_v53  ;;  %9575 = vst [vmem:[#allocation41_spill] sm:$0xff] %v7364_v57 }
 0x2d8   : > { %v1890_v3 = vmax.f32 %v1858_v9, 0.0  ;;  %2696 = vmatmul.f32.gmra.mxu1 %v7337_v25 }
 0x2da   : > { %v7342_v35 = vrot.slane %v1890_v3, 7  ;;  %v7371_v3 = vpop.f32.mrf.mxu3 }
 0x2db   : > { %v1767_v7 = vpop.f32.mrf.mxu2 }
 0x2dc   : > { %v1823_v44 = vadd.f32 %v1767_v7, %v1597_v62  ;;  %v7353_v2 = vsel %vm1936_vm8, %v7318_v47, %v7342_v35  ;;  %v1477_v10 = vpop.f32.mrf.mxu0 }
 0x2dd   : > { %9574 = vst [vmem:[#allocation40_spill] sm:$0xff] %v7353_v2  ;;  %v1602_v52 = vpop.f32.mrf.mxu1  ;;  %2512 = vmatmul.f32.gmra.mxu3 %v7353_v2 }
 0x2de   : > { %v1859_v18 = vadd.f32 %v7241_v34, %v1823_v44  ;;  %v2229_v44 = vrot.slane %v7368_v6, 2 }
 0x2df   : > { %2577 = vmatmul.f32.gmra.mxu0 %v7359_v28  ;;  %2797 = vmatmul.f32.gmra.mxu2 %v7321_v53 }
 0x2e0   : > { %v1891_v9 = vmax.f32 %v1859_v18, 0.0  ;;  %2699 = vmatmul.f32.gmra.mxu1 %v7364_v57  ;;  %v7383_v18 = vsel %vm955_vm4, %v2116_v15, %v2117_v29  ;;  %v7390_v11 = vsel %vm1068_vm5, %v2227_v41, %v2229_v44  ;;  %v2232_v57 = vrot.slane %v7036_v51, 2 }
 0x2e1   : > { %9577 = vst [vmem:[#allocation43_spill] sm:$0xff] %v7390_v11 }
 0x2e2   : > { %v7373_v62 = vrot.slane %v1891_v9, 7  ;;  %v1603_v9 = vadd.f32 %v1602_v52, %v1474_v0  ;;  %v2332_v52 = vld [vmem:[#allocation7 + $0xa8] sm:$0xff] }
 0x2e3   : > { %v1770_v7 = vpop.f32.mrf.mxu2  ;;  %2901 = vmatpush.msrb.mxu3 %v2332_v52 }
 0x2e4   : > { %9576 = vst [vmem:[#allocation42_spill] sm:$0xff] %v7373_v62  ;;  %v1824_v48 = vadd.f32 %v1770_v7, %v1600_v30  ;;  %v2119_v7 = vrot.slane %v7315_v54, 1 }
 0x2e5   : > { %v1605_v25 = vpop.f32.mrf.mxu1  ;;  %5808 = vmatmul.msk.f32.gmra.mxu3 %vm6874_vm9, %v7373_v62 }
 0x2e6   : > { %v1860_v59 = vadd.f32 %v7241_v34, %v1824_v48  ;;  %v7398_v48 = vsel %vm1936_vm8, 0.0, %v7019_v16  ;;  %v1606_v19 = vadd.f32 %v1605_v25, %v1477_v10 }
 0x2e7   : > { %2580 = vmatmul.f32.gmra.mxu0 %v7383_v18  ;;  %5822 = vmatmul.msk.f32.gmra.mxu2 %vm6874_vm9, %v6878_v32  ;;  %v7401_v32 = vpop.f32.mrf.mxu3  ;;  %v2231_v54 = vrot.slane %v7398_v48, 2 }
 0x2e8   : > { %v1892_v5 = vmax.f32 %v1860_v59, 0.0  ;;  %2702 = vmatmul.f32.gmra.mxu1 %v7390_v11 }
 0x2ea   : > { %v7393_v30 = vrot.slane %v1892_v5, 7  ;;  %v7412_v5 = vsel %vm955_vm4, %v2117_v29, %v2119_v7  ;;  %v2122_v29 = vrot.slane %v7003_v21, 1  ;;  %v1480_v7 = vpop.f32.mrf.mxu0 }
 0x2eb   : > { %v1773_v15 = vpop.f32.mrf.mxu2  ;;  %9579 = vst [vmem:[#allocation45_spill] sm:$0xff] %v7412_v5 }
 0x2ec   : > { %v1825_v41 = vadd.f32 %v1773_v15, %v1603_v9  ;;  %v7406_v44 = vsel %vm1936_vm8, %v7373_v62, %v7393_v30  ;;  %v7417_v9 = vsel %vm1068_vm5, %v2231_v54, %v2232_v57  ;;  %v7421_v15 = vsel %vm1936_vm8, %v7030_v37, 0.0 }
 0x2ed   : > { %9578 = vst [vmem:[#allocation44_spill] sm:$0xff] %v7406_v44  ;;  %v1608_v0 = vpop.f32.mrf.mxu1  ;;  %2518 = vmatmul.f32.gmra.mxu3 %v7406_v44  ;;  %v2234_v56 = vrot.slane %v7421_v15, 2  ;;  %v2121_v54 = vrot.slane %v7347_v38, 1 }
 0x2ee   : > { %v1861_v59 = vadd.f32 %v7241_v34, %v1825_v41  ;;  %9580 = vst [vmem:[#allocation46_spill] sm:$0xff] %v7417_v9  ;;  %v1609_v10 = vadd.f32 %v1608_v0, %v1480_v7 }
 0x2ef   : > { %2583 = vmatmul.f32.gmra.mxu0 %v7412_v5  ;;  %2803 = vmatmul.f32.gmra.mxu2 %v6902_v63  ;;  %v7432_v37 = vpop.f32.mrf.mxu3 }
 0x2f0   : > { %v1893_v11 = vmax.f32 %v1861_v59, 0.0  ;;  %2705 = vmatmul.f32.gmra.mxu1 %v7417_v9  ;;  %v2237_v9 = vrot.slane %v7078_v33, 2 }
 0x2f2   : > { %v7424_v41 = vrot.slane %v1893_v11, 7  ;;  %v7436_v11 = vsel %vm955_vm4, %v2121_v54, %v2122_v29 }
 0x2f3   : > { %v1776_v52 = vpop.f32.mrf.mxu2  ;;  %9582 = vst [vmem:[#allocation48_spill] sm:$0xff] %v7436_v11 }
 0x2f4   : > { %9581 = vst [vmem:[#allocation47_spill] sm:$0xff] %v7424_v41  ;;  %v1826_v63 = vadd.f32 %v1776_v52, %v1606_v19  ;;  %v7443_v19 = vsel %vm1068_vm5, %v2232_v57, %v2234_v56  ;;  %v2124_v52 = vrot.slane %v7368_v6, 1  ;;  %v2331_v57 = vld [vmem:[#allocation7 + $0xa0] sm:$0xff] }
 0x2f5   : > { %v1611_v20 = vpop.f32.mrf.mxu1  ;;  %5810 = vmatmul.msk.f32.gmra.mxu3 %vm6874_vm9, %v7424_v41  ;;  %9583 = vst [vmem:[#allocation49_spill] sm:$0xff] %v7443_v19 }
 0x2f6   : > { %v1862_v25 = vadd.f32 %v7241_v34, %v1826_v63  ;;  %v7451_v63 = vsel %vm1936_vm8, 0.0, %v7057_v8  ;;  %2902 = vmatpush.msrb.mxu3 %v2331_v57  ;;  %v2127_v57 = vrot.slane %v7036_v51, 1 }
 0x2f7   : > { %2586 = vmatmul.f32.gmra.mxu0 %v7436_v11  ;;  %5824 = vmatmul.msk.f32.gmra.mxu2 %vm6874_vm9, %v6916_v17  ;;  %v2236_v6 = vrot.slane %v7451_v63, 2 }
 0x2f8   : > { %v1894_v38 = vmax.f32 %v1862_v25, 0.0  ;;  %2708 = vmatmul.f32.gmra.mxu1 %v7443_v19  ;;  %v1483_v25 = vpop.f32.mrf.mxu0  ;;  %v7474_v19 = vpop.f32.mrf.mxu3 }
 0x2fa   : > { %v7446_v59 = vrot.slane %v1894_v38, 7  ;;  %v7463_v38 = vsel %vm955_vm4, %v2122_v29, %v2124_v52  ;;  %v1612_v29 = vadd.f32 %v1611_v20, %v1483_v25 }
 0x2fb   : > { %v1779_v54 = vpop.f32.mrf.mxu2  ;;  %9585 = vst [vmem:[#allocation51_spill] sm:$0xff] %v7463_v38 }
 0x2fc   : > { %v1827_v39 = vadd.f32 %v1779_v54, %v1609_v10  ;;  %v7457_v56 = vsel %vm1936_vm8, %v7424_v41, %v7446_v59  ;;  %v7468_v10 = vsel %vm1068_vm5, %v2236_v6, %v2237_v9  ;;  %v7472_v54 = vsel %vm1936_vm8, %v7072_v27, 0.0 }
 0x2fd   : > { %9584 = vst [vmem:[#allocation50_spill] sm:$0xff] %v7457_v56  ;;  %v1614_v0 = vpop.f32.mrf.mxu1  ;;  %2524 = vmatmul.f32.gmra.mxu3 %v7457_v56  ;;  %v2239_v6 = vrot.slane %v7472_v54, 2 }
 0x2fe   : > { %v1863_v7 = vadd.f32 %v7241_v34, %v1827_v39  ;;  %9586 = vst [vmem:[#allocation52_spill] sm:$0xff] %v7468_v10  ;;  %v2330_v39 = vld [vmem:[#allocation7 + $0x98] sm:$0xff] }
 0x2ff   : > { %2589 = vmatmul.f32.gmra.mxu0 %v7463_v38  ;;  %2809 = vmatmul.f32.gmra.mxu2 %v6931_v45  ;;  %v2126_v38 = vrot.slane %v7398_v48, 1 }
 0x300   : > { %v1895_v23 = vmax.f32 %v1863_v7, 0.0  ;;  %2711 = vmatmul.f32.gmra.mxu1 %v7468_v10  ;;  %2903 = vmatpush.msrb.mxu3 %v2330_v39  ;;  %v7497_v48 = vpop.f32.mrf.mxu3 }
 0x301   : > { %v7487_v39 = vsel %vm955_vm4, %v2126_v38, %v2127_v57  ;;  %v2129_v38 = vrot.slane %v7421_v15, 1 }
 0x302   : > { %v7477_v52 = vrot.slane %v1895_v23, 7  ;;  %9588 = vst [vmem:[#allocation54_spill] sm:$0xff] %v7487_v39  ;;  %v1486_v23 = vpop.f32.mrf.mxu0 }
 0x303   : > { %v1782_v45 = vpop.f32.mrf.mxu2  ;;  %v1615_v25 = vadd.f32 %v1614_v0, %v1486_v23  ;;  %v7515_v15 = vsel %vm955_vm4, %v2127_v57, %v2129_v38  ;;  %v2061_v23 = vsel %vm1936_vm8, %v7147_v1, 0.0  ;;  %v2329_v1 = vld [vmem:[#allocation7 + $0x90] sm:$0xff] }
 0x304   : > { %9587 = vst [vmem:[#allocation53_spill] sm:$0xff] %v7477_v52  ;;  %v1828_v17 = vadd.f32 %v1782_v45, %v1612_v29  ;;  %v7494_v45 = vsel %vm1068_vm5, %v2237_v9, %v2239_v6  ;;  %v2044_v29 = vsel %vm1936_vm8, 0.0, %v7117_v43  ;;  %v2244_v38 = vrot.slane %v2061_v23, 2  ;;  %2904 = vmatpush.msrb.mxu3 %v2329_v1 }
 0x305   : > { %v1617_v27 = vpop.f32.mrf.mxu1  ;;  %5812 = vmatmul.msk.f32.gmra.mxu3 %vm6874_vm9, %v7477_v52  ;;  %9589 = vst [vmem:[#allocation55_spill] sm:$0xff] %v7494_v45  ;;  %v2241_v0 = vrot.slane %v2044_v29, 2 }
 0x306   : > { %v1864_v7 = vadd.f32 %v7241_v34, %v1828_v17  ;;  %9591 = vst [vmem:[#allocation57_spill] sm:$0xff] %v7515_v15 }
 0x307   : > { %2592 = vmatmul.f32.gmra.mxu0 %v7487_v39  ;;  %5826 = vmatmul.msk.f32.gmra.mxu2 %vm6874_vm9, %v6952_v60  ;;  %v2242_v39 = vrot.slane %v7154_v58, 2 }
 0x308   : > { %v1896_v20 = vmax.f32 %v1864_v7, 0.0  ;;  %2714 = vmatmul.f32.gmra.mxu1 %v7494_v45 }
 0x30a   : > { %v7499_v17 = vrot.slane %v1896_v20, 7 }
 0x30b   : > { %v1785_v10 = vpop.f32.mrf.mxu2 }
 0x30c   : > { %v1829_v60 = vadd.f32 %v1785_v10, %v1615_v25  ;;  %v7508_v9 = vsel %vm1936_vm8, %v7477_v52, %v7499_v17  ;;  %v7520_v10 = vsel %vm1068_vm5, %v2241_v0, %v2242_v39  ;;  %v1489_v25 = vpop.f32.mrf.mxu0  ;;  %v2131_v0 = vrot.slane %v7451_v63, 1 }
 0x30d   : > { %9590 = vst [vmem:[#allocation56_spill] sm:$0xff] %v7508_v9  ;;  %v7510_v6 = vpop.f32.mrf.mxu1  ;;  %2530 = vmatmul.f32.gmra.mxu3 %v7508_v9  ;;  %v1618_v45 = vadd.f32 %v1617_v27, %v1489_v25  ;;  %v7545_v63 = vsel %vm1068_vm5, %v2242_v39, %v2244_v38  ;;  %v2045_v25 = vsel %vm1936_vm8, 0.0, %v7172_v50 }
 0x30e   : > { %v1865_v7 = vadd.f32 %v7241_v34, %v1829_v60  ;;  %9592 = vst [vmem:[#allocation58_spill] sm:$0xff] %v7520_v10  ;;  %v2132_v60 = vrot.slane %v7078_v33, 1  ;;  %v2377_v39 = vrot.slane %v2045_v25, 2 }
 0x30f   : > { %2595 = vmatmul.f32.gmra.mxu0 %v7515_v15  ;;  %2815 = vmatmul.f32.gmra.mxu2 %v6963_v4  ;;  %v7528_v15 = vpop.f32.mrf.mxu3  ;;  %9595 = vst [vmem:[#allocation61_spill] sm:$0xff] %v7545_v63 }
 0x310   : > { %v1897_v20 = vmax.f32 %v1865_v7, 0.0  ;;  %2717 = vmatmul.f32.gmra.mxu1 %v7520_v10  ;;  %v7538_v7 = vsel %vm955_vm4, %v2131_v0, %v2132_v60  ;;  %v2137_v10 = vrot.slane %v7154_v58, 1 }
 0x311   : > { %9594 = vst [vmem:[#allocation60_spill] sm:$0xff] %v7538_v7 }
 0x312   : > { %v7525_v11 = vrot.slane %v1897_v20, 7 }
 0x313   : > { %v1788_v57 = vpop.f32.mrf.mxu2 }
 0x314   : > { %9593 = vst [vmem:[#allocation59_spill] sm:$0xff] %v7525_v11  ;;  %v1830_v4 = vadd.f32 %v1788_v57, %v1618_v45  ;;  %v2378_v57 = vrot.slane %v7193_v14, 2 }
 0x315   : > { %v7531_v5 = vpop.f32.mrf.mxu1  ;;  %5814 = vmatmul.msk.f32.gmra.mxu3 %vm6874_vm9, %v7525_v11 }
 0x316   : > { %v1866_v27 = vadd.f32 %v7241_v34, %v1830_v4  ;;  %v2134_v4 = vrot.slane %v7472_v54, 1  ;;  %v7570_v54 = vsel %vm1068_vm5, %v2377_v39, %v2378_v57  ;;  %v2139_v39 = vrot.slane %v2061_v23, 1 }
 0x317   : > { %2598 = vmatmul.f32.gmra.mxu0 %v7538_v7  ;;  %5828 = vmatmul.msk.f32.gmra.mxu2 %vm6874_vm9, %v6983_v42  ;;  %v7562_v38 = vpop.f32.mrf.mxu3  ;;  %9599 = vst [vmem:[#allocation65_spill] sm:$0xff] %v7570_v54  ;;  %v2136_v42 = vrot.slane %v2044_v29, 1  ;;  %v2046_v29 = vsel %vm1936_vm8, 0.0, %v7212_v24 }
 0x318   : > { %v1898_v45 = vmax.f32 %v1866_v27, 0.0  ;;  %2720 = vmatmul.f32.gmra.mxu1 %v7545_v63  ;;  %9597 = vst [vmem:[#allocation63_spill] sm:$0xff] %v7562_v38  ;;  %v7565_v27 = vsel %vm955_vm4, %v2132_v60, %v2134_v4  ;;  %v1492_v63 = vpop.f32.mrf.mxu0 }
 0x319   : > { %9598 = vst [vmem:[#allocation64_spill] sm:$0xff] %v7565_v27  ;;  %v7579_v60 = vsel %vm955_vm4, %v2136_v42, %v2137_v10  ;;  %v2247_v42 = vrot.slane %v7270_v22, 2 }
 0x31a   : > { %v7548_v20 = vrot.slane %v1898_v45, 7  ;;  %v2062_v45 = vsel %vm1936_vm8, %v7186_v12, 0.0  ;;  %9600 = vst [vmem:[#allocation66_spill] sm:$0xff] %v7579_v60 }
 0x31b   : > { %v2380_v50 = vrot.slane %v2062_v45, 2 }
 0x31c   : > { %v7557_v0 = vsel %vm1936_vm8, %v7525_v11, %v7548_v20 }
 0x31d   : > { %9596 = vst [vmem:[#allocation62_spill] sm:$0xff] %v7557_v0  ;;  %v7559_v1 = vpop.f32.mrf.mxu1  ;;  %2536 = vmatmul.f32.gmra.mxu3 %v7557_v0  ;;  %v7586_v12 = vsel %vm1068_vm5, %v2378_v57, %v2380_v50  ;;  %v7609_v57 = vsel %vm1936_vm8, %v7254_v13, 0.0 }
 0x31e   : > { %9601 = vst [vmem:[#allocation67_spill] sm:$0xff] %v7586_v12 }
 0x31f   : > { %2601 = vmatmul.f32.gmra.mxu0 %v7565_v27  ;;  %2821 = vmatmul.f32.gmra.mxu2 %v7003_v21  ;;  %v7588_v4 = vpop.f32.mrf.mxu3  ;;  %v2246_v27 = vrot.slane %v2046_v29, 2 }
 0x320   : > { %2723 = vmatmul.f32.gmra.mxu1 %v7570_v54  ;;  %9602 = vst [vmem:[#allocation68_spill] sm:$0xff] %v7588_v4  ;;  %v2328_v54 = vld [vmem:[#allocation7 + $0x88] sm:$0xff]  ;;  %v1495_v21 = vpop.f32.mrf.mxu0  ;;  %v2327_v4 = vld [vmem:[#allocation7 + $0x80] sm:$0xff] }
 0x321   : > { %2905 = vmatpush.msrb.mxu3 %v2328_v54  ;;  %v7602_v50 = vsel %vm1068_vm5, %v2246_v27, %v2247_v42  ;;  %v2364_v54 = vrot.slane %v7193_v14, 1  ;;  %v2366_v14 = vrot.slane %v2062_v45, 1 }
 0x322   : > { %9604 = vst [vmem:[#allocation70_spill] sm:$0xff] %v7602_v50 }
 0x323   : > { %2906 = vmatpush.msrb.mxu3 %v2327_v4  ;;  %v7650_v4 = vsel %vm1936_vm8, %v7342_v35, 0.0  ;;  %v3148_v35 = vld [vmem:[#allocation7 + $0x3f8] sm:$0xff] }
 0x324   : > { %3278 = vmatpush.msra.mxu2 %v3148_v35 }
 0x325   : > { %v7576_v7 = vpop.f32.mrf.mxu1 }
 0x327   : > { %2604 = vmatmul.f32.gmra.mxu0 %v7579_v60  ;;  %5830 = vmatmul.msk.f32.gmra.mxu2 %vm6874_vm9, %v7019_v16  ;;  %v7597_v16 = vsel %vm955_vm4, %v2137_v10, %v2139_v39  ;;  %v7604_v23 = vpop.f32.mrf.mxu3  ;;  %v2249_v10 = vrot.slane %v7609_v57, 2 }
 0x328   : > { %2726 = vmatmul.f32.gmra.mxu1 %v7586_v12  ;;  %9603 = vst [vmem:[#allocation69_spill] sm:$0xff] %v7597_v16  ;;  %v2363_v12 = vrot.slane %v2045_v25, 1  ;;  %v1621_v25 = vadd.f32 %v7510_v6, %v1492_v63  ;;  %v7641_v6 = vsel %vm955_vm4, %v2364_v54, %v2366_v14 }
 0x329   : > { %9605 = vst [vmem:[#allocation71_spill] sm:$0xff] %v7604_v23  ;;  %v7623_v13 = vsel %vm1068_vm5, %v2247_v42, %v2249_v10  ;;  %v2252_v23 = vrot.slane %v7353_v2, 2 }
 0x32a   : > { %9607 = vst [vmem:[#allocation73_spill] sm:$0xff] %v7623_v13 }
 0x32b   : > { %9609 = vst [vmem:[#allocation75_spill] sm:$0xff] %v7641_v6 }
 0x32d   : > { %v7594_v60 = vpop.f32.mrf.mxu1 }
 0x32f   : > { %2607 = vmatmul.f32.gmra.mxu0 %v7597_v16  ;;  %2827 = vmatmul.f32.gmra.mxu2 %v7036_v51  ;;  %v7616_v51 = vsel %vm955_vm4, %v2363_v12, %v2364_v54  ;;  %v7625_v27 = vpop.f32.mrf.mxu3  ;;  %v7631_v12 = vsel %vm1936_vm8, 0.0, %v7318_v47 }
 0x330   : > { %2729 = vmatmul.f32.gmra.mxu1 %v7602_v50  ;;  %9606 = vst [vmem:[#allocation72_spill] sm:$0xff] %v7616_v51 }
 0x331   : > { %9608 = vst [vmem:[#allocation74_spill] sm:$0xff] %v7625_v27 }
 0x334   : > { %v1498_v39 = vpop.f32.mrf.mxu0 }
 0x335   : > { %v7613_v16 = vpop.f32.mrf.mxu1 }
 0x337   : > { %2610 = vmatmul.f32.gmra.mxu0 %v7616_v51  ;;  %5832 = vmatmul.msk.f32.gmra.mxu2 %vm6874_vm9, %v7057_v8  ;;  %v7656_v14 = vpop.f32.mrf.mxu3 }
 0x338   : > { %2732 = vmatmul.f32.gmra.mxu1 %v7623_v13  ;;  %v2251_v13 = vrot.slane %v7631_v12, 2  ;;  %9612 = vst [vmem:[#allocation78_spill] sm:$0xff] %v7656_v14 }
 0x33a   : > { %v1791_v50 = vpop.f32.mrf.mxu2  ;;  %v7646_v45 = vsel %vm1068_vm5, %v2251_v13, %v2252_v23  ;;  %v2254_v13 = vrot.slane %v7650_v4, 2 }
 0x33b   : > { %v1831_v51 = vadd.f32 %v1791_v50, %v1621_v25  ;;  %9610 = vst [vmem:[#allocation76_spill] sm:$0xff] %v7646_v45  ;;  %v2142_v25 = vrot.slane %v7270_v22, 1 }
 0x33c   : > { %v7634_v8 = vpop.f32.mrf.mxu0 }
 0x33d   : > { %v1867_v42 = vadd.f32 %v7241_v34, %v1831_v51  ;;  %v7637_v10 = vpop.f32.mrf.mxu1  ;;  %v1624_v51 = vadd.f32 %v7531_v5, %v1495_v21 }
 0x33f   : > { %v1899_v63 = vmax.f32 %v1867_v42, 0.0  ;;  %2613 = vmatmul.f32.gmra.mxu0 %v7641_v6  ;;  %2833 = vmatmul.f32.gmra.mxu2 %v7078_v33  ;;  %v2141_v33 = vrot.slane %v2046_v29, 1  ;;  %v7679_v29 = vsel %vm1936_vm8, 0.0, %v7321_v53 }
 0x340   : > { %2735 = vmatmul.f32.gmra.mxu1 %v7646_v45 }
 0x341   : > { %v7654_v50 = vrot.slane %v1899_v63, 7  ;;  %v3164_v63 = vld [vmem:[#allocation7 + $0x478] sm:$0xff]  ;;  %v7667_v45 = vsel %vm955_vm4, %v2141_v33, %v2142_v25  ;;  %v1627_v33 = vadd.f32 %v7559_v1, %v1498_v39  ;;  %v9471_v39 = vrot.slane %v7679_v29, 1 }
 0x342   : > { %v1794_v54 = vpop.f32.mrf.mxu2  ;;  %9613 = vst [vmem:[#allocation79_spill] sm:$0xff] %v7667_v45  ;;  %3391 = vmatpush.msra.mxu3 %v3164_v63  ;;  %v2144_v63 = vrot.slane %v7609_v57, 1 }
 0x343   : > { %9611 = vst [vmem:[#allocation77_spill] sm:$0xff] %v7654_v50  ;;  %v1832_v42 = vadd.f32 %v1794_v54, %v1624_v51  ;;  %5816 = vmatmul.msk.f32.gmra.mxu3 %vm6874_vm9, %v7654_v50  ;;  %v7674_v54 = vsel %vm1068_vm5, %v2252_v23, %v2254_v13  ;;  %v2257_v23 = vrot.slane %v7406_v44, 2  ;;  %v7692_v13 = vsel %vm1936_vm8, %v7321_v53, 0.0 }
 0x344   : > { %v2569_v6 = vpop.f32.mrf.mxu0  ;;  %9614 = vst [vmem:[#allocation80_spill] sm:$0xff] %v7674_v54  ;;  %v9470_v57 = vrot.slane %v7692_v13, 1  ;;  %v7716_v38 = vsel %vm955_vm4, %v2142_v25, %v2144_v63 }
 0x345   : > { %v1868_v21 = vadd.f32 %v7241_v34, %v1832_v42  ;;  %v7664_v5 = vpop.f32.mrf.mxu1  ;;  %v3132_v42 = vld [vmem:[#allocation7 + $0x378] sm:$0xff]  ;;  %9618 = vst [vmem:[#allocation84_spill] sm:$0xff] %v7716_v38 }
 0x346   : > { %3165 = vmatpush.msra.mxu1 %v3132_v42  ;;  %v7701_v42 = vpop.f32.mrf.mxu3 }
 0x347   : > { %v1900_v51 = vmax.f32 %v1868_v21, 0.0  ;;  %2616 = vmatmul.f32.gmra.mxu0 %v7667_v45  ;;  %5834 = vmatmul.msk.f32.gmra.mxu2 %vm6874_vm9, %v7117_v43  ;;  %v7687_v43 = vsel %vm1936_vm8, 0.0, %v7373_v62  ;;  %9616 = vst [vmem:[#allocation82_spill] sm:$0xff] %v7701_v42 }
 0x348   : > { %2738 = vmatmul.f32.gmra.mxu1 %v7674_v54 }
 0x349   : > { %v7682_v35 = vrot.slane %v1900_v51, 7  ;;  %v2358_v51 = vld [vmem:[#allocation7 + $0x178] sm:$0xff] }
 0x34a   : > { %v1797_v21 = vpop.f32.mrf.mxu2  ;;  %3004 = vmatpush.msra.mxu0 %v2358_v51  ;;  %v7725_v51 = vsel %vm1936_vm8, %v7393_v30, 0.0 }
 0x34b   : > { %v1833_v54 = vadd.f32 %v1797_v21, %v1627_v33  ;;  %v7697_v1 = vsel %vm1936_vm8, %v7654_v50, %v7682_v35  ;;  %v2256_v33 = vrot.slane %v7687_v43, 2  ;;  %v7713_v21 = vsel %vm955_vm4, %v9471_v39, %v9470_v57 }
 0x34c   : > { %9615 = vst [vmem:[#allocation81_spill] sm:$0xff] %v7697_v1  ;;  %2542 = vmatmul.f32.gmra.mxu3 %v7697_v1  ;;  %v2572_v45 = vpop.f32.mrf.mxu0  ;;  %v1630_v57 = vadd.f32 %v7576_v7, %v7634_v8  ;;  %v2570_v8 = vadd.f32 %v2569_v6, %v7252_v61 }
 0x34d   : > { %v1869_v14 = vadd.f32 %v7241_v34, %v1833_v54  ;;  %v7705_v27 = vpop.f32.mrf.mxu1  ;;  %9617 = vst [vmem:[#allocation83_spill] sm:$0xff] %v7713_v21  ;;  %v7721_v54 = vsel %vm1068_vm5, %v2256_v33, %v2257_v23  ;;  %v2259_v21 = vrot.slane %v7725_v51, 2 }
 0x34e   : > { %9619 = vst [vmem:[#allocation85_spill] sm:$0xff] %v7721_v54  ;;  %v7734_v33 = vpop.f32.mrf.mxu3 }
 0x34f   : > { %v1901_v42 = vmax.f32 %v1869_v14, 0.0  ;;  %2619 = vmatmul.f32.gmra.mxu0 %v7716_v38  ;;  %2839 = vmatmul.f32.gmra.mxu2 %v7154_v58  ;;  %v2147_v14 = vrot.slane %v7353_v2, 1  ;;  %v3147_v58 = vld [vmem:[#allocation7 + $0x3f0] sm:$0xff]  ;;  %9621 = vst [vmem:[#allocation87_spill] sm:$0xff] %v7734_v33 }
 0x350   : > { %2741 = vmatmul.f32.gmra.mxu1 %v7721_v54  ;;  %v2146_v54 = vrot.slane %v7631_v12, 1  ;;  %3279 = vmatpush.msra.mxu2 %v3147_v58  ;;  %v7752_v58 = vsel %vm1068_vm5, %v2257_v23, %v2259_v21  ;;  %v2683_v12 = vadd.f32 %v7594_v60, %v2570_v8  ;;  %v2357_v21 = vld [vmem:[#allocation7 + $0x170] sm:$0xff] }
 0x351   : > { %v7730_v39 = vrot.slane %v1901_v42, 7  ;;  %9623 = vst [vmem:[#allocation89_spill] sm:$0xff] %v7752_v58  ;;  %3005 = vmatpush.msra.mxu0 %v2357_v21  ;;  %v7789_v21 = vsel %vm1936_vm8, %v7446_v59, 0.0 }
 0x352   : > { %v1800_v25 = vpop.f32.mrf.mxu2 }
 0x353   : > { %9620 = vst [vmem:[#allocation86_spill] sm:$0xff] %v7730_v39  ;;  %v1834_v63 = vadd.f32 %v1800_v25, %v1630_v57  ;;  %v3163_v57 = vld [vmem:[#allocation7 + $0x470] sm:$0xff]  ;;  %v7745_v25 = vsel %vm955_vm4, %v2146_v54, %v2147_v14  ;;  %v2149_v54 = vrot.slane %v7650_v4, 1  ;;  %v2573_v4 = vadd.f32 %v2572_v45, %v7279_v26 }
 0x354   : > { %5818 = vmatmul.msk.f32.gmra.mxu3 %vm6874_vm9, %v7730_v39  ;;  %v2575_v30 = vpop.f32.mrf.mxu0  ;;  %9622 = vst [vmem:[#allocation88_spill] sm:$0xff] %v7745_v25  ;;  %v9629_v45 = vrot.slane %v7679_v29, 1 }
 0x355   : > { %v1870_v7 = vadd.f32 %v7241_v34, %v1834_v63  ;;  %v7742_v42 = vpop.f32.mrf.mxu1  ;;  %3392 = vmatpush.msra.mxu3 %v3163_v57  ;;  %v3131_v34 = vld [vmem:[#allocation7 + $0x370] sm:$0xff]  ;;  %v7761_v63 = vsel %vm1936_vm8, 0.0, %v7424_v41  ;;  %v2686_v26 = vadd.f32 %v7613_v16, %v2573_v4  ;;  %v2151_v16 = vrot.slane %v7687_v43, 1  ;;  %v3130_v43 = vld [vmem:[#allocation7 + $0x368] sm:$0xff] }
 0x356   : > { %3166 = vmatpush.msra.mxu1 %v3131_v34  ;;  %v7771_v57 = vpop.f32.mrf.mxu3  ;;  %v2261_v34 = vrot.slane %v7761_v63, 2  ;;  %v2576_v4 = vadd.f32 %v2575_v30, %v7301_v46  ;;  %v9631_v30 = vrot.slane %v7692_v13, 1 }
 0x357   : > { %v1902_v38 = vmax.f32 %v1870_v7, 0.0  ;;  %2622 = vmatmul.f32.gmra.mxu0 %v7745_v25  ;;  %5836 = vmatmul.msk.f32.gmra.mxu2 %vm6874_vm9, %v7321_v53  ;;  %9626 = vst [vmem:[#allocation92_spill] sm:$0xff] %v7771_v57 }
 0x358   : > { %2744 = vmatmul.f32.gmra.mxu1 %v7752_v58  ;;  %v2689_v46 = vadd.f32 %v7637_v10, %v2576_v4 }
 0x359   : > { %v7755_v61 = vrot.slane %v1902_v38, 7  ;;  %v2262_v38 = vrot.slane %v7457_v56, 2  ;;  %3167 = vmatpush.msra.mxu1 %v3130_v43 }
 0x35a   : > { %v2795_v6 = vpop.f32.mrf.mxu2 }
 0x35b   : > { %v7763_v7 = vadd.f32 %v2795_v6, %v2683_v12  ;;  %v7768_v23 = vsel %vm1936_vm8, %v7730_v39, %v7755_v61  ;;  %v2102_v12 = vrot.slane %v7321_v53, 1  ;;  %v7780_v6 = vsel %vm955_vm4, %v2147_v14, %v2149_v54 }
 0x35c   : > { %9625 = vst [vmem:[#allocation91_spill] sm:$0xff] %v7768_v23  ;;  %2548 = vmatmul.f32.gmra.mxu3 %v7768_v23  ;;  %v2578_v60 = vpop.f32.mrf.mxu0  ;;  %v7785_v58 = vsel %vm1068_vm5, %v2261_v34, %v2262_v38  ;;  %v2264_v34 = vrot.slane %v7789_v21, 2 }
 0x35d   : > { %9624 = vst [vmem:[#allocation90_spill] sm:$0xff] %v7763_v7  ;;  %v7775_v8 = vpop.f32.mrf.mxu1  ;;  %v7796_v14 = vsel %vm955_vm4, %v9629_v45, %v2102_v12  ;;  %v3146_v7 = vld [vmem:[#allocation7 + $0x3e8] sm:$0xff]  ;;  %v2579_v10 = vadd.f32 %v2578_v60, %v7339_v36 }
 0x35e   : > { %9627 = vst [vmem:[#allocation93_spill] sm:$0xff] %v7780_v6  ;;  %v7802_v57 = vpop.f32.mrf.mxu3  ;;  %3280 = vmatpush.msra.mxu2 %v3146_v7  ;;  %v7824_v7 = vsel %vm955_vm4, %v2102_v12, %v9631_v30  ;;  %v7851_v30 = vsel %vm1936_vm8, %v7499_v17, 0.0 }
 0x35f   : > { %2625 = vmatmul.f32.gmra.mxu0 %v7780_v6  ;;  %2845 = vmatmul.f32.gmra.mxu2 %v7321_v53  ;;  %9628 = vst [vmem:[#allocation94_spill] sm:$0xff] %v7785_v58  ;;  %v2152_v6 = vrot.slane %v7406_v44, 1  ;;  %v2692_v36 = vadd.f32 %v7664_v5, %v2579_v10 }
 0x360   : > { %2747 = vmatmul.f32.gmra.mxu1 %v7785_v58  ;;  %v3162_v58 = vld [vmem:[#allocation7 + $0x468] sm:$0xff] }
 0x361   : > { %v7810_v33 = vsel %vm955_vm4, %v2151_v16, %v2152_v6  ;;  %3393 = vmatpush.msra.mxu3 %v3162_v58  ;;  %v2356_v16 = vld [vmem:[#allocation7 + $0x168] sm:$0xff] }
 0x362   : > { %v2798_v54 = vpop.f32.mrf.mxu2  ;;  %3006 = vmatpush.msra.mxu0 %v2356_v16  ;;  %v3145_v16 = vld [vmem:[#allocation7 + $0x3e0] sm:$0xff] }
 0x363   : > { %v7799_v25 = vadd.f32 %v2798_v54, %v2686_v26  ;;  %v7817_v26 = vsel %vm1068_vm5, %v2262_v38, %v2264_v34  ;;  %v2154_v54 = vrot.slane %v7725_v51, 1  ;;  %v2267_v34 = vrot.slane %v7508_v9, 2  ;;  %3281 = vmatpush.msra.mxu2 %v3145_v16 }
 0x364   : > { %v2581_v59 = vpop.f32.mrf.mxu0  ;;  %2907 = vmatmul.f32.vlgmr.msrb.gmra.mxu3 %v7796_v14  ;;  %9630 = vst [vmem:[#allocation95_spill] sm:$0xff] %v7817_v26 }
 0x365   : > { %v7807_v45 = vpop.f32.mrf.mxu1  ;;  %v7842_v43 = vsel %vm955_vm4, %v2152_v6, %v2154_v54  ;;  %v2269_v54 = vrot.slane %v7851_v30, 2  ;;  %v2582_v17 = vadd.f32 %v2581_v59, %v7371_v3  ;;  %v3128_v3 = vld [vmem:[#allocation7 + $0x358] sm:$0xff] }
 0x366   : > { %v7839_v51 = vpop.f32.mrf.mxu3  ;;  %9632 = vst [vmem:[#allocation96_spill] sm:$0xff] %v7842_v43 }
 0x367   : > { %2628 = vmatmul.f32.gmra.mxu0 %v7810_v33  ;;  %5838 = vmatmul.msk.f32.gmra.mxu2 %vm6874_vm9, %v7212_v24  ;;  %v7829_v24 = vsel %vm1936_vm8, 0.0, %v7477_v52  ;;  %v2695_v59 = vadd.f32 %v7705_v27, %v2582_v17 }
 0x368   : > { %2750 = vmatmul.f32.gmra.mxu1 %v7817_v26  ;;  %v2266_v4 = vrot.slane %v7829_v24, 2 }
 0x36a   : > { %v2801_v58 = vpop.f32.mrf.mxu2 }
 0x36b   : > { %v7831_v38 = vadd.f32 %v2801_v58, %v2689_v46  ;;  %v7847_v46 = vsel %vm1068_vm5, %v2266_v4, %v2267_v34  ;;  %v2157_v58 = vrot.slane %v7457_v56, 1  ;;  %v2156_v4 = vrot.slane %v7761_v63, 1  ;;  %v3129_v63 = vld [vmem:[#allocation7 + $0x360] sm:$0xff] }
 0x36c   : > { %v2584_v26 = vpop.f32.mrf.mxu0  ;;  %2910 = vmatmul.f32.gmra.mxu3 %v7824_v7  ;;  %9633 = vst [vmem:[#allocation97_spill] sm:$0xff] %v7847_v46  ;;  %3168 = vmatpush.msra.mxu1 %v3129_v63 }
 0x36d   : > { %v7836_v12 = vpop.f32.mrf.mxu1  ;;  %v7865_v5 = vsel %vm955_vm4, %v2156_v4, %v2157_v58  ;;  %v3127_v4 = vld [vmem:[#allocation7 + $0x350] sm:$0xff]  ;;  %v2585_v27 = vadd.f32 %v2584_v26, %v7401_v32  ;;  %v3125_v32 = vld [vmem:[#allocation7 + $0x340] sm:$0xff] }
 0x36e   : > { %v7874_v10 = vpop.f32.mrf.mxu3  ;;  %3169 = vmatpush.msra.mxu1 %v3128_v3 }
 0x36f   : > { %2631 = vmatmul.f32.gmra.mxu0 %v7842_v43  ;;  %2851 = vmatmul.f32.gmra.mxu2 %v7270_v22  ;;  %v2698_v26 = vadd.f32 %v7742_v42, %v2585_v27 }
 0x370   : > { %2753 = vmatmul.f32.gmra.mxu1 %v7847_v46  ;;  %v3161_v46 = vld [vmem:[#allocation7 + $0x460] sm:$0xff] }
 0x371   : > { %3394 = vmatpush.msra.mxu3 %v3161_v46  ;;  %v2159_v46 = vrot.slane %v7789_v21, 1  ;;  %3170 = vmatpush.msra.mxu1 %v3127_v4 }
 0x372   : > { %v2804_v60 = vpop.f32.mrf.mxu2 }
 0x373   : > { %v7856_v6 = vadd.f32 %v2804_v60, %v2692_v36  ;;  %v7881_v60 = vsel %vm1936_vm8, 0.0, %v7525_v11  ;;  %v7892_v63 = vsel %vm955_vm4, %v2157_v58, %v2159_v46  ;;  %v2162_v46 = vrot.slane %v7508_v9, 1 }
 0x374   : > { %v2587_v22 = vpop.f32.mrf.mxu0  ;;  %2913 = vmatmul.f32.gmra.mxu3 %v7283_v55  ;;  %v7872_v55 = vsel %vm1068_vm5, %v2267_v34, %v2269_v54  ;;  %v2272_v34 = vrot.slane %v7557_v0, 2  ;;  %v2355_v54 = vld [vmem:[#allocation7 + $0x160] sm:$0xff]  ;;  %v2271_v21 = vrot.slane %v7881_v60, 2 }
 0x375   : > { %v7862_v43 = vpop.f32.mrf.mxu1  ;;  %9634 = vst [vmem:[#allocation98_spill] sm:$0xff] %v7872_v55  ;;  %3007 = vmatpush.msra.mxu0 %v2355_v54  ;;  %v3124_v54 = vld [vmem:[#allocation7 + $0x338] sm:$0xff]  ;;  %v2588_v42 = vadd.f32 %v2587_v22, %v7432_v37  ;;  %v3122_v37 = vld [vmem:[#allocation7 + $0x328] sm:$0xff] }
 0x376   : > { %v7897_v3 = vsel %vm1068_vm5, %v2271_v21, %v2272_v34  ;;  %v7905_v58 = vpop.f32.mrf.mxu3 }
 0x377   : > { %2634 = vmatmul.f32.gmra.mxu0 %v7865_v5  ;;  %5840 = vmatmul.msk.f32.gmra.mxu2 %vm6874_vm9, %v7318_v47  ;;  %9635 = vst [vmem:[#allocation99_spill] sm:$0xff] %v7897_v3  ;;  %v2701_v22 = vadd.f32 %v7775_v8, %v2588_v42 }
 0x378   : > { %2756 = vmatmul.f32.gmra.mxu1 %v7872_v55  ;;  %v3144_v55 = vld [vmem:[#allocation7 + $0x3d8] sm:$0xff] }
 0x379   : > { %3282 = vmatpush.msra.mxu2 %v3144_v55 }
 0x37a   : > { %v2807_v36 = vpop.f32.mrf.mxu2 }
 0x37b   : > { %v7883_v16 = vadd.f32 %v2807_v36, %v2695_v59  ;;  %v3126_v59 = vld [vmem:[#allocation7 + $0x348] sm:$0xff] }
 0x37c   : > { %v2590_v47 = vpop.f32.mrf.mxu0  ;;  %2916 = vmatmul.f32.gmra.mxu3 %v7306_v40  ;;  %v7901_v40 = vsel %vm1936_vm8, %v7548_v20, 0.0  ;;  %3171 = vmatpush.msra.mxu1 %v3126_v59  ;;  %v3160_v59 = vld [vmem:[#allocation7 + $0x458] sm:$0xff] }
 0x37d   : > { %v7888_v17 = vpop.f32.mrf.mxu1  ;;  %v2274_v21 = vrot.slane %v7901_v40, 2  ;;  %3395 = vmatpush.msra.mxu3 %v3160_v59  ;;  %v2277_v59 = vrot.slane %v7697_v1, 2  ;;  %v2591_v8 = vadd.f32 %v2590_v47, %v7474_v19  ;;  %v3119_v47 = vld [vmem:[#allocation7 + $0x310] sm:$0xff] }
 0x37e   : > { %3172 = vmatpush.msra.mxu1 %v3125_v32  ;;  %v7931_v32 = vsel %vm1936_vm8, 0.0, %v7654_v50 }
 0x37f   : > { %2637 = vmatmul.f32.gmra.mxu0 %v7892_v63  ;;  %2857 = vmatmul.f32.gmra.mxu2 %v7353_v2  ;;  %v2276_v42 = vrot.slane %v7931_v32, 2  ;;  %v2704_v19 = vadd.f32 %v7807_v45, %v2591_v8 }
 0x380   : > { %2759 = vmatmul.f32.gmra.mxu1 %v7897_v3  ;;  %v2161_v3 = vrot.slane %v7829_v24, 1  ;;  %v7924_v24 = vsel %vm1068_vm5, %v2272_v34, %v2274_v21  ;;  %v2354_v34 = vld [vmem:[#allocation7 + $0x158] sm:$0xff]  ;;  %v7936_v21 = vpop.f32.mrf.mxu3 }
 0x381   : > { %3173 = vmatpush.msra.mxu1 %v3124_v54  ;;  %9637 = vst [vmem:[#allocation101_spill] sm:$0xff] %v7924_v24  ;;  %3008 = vmatpush.msra.mxu0 %v2354_v34 }
 0x382   : > { %v2810_v36 = vpop.f32.mrf.mxu2  ;;  %v7917_v2 = vsel %vm955_vm4, %v2161_v3, %v2162_v46  ;;  %v2164_v3 = vrot.slane %v7851_v30, 1 }
 0x383   : > { %v7908_v4 = vadd.f32 %v2810_v36, %v2698_v26  ;;  %9636 = vst [vmem:[#allocation100_spill] sm:$0xff] %v7917_v2  ;;  %v3123_v26 = vld [vmem:[#allocation7 + $0x330] sm:$0xff]  ;;  %v3121_v36 = vld [vmem:[#allocation7 + $0x320] sm:$0xff] }
 0x384   : > { %v2593_v20 = vpop.f32.mrf.mxu0  ;;  %2919 = vmatmul.f32.gmra.mxu3 %v7330_v49  ;;  %3174 = vmatpush.msra.mxu1 %v3123_v26  ;;  %v7944_v26 = vsel %vm955_vm4, %v2162_v46, %v2164_v3  ;;  %v2167_v3 = vrot.slane %v7557_v0, 1 }
 0x385   : > { %v7914_v27 = vpop.f32.mrf.mxu1  ;;  %9638 = vst [vmem:[#allocation102_spill] sm:$0xff] %v7944_v26  ;;  %v2594_v45 = vadd.f32 %v2593_v20, %v7497_v48 }
 0x386   : > { %3175 = vmatpush.msra.mxu1 %v3122_v37  ;;  %v7949_v37 = vsel %vm1068_vm5, %v2276_v42, %v2277_v59  ;;  %v2353_v42 = vld [vmem:[#allocation7 + $0x150] sm:$0xff] }
 0x387   : > { %2640 = vmatmul.f32.gmra.mxu0 %v7917_v2  ;;  %5842 = vmatmul.msk.f32.gmra.mxu2 %vm6874_vm9, %v7373_v62  ;;  %9639 = vst [vmem:[#allocation103_spill] sm:$0xff] %v7949_v37  ;;  %v3143_v62 = vld [vmem:[#allocation7 + $0x3d0] sm:$0xff]  ;;  %v3117_v2 = vld [vmem:[#allocation7 + $0x300] sm:$0xff] }
 0x388   : > { %2762 = vmatmul.f32.gmra.mxu1 %v7924_v24  ;;  %3009 = vmatpush.msra.mxu0 %v2353_v42  ;;  %v7983_v42 = vsel %vm1936_vm8, 0.0, %v7730_v39  ;;  %v3142_v39 = vld [vmem:[#allocation7 + $0x3c8] sm:$0xff] }
 0x389   : > { %3176 = vmatpush.msra.mxu1 %v3121_v36  ;;  %v3118_v36 = vld [vmem:[#allocation7 + $0x308] sm:$0xff]  ;;  %3283 = vmatpush.msra.mxu2 %v3143_v62  ;;  %v2350_v62 = vld [vmem:[#allocation7 + $0x138] sm:$0xff] }
 0x38a   : > { %v2813_v55 = vpop.f32.mrf.mxu2 }
 0x38b   : > { %v7933_v54 = vadd.f32 %v2813_v55, %v2701_v22  ;;  %v3120_v22 = vld [vmem:[#allocation7 + $0x318] sm:$0xff]  ;;  %v7953_v55 = vsel %vm1936_vm8, %v7682_v35, 0.0  ;;  %v2166_v35 = vrot.slane %v7881_v60, 1  ;;  %v2707_v60 = vadd.f32 %v7836_v12, %v2594_v45  ;;  %v2348_v45 = vld [vmem:[#allocation7 + $0x128] sm:$0xff]  ;;  %3284 = vmatpush.msra.mxu2 %v3142_v39 }
 0x38c   : > { %v2596_v24 = vpop.f32.mrf.mxu0  ;;  %2922 = vmatmul.f32.gmra.mxu3 %v7359_v28  ;;  %3177 = vmatpush.msra.mxu1 %v3120_v22  ;;  %v2352_v22 = vld [vmem:[#allocation7 + $0x148] sm:$0xff]  ;;  %v3140_v39 = vld [vmem:[#allocation7 + $0x3b8] sm:$0xff] }
 0x38d   : > { %v7940_v30 = vpop.f32.mrf.mxu1  ;;  %3010 = vmatpush.msra.mxu0 %v2352_v22  ;;  %v2597_v12 = vadd.f32 %v2596_v24, %v7528_v15  ;;  %v8003_v15 = vsel %vm1936_vm8, %v7755_v61, 0.0  ;;  %v9644_v61 = vld [vmem:[#allocation48_spill] sm:$0xff] }
 0x38e   : > { %3178 = vmatpush.msra.mxu1 %v3119_v47  ;;  %v7969_v47 = vsel %vm955_vm4, %v2166_v35, %v2167_v3 }
 0x38f   : > { %2643 = vmatmul.f32.gmra.mxu0 %v7944_v26  ;;  %2863 = vmatmul.f32.gmra.mxu2 %v7406_v44  ;;  %v2279_v44 = vrot.slane %v7953_v55, 2 }
 0x390   : > { %2765 = vmatmul.f32.gmra.mxu1 %v7949_v37  ;;  %v7966_v37 = vpop.f32.mrf.mxu3 }
 0x391   : > { %3179 = vmatpush.msra.mxu1 %v3118_v36  ;;  %v7976_v48 = vsel %vm1068_vm5, %v2277_v59, %v2279_v44  ;;  %v2169_v36 = vrot.slane %v7901_v40, 1  ;;  %v2383_v44 = vrot.slane %v7768_v23, 2  ;;  %v2349_v59 = vld [vmem:[#allocation7 + $0x130] sm:$0xff]  ;;  %v2382_v40 = vrot.slane %v7983_v42, 2 }
 0x392   : > { %v2816_v46 = vpop.f32.mrf.mxu2  ;;  %9640 = vst [vmem:[#allocation104_spill] sm:$0xff] %v7976_v48 }
 0x393   : > { %v7958_v34 = vadd.f32 %v2816_v46, %v2704_v19  ;;  %v3159_v19 = vld [vmem:[#allocation7 + $0x450] sm:$0xff]  ;;  %v2351_v46 = vld [vmem:[#allocation7 + $0x140] sm:$0xff]  ;;  %3180 = vmatpush.msra.mxu1 %v3117_v2 }
 0x394   : > { %v2599_v26 = vpop.f32.mrf.mxu0  ;;  %2925 = vmatmul.f32.gmra.mxu3 %v7383_v18  ;;  %3011 = vmatpush.msra.mxu0 %v2351_v46  ;;  %v2347_v46 = vld [vmem:[#allocation7 + $0x120] sm:$0xff] }
 0x395   : > { %v7964_v8 = vpop.f32.mrf.mxu1  ;;  %3396 = vmatpush.msra.mxu3 %v3159_v19  ;;  %v9641_v19 = vld [vmem:[#allocation45_spill] sm:$0xff] }
 0x396   : > { %3012 = vmatpush.msra.mxu0 %v2350_v62  ;;  %v7999_v62 = vsel %vm1068_vm5, %v2382_v40, %v2383_v44  ;;  %v2385_v40 = vrot.slane %v8003_v15, 2 }
 0x397   : > { %2646 = vmatmul.f32.gmra.mxu0 %v7969_v47  ;;  %5844 = vmatmul.msk.f32.gmra.mxu2 %vm6874_vm9, %v7424_v41  ;;  %9643 = vst [vmem:[#allocation105_spill] sm:$0xff] %v7999_v62  ;;  %v2171_v41 = vrot.slane %v7931_v32, 1 }
 0x398   : > { %2768 = vmatmul.f32.gmra.mxu1 %v7976_v48  ;;  %3013 = vmatpush.msra.mxu0 %v2349_v59  ;;  %v7994_v48 = vsel %vm955_vm4, %v2167_v3, %v2169_v36  ;;  %v8005_v24 = vpop.f32.mrf.mxu3  ;;  %v2710_v3 = vadd.f32 %v7862_v43, %v2597_v12  ;;  %v2172_v36 = vrot.slane %v7697_v1, 1  ;;  %v2344_v43 = vld [vmem:[#allocation7 + $0x108] sm:$0xff]  ;;  %v8026_v32 = vsel %vm1068_vm5, %v2383_v44, %v2385_v40  ;;  %v9649_v44 = vld [vmem:[#allocation68_spill] sm:$0xff] }
 0x399   : > { %9642 = vst [vmem:[#allocation45_spill] sm:$0xff] %v7994_v48  ;;  %v3158_v12 = vld [vmem:[#allocation7 + $0x448] sm:$0xff] }
 0x39a   : > { %v2819_v20 = vpop.f32.mrf.mxu2  ;;  %3014 = vmatpush.msra.mxu0 %v2348_v45  ;;  %v2345_v45 = vld [vmem:[#allocation7 + $0x110] sm:$0xff]  ;;  %3397 = vmatpush.msra.mxu3 %v3158_v12 }
 0x39b   : > { %v7985_v35 = vadd.f32 %v2819_v20, %v2707_v60  ;;  %v2346_v60 = vld [vmem:[#allocation7 + $0x118] sm:$0xff]  ;;  %v3139_v12 = vld [vmem:[#allocation7 + $0x3b0] sm:$0xff] }
 0x39c   : > { %v2602_v22 = vpop.f32.mrf.mxu0  ;;  %2928 = vmatmul.f32.gmra.mxu3 %v9641_v19  ;;  %3015 = vmatpush.msra.mxu0 %v2347_v46 }
 0x39d   : > { %v7990_v2 = vpop.f32.mrf.mxu1  ;;  %v2603_v40 = vadd.f32 %v2602_v22, %v9649_v44 }
 0x39e   : > { %3016 = vmatpush.msra.mxu0 %v2346_v60  ;;  %v8019_v60 = vsel %vm955_vm4, %v2171_v41, %v2172_v36 }
 0x39f   : > { %2649 = vmatmul.f32.gmra.mxu0 %v7994_v48  ;;  %2869 = vmatmul.f32.gmra.mxu2 %v7457_v56  ;;  %9646 = vst [vmem:[#allocation48_spill] sm:$0xff] %v8019_v60 }
 0x3a0   : > { %2771 = vmatmul.f32.gmra.mxu1 %v7999_v62  ;;  %3017 = vmatpush.msra.mxu0 %v2345_v45  ;;  %v9645_v62 = vld [vmem:[#allocation63_spill] sm:$0xff]  ;;  %v2174_v45 = vrot.slane %v7953_v55, 1  ;;  %v9520_v55 = vrot.slane %v7692_v13, 2 }
 0x3a1   : > { %v2600_v46 = vadd.f32 %v2599_v26, %v9645_v62  ;;  %9647 = vst [vmem:[#allocation63_spill] sm:$0xff] %v8026_v32  ;;  %v8030_v26 = vpop.f32.mrf.mxu3 }
 0x3a2   : > { %v2822_v20 = vpop.f32.mrf.mxu2  ;;  %3018 = vmatpush.msra.mxu0 %v2344_v43 }
 0x3a3   : > { %v8010_v59 = vadd.f32 %v2822_v20, %v2710_v3  ;;  %v2343_v3 = vld [vmem:[#allocation7 + $0x100] sm:$0xff]  ;;  %v2713_v41 = vadd.f32 %v7888_v17, %v2600_v46  ;;  %v2206_v17 = vrot.slane %v7679_v29, 2  ;;  %v8041_v46 = vsel %vm955_vm4, %v2172_v36, %v2174_v45  ;;  %v3136_v36 = vld [vmem:[#allocation7 + $0x398] sm:$0xff] }
 0x3a4   : > { %v2605_v56 = vpop.f32.mrf.mxu0  ;;  %2931 = vmatmul.f32.gmra.mxu3 %v9644_v61  ;;  %v3141_v20 = vld [vmem:[#allocation7 + $0x3c0] sm:$0xff]  ;;  %3019 = vmatpush.msra.mxu0 %v2343_v3  ;;  %v3138_v3 = vld [vmem:[#allocation7 + $0x3a8] sm:$0xff]  ;;  %v2716_v29 = vadd.f32 %v7914_v27, %v2603_v40 }
 0x3a5   : > { %v8016_v48 = vpop.f32.mrf.mxu1  ;;  %3285 = vmatpush.msra.mxu2 %v3141_v20  ;;  %v3137_v20 = vld [vmem:[#allocation7 + $0x3a0] sm:$0xff]  ;;  %v8052_v22 = vsel %vm1068_vm5, %v2206_v17, %v9520_v55  ;;  %v9654_v55 = vld [vmem:[#allocation71_spill] sm:$0xff] }
 0x3a6   : > { %9652 = vst [vmem:[#allocation68_spill] sm:$0xff] %v8052_v22  ;;  %v2606_v22 = vadd.f32 %v2605_v56, %v9654_v55  ;;  %v3157_v27 = vld [vmem:[#allocation7 + $0x440] sm:$0xff] }
 0x3a7   : > { %2652 = vmatmul.f32.gmra.mxu0 %v8019_v60  ;;  %5846 = vmatmul.msk.f32.gmra.mxu2 %vm6874_vm9, %v7477_v52  ;;  %v9648_v60 = vld [vmem:[#allocation51_spill] sm:$0xff] }
 0x3a8   : > { %2774 = vmatmul.f32.gmra.mxu1 %v8026_v32  ;;  %3286 = vmatpush.msra.mxu2 %v3140_v39  ;;  %9650 = vst [vmem:[#allocation51_spill] sm:$0xff] %v8041_v46  ;;  %v9651_v39 = vld [vmem:[#allocation19_spill] sm:$0xff]  ;;  %v2719_v56 = vadd.f32 %v7940_v30, %v2606_v22 }
 0x3a9   : > { %v8058_v44 = vpop.f32.mrf.mxu3  ;;  %3398 = vmatpush.msra.mxu3 %v3157_v27 }
 0x3aa   : > { %v2825_v62 = vpop.f32.mrf.mxu2  ;;  %3287 = vmatpush.msra.mxu2 %v3139_v12  ;;  %v3135_v12 = vld [vmem:[#allocation7 + $0x390] sm:$0xff] }
 0x3ab   : > { %v8033_v43 = vadd.f32 %v2825_v62, %v2713_v41  ;;  %v2369_v62 = vrot.slane %v7768_v23, 1 }
 0x3ac   : > { %v2608_v52 = vpop.f32.mrf.mxu0  ;;  %2934 = vmatmul.f32.gmra.mxu3 %v9648_v60  ;;  %3288 = vmatpush.msra.mxu2 %v3138_v3  ;;  %v2368_v3 = vrot.slane %v7983_v42, 1  ;;  %v9656_v42 = vld [vmem:[#allocation20_spill] sm:$0xff] }
 0x3ad   : > { %v8037_v32 = vpop.f32.mrf.mxu1 }
 0x3ae   : > { %3289 = vmatpush.msra.mxu2 %v3137_v20  ;;  %v8066_v23 = vsel %vm955_vm4, %v2368_v3, %v2369_v62  ;;  %v3133_v20 = vld [vmem:[#allocation7 + $0x380] sm:$0xff] }
 0x3af   : > { %2655 = vmatmul.f32.gmra.mxu0 %v8041_v46  ;;  %2875 = vmatmul.f32.gmra.mxu2 %v7508_v9  ;;  %v3134_v46 = vld [vmem:[#allocation7 + $0x388] sm:$0xff]  ;;  %9655 = vst [vmem:[#allocation19_spill] sm:$0xff] %v8066_v23  ;;  %v9659_v3 = vld [vmem:[#allocation74_spill] sm:$0xff] }
 0x3b0   : > { %5852 = vmatmul.msk.f32.vlgmr.msra.gmra.mxu1 %vm6874_vm9, %v9651_v39  ;;  %v9653_v39 = vld [vmem:[#allocation54_spill] sm:$0xff]  ;;  %3290 = vmatpush.msra.mxu2 %v3136_v36  ;;  %v2609_v27 = vadd.f32 %v2608_v52, %v9659_v3  ;;  %v3156_v3 = vld [vmem:[#allocation7 + $0x438] sm:$0xff] }
 0x3b1   : > { %3399 = vmatpush.msra.mxu3 %v3156_v3 }
 0x3b2   : > { %v2828_v41 = vpop.f32.mrf.mxu2  ;;  %3291 = vmatpush.msra.mxu2 %v3135_v12  ;;  %v9658_v12 = vld [vmem:[#allocation57_spill] sm:$0xff]  ;;  %v2722_v22 = vadd.f32 %v7964_v8, %v2609_v27  ;;  %v9665_v8 = vld [vmem:[#allocation22_spill] sm:$0xff] }
 0x3b3   : > { %v8056_v45 = vadd.f32 %v2828_v41, %v2716_v29  ;;  %v2371_v29 = vrot.slane %v8003_v15, 1  ;;  %v9661_v15 = vld [vmem:[#allocation21_spill] sm:$0xff] }
 0x3b4   : > { %v2611_v9 = vpop.f32.mrf.mxu0  ;;  %2937 = vmatmul.f32.gmra.mxu3 %v9653_v39  ;;  %3292 = vmatpush.msra.mxu2 %v3134_v46  ;;  %v2207_v46 = vrot.slane %v7321_v53, 2 }
 0x3b5   : > { %v8063_v40 = vpop.f32.mrf.mxu1 }
 0x3b6   : > { %3293 = vmatpush.msra.mxu2 %v3133_v20 }
 0x3b7   : > { %2658 = vmatmul.f32.gmra.mxu0 %v8066_v23  ;;  %5848 = vmatmul.msk.f32.gmra.mxu2 %vm6874_vm9, %v7525_v11  ;;  %v8079_v23 = vpop.f32.mrf.mxu3  ;;  %v8082_v11 = vsel %vm955_vm4, %v2369_v62, %v2371_v29  ;;  %v9663_v62 = vld [vmem:[#allocation60_spill] sm:$0xff] }
 0x3b8   : > { %3184 = vmatmul.f32.gmra.mxu1 %v9656_v42  ;;  %9660 = vst [vmem:[#allocation71_spill] sm:$0xff] %v8082_v11 }
 0x3ba   : > { %v2831_v55 = vpop.f32.mrf.mxu2 }
 0x3bb   : > { %v8075_v36 = vadd.f32 %v2831_v55, %v2719_v56  ;;  %v8097_v56 = vsel %vm1068_vm5, %v2206_v17, %v2207_v46  ;;  %v9664_v55 = vld [vmem:[#allocation78_spill] sm:$0xff] }
 0x3bc   : > { %v2614_v41 = vpop.f32.mrf.mxu0  ;;  %2940 = vmatmul.f32.gmra.mxu3 %v9658_v12  ;;  %v2612_v29 = vadd.f32 %v2611_v9, %v9664_v55  ;;  %v9667_v9 = vld [vmem:[#allocation64_spill] sm:$0xff]  ;;  %v9668_v55 = vrot.slane %v7692_v13, 2 }
 0x3bd   : > { %9657 = vst [vmem:[#allocation54_spill] sm:$0xff] %v8075_v36  ;;  %v8086_v30 = vpop.f32.mrf.mxu1  ;;  %v9679_v36 = vld [vmem:[#allocation34_spill] sm:$0xff] }
 0x3be   : > { %v2725_v27 = vadd.f32 %v7990_v2, %v2612_v29  ;;  %v8114_v3 = vsel %vm1068_vm5, %v2207_v46, %v9668_v55  ;;  %v9671_v2 = vld [vmem:[#allocation23_spill] sm:$0xff]  ;;  %v3155_v55 = vld [vmem:[#allocation7 + $0x430] sm:$0xff] }
 0x3bf   : > { %2661 = vmatmul.f32.gmra.mxu0 %v8082_v11  ;;  %2881 = vmatmul.f32.gmra.mxu2 %v7557_v0  ;;  %9669 = vst [vmem:[#allocation74_spill] sm:$0xff] %v8114_v3  ;;  %v9670_v0 = vld [vmem:[#allocation82_spill] sm:$0xff] }
 0x3c0   : > { %5854 = vmatmul.msk.f32.gmra.mxu1 %vm6874_vm9, %v9661_v15  ;;  %3400 = vmatpush.msra.mxu3 %v3155_v55 }
 0x3c2   : > { %v2834_v52 = vpop.f32.mrf.mxu2 }
 0x3c3   : > { %v8093_v20 = vadd.f32 %v2834_v52, %v2722_v22 }
 0x3c4   : > { %v2617_v42 = vpop.f32.mrf.mxu0  ;;  %2943 = vmatmul.f32.gmra.mxu3 %v9663_v62 }
 0x3c5   : > { %9662 = vst [vmem:[#allocation20_spill] sm:$0xff] %v8093_v20  ;;  %v2739_v15 = vpop.f32.mrf.mxu1 }
 0x3c6   : > { %v8100_v11 = vpop.f32.mrf.mxu3 }
 0x3c7   : > { %5850 = vmatmul.msk.f32.gmra.mxu2 %vm6874_vm9, %v7654_v50  ;;  %3020 = vmatmul.f32.vlgmr.msra.gmra.mxu0 %v8097_v56  ;;  %v2615_v50 = vadd.f32 %v2614_v41, %v9670_v0  ;;  %v9674_v0 = vld [vmem:[#allocation87_spill] sm:$0xff] }
 0x3c8   : > { %3190 = vmatmul.f32.gmra.mxu1 %v9665_v8  ;;  %v2618_v41 = vadd.f32 %v2617_v42, %v9674_v0 }
 0x3c9   : > { %v2728_v29 = vadd.f32 %v8016_v48, %v2615_v50 }
 0x3ca   : > { %v2837_v22 = vpop.f32.mrf.mxu2  ;;  %v2731_v50 = vadd.f32 %v8037_v32, %v2618_v41 }
 0x3cb   : > { %v8108_v17 = vadd.f32 %v2837_v22, %v2725_v27  ;;  %v9673_v22 = vld [vmem:[#allocation66_spill] sm:$0xff] }
 0x3cc   : > { %v2620_v52 = vpop.f32.mrf.mxu0  ;;  %2946 = vmatmul.f32.gmra.mxu3 %v9667_v9 }
 0x3cd   : > { %9666 = vst [vmem:[#allocation57_spill] sm:$0xff] %v8108_v17  ;;  %v2742_v13 = vpop.f32.mrf.mxu1  ;;  %v9675_v17 = vld [vmem:[#allocation33_spill] sm:$0xff] }
 0x3cf   : > { %v8117_v20 = vpop.f32.mrf.mxu3  ;;  %2887 = vmatmul.f32.gmra.mxu2 %v7697_v1  ;;  %3023 = vmatmul.f32.gmra.mxu0 %v8114_v3  ;;  %v9678_v3 = vld [vmem:[#allocation92_spill] sm:$0xff] }
 0x3d0   : > { %5856 = vmatmul.msk.f32.gmra.mxu1 %vm6874_vm9, %v9671_v2  ;;  %v9676_v2 = vld [vmem:[#allocation24_spill] sm:$0xff]  ;;  %v2621_v42 = vadd.f32 %v2620_v52, %v9678_v3  ;;  %v3154_v3 = vld [vmem:[#allocation7 + $0x428] sm:$0xff] }
 0x3d1   : > { %3401 = vmatpush.msra.mxu3 %v3154_v3  ;;  %v9686_v3 = vld [vmem:[#allocation36_spill] sm:$0xff] }
 0x3d2   : > { %v2840_v8 = vpop.f32.mrf.mxu2  ;;  %v2734_v32 = vadd.f32 %v8063_v40, %v2621_v42  ;;  %v9685_v40 = vld [vmem:[#allocation26_spill] sm:$0xff] }
 0x3d3   : > { %v8125_v27 = vadd.f32 %v2840_v8, %v2728_v29 }
 0x3d4   : > { %v2623_v46 = vpop.f32.mrf.mxu0  ;;  %2949 = vmatmul.f32.gmra.mxu3 %v9673_v22 }
 0x3d5   : > { %9672 = vst [vmem:[#allocation21_spill] sm:$0xff] %v8125_v27  ;;  %v9677_v27 = vld [vmem:[#allocation69_spill] sm:$0xff]  ;;  %v2745_v0 = vpop.f32.mrf.mxu1  ;;  %v2624_v52 = vadd.f32 %v2623_v46, %v7802_v57 }
 0x3d7   : > { %v8129_v1 = vpop.f32.mrf.mxu3  ;;  %3026 = vmatmul.f32.gmra.mxu0 %v9675_v17  ;;  %3294 = vmatmul.f32.vlgmr.msra.gmra.mxu2 %v7330_v49  ;;  %v9680_v49 = vld [vmem:[#allocation25_spill] sm:$0xff]  ;;  %v2737_v42 = vadd.f32 %v8086_v30, %v2624_v52 }
 0x3d8   : > { %3196 = vmatmul.f32.gmra.mxu1 %v9676_v2 }
 0x3da   : > { %v2843_v48 = vpop.f32.mrf.mxu2 }
 0x3db   : > { %v8135_v29 = vadd.f32 %v2843_v48, %v2731_v50  ;;  %v9683_v48 = vld [vmem:[#allocation90_spill] sm:$0xff] }
 0x3dc   : > { %v2626_v8 = vpop.f32.mrf.mxu0  ;;  %2952 = vmatmul.f32.gmra.mxu3 %v9677_v27 }
 0x3dd   : > { %v2627_v57 = vadd.f32 %v2626_v8, %v7839_v51  ;;  %v3153_v8 = vld [vmem:[#allocation7 + $0x420] sm:$0xff] }
 0x3de   : > { %3402 = vmatpush.msra.mxu3 %v3153_v8  ;;  %v9692_v8 = vld [vmem:[#allocation39_spill] sm:$0xff] }
 0x3df   : > { %v8139_v55 = vpop.f32.mrf.mxu3  ;;  %3029 = vmatmul.f32.gmra.mxu0 %v9679_v36  ;;  %3297 = vmatmul.f32.gmra.mxu2 %v7359_v28  ;;  %v9682_v36 = vld [vmem:[#allocation35_spill] sm:$0xff]  ;;  %v2748_v28 = vpop.f32.mrf.mxu1  ;;  %v2740_v30 = vadd.f32 %v2739_v15, %v2627_v57  ;;  %v9690_v15 = vld [vmem:[#allocation28_spill] sm:$0xff] }
 0x3e0   : > { %5858 = vmatmul.msk.f32.gmra.mxu1 %vm6874_vm9, %v9680_v49 }
 0x3e2   : > { %v2846_v17 = vpop.f32.mrf.mxu2 }
 0x3e3   : > { %v8147_v41 = vadd.f32 %v2846_v17, %v2734_v32 }
 0x3e4   : > { %v2629_v2 = vpop.f32.mrf.mxu0  ;;  %2955 = vmatmul.f32.gmra.mxu3 %v7796_v14 }
 0x3e5   : > { %9681 = vst [vmem:[#allocation60_spill] sm:$0xff] %v8147_v41  ;;  %v2630_v51 = vadd.f32 %v2629_v2, %v7874_v10 }
 0x3e7   : > { %v2908_v50 = vpop.f32.mrf.mxu3  ;;  %3032 = vmatmul.f32.gmra.mxu0 %v9682_v36  ;;  %3300 = vmatmul.f32.gmra.mxu2 %v7383_v18  ;;  %v2751_v52 = vpop.f32.mrf.mxu1  ;;  %v2743_v57 = vadd.f32 %v2742_v13, %v2630_v51 }
 0x3e8   : > { %v8154_v49 = vadd.f32 %v2908_v50, %v9683_v48  ;;  %3202 = vmatmul.f32.gmra.mxu1 %v9685_v40  ;;  %v9687_v50 = vld [vmem:[#allocation27_spill] sm:$0xff] }
 0x3ea   : > { %9684 = vst [vmem:[#allocation78_spill] sm:$0xff] %v8154_v49  ;;  %v2849_v32 = vpop.f32.mrf.mxu2  ;;  %v9689_v49 = vld [vmem:[#allocation37_spill] sm:$0xff] }
 0x3eb   : > { %v8158_v17 = vadd.f32 %v2849_v32, %v2737_v42  ;;  %v9688_v32 = vld [vmem:[#allocation79_spill] sm:$0xff] }
 0x3ec   : > { %v2632_v41 = vpop.f32.mrf.mxu0  ;;  %2958 = vmatmul.f32.gmra.mxu3 %v7824_v7 }
 0x3ed   : > { %v2633_v10 = vadd.f32 %v2632_v41, %v7905_v58  ;;  %v3152_v41 = vld [vmem:[#allocation7 + $0x418] sm:$0xff] }
 0x3ee   : > { %3403 = vmatpush.msra.mxu3 %v3152_v41  ;;  %v9698_v41 = vld [vmem:[#allocation43_spill] sm:$0xff] }
 0x3ef   : > { %v2911_v46 = vpop.f32.mrf.mxu3  ;;  %3035 = vmatmul.f32.gmra.mxu0 %v9686_v3  ;;  %3303 = vmatmul.f32.gmra.mxu2 %v9641_v19  ;;  %v2746_v13 = vadd.f32 %v2745_v0, %v2633_v10  ;;  %v9696_v0 = vld [vmem:[#allocation30_spill] sm:$0xff] }
 0x3f0   : > { %v8165_v18 = vadd.f32 %v2911_v46, %v7799_v25  ;;  %5860 = vmatmul.msk.f32.gmra.mxu1 %vm6874_vm9, %v9687_v50 }
 0x3f2   : > { %v2852_v48 = vpop.f32.mrf.mxu2 }
 0x3f3   : > { %v8170_v40 = vadd.f32 %v2852_v48, %v2740_v30  ;;  %v2754_v30 = vpop.f32.mrf.mxu1 }
 0x3f4   : > { %v2635_v42 = vpop.f32.mrf.mxu0  ;;  %2961 = vmatmul.f32.gmra.mxu3 %v9688_v32  ;;  %v9691_v32 = vld [vmem:[#allocation84_spill] sm:$0xff] }
 0x3f5   : > { %v2636_v58 = vadd.f32 %v2635_v42, %v7936_v21 }
 0x3f7   : > { %v2914_v19 = vpop.f32.mrf.mxu3  ;;  %3038 = vmatmul.f32.gmra.mxu0 %v9689_v49  ;;  %3306 = vmatmul.f32.gmra.mxu2 %v9644_v61  ;;  %v9693_v61 = vld [vmem:[#allocation29_spill] sm:$0xff]  ;;  %v2749_v10 = vadd.f32 %v2748_v28, %v2636_v58 }
 0x3f8   : > { %v8177_v25 = vadd.f32 %v2914_v19, %v7831_v38  ;;  %3208 = vmatmul.f32.gmra.mxu1 %v9690_v15 }
 0x3fa   : > { %v2855_v46 = vpop.f32.mrf.mxu2 }
 0x3fb   : > { %v8180_v50 = vadd.f32 %v2855_v46, %v2743_v57  ;;  %v9694_v57 = vld [vmem:[#allocation88_spill] sm:$0xff]  ;;  %v2757_v46 = vpop.f32.mrf.mxu1 }
 0x3fc   : > { %v2638_v48 = vpop.f32.mrf.mxu0  ;;  %2964 = vmatmul.f32.gmra.mxu3 %v9691_v32  ;;  %v9695_v32 = vld [vmem:[#allocation41_spill] sm:$0xff] }
 0x3fd   : > { %v2639_v21 = vadd.f32 %v2638_v48, %v7966_v37  ;;  %v3151_v48 = vld [vmem:[#allocation7 + $0x410] sm:$0xff] }
 0x3fe   : > { %3404 = vmatpush.msra.mxu3 %v3151_v48  ;;  %v9703_v48 = vld [vmem:[#allocation49_spill] sm:$0xff] }
 0x3ff   : > { %v2917_v2 = vpop.f32.mrf.mxu3  ;;  %3041 = vmatmul.f32.gmra.mxu0 %v9692_v8  ;;  %3309 = vmatmul.f32.gmra.mxu2 %v9648_v60  ;;  %v2752_v28 = vadd.f32 %v2751_v52, %v2639_v21 }
 0x400   : > { %v8187_v38 = vadd.f32 %v2917_v2, %v7856_v6  ;;  %5862 = vmatmul.msk.f32.gmra.mxu1 %vm6874_vm9, %v9693_v61 }
 0x402   : > { %v2858_v51 = vpop.f32.mrf.mxu2 }
 0x403   : > { %v8192_v19 = vadd.f32 %v2858_v51, %v2746_v13  ;;  %v9697_v13 = vld [vmem:[#allocation93_spill] sm:$0xff] }
 0x404   : > { %v2641_v15 = vpop.f32.mrf.mxu0  ;;  %2967 = vmatmul.f32.gmra.mxu3 %v9694_v57 }
 0x405   : > { %v2642_v37 = vadd.f32 %v2641_v15, %v8005_v24 }
 0x407   : > { %v2920_v60 = vpop.f32.mrf.mxu3  ;;  %3044 = vmatmul.f32.gmra.mxu0 %v9695_v32  ;;  %3312 = vmatmul.f32.gmra.mxu2 %v9653_v39  ;;  %v2760_v39 = vpop.f32.mrf.mxu1  ;;  %v2755_v52 = vadd.f32 %v2754_v30, %v2642_v37 }
 0x408   : > { %v8199_v6 = vadd.f32 %v2920_v60, %v7883_v16  ;;  %3214 = vmatmul.f32.gmra.mxu1 %v9696_v0  ;;  %v9699_v60 = vld [vmem:[#allocation31_spill] sm:$0xff] }
 0x40a   : > { %v2861_v2 = vpop.f32.mrf.mxu2 }
 0x40b   : > { %v8202_v61 = vadd.f32 %v2861_v2, %v2749_v10 }
 0x40c   : > { %2970 = vmatmul.f32.gmra.mxu3 %v9697_v13  ;;  %v2644_v42 = vpop.f32.mrf.mxu0 }
 0x40d   : > { %v2645_v24 = vadd.f32 %v2644_v42, %v8030_v26  ;;  %v3150_v42 = vld [vmem:[#allocation7 + $0x408] sm:$0xff] }
 0x40e   : > { %3405 = vmatpush.msra.mxu3 %v3150_v42 }
 0x40f   : > { %v2923_v51 = vpop.f32.mrf.mxu3  ;;  %3047 = vmatmul.f32.gmra.mxu0 %v9698_v41  ;;  %3315 = vmatmul.f32.gmra.mxu2 %v9658_v12  ;;  %v9700_v12 = vld [vmem:[#allocation46_spill] sm:$0xff]  ;;  %v2763_v21 = vpop.f32.mrf.mxu1 }
 0x410   : > { %v8209_v16 = vadd.f32 %v2923_v51, %v7908_v4  ;;  %5864 = vmatmul.msk.f32.gmra.mxu1 %vm6874_vm9, %v9699_v60  ;;  %v9701_v51 = vld [vmem:[#allocation32_spill] sm:$0xff] }
 0x412   : > { %v2864_v58 = vpop.f32.mrf.mxu2 }
 0x413   : > { %v8214_v0 = vadd.f32 %v2864_v58, %v2752_v28  ;;  %v9702_v58 = vld [vmem:[#allocation96_spill] sm:$0xff] }
 0x414   : > { %2973 = vmatmul.f32.gmra.mxu3 %v7810_v33  ;;  %v2647_v4 = vpop.f32.mrf.mxu0 }
 0x415   : > { %v2648_v26 = vadd.f32 %v2647_v4, %v8058_v44 }
 0x417   : > { %v2926_v10 = vpop.f32.mrf.mxu3  ;;  %3050 = vmatmul.f32.gmra.mxu0 %v9700_v12  ;;  %3318 = vmatmul.f32.gmra.mxu2 %v9663_v62 }
 0x418   : > { %v8221_v2 = vadd.f32 %v2926_v10, %v7933_v54  ;;  %3220 = vmatmul.f32.gmra.mxu1 %v9701_v51  ;;  %v2758_v54 = vadd.f32 %v2757_v46, %v2645_v24  ;;  %v2766_v51 = vpop.f32.mrf.mxu1  ;;  %v2761_v46 = vadd.f32 %v2760_v39, %v2648_v26 }
 0x41a   : > { %v2867_v60 = vpop.f32.mrf.mxu2 }
 0x41b   : > { %v8224_v28 = vadd.f32 %v2867_v60, %v2755_v52  ;;  %v9705_v52 = vld [vmem:[#allocation52_spill] sm:$0xff] }
 0x41c   : > { %2976 = vmatmul.f32.gmra.mxu3 %v9702_v58  ;;  %v2650_v30 = vpop.f32.mrf.mxu0 }
 0x41d   : > { %v2651_v44 = vadd.f32 %v2650_v30, %v8079_v23  ;;  %v3149_v30 = vld [vmem:[#allocation7 + $0x400] sm:$0xff] }
 0x41e   : > { %3406 = vmatpush.msra.mxu3 %v3149_v30  ;;  %v9716_v30 = vld [vmem:[#allocation61_spill] sm:$0xff] }
 0x41f   : > { %v2929_v15 = vpop.f32.mrf.mxu3  ;;  %3053 = vmatmul.f32.gmra.mxu0 %v9703_v48  ;;  %3321 = vmatmul.f32.gmra.mxu2 %v9667_v9  ;;  %v2764_v39 = vadd.f32 %v2763_v21, %v2651_v44  ;;  %v9714_v21 = vld [vmem:[#allocation40_spill] sm:$0xff] }
 0x420   : > { %v8231_v62 = vadd.f32 %v2929_v15, %v7958_v34  ;;  %5866 = vmatmul.msk.f32.gmra.mxu1 %vm6874_vm9, %v7321_v53  ;;  %v2769_v4 = vpop.f32.mrf.mxu1 }
 0x422   : > { %9704 = vst [vmem:[#allocation22_spill] sm:$0xff] %v8231_v62  ;;  %v2870_v37 = vpop.f32.mrf.mxu2 }
 0x423   : > { %v8236_v10 = vadd.f32 %v2870_v37, %v2758_v54  ;;  %v9707_v37 = vld [vmem:[#allocation55_spill] sm:$0xff] }
 0x424   : > { %2979 = vmatmul.f32.gmra.mxu3 %v7865_v5  ;;  %v2653_v15 = vpop.f32.mrf.mxu0 }
 0x425   : > { %v2654_v23 = vadd.f32 %v2653_v15, %v8100_v11 }
 0x427   : > { %v2932_v9 = vpop.f32.mrf.mxu3  ;;  %3056 = vmatmul.f32.gmra.mxu0 %v9705_v52  ;;  %3324 = vmatmul.f32.gmra.mxu2 %v9673_v22  ;;  %v9709_v22 = vld [vmem:[#allocation38_spill] sm:$0xff]  ;;  %v2767_v44 = vadd.f32 %v2766_v51, %v2654_v23 }
 0x428   : > { %v8243_v34 = vadd.f32 %v2932_v9, %v7985_v35  ;;  %3226 = vmatmul.f32.gmra.mxu1 %v7321_v53  ;;  %v9710_v9 = vld [vmem:[#allocation100_spill] sm:$0xff] }
 0x42a   : > { %9706 = vst [vmem:[#allocation64_spill] sm:$0xff] %v8243_v34  ;;  %v2873_v60 = vpop.f32.mrf.mxu2  ;;  %v9717_v34 = vld [vmem:[#allocation75_spill] sm:$0xff] }
 0x42b   : > { %v8246_v24 = vadd.f32 %v2873_v60, %v2761_v46 }
 0x42c   : > { %2982 = vmatmul.f32.gmra.mxu3 %v7892_v63  ;;  %v2656_v46 = vpop.f32.mrf.mxu0 }
 0x42d   : > { %v2657_v11 = vadd.f32 %v2656_v46, %v8117_v20 }
 0x42f   : > { %v2935_v54 = vpop.f32.mrf.mxu3  ;;  %3059 = vmatmul.f32.gmra.mxu0 %v9707_v37  ;;  %3327 = vmatmul.f32.gmra.mxu2 %v9677_v27  ;;  %v9711_v27 = vld [vmem:[#allocation58_spill] sm:$0xff]  ;;  %v2770_v51 = vadd.f32 %v2769_v4, %v2657_v11 }
 0x430   : > { %v8253_v35 = vadd.f32 %v2935_v54, %v8010_v59  ;;  %5868 = vmatmul.msk.f32.gmra.mxu1 %vm6874_vm9, %v9709_v22  ;;  %v9712_v59 = vld [vmem:[#allocation72_spill] sm:$0xff]  ;;  %v2772_v54 = vpop.f32.mrf.mxu1 }
 0x432   : > { %9708 = vst [vmem:[#allocation82_spill] sm:$0xff] %v8253_v35  ;;  %v2876_v26 = vpop.f32.mrf.mxu2 }
 0x433   : > { %v8258_v42 = vadd.f32 %v2876_v26, %v2764_v39  ;;  %v9715_v26 = vld [vmem:[#allocation102_spill] sm:$0xff] }
 0x434   : > { %2985 = vmatmul.f32.gmra.mxu3 %v9710_v9 }
 0x437   : > { %v2938_v60 = vpop.f32.mrf.mxu3  ;;  %3062 = vmatmul.f32.gmra.mxu0 %v9711_v27  ;;  %3330 = vmatmul.f32.gmra.mxu2 %v9712_v59  ;;  %v2659_v59 = vpop.f32.mrf.mxu0 }
 0x438   : > { %v8265_v35 = vadd.f32 %v2938_v60, %v8033_v43  ;;  %3232 = vmatmul.f32.gmra.mxu1 %v9714_v21  ;;  %v9719_v43 = vld [vmem:[#allocation42_spill] sm:$0xff]  ;;  %v2775_v23 = vpop.f32.mrf.mxu1  ;;  %v2660_v20 = vadd.f32 %v2659_v59, %v8129_v1 }
 0x43a   : > { %9713 = vst [vmem:[#allocation23_spill] sm:$0xff] %v8265_v35  ;;  %v2879_v22 = vpop.f32.mrf.mxu2 }
 0x43b   : > { %v8268_v39 = vadd.f32 %v2879_v22, %v2767_v44  ;;  %v9722_v44 = vld [vmem:[#allocation44_spill] sm:$0xff]  ;;  %v2773_v22 = vadd.f32 %v2772_v54, %v2660_v20 }
 0x43c   : > { %2988 = vmatmul.f32.gmra.mxu3 %v9715_v26 }
 0x43f   : > { %v2941_v15 = vpop.f32.mrf.mxu3  ;;  %3065 = vmatmul.f32.gmra.mxu0 %v9716_v30  ;;  %3333 = vmatmul.f32.gmra.mxu2 %v9717_v34  ;;  %v2662_v4 = vpop.f32.mrf.mxu0 }
 0x440   : > { %v8275_v62 = vadd.f32 %v2941_v15, %v8056_v45  ;;  %5870 = vmatmul.msk.f32.gmra.mxu1 %vm6874_vm9, %v9719_v43  ;;  %v9720_v45 = vld [vmem:[#allocation54_spill] sm:$0xff]  ;;  %v3182_v43 = vpop.f32.mrf.mxu1  ;;  %v2663_v1 = vadd.f32 %v2662_v4, %v8139_v55 }
 0x441   : > { %v9729_v4 = vld [vmem:[#allocation70_spill] sm:$0xff] }
 0x442   : > { %9718 = vst [vmem:[#allocation66_spill] sm:$0xff] %v8275_v62  ;;  %v2882_v60 = vpop.f32.mrf.mxu2  ;;  %v9725_v62 = vld [vmem:[#allocation20_spill] sm:$0xff]  ;;  %v2776_v54 = vadd.f32 %v2775_v23, %v2663_v1  ;;  %v9732_v23 = vld [vmem:[#allocation51_spill] sm:$0xff] }
 0x443   : > { %v8280_v21 = vadd.f32 %v2882_v60, %v2770_v51  ;;  %v9723_v51 = vld [vmem:[#allocation45_spill] sm:$0xff]  ;;  %v9724_v60 = vld [vmem:[#allocation74_spill] sm:$0xff] }
 0x444   : > { %2991 = vmatmul.f32.gmra.mxu3 %v7969_v47 }
 0x447   : > { %v2944_v46 = vpop.f32.mrf.mxu3  ;;  %3068 = vmatmul.f32.gmra.mxu0 %v8097_v56  ;;  %3336 = vmatmul.f32.gmra.mxu2 %v7796_v14 }
 0x448   : > { %v8287_v34 = vadd.f32 %v2944_v46, %v9720_v45  ;;  %3238 = vmatmul.f32.gmra.mxu1 %v9722_v44  ;;  %v9727_v45 = vld [vmem:[#allocation47_spill] sm:$0xff] }
 0x44a   : > { %9721 = vst [vmem:[#allocation87_spill] sm:$0xff] %v8287_v34  ;;  %v2885_v11 = vpop.f32.mrf.mxu2  ;;  %v9730_v34 = vld [vmem:[#allocation57_spill] sm:$0xff] }
 0x44b   : > { %v8290_v15 = vadd.f32 %v2885_v11, %v2773_v22  ;;  %v9728_v22 = vld [vmem:[#allocation48_spill] sm:$0xff]  ;;  %v3185_v11 = vpop.f32.mrf.mxu1 }
 0x44c   : > { %2994 = vmatmul.f32.gmra.mxu3 %v9723_v51 }
 0x44f   : > { %v2947_v59 = vpop.f32.mrf.mxu3  ;;  %3071 = vmatmul.f32.gmra.mxu0 %v9724_v60  ;;  %3339 = vmatmul.f32.gmra.mxu2 %v7824_v7 }
 0x450   : > { %v8297_v46 = vadd.f32 %v2947_v59, %v9725_v62  ;;  %5872 = vmatmul.msk.f32.gmra.mxu1 %vm6874_vm9, %v9727_v45  ;;  %v9731_v62 = vld [vmem:[#allocation50_spill] sm:$0xff]  ;;  %v9733_v45 = vld [vmem:[#allocation73_spill] sm:$0xff] }
 0x452   : > { %9726 = vst [vmem:[#allocation33_spill] sm:$0xff] %v8297_v46  ;;  %v2888_v20 = vpop.f32.mrf.mxu2 }
 0x453   : > { %v8302_v44 = vadd.f32 %v2888_v20, %v2776_v54  ;;  %v3188_v54 = vpop.f32.mrf.mxu1  ;;  %v9734_v20 = vld [vmem:[#allocation21_spill] sm:$0xff] }
 0x454   : > { %2997 = vmatmul.f32.gmra.mxu3 %v9728_v22 }
 0x457   : > { %v2950_v55 = vpop.f32.mrf.mxu3  ;;  %3074 = vmatmul.f32.gmra.mxu0 %v9729_v4  ;;  %3342 = vmatmul.f32.gmra.mxu2 %v9694_v57  ;;  %v9735_v57 = vld [vmem:[#allocation53_spill] sm:$0xff] }
 0x458   : > { %v8308_v35 = vadd.f32 %v2950_v55, %v9730_v34  ;;  %3244 = vmatmul.f32.gmra.mxu1 %v9731_v62  ;;  %v9736_v62 = vld [vmem:[#allocation76_spill] sm:$0xff] }
 0x45a   : > { %v3295_v59 = vpop.f32.mrf.mxu2 }
 0x45b   : > { %v8311_v46 = vadd.f32 %v3295_v59, %v3182_v43  ;;  %v9737_v59 = vld [vmem:[#allocation56_spill] sm:$0xff] }
 0x45c   : > { %3000 = vmatmul.f32.gmra.mxu3 %v9732_v23 }
 0x45f   : > { %v2953_v1 = vpop.f32.mrf.mxu3  ;;  %3077 = vmatmul.f32.gmra.mxu0 %v9733_v45  ;;  %3345 = vmatmul.f32.gmra.mxu2 %v9697_v13 }
 0x460   : > { %v8317_v4 = vadd.f32 %v2953_v1, %v9734_v20  ;;  %5874 = vmatmul.msk.f32.gmra.mxu1 %vm6874_vm9, %v9735_v57  ;;  %v3191_v1 = vpop.f32.mrf.mxu1  ;;  %v9738_v57 = vld [vmem:[#allocation80_spill] sm:$0xff] }
 0x462   : > { %v3298_v34 = vpop.f32.mrf.mxu2 }
 0x463   : > { %v8322_v55 = vadd.f32 %v3298_v34, %v3185_v11 }
 0x464   : > { %3407 = vmatmul.f32.vlgmr.msra.gmra.mxu3 %v9682_v36  ;;  %v9739_v36 = vld [vmem:[#allocation60_spill] sm:$0xff] }
 0x467   : > { %v2956_v43 = vpop.f32.mrf.mxu3  ;;  %3080 = vmatmul.f32.gmra.mxu0 %v9736_v62  ;;  %3348 = vmatmul.f32.gmra.mxu2 %v7810_v33  ;;  %v9740_v33 = vld [vmem:[#allocation59_spill] sm:$0xff] }
 0x468   : > { %v8328_v13 = vadd.f32 %v2956_v43, %v8135_v29  ;;  %3250 = vmatmul.f32.gmra.mxu1 %v9737_v59  ;;  %v3194_v59 = vpop.f32.mrf.mxu1 }
 0x46a   : > { %v3301_v45 = vpop.f32.mrf.mxu2 }
 0x46b   : > { %v8331_v20 = vadd.f32 %v3301_v45, %v3188_v54  ;;  %v9743_v45 = vld [vmem:[#allocation62_spill] sm:$0xff] }
 0x46c   : > { %3410 = vmatmul.f32.gmra.mxu3 %v9686_v3  ;;  %v9741_v3 = vld [vmem:[#allocation85_spill] sm:$0xff] }
 0x46f   : > { %v2959_v11 = vpop.f32.mrf.mxu3  ;;  %3083 = vmatmul.f32.gmra.mxu0 %v9738_v57  ;;  %3351 = vmatmul.f32.gmra.mxu2 %v9702_v58 }
 0x470   : > { %v8337_v34 = vadd.f32 %v2959_v11, %v9739_v36  ;;  %5876 = vmatmul.msk.f32.gmra.mxu1 %vm6874_vm9, %v9740_v33  ;;  %v8351_v11 = vpop.f32.mrf.mxu0 }
 0x472   : > { %v3304_v29 = vpop.f32.mrf.mxu2 }
 0x473   : > { %v8342_v43 = vadd.f32 %v3304_v29, %v3191_v1  ;;  %v3197_v1 = vpop.f32.mrf.mxu1 }
 0x474   : > { %3413 = vmatmul.f32.gmra.mxu3 %v9689_v49  ;;  %v9744_v49 = vld [vmem:[#allocation89_spill] sm:$0xff] }
 0x477   : > { %v2962_v54 = vpop.f32.mrf.mxu3  ;;  %3086 = vmatmul.f32.gmra.mxu0 %v9741_v3  ;;  %3354 = vmatmul.f32.gmra.mxu2 %v7865_v5 }
 0x478   : > { %v8348_v58 = vadd.f32 %v2962_v54, %v8158_v17  ;;  %3256 = vmatmul.f32.gmra.mxu1 %v9743_v45  ;;  %v9746_v17 = vld [vmem:[#allocation77_spill] sm:$0xff]  ;;  %v8364_v45 = vpop.f32.mrf.mxu0 }
 0x47a   : > { %9742 = vst [vmem:[#allocation24_spill] sm:$0xff] %v8348_v58  ;;  %v3307_v36 = vpop.f32.mrf.mxu2  ;;  %v9750_v58 = vld [vmem:[#allocation86_spill] sm:$0xff] }
 0x47b   : > { %v8353_v33 = vadd.f32 %v3307_v36, %v3194_v59  ;;  %v9747_v36 = vld [vmem:[#allocation94_spill] sm:$0xff] }
 0x47c   : > { %3416 = vmatmul.f32.gmra.mxu3 %v9692_v8 }
 0x47f   : > { %v2965_v29 = vpop.f32.mrf.mxu3  ;;  %3089 = vmatmul.f32.gmra.mxu0 %v9744_v49  ;;  %3357 = vmatmul.f32.gmra.mxu2 %v7892_v63  ;;  %v3200_v63 = vpop.f32.mrf.mxu1 }
 0x480   : > { %v8359_v5 = vadd.f32 %v2965_v29, %v8170_v40  ;;  %5878 = vmatmul.msk.f32.gmra.mxu1 %vm6874_vm9, %v9746_v17  ;;  %v9748_v29 = vld [vmem:[#allocation81_spill] sm:$0xff] }
 0x482   : > { %9745 = vst [vmem:[#allocation69_spill] sm:$0xff] %v8359_v5  ;;  %v3310_v54 = vpop.f32.mrf.mxu2 }
 0x483   : > { %v8366_v59 = vadd.f32 %v3310_v54, %v3197_v1  ;;  %v8378_v1 = vpop.f32.mrf.mxu0 }
 0x484   : > { %3419 = vmatmul.f32.gmra.mxu3 %v9695_v32  ;;  %v9749_v32 = vld [vmem:[#allocation95_spill] sm:$0xff] }
 0x487   : > { %v2968_v8 = vpop.f32.mrf.mxu3  ;;  %3092 = vmatmul.f32.gmra.mxu0 %v9747_v36  ;;  %3360 = vmatmul.f32.gmra.mxu2 %v9710_v9 }
 0x488   : > { %v8372_v40 = vadd.f32 %v2968_v8, %v8180_v50  ;;  %3262 = vmatmul.f32.gmra.mxu1 %v9748_v29  ;;  %v3203_v50 = vpop.f32.mrf.mxu1  ;;  %v9751_v29 = vld [vmem:[#allocation97_spill] sm:$0xff] }
 0x48a   : > { %v3313_v5 = vpop.f32.mrf.mxu2 }
 0x48b   : > { %v8375_v17 = vadd.f32 %v3313_v5, %v3200_v63 }
 0x48c   : > { %3422 = vmatmul.f32.gmra.mxu3 %v9698_v41  ;;  %v8391_v41 = vpop.f32.mrf.mxu0 }
 0x48f   : > { %v2971_v54 = vpop.f32.mrf.mxu3  ;;  %3095 = vmatmul.f32.gmra.mxu0 %v9749_v32  ;;  %3363 = vmatmul.f32.gmra.mxu2 %v9715_v26  ;;  %v9752_v26 = vld [vmem:[#allocation91_spill] sm:$0xff] }
 0x490   : > { %v8383_v9 = vadd.f32 %v2971_v54, %v8192_v19  ;;  %5880 = vmatmul.msk.f32.gmra.mxu1 %vm6874_vm9, %v9750_v58  ;;  %v9753_v54 = vld [vmem:[#allocation98_spill] sm:$0xff] }
 0x492   : > { %v3316_v8 = vpop.f32.mrf.mxu2 }
 0x493   : > { %v8388_v5 = vadd.f32 %v3316_v8, %v3203_v50 }
 0x494   : > { %3425 = vmatmul.f32.gmra.mxu3 %v9700_v12 }
 0x497   : > { %v2974_v63 = vpop.f32.mrf.mxu3  ;;  %3098 = vmatmul.f32.gmra.mxu0 %v9751_v29  ;;  %3366 = vmatmul.f32.gmra.mxu2 %v7969_v47  ;;  %v8408_v47 = vpop.f32.mrf.mxu0 }
 0x498   : > { %v8396_v19 = vadd.f32 %v2974_v63, %v8202_v61  ;;  %3268 = vmatmul.f32.gmra.mxu1 %v9752_v26  ;;  %v4135_v61 = vld [vmem:[#allocation8 + $0x1f8] sm:$0xff]  ;;  %v4134_v26 = vld [vmem:[#allocation8 + $0x1f0] sm:$0xff] }
 0x499   : > { %4168 = vmatpush.msrb.mxu0 %v4135_v61  ;;  %v9755_v63 = vld [vmem:[#allocation101_spill] sm:$0xff]  ;;  %v9758_v61 = vld [vmem:[#allocation19_spill] sm:$0xff] }
 0x49b   : > { %4169 = vmatpush.msrb.mxu0 %v4134_v26  ;;  %v4133_v26 = vld [vmem:[#allocation8 + $0x1e8] sm:$0xff] }
 0x49c   : > { %3428 = vmatmul.f32.gmra.mxu3 %v9703_v48  ;;  %v9754_v48 = vld [vmem:[#allocation99_spill] sm:$0xff] }
 0x49d   : > { %4170 = vmatpush.msrb.mxu0 %v4133_v26  ;;  %v4167_v26 = vld [vmem:[#allocation8 + $0x2f8] sm:$0xff] }
 0x49e   : > { %4250 = vmatpush.msrb.mxu2 %v4167_v26 }
 0x49f   : > { %v2977_v58 = vpop.f32.mrf.mxu3  ;;  %3101 = vmatmul.f32.gmra.mxu0 %v9753_v54  ;;  %3369 = vmatmul.f32.gmra.mxu2 %v9723_v51 }
 0x4a0   : > { %v8403_v12 = vadd.f32 %v2977_v58, %v8214_v0  ;;  %5882 = vmatmul.msk.f32.gmra.mxu1 %vm6874_vm9, %v7321_v53  ;;  %v8417_v0 = vpop.f32.mrf.mxu0  ;;  %v9757_v58 = vld [vmem:[#allocation103_spill] sm:$0xff] }
 0x4a4   : > { %3431 = vmatmul.f32.gmra.mxu3 %v9705_v52 }
 0x4a7   : > { %v2980_v50 = vpop.f32.mrf.mxu3  ;;  %3104 = vmatmul.f32.gmra.mxu0 %v9754_v48  ;;  %3372 = vmatmul.f32.gmra.mxu2 %v9728_v22 }
 0x4a8   : > { %v8414_v51 = vadd.f32 %v2980_v50, %v8224_v28  ;;  %3274 = vmatmul.f32.gmra.mxu1 %v7321_v53  ;;  %v8426_v28 = vpop.f32.mrf.mxu0  ;;  %v9759_v50 = vld [vmem:[#allocation104_spill] sm:$0xff] }
 0x4ac   : > { %3434 = vmatmul.f32.gmra.mxu3 %v9707_v37 }
 0x4af   : > { %v2983_v8 = vpop.f32.mrf.mxu3  ;;  %3107 = vmatmul.f32.gmra.mxu0 %v9755_v63  ;;  %3375 = vmatmul.f32.gmra.mxu2 %v9732_v23 }
 0x4b0   : > { %v8423_v52 = vadd.f32 %v2983_v8, %v8236_v10  ;;  %v8434_v23 = vpop.f32.mrf.mxu0  ;;  %v9760_v8 = vld [vmem:[#allocation71_spill] sm:$0xff] }
 0x4b2   : > { %9756 = vst [vmem:[#allocation92_spill] sm:$0xff] %v8423_v52  ;;  %v9761_v52 = vld [vmem:[#allocation65_spill] sm:$0xff] }
 0x4b4   : > { %3437 = vmatmul.f32.gmra.mxu3 %v9711_v27 }
 0x4b7   : > { %v2986_v22 = vpop.f32.mrf.mxu3  ;;  %3110 = vmatmul.f32.gmra.mxu0 %v9757_v58  ;;  %3378 = vmatmul.f32.gmra.mxu2 %v9758_v61 }
 0x4b8   : > { %v8431_v37 = vadd.f32 %v2986_v22, %v8246_v24 }
 0x4bc   : > { %3440 = vmatmul.f32.gmra.mxu3 %v9716_v30  ;;  %v9763_v30 = vld [vmem:[#allocation67_spill] sm:$0xff] }
 0x4bf   : > { %v2989_v10 = vpop.f32.mrf.mxu3  ;;  %3113 = vmatmul.f32.gmra.mxu0 %v9759_v50  ;;  %3381 = vmatmul.f32.gmra.mxu2 %v9760_v8 }
 0x4c0   : > { %v8439_v27 = vadd.f32 %v2989_v10, %v8258_v42 }
 0x4c4   : > { %3443 = vmatmul.f32.gmra.mxu3 %v9761_v52 }
 0x4c7   : > { %v2992_v61 = vpop.f32.mrf.mxu3  ;;  %3384 = vmatmul.f32.gmra.mxu2 %v7796_v14  ;;  %v4132_v14 = vld [vmem:[#allocation8 + $0x1e0] sm:$0xff] }
 0x4c8   : > { %v8444_v24 = vadd.f32 %v2992_v61, %v8268_v39  ;;  %4171 = vmatpush.msrb.mxu0 %v4132_v14  ;;  %v4151_v61 = vld [vmem:[#allocation8 + $0x278] sm:$0xff]  ;;  %v4130_v14 = vld [vmem:[#allocation8 + $0x1d0] sm:$0xff] }
 0x4c9   : > { %4209 = vmatpush.msrb.mxu1 %v4151_v61 }
 0x4ca   : > { %9762 = vst [vmem:[#allocation34_spill] sm:$0xff] %v8444_v24  ;;  %v4154_v24 = vld [vmem:[#allocation8 + $0x290] sm:$0xff] }
 0x4cc   : > { %3446 = vmatmul.f32.gmra.mxu3 %v9763_v30  ;;  %v4149_v30 = vld [vmem:[#allocation8 + $0x268] sm:$0xff] }
 0x4cf   : > { %v2995_v22 = vpop.f32.mrf.mxu3  ;;  %3387 = vmatmul.f32.gmra.mxu2 %v7824_v7  ;;  %v4150_v7 = vld [vmem:[#allocation8 + $0x270] sm:$0xff] }
 0x4d0   : > { %v8449_v8 = vadd.f32 %v2995_v22, %v8280_v21  ;;  %v4166_v21 = vld [vmem:[#allocation8 + $0x2f0] sm:$0xff]  ;;  %4210 = vmatpush.msrb.mxu1 %v4150_v7  ;;  %v4165_v22 = vld [vmem:[#allocation8 + $0x2e8] sm:$0xff] }
 0x4d1   : > { %4251 = vmatpush.msrb.mxu2 %v4166_v21  ;;  %v4129_v7 = vld [vmem:[#allocation8 + $0x1c8] sm:$0xff]  ;;  %v4147_v21 = vld [vmem:[#allocation8 + $0x258] sm:$0xff] }
 0x4d2   : > { %9764 = vst [vmem:[#allocation25_spill] sm:$0xff] %v8449_v8  ;;  %4211 = vmatpush.msrb.mxu1 %v4149_v30  ;;  %v4128_v30 = vld [vmem:[#allocation8 + $0x1c0] sm:$0xff]  ;;  %v4162_v8 = vld [vmem:[#allocation8 + $0x2d0] sm:$0xff] }
 0x4d3   : > { %4252 = vmatpush.msrb.mxu2 %v4165_v22  ;;  %v4146_v22 = vld [vmem:[#allocation8 + $0x250] sm:$0xff] }
 0x4d4   : > { %3449 = vmatmul.f32.gmra.mxu3 %v8097_v56 }
 0x4d7   : > { %v2998_v42 = vpop.f32.mrf.mxu3 }
 0x4d8   : > { %v8453_v52 = vadd.f32 %v2998_v42, %v8290_v15  ;;  %v4131_v15 = vld [vmem:[#allocation8 + $0x1d8] sm:$0xff] }
 0x4d9   : > { %4172 = vmatpush.msrb.mxu0 %v4131_v15  ;;  %v4163_v15 = vld [vmem:[#allocation8 + $0x2d8] sm:$0xff] }
 0x4da   : > { %9765 = vst [vmem:[#allocation35_spill] sm:$0xff] %v8453_v52 }
 0x4db   : > { %4173 = vmatpush.msrb.mxu0 %v4130_v14 }
 0x4dc   : > { %3452 = vmatmul.f32.gmra.mxu3 %v9724_v60 }
 0x4dd   : > { %4174 = vmatpush.msrb.mxu0 %v4129_v7  ;;  %v4159_v7 = vld [vmem:[#allocation8 + $0x2b8] sm:$0xff] }
 0x4df   : > { %v3001_v10 = vpop.f32.mrf.mxu3  ;;  %4175 = vmatpush.msrb.mxu0 %v4128_v30 }
 0x4e0   : > { %v8457_v39 = vadd.f32 %v3001_v10, %v8302_v44  ;;  %v4148_v44 = vld [vmem:[#allocation8 + $0x260] sm:$0xff] }
 0x4e1   : > { %v4164_v10 = vld [vmem:[#allocation8 + $0x2e0] sm:$0xff]  ;;  %4212 = vmatpush.msrb.mxu1 %v4148_v44  ;;  %v4126_v44 = vld [vmem:[#allocation8 + $0x1b0] sm:$0xff] }
 0x4e2   : > { %9766 = vst [vmem:[#allocation90_spill] sm:$0xff] %v8457_v39  ;;  %v9767_v39 = vld [vmem:[#allocation78_spill] sm:$0xff]  ;;  %4253 = vmatpush.msrb.mxu2 %v4164_v10 }
 0x4e3   : > { %v3022_v26 = vadd.f32 %v8351_v11, %v9767_v39  ;;  %4213 = vmatpush.msrb.mxu1 %v4147_v21  ;;  %v4145_v11 = vld [vmem:[#allocation8 + $0x248] sm:$0xff]  ;;  %v4144_v10 = vld [vmem:[#allocation8 + $0x240] sm:$0xff] }
 0x4e4   : > { %3455 = vmatmul.f32.gmra.mxu3 %v9736_v62  ;;  %v4067_v62 = vld [vmem:[#allocation8 + $0x78] sm:$0xff]  ;;  %4254 = vmatpush.msrb.mxu2 %v4163_v15  ;;  %v4161_v39 = vld [vmem:[#allocation8 + $0x2c8] sm:$0xff]  ;;  %v6414_v15 = vmov 1966171168  }
 0x4e5   : > { %4291 = vmatpush.msrb.mxu3 %v4067_v62  ;;  %4214 = vmatpush.msrb.mxu1 %v4146_v22  ;;  %v4143_v62 = vld [vmem:[#allocation8 + $0x238] sm:$0xff]  ;;  %v3605_v30 = vunpack.c.l.s4 %v6414_v15 }
 0x4e6   : > { %4255 = vmatpush.msrb.mxu2 %v4162_v8 }
 0x4e7   : > { %v3408_v42 = vpop.f32.mrf.mxu3  ;;  %4215 = vmatpush.msrb.mxu1 %v4145_v11  ;;  %v4142_v11 = vld [vmem:[#allocation8 + $0x230] sm:$0xff] }
 0x4e8   : > { %v3409_v61 = vadd.f32 %v3408_v42, %v8311_v46  ;;  %v4127_v46 = vld [vmem:[#allocation8 + $0x1b8] sm:$0xff]  ;;  %v8467_v42 = vld [vmem:[%s9392_s4] ss:$0 sm:$0xff]  ;;  %4256 = vmatpush.msrb.mxu2 %v4161_v39  ;;  %v4158_v39 = vld [vmem:[#allocation8 + $0x2b0] sm:$0xff] }
 0x4e9   : > { %4176 = vmatpush.msrb.mxu0 %v4127_v46  ;;  %4216 = vmatpush.msrb.mxu1 %v4144_v10  ;;  %v4124_v46 = vld [vmem:[#allocation8 + $0x1a0] sm:$0xff]  ;;  %v8478_v10 = vunpack.c.0.s8 %v3605_v30  ;;  %v4139_v30 = vld [vmem:[#allocation8 + $0x218] sm:$0xff] }
 0x4ea   : > { %v3504_v52 = vadd.f32 %v3409_v61, %v3022_v26  ;;  %v4160_v26 = vld [vmem:[#allocation8 + $0x2c0] sm:$0xff]  ;;  %v4125_v61 = vld [vmem:[#allocation8 + $0x1a8] sm:$0xff] }
 0x4eb   : > { %4177 = vmatpush.msrb.mxu0 %v4126_v44  ;;  %4257 = vmatpush.msrb.mxu2 %v4160_v26  ;;  %v4066_v26 = vld [vmem:[#allocation8 + $0x70] sm:$0xff] }
 0x4ec   : > { %3458 = vmatmul.f32.gmra.mxu3 %v9738_v57  ;;  %v3025_v57 = vadd.f32 %v8364_v45, %v8165_v18  ;;  %v3540_v21 = vadd.f32 %v8467_v42, %v3504_v52  ;;  %4217 = vmatpush.msrb.mxu1 %v4143_v62  ;;  %v4123_v18 = vld [vmem:[#allocation8 + $0x198] sm:$0xff]  ;;  %v4157_v45 = vld [vmem:[#allocation8 + $0x2a8] sm:$0xff]  ;;  %v8476_v52 = vpop.f32.mrf.mxu0  ;;  %v4156_v62 = vld [vmem:[#allocation8 + $0x2a0] sm:$0xff] }
 0x4ed   : > { %4178 = vmatpush.msrb.mxu0 %v4125_v61  ;;  %4258 = vmatpush.msrb.mxu2 %v4159_v7  ;;  %v4140_v61 = vld [vmem:[#allocation8 + $0x220] sm:$0xff]  ;;  %v3028_v7 = vadd.f32 %v8378_v1, %v8177_v25  ;;  %v4153_v1 = vld [vmem:[#allocation8 + $0x288] sm:$0xff] }
 0x4ee   : > { %4218 = vmatpush.msrb.mxu1 %v4142_v11  ;;  %v3572_v44 = vmax.f32 %v3540_v21, 0.0  ;;  %4292 = vmatpush.msrb.mxu3 %v4066_v26  ;;  %v4121_v21 = vld [vmem:[#allocation8 + $0x188] sm:$0xff]  ;;  %v4138_v26 = vld [vmem:[#allocation8 + $0x210] sm:$0xff] }
 0x4ef   : > { %v3411_v14 = vpop.f32.mrf.mxu3  ;;  %4179 = vmatpush.msrb.mxu0 %v4124_v46  ;;  %4259 = vmatpush.msrb.mxu2 %v4158_v39  ;;  %v4155_v46 = vld [vmem:[#allocation8 + $0x298] sm:$0xff] }
 0x4f0   : > { %v3412_v8 = vadd.f32 %v3411_v14, %v8322_v55  ;;  %v4141_v55 = vld [vmem:[#allocation8 + $0x228] sm:$0xff]  ;;  %v8474_v14 = vpop.f32.mrf.mxu1  ;;  %v3607_v11 = vperm.slane %v3572_v44, %v8478_v10 }
 0x4f1   : > { %4180 = vmatpush.msrb.mxu0 %v4123_v18  ;;  %4219 = vmatpush.msrb.mxu1 %v4141_v55  ;;  %v4120_v55 = vld [vmem:[#allocation8 + $0x180] sm:$0xff] }
 0x4f2   : > { %v3505_v22 = vadd.f32 %v3412_v8, %v3025_v57  ;;  %v8480_v57 = vpop.f32.mrf.mxu2  ;;  %4260 = vmatpush.msrb.mxu2 %v4157_v45  ;;  %v3764_v45 = vrot.slane %v3607_v11, 4 }
 0x4f3   : > { %4220 = vmatpush.msrb.mxu1 %v4140_v61  ;;  %v4152_v61 = vld [vmem:[#allocation8 + $0x280] sm:$0xff] }
 0x4f4   : > { %3461 = vmatmul.f32.gmra.mxu3 %v9741_v3  ;;  %v4122_v3 = vld [vmem:[#allocation8 + $0x190] sm:$0xff]  ;;  %v3541_v39 = vadd.f32 %v8467_v42, %v3505_v22  ;;  %4261 = vmatpush.msrb.mxu2 %v4156_v62  ;;  %v3031_v62 = vadd.f32 %v8391_v41, %v8187_v38 }
 0x4f5   : > { %4181 = vmatpush.msrb.mxu0 %v4122_v3  ;;  %4221 = vmatpush.msrb.mxu1 %v4139_v30  ;;  %v4136_v3 = vld [vmem:[#allocation8 + $0x200] sm:$0xff] }
 0x4f6   : > { %4262 = vmatpush.msrb.mxu2 %v4155_v46  ;;  %v3573_v44 = vmax.f32 %v3541_v39, 0.0 }
 0x4f7   : > { %v3414_v8 = vpop.f32.mrf.mxu3  ;;  %4182 = vmatpush.msrb.mxu0 %v4121_v21  ;;  %4222 = vmatpush.msrb.mxu1 %v4138_v26 }
 0x4f8   : > { %v3415_v15 = vadd.f32 %v3414_v8, %v8331_v20  ;;  %v4137_v20 = vld [vmem:[#allocation8 + $0x208] sm:$0xff]  ;;  %4263 = vmatpush.msrb.mxu2 %v4154_v24  ;;  %v3828_v24 = vmax.f32 %v3607_v11, %v3764_v45  ;;  %v3611_v46 = vperm.slane %v3573_v44, %v8478_v10  ;;  %v3034_v11 = vadd.f32 %v8408_v47, %v8199_v6 }
 0x4f9   : > { %4183 = vmatpush.msrb.mxu0 %v4120_v55  ;;  %4223 = vmatpush.msrb.mxu1 %v4137_v20 }
 0x4fa   : > { %v3506_v18 = vadd.f32 %v3415_v15, %v3028_v7  ;;  %v8491_v7 = vpop.f32.mrf.mxu1  ;;  %v8493_v15 = vpop.f32.mrf.mxu0  ;;  %4264 = vmatpush.msrb.mxu2 %v4153_v1  ;;  %v3861_v55 = vsel %vm3860_vm10, %v3828_v24, -inf  ;;  %v3765_v26 = vrot.slane %v3611_v46, 4 }
 0x4fb   : > { %v8497_v30 = vpop.f32.mrf.mxu2  ;;  %4224 = vmatpush.msrb.mxu1 %v4136_v3 }
 0x4fc   : > { %v3542_v25 = vadd.f32 %v8467_v42, %v3506_v18  ;;  %3464 = vmatmul.f32.gmra.mxu3 %v9744_v49  ;;  %4265 = vmatpush.msrb.mxu2 %v4152_v61  ;;  %v3829_v3 = vmax.f32 %v3611_v46, %v3765_v26 }
 0x4fe   : > { %v3574_v8 = vmax.f32 %v3542_v25, 0.0  ;;  %v3864_v6 = vsel %vm3860_vm10, %v3829_v3, -inf }
 0x4ff   : > { %v3417_v22 = vpop.f32.mrf.mxu3 }
 0x500   : > { %v3615_v49 = vperm.slane %v3574_v8, %v8478_v10  ;;  %v3418_v21 = vadd.f32 %v3417_v22, %v8342_v43  ;;  %v4065_v8 = vld [vmem:[#allocation8 + $0x68] sm:$0xff] }
 0x501   : > { %4293 = vmatpush.msrb.mxu3 %v4065_v8 }
 0x502   : > { %v3766_v39 = vrot.slane %v3615_v49, 4  ;;  %v3507_v18 = vadd.f32 %v3418_v21, %v3031_v62  ;;  %v8508_v22 = vpop.f32.mrf.mxu1 }
 0x504   : > { %v3830_v38 = vmax.f32 %v3615_v49, %v3766_v39  ;;  %v3543_v41 = vadd.f32 %v8467_v42, %v3507_v18  ;;  %3467 = vmatmul.f32.gmra.mxu3 %v9747_v36  ;;  %v8510_v36 = vpop.f32.mrf.mxu0  ;;  %v8512_v49 = vpop.f32.mrf.mxu2  ;;  %v3037_v39 = vadd.f32 %v8417_v0, %v8209_v16  ;;  %v3040_v16 = vadd.f32 %v8426_v28, %v8221_v2 }
 0x506   : > { %v3862_v43 = vsel %vm3860_vm10, %v3830_v38, -inf  ;;  %v3575_v25 = vmax.f32 %v3543_v41, 0.0 }
 0x507   : > { %v3863_v20 = vmax.f32 %v3861_v55, %v3862_v43  ;;  %v3420_v1 = vpop.f32.mrf.mxu3  ;;  %v4064_v43 = vld [vmem:[#allocation8 + $0x60] sm:$0xff] }
 0x508   : > { %v3619_v45 = vperm.slane %v3575_v25, %v8478_v10  ;;  %v3421_v44 = vadd.f32 %v3420_v1, %v8353_v33  ;;  %4294 = vmatpush.msrb.mxu3 %v4064_v43 }
 0x509   : > { %3925 = vst [vmem:[#allocation1] ss:$2 sm:$0xff] %v3863_v20 }
 0x50a   : > { %v3767_v61 = vrot.slane %v3619_v45, 4  ;;  %v3508_v62 = vadd.f32 %v3421_v44, %v3034_v11  ;;  %v8521_v41 = vpop.f32.mrf.mxu1 }
 0x50c   : > { %v3831_v21 = vmax.f32 %v3619_v45, %v3767_v61  ;;  %3470 = vmatmul.f32.gmra.mxu3 %v9749_v32  ;;  %v3544_v46 = vadd.f32 %v8467_v42, %v3508_v62  ;;  %v8523_v55 = vpop.f32.mrf.mxu0  ;;  %v8526_v32 = vpop.f32.mrf.mxu2 }
 0x50e   : > { %v3865_v47 = vsel %vm3860_vm10, %v3831_v21, -inf  ;;  %v3576_v26 = vmax.f32 %v3544_v46, 0.0 }
 0x50f   : > { %v3866_v33 = vmax.f32 %v3864_v6, %v3865_v47  ;;  %v3423_v24 = vpop.f32.mrf.mxu3 }
 0x510   : > { %v3424_v18 = vadd.f32 %v3423_v24, %v8366_v59  ;;  %v3623_v1 = vperm.slane %v3576_v26, %v8478_v10 }
 0x511   : > { %3927 = vst [vmem:[#allocation1 + $0x1] ss:$2 sm:$0xff] %v3866_v33 }
 0x512   : > { %v3509_v38 = vadd.f32 %v3424_v18, %v3037_v39  ;;  %v8544_v61 = vpop.f32.mrf.mxu1  ;;  %v3768_v21 = vrot.slane %v3623_v1, 4  ;;  %v9768_v18 = vld [vmem:[#allocation22_spill] sm:$0xff] }
 0x513   : > { %v3043_v46 = vadd.f32 %v8434_v23, %v9768_v18 }
 0x514   : > { %3473 = vmatmul.f32.gmra.mxu3 %v9751_v29  ;;  %v3545_v11 = vadd.f32 %v8467_v42, %v3509_v38  ;;  %v8546_v62 = vpop.f32.mrf.mxu0  ;;  %v8551_v24 = vpop.f32.mrf.mxu2  ;;  %v3832_v43 = vmax.f32 %v3623_v1, %v3768_v21  ;;  %v3320_v1 = vadd.f32 %v8480_v57, %v8474_v14 }
 0x516   : > { %v3577_v6 = vmax.f32 %v3545_v11, 0.0 }
 0x517   : > { %v3426_v25 = vpop.f32.mrf.mxu3 }
 0x518   : > { %v3427_v59 = vadd.f32 %v3426_v25, %v8375_v17  ;;  %v3928_v0 = vld.sshfl [vmem:[#allocation1] sm:$0xff pattern:$0x75316420]  ;;  %v3627_v25 = vperm.slane %v3577_v6, %v8478_v10 }
 0x519   : > { %v8531_v20 = vrot.slane %v3928_v0, 7 }
 0x51a   : > { %v3510_v45 = vadd.f32 %v3427_v59, %v3040_v16 }
 0x51b   : > { %5884 = vmatmul.msk.f32.vlgmr.msrb.gmra.mxu0 %vm6874_vm9, %v8531_v20  ;;  %v3972_v29 = vsel %vm1936_vm8, 0.0, %v8531_v20  ;;  %v3980_v2 = vsel %vm1936_vm8, %v8531_v20, 0.0 }
 0x51c   : > { %v3546_v17 = vadd.f32 %v8467_v42, %v3510_v45  ;;  %3476 = vmatmul.f32.gmra.mxu3 %v9753_v54  ;;  %v4001_v28 = vrot.slane %v3972_v29, 1  ;;  %v4002_v44 = vrot.slane %v3980_v2, 1  ;;  %v4027_v8 = vrot.slane %v3972_v29, 2 }
 0x51d   : > { %v4028_v3 = vrot.slane %v3980_v2, 2  ;;  %v3867_v45 = vsel %vm3860_vm10, %v3832_v43, -inf  ;;  %v3769_v29 = vrot.slane %v3627_v25, 4 }
 0x51e   : > { %v3578_v47 = vmax.f32 %v3546_v17, 0.0  ;;  %v8549_v33 = vsel %vm955_vm4, %v4001_v28, %v4002_v44  ;;  %v8567_v28 = vpop.f32.mrf.mxu1  ;;  %v8571_v44 = vpop.f32.mrf.mxu0 }
 0x51f   : > { %v3429_v39 = vpop.f32.mrf.mxu3  ;;  %4225 = vmatmul.f32.vlgmr.msrb.gmra.mxu1 %v8549_v33  ;;  %v8555_v54 = vsel %vm1068_vm5, %v4027_v8, %v4028_v3  ;;  %v8574_v3 = vpop.f32.mrf.mxu2  ;;  %v3833_v21 = vmax.f32 %v3627_v25, %v3769_v29  ;;  %v4062_v25 = vld [vmem:[#allocation8 + $0x50] sm:$0xff]  ;;  %v9770_v29 = vld [vmem:[#allocation82_spill] sm:$0xff] }
 0x520   : > { %v3631_v38 = vperm.slane %v3578_v47, %v8478_v10  ;;  %v3430_v26 = vadd.f32 %v3429_v39, %v8388_v5  ;;  %4266 = vmatmul.f32.vlgmr.msrb.gmra.mxu2 %v8555_v54  ;;  %v9769_v39 = vld [vmem:[#allocation64_spill] sm:$0xff] }
 0x521   : > { %v3046_v18 = vadd.f32 %v8476_v52, %v9769_v39  ;;  %v3870_v14 = vsel %vm3860_vm10, %v3833_v21, -inf }
 0x522   : > { %v3770_v16 = vrot.slane %v3631_v38, 4  ;;  %v3511_v59 = vadd.f32 %v3430_v26, %v3043_v46 }
 0x524   : > { %v3834_v0 = vmax.f32 %v3631_v38, %v3770_v16  ;;  %v3547_v11 = vadd.f32 %v8467_v42, %v3511_v59  ;;  %3479 = vmatmul.f32.gmra.mxu3 %v9754_v48  ;;  %v4063_v48 = vld [vmem:[#allocation8 + $0x58] sm:$0xff]  ;;  %v3323_v16 = vadd.f32 %v8497_v30, %v8491_v7  ;;  %v4060_v7 = vld [vmem:[#allocation8 + $0x40] sm:$0xff]  ;;  %v3326_v30 = vadd.f32 %v8512_v49, %v8508_v22  ;;  %v4057_v22 = vld [vmem:[#allocation8 + $0x28] sm:$0xff] }
 0x525   : > { %4295 = vmatpush.msrb.mxu3 %v4063_v48 }
 0x526   : > { %v3868_v23 = vsel %vm3860_vm10, %v3834_v0, -inf  ;;  %v3579_v2 = vmax.f32 %v3547_v11, 0.0  ;;  %v8583_v59 = vpop.f32.mrf.mxu1  ;;  %v8585_v0 = vpop.f32.mrf.mxu0  ;;  %v4061_v11 = vld [vmem:[#allocation8 + $0x48] sm:$0xff] }
 0x527   : > { %v3869_v17 = vmax.f32 %v3867_v45, %v3868_v23  ;;  %v3432_v5 = vpop.f32.mrf.mxu3  ;;  %4296 = vmatpush.msrb.mxu3 %v4062_v25  ;;  %v8588_v45 = vpop.f32.mrf.mxu2  ;;  %v3049_v23 = vadd.f32 %v8493_v15, %v9770_v29 }
 0x528   : > { %v3635_v8 = vperm.slane %v3579_v2, %v8478_v10  ;;  %v3433_v47 = vadd.f32 %v3432_v5, %v3320_v1  ;;  %v4059_v5 = vld [vmem:[#allocation8 + $0x38] sm:$0xff] }
 0x529   : > { %3930 = vst [vmem:[#allocation1 + $0x10] ss:$2 sm:$0xff] %v3869_v17  ;;  %4297 = vmatpush.msrb.mxu3 %v4061_v11 }
 0x52a   : > { %v3771_v6 = vrot.slane %v3635_v8, 4  ;;  %v3512_v38 = vadd.f32 %v3433_v47, %v3046_v18  ;;  %v4058_v47 = vld [vmem:[#allocation8 + $0x30] sm:$0xff] }
 0x52b   : > { %4298 = vmatpush.msrb.mxu3 %v4060_v7 }
 0x52c   : > { %v3835_v46 = vmax.f32 %v3635_v8, %v3771_v6  ;;  %3482 = vmatmul.f32.gmra.mxu3 %v9755_v63  ;;  %v3548_v52 = vadd.f32 %v8467_v42, %v3512_v38  ;;  %v9771_v8 = vld [vmem:[#allocation23_spill] sm:$0xff] }
 0x52d   : > { %4299 = vmatpush.msrb.mxu3 %v4059_v5  ;;  %v3052_v48 = vadd.f32 %v8510_v36, %v9771_v8 }
 0x52e   : > { %v3871_v57 = vsel %vm3860_vm10, %v3835_v46, -inf  ;;  %v3580_v2 = vmax.f32 %v3548_v52, 0.0  ;;  %v8608_v46 = vpop.f32.mrf.mxu1 }
 0x52f   : > { %v3872_v26 = vmax.f32 %v3870_v14, %v3871_v57  ;;  %v3435_v43 = vpop.f32.mrf.mxu3  ;;  %4300 = vmatpush.msrb.mxu3 %v4058_v47  ;;  %v8610_v14 = vpop.f32.mrf.mxu0  ;;  %v4053_v47 = vld [vmem:[#allocation8 + $0x8] sm:$0xff] }
 0x530   : > { %v3436_v63 = vadd.f32 %v3435_v43, %v3323_v16  ;;  %v4056_v43 = vld [vmem:[#allocation8 + $0x20] sm:$0xff]  ;;  %v3329_v16 = vadd.f32 %v8526_v32, %v8521_v41  ;;  %v8616_v25 = vpop.f32.mrf.mxu2 }
 0x531   : > { %3932 = vst [vmem:[#allocation1 + $0x11] ss:$2 sm:$0xff] %v3872_v26  ;;  %4301 = vmatpush.msrb.mxu3 %v4057_v22  ;;  %v9772_v41 = vld [vmem:[#allocation66_spill] sm:$0xff]  ;;  %v9773_v22 = vld [vmem:[#allocation105_spill] sm:$0xff] }
 0x532   : > { %v3513_v17 = vadd.f32 %v3436_v63, %v3049_v23  ;;  %v3055_v32 = vadd.f32 %v8523_v55, %v9772_v41  ;;  %v4052_v55 = vld [vmem:[#allocation8] sm:$0xff] }
 0x533   : > { %4302 = vmatpush.msrb.mxu3 %v4056_v43 }
 0x534   : > { %3485 = vmatmul.f32.gmra.mxu3 %v9757_v58  ;;  %v3639_v58 = vperm.slane %v3580_v2, %v8478_v10  ;;  %v3549_v15 = vadd.f32 %v8467_v42, %v3513_v17 }
 0x536   : > { %v3772_v11 = vrot.slane %v3639_v58, 4  ;;  %v3581_v29 = vmax.f32 %v3549_v15, 0.0 }
 0x537   : > { %v3438_v1 = vpop.f32.mrf.mxu3 }
 0x538   : > { %v3439_v21 = vadd.f32 %v3438_v1, %v3326_v30  ;;  %v3933_v6 = vld.sshfl [vmem:[#allocation1 + $0x10] sm:$0xff pattern:$0x75316420]  ;;  %v4054_v1 = vld [vmem:[#allocation8 + $0x10] sm:$0xff]  ;;  %v3836_v8 = vmax.f32 %v3639_v58, %v3772_v11  ;;  %v8638_v43 = vpop.f32.mrf.mxu2 }
 0x539   : > { %v8597_v39 = vrot.slane %v3933_v6, 7  ;;  %v4055_v30 = vld [vmem:[#allocation8 + $0x18] sm:$0xff] }
 0x53a   : > { %v3514_v18 = vadd.f32 %v3439_v21, %v3052_v48  ;;  %4303 = vmatpush.msrb.mxu3 %v4055_v30  ;;  %v3643_v48 = vperm.slane %v3581_v29, %v8478_v10 }
 0x53b   : > { %5886 = vmatmul.msk.f32.gmra.mxu0 %vm6874_vm9, %v8597_v39  ;;  %v3973_v49 = vsel %vm1936_vm8, 0.0, %v8597_v39  ;;  %v3981_v36 = vsel %vm1936_vm8, %v8597_v39, 0.0 }
 0x53c   : > { %v3550_v57 = vadd.f32 %v8467_v42, %v3514_v18  ;;  %3488 = vmatmul.f32.gmra.mxu3 %v9759_v50  ;;  %v4004_v38 = vrot.slane %v3973_v49, 1  ;;  %v4005_v26 = vrot.slane %v3981_v36, 1  ;;  %v4030_v52 = vrot.slane %v3973_v49, 2  ;;  %v8632_v49 = vpop.f32.mrf.mxu1 }
 0x53d   : > { %v4031_v63 = vrot.slane %v3981_v36, 2  ;;  %4304 = vmatpush.msrb.mxu3 %v4054_v1  ;;  %v8634_v36 = vpop.f32.mrf.mxu0  ;;  %v3773_v58 = vrot.slane %v3643_v48, 4 }
 0x53e   : > { %v3582_v23 = vmax.f32 %v3550_v57, 0.0  ;;  %v8619_v7 = vsel %vm955_vm4, %v4004_v38, %v4005_v26  ;;  %v3873_v57 = vsel %vm3860_vm10, %v3836_v8, -inf }
 0x53f   : > { %v3441_v2 = vpop.f32.mrf.mxu3  ;;  %4228 = vmatmul.f32.gmra.mxu1 %v8619_v7  ;;  %v8623_v50 = vsel %vm1068_vm5, %v4030_v52, %v4031_v63  ;;  %4305 = vmatpush.msrb.mxu3 %v4053_v47  ;;  %v3332_v63 = vadd.f32 %v8551_v24, %v8544_v61  ;;  %v3837_v29 = vmax.f32 %v3643_v48, %v3773_v58 }
 0x540   : > { %v3647_v17 = vperm.slane %v3582_v23, %v8478_v10  ;;  %v3442_v5 = vadd.f32 %v3441_v2, %v3329_v16  ;;  %4269 = vmatmul.f32.gmra.mxu2 %v8623_v50  ;;  %v9774_v2 = vld [vmem:[#allocation87_spill] sm:$0xff]  ;;  %v3335_v24 = vadd.f32 %v8574_v3, %v8567_v28  ;;  %v8654_v47 = vpop.f32.mrf.mxu2  ;;  %v3064_v28 = vadd.f32 %v8585_v0, %v8308_v35 }
 0x541   : > { %4306 = vmatpush.msrb.mxu3 %v4052_v55  ;;  %v3058_v41 = vadd.f32 %v8546_v62, %v9774_v2  ;;  %v3338_v55 = vadd.f32 %v8588_v45, %v8583_v59 }
 0x542   : > { %v3774_v21 = vrot.slane %v3647_v17, 4  ;;  %v3515_v6 = vadd.f32 %v3442_v5, %v3055_v32  ;;  %v3876_v5 = vsel %vm3860_vm10, %v3837_v29, -inf }
 0x544   : > { %v3838_v15 = vmax.f32 %v3647_v17, %v3774_v21  ;;  %v3551_v18 = vadd.f32 %v8467_v42, %v3515_v6  ;;  %3491 = vmatmul.f32.gmra.mxu3 %v9773_v22  ;;  %v9775_v17 = vld [vmem:[#allocation63_spill] sm:$0xff]  ;;  %v8648_v61 = vpop.f32.mrf.mxu1 }
 0x545   : > { %v8652_v48 = vpop.f32.mrf.mxu0 }
 0x546   : > { %v3874_v38 = vsel %vm3860_vm10, %v3838_v15, -inf  ;;  %v3583_v26 = vmax.f32 %v3551_v18, 0.0  ;;  %v9776_v18 = vld [vmem:[#allocation33_spill] sm:$0xff] }
 0x547   : > { %v3875_v16 = vmax.f32 %v3873_v57, %v3874_v38  ;;  %v3444_v52 = vpop.f32.mrf.mxu3  ;;  %v3061_v22 = vadd.f32 %v8571_v44, %v9776_v18 }
 0x548   : > { %v3651_v11 = vperm.slane %v3583_v26, %v8478_v10  ;;  %v3445_v30 = vadd.f32 %v3444_v52, %v3332_v63 }
 0x549   : > { %3935 = vst [vmem:[#allocation1 + $0x20] ss:$2 sm:$0xff] %v3875_v16 }
 0x54a   : > { %v3775_v23 = vrot.slane %v3651_v11, 4  ;;  %v3516_v8 = vadd.f32 %v3445_v30, %v3058_v41 }
 0x54c   : > { %v3839_v32 = vmax.f32 %v3651_v11, %v3775_v23  ;;  %3494 = vmatmul.f32.gmra.mxu3 %v9775_v17  ;;  %v3552_v62 = vadd.f32 %v8467_v42, %v3516_v8  ;;  %v8666_v52 = vpop.f32.mrf.mxu1  ;;  %v3341_v11 = vadd.f32 %v8616_v25, %v8608_v46  ;;  %v3067_v46 = vadd.f32 %v8610_v14, %v8317_v4 }
 0x54d   : > { %v8668_v63 = vpop.f32.mrf.mxu0 }
 0x54e   : > { %v3877_v1 = vsel %vm3860_vm10, %v3839_v32, -inf  ;;  %v3584_v57 = vmax.f32 %v3552_v62, 0.0 }
 0x54f   : > { %v3878_v21 = vmax.f32 %v3876_v5, %v3877_v1  ;;  %v3447_v6 = vpop.f32.mrf.mxu3 }
 0x550   : > { %v3448_v15 = vadd.f32 %v3447_v6, %v3335_v24  ;;  %v3655_v44 = vperm.slane %v3584_v57, %v8478_v10 }
 0x551   : > { %3937 = vst [vmem:[#allocation1 + $0x21] ss:$2 sm:$0xff] %v3878_v21 }
 0x552   : > { %v3517_v58 = vadd.f32 %v3448_v15, %v3061_v22  ;;  %v3776_v32 = vrot.slane %v3655_v44, 4 }
 0x554   : > { %3497 = vmatmul.f32.gmra.mxu3 %v8097_v56  ;;  %v3553_v59 = vadd.f32 %v8467_v42, %v3517_v58  ;;  %v3349_v56 = vpop.f32.mrf.mxu2  ;;  %v3840_v6 = vmax.f32 %v3655_v44, %v3776_v32  ;;  %v3239_v18 = vpop.f32.mrf.mxu1  ;;  %v3344_v44 = vadd.f32 %v8638_v43, %v8632_v49 }
 0x555   : > { %v8695_v22 = vpop.f32.mrf.mxu0 }
 0x556   : > { %v3585_v17 = vmax.f32 %v3553_v59, 0.0  ;;  %v3879_v14 = vsel %vm3860_vm10, %v3840_v6, -inf  ;;  %v9777_v6 = vld [vmem:[#allocation24_spill] sm:$0xff] }
 0x557   : > { %v3450_v38 = vpop.f32.mrf.mxu3 }
 0x558   : > { %v3451_v3 = vadd.f32 %v3450_v38, %v3338_v55  ;;  %v3938_v26 = vld.sshfl [vmem:[#allocation1 + $0x20] sm:$0xff pattern:$0x75316420]  ;;  %v3659_v24 = vperm.slane %v3585_v17, %v8478_v10 }
 0x559   : > { %v8664_v16 = vrot.slane %v3938_v26, 7 }
 0x55a   : > { %v3518_v45 = vadd.f32 %v3451_v3, %v3064_v28  ;;  %v3777_v58 = vrot.slane %v3659_v24, 4 }
 0x55b   : > { %5888 = vmatmul.msk.f32.gmra.mxu0 %vm6874_vm9, %v8664_v16  ;;  %v3974_v35 = vsel %vm1936_vm8, 0.0, %v8664_v16  ;;  %v3982_v0 = vsel %vm1936_vm8, %v8664_v16, 0.0 }
 0x55c   : > { %v3554_v29 = vadd.f32 %v8467_v42, %v3518_v45  ;;  %3500 = vmatmul.f32.gmra.mxu3 %v9724_v60  ;;  %v4007_v23 = vrot.slane %v3974_v35, 1  ;;  %v4008_v30 = vrot.slane %v3982_v0, 1  ;;  %v4033_v2 = vrot.slane %v3974_v35, 2  ;;  %v3352_v4 = vpop.f32.mrf.mxu2 }
 0x55d   : > { %v4034_v41 = vrot.slane %v3982_v0, 2  ;;  %v3841_v45 = vmax.f32 %v3659_v24, %v3777_v58  ;;  %v3076_v24 = vadd.f32 %v8668_v63, %v9777_v6 }
 0x55e   : > { %v3586_v5 = vmax.f32 %v3554_v29, 0.0  ;;  %v8684_v1 = vsel %vm955_vm4, %v4007_v23, %v4008_v30  ;;  %v8711_v23 = vpop.f32.mrf.mxu1  ;;  %v8713_v30 = vpop.f32.mrf.mxu0 }
 0x55f   : > { %v3453_v8 = vpop.f32.mrf.mxu3  ;;  %4231 = vmatmul.f32.gmra.mxu1 %v8684_v1  ;;  %v8688_v21 = vsel %vm1068_vm5, %v4033_v2, %v4034_v41  ;;  %v3882_v49 = vsel %vm3860_vm10, %v3841_v45, -inf }
 0x560   : > { %v3663_v60 = vperm.slane %v3586_v5, %v8478_v10  ;;  %v3454_v25 = vadd.f32 %v3453_v8, %v3341_v11  ;;  %4272 = vmatmul.f32.gmra.mxu2 %v8688_v21  ;;  %v3070_v11 = vadd.f32 %v8634_v36, %v8328_v13  ;;  %v3347_v13 = vadd.f32 %v8654_v47, %v8648_v61 }
 0x561   : > { %v3350_v8 = vadd.f32 %v3349_v56, %v8666_v52 }
 0x562   : > { %v3778_v62 = vrot.slane %v3663_v60, 4  ;;  %v3519_v15 = vadd.f32 %v3454_v25, %v3067_v46 }
 0x564   : > { %v3842_v55 = vmax.f32 %v3663_v60, %v3778_v62  ;;  %v3555_v57 = vadd.f32 %v8467_v42, %v3519_v15  ;;  %5900 = vmatmul.msk.f32.vlgmr.msrb.gmra.mxu3 %vm6874_vm9, %v7321_v53  ;;  %v3355_v41 = vpop.f32.mrf.mxu2 }
 0x566   : > { %v3880_v38 = vsel %vm3860_vm10, %v3842_v55, -inf  ;;  %v3587_v28 = vmax.f32 %v3555_v57, 0.0  ;;  %v3245_v61 = vpop.f32.mrf.mxu1  ;;  %v8728_v47 = vpop.f32.mrf.mxu0 }
 0x567   : > { %v3881_v3 = vmax.f32 %v3879_v14, %v3880_v38  ;;  %v3456_v26 = vpop.f32.mrf.mxu3 }
 0x568   : > { %v3667_v59 = vperm.slane %v3587_v28, %v8478_v10  ;;  %v3457_v0 = vadd.f32 %v3456_v26, %v3344_v44  ;;  %v3353_v28 = vadd.f32 %v3352_v4, %v3239_v18 }
 0x569   : > { %3940 = vst [vmem:[#allocation1 + $0x30] ss:$2 sm:$0xff] %v3881_v3 }
 0x56a   : > { %v3779_v35 = vrot.slane %v3667_v59, 4  ;;  %v3520_v2 = vadd.f32 %v3457_v0, %v3070_v11 }
 0x56c   : > { %v3843_v29 = vmax.f32 %v3667_v59, %v3779_v35  ;;  %5902 = vmatmul.msk.f32.gmra.mxu3 %vm6874_vm9, %v8531_v20  ;;  %v3556_v36 = vadd.f32 %v8467_v42, %v3520_v2  ;;  %v3073_v20 = vadd.f32 %v8652_v48, %v8337_v34  ;;  %v3358_v55 = vpop.f32.mrf.mxu2 }
 0x56e   : > { %v3883_v43 = vsel %vm3860_vm10, %v3843_v29, -inf  ;;  %v3588_v46 = vmax.f32 %v3556_v36, 0.0  ;;  %v9778_v29 = vld [vmem:[#allocation69_spill] sm:$0xff]  ;;  %v3248_v4 = vpop.f32.mrf.mxu1  ;;  %v3087_v2 = vpop.f32.mrf.mxu0 }
 0x56f   : > { %v3884_v32 = vmax.f32 %v3882_v49, %v3883_v43  ;;  %v3459_v17 = vpop.f32.mrf.mxu3  ;;  %v3079_v49 = vadd.f32 %v8695_v22, %v9778_v29 }
 0x570   : > { %v3460_v5 = vadd.f32 %v3459_v17, %v3347_v13  ;;  %v3671_v34 = vperm.slane %v3588_v46, %v8478_v10 }
 0x571   : > { %3942 = vst [vmem:[#allocation1 + $0x31] ss:$2 sm:$0xff] %v3884_v32 }
 0x572   : > { %v3521_v60 = vadd.f32 %v3460_v5, %v3073_v20  ;;  %v3780_v44 = vrot.slane %v3671_v34, 4 }
 0x574   : > { %5904 = vmatmul.msk.f32.gmra.mxu3 %vm6874_vm9, %v8597_v39  ;;  %v3557_v48 = vadd.f32 %v8467_v42, %v3521_v60  ;;  %v3844_v32 = vmax.f32 %v3671_v34, %v3780_v44  ;;  %v3361_v5 = vpop.f32.mrf.mxu2 }
 0x575   : > { %v3362_v29 = vadd.f32 %v3361_v5, %v3248_v4 }
 0x576   : > { %v3589_v59 = vmax.f32 %v3557_v48, 0.0  ;;  %v3885_v22 = vsel %vm3860_vm10, %v3844_v32, -inf }
 0x577   : > { %v3462_v25 = vpop.f32.mrf.mxu3 }
 0x578   : > { %v3463_v62 = vadd.f32 %v3462_v25, %v3350_v8  ;;  %v3943_v15 = vld.sshfl [vmem:[#allocation1 + $0x30] sm:$0xff pattern:$0x75316420]  ;;  %v3675_v17 = vperm.slane %v3589_v59, %v8478_v10 }
 0x579   : > { %v8730_v57 = vrot.slane %v3943_v15, 7 }
 0x57a   : > { %v3522_v14 = vadd.f32 %v3463_v62, %v3076_v24  ;;  %v3781_v46 = vrot.slane %v3675_v17, 4  ;;  %v3356_v62 = vadd.f32 %v3355_v41, %v8711_v23  ;;  %v3359_v41 = vadd.f32 %v3358_v55, %v3245_v61 }
 0x57b   : > { %5890 = vmatmul.msk.f32.gmra.mxu0 %vm6874_vm9, %v8730_v57  ;;  %v3975_v52 = vsel %vm1936_vm8, 0.0, %v8730_v57  ;;  %v3983_v63 = vsel %vm1936_vm8, %v8730_v57, 0.0 }
 0x57c   : > { %v3558_v56 = vadd.f32 %v8467_v42, %v3522_v14  ;;  %5906 = vmatmul.msk.f32.gmra.mxu3 %vm6874_vm9, %v8664_v16  ;;  %v4104_v58 = vrot.slane %v3975_v52, 1  ;;  %v4105_v38 = vrot.slane %v3983_v63, 1  ;;  %v4112_v3 = vrot.slane %v3975_v52, 2 }
 0x57d   : > { %v4113_v26 = vrot.slane %v3983_v63, 2  ;;  %v3845_v34 = vmax.f32 %v3675_v17, %v3781_v46  ;;  %v3082_v52 = vadd.f32 %v8713_v30, %v8372_v40  ;;  %v3251_v63 = vpop.f32.mrf.mxu1  ;;  %v3088_v17 = vadd.f32 %v3087_v2, %v8396_v19 }
 0x57e   : > { %v3590_v45 = vmax.f32 %v3558_v56, 0.0  ;;  %v8746_v35 = vsel %vm955_vm4, %v4104_v58, %v4105_v38  ;;  %v3090_v56 = vpop.f32.mrf.mxu0  ;;  %v3364_v38 = vpop.f32.mrf.mxu2 }
 0x57f   : > { %v3465_v0 = vpop.f32.mrf.mxu3  ;;  %4234 = vmatmul.f32.gmra.mxu1 %v8746_v35  ;;  %v8750_v11 = vsel %vm1068_vm5, %v4112_v3, %v4113_v26  ;;  %v3365_v5 = vadd.f32 %v3364_v38, %v3251_v63 }
 0x580   : > { %v3679_v43 = vperm.slane %v3590_v45, %v8478_v10  ;;  %v3466_v18 = vadd.f32 %v3465_v0, %v3353_v28  ;;  %4275 = vmatmul.f32.gmra.mxu2 %v8750_v11  ;;  %v3888_v28 = vsel %vm3860_vm10, %v3845_v34, -inf  ;;  %v3085_v0 = vadd.f32 %v8728_v47, %v8383_v9 }
 0x582   : > { %v3782_v13 = vrot.slane %v3679_v43, 4  ;;  %v3523_v36 = vadd.f32 %v3466_v18, %v3079_v49 }
 0x584   : > { %v3846_v20 = vmax.f32 %v3679_v43, %v3782_v13  ;;  %v3559_v8 = vadd.f32 %v8467_v42, %v3523_v36  ;;  %5908 = vmatmul.msk.f32.gmra.mxu3 %vm6874_vm9, %v7321_v53 }
 0x585   : > { %v3254_v40 = vpop.f32.mrf.mxu1 }
 0x586   : > { %v3886_v60 = vsel %vm3860_vm10, %v3846_v20, -inf  ;;  %v3591_v25 = vmax.f32 %v3559_v8, 0.0  ;;  %v8772_v30 = vpop.f32.mrf.mxu0  ;;  %v3367_v18 = vpop.f32.mrf.mxu2 }
 0x587   : > { %v3887_v6 = vmax.f32 %v3885_v22, %v3886_v60  ;;  %v3468_v24 = vpop.f32.mrf.mxu3 }
 0x588   : > { %v3683_v15 = vperm.slane %v3591_v25, %v8478_v10  ;;  %v3469_v14 = vadd.f32 %v3468_v24, %v3356_v62 }
 0x589   : > { %3944 = vst [vmem:[#allocation1] ss:$2 sm:$0xff] %v3887_v6 }
 0x58a   : > { %v3783_v48 = vrot.slane %v3683_v15, 4  ;;  %v3524_v26 = vadd.f32 %v3469_v14, %v3082_v52 }
 0x58c   : > { %v3847_v58 = vmax.f32 %v3683_v15, %v3783_v48  ;;  %v3560_v59 = vadd.f32 %v8467_v42, %v3524_v26  ;;  %v3091_v48 = vadd.f32 %v3090_v56, %v8403_v12 }
 0x58d   : > { %v3257_v34 = vpop.f32.mrf.mxu1 }
 0x58e   : > { %v3889_v3 = vsel %vm3860_vm10, %v3847_v58, -inf  ;;  %v3592_v49 = vmax.f32 %v3560_v59, 0.0  ;;  %v3096_v14 = vpop.f32.mrf.mxu0  ;;  %v3370_v58 = vpop.f32.mrf.mxu2 }
 0x58f   : > { %v3890_v44 = vmax.f32 %v3888_v28, %v3889_v3  ;;  %v3471_v23 = vpop.f32.mrf.mxu3 }
 0x590   : > { %v3472_v45 = vadd.f32 %v3471_v23, %v3359_v41  ;;  %v3687_v55 = vperm.slane %v3592_v49, %v8478_v10  ;;  %v4445_v41 = vld [vmem:[#allocation8 + $0x3f8] sm:$0xff]  ;;  %v4444_v49 = vld [vmem:[#allocation8 + $0x3f0] sm:$0xff] }
 0x591   : > { %3945 = vst [vmem:[#allocation1 + $0x1] ss:$2 sm:$0xff] %v3890_v44  ;;  %4503 = vmatpush.msra.mxu3 %v4445_v41 }
 0x592   : > { %v3525_v43 = vadd.f32 %v3472_v45, %v3085_v0  ;;  %v3784_v60 = vrot.slane %v3687_v55, 4 }
 0x593   : > { %4504 = vmatpush.msra.mxu3 %v4444_v49 }
 0x594   : > { %v3561_v20 = vadd.f32 %v8467_v42, %v3525_v43  ;;  %v3848_v38 = vmax.f32 %v3687_v55, %v3784_v60  ;;  %v3368_v43 = vadd.f32 %v3367_v18, %v3254_v40  ;;  %v4083_v60 = vld [vmem:[#allocation8 + $0xf8] sm:$0xff] }
 0x595   : > { %4332 = vmatpush.msra.mxu0 %v4083_v60 }
 0x596   : > { %v3593_v25 = vmax.f32 %v3561_v20, 0.0  ;;  %v3891_v59 = vsel %vm3860_vm10, %v3848_v38, -inf  ;;  %v3373_v20 = vpop.f32.mrf.mxu2 }
 0x597   : > { %v3474_v32 = vpop.f32.mrf.mxu3 }
 0x598   : > { %v3475_v13 = vadd.f32 %v3474_v32, %v3362_v29  ;;  %v3946_v36 = vld.sshfl [vmem:[#allocation1] sm:$0xff pattern:$0x75316420]  ;;  %v3691_v28 = vperm.slane %v3593_v25, %v8478_v10 }
 0x599   : > { %v3960_v61 = vrot.slane %v3946_v36, 7  ;;  %v3099_v36 = vpop.f32.mrf.mxu0  ;;  %v4439_v25 = vld [vmem:[#allocation8 + $0x3c8] sm:$0xff] }
 0x59a   : > { %v3526_v8 = vadd.f32 %v3475_v13, %v3088_v17  ;;  %v3785_v45 = vrot.slane %v3691_v28, 4  ;;  %v4443_v17 = vld [vmem:[#allocation8 + $0x3e8] sm:$0xff]  ;;  %v3260_v13 = vpop.f32.mrf.mxu1 }
 0x59b   : > { %5892 = vmatmul.msk.f32.gmra.mxu0 %vm6874_vm9, %v3960_v61  ;;  %5910 = vmatmul.msk.f32.gmra.mxu3 %vm6874_vm9, %v3960_v61  ;;  %v3976_v9 = vsel %vm1936_vm8, 0.0, %v3960_v61  ;;  %v3984_v47 = vsel %vm1936_vm8, %v3960_v61, 0.0 }
 0x59c   : > { %v3562_v19 = vadd.f32 %v8467_v42, %v3526_v8  ;;  %v4010_v4 = vrot.slane %v3976_v9, 1  ;;  %v4011_v2 = vrot.slane %v3984_v47, 1  ;;  %v4036_v22 = vrot.slane %v3976_v9, 2  ;;  %4505 = vmatpush.msra.mxu3 %v4443_v17  ;;  %v4442_v8 = vld [vmem:[#allocation8 + $0x3e0] sm:$0xff] }
 0x59d   : > { %v4037_v46 = vrot.slane %v3984_v47, 2  ;;  %v3094_v9 = vadd.f32 %v8772_v30, %v8414_v51  ;;  %v8806_v51 = vld [vmem:[%s9392_s4] ss:$0 sm:$0xff]  ;;  %v4434_v17 = vld [vmem:[#allocation8 + $0x3a0] sm:$0xff] }
 0x59e   : > { %v3594_v6 = vmax.f32 %v3562_v19, 0.0  ;;  %v8785_v24 = vsel %vm955_vm4, %v4010_v4, %v4011_v2  ;;  %4506 = vmatpush.msra.mxu3 %v4442_v8  ;;  %v4441_v19 = vld [vmem:[#allocation8 + $0x3d8] sm:$0xff] }
 0x59f   : > { %v3477_v62 = vpop.f32.mrf.mxu3  ;;  %4237 = vmatmul.f32.gmra.mxu1 %v8785_v24  ;;  %v8789_v15 = vsel %vm1068_vm5, %v4036_v22, %v4037_v46  ;;  %v4440_v22 = vld [vmem:[#allocation8 + $0x3d0] sm:$0xff]  ;;  %v3371_v46 = vadd.f32 %v3370_v58, %v3257_v34  ;;  %v3376_v34 = vpop.f32.mrf.mxu2  ;;  %v4437_v58 = vld [vmem:[#allocation8 + $0x3b8] sm:$0xff] }
 0x5a0   : > { %v3695_v52 = vperm.slane %v3594_v6, %v8478_v10  ;;  %v3478_v63 = vadd.f32 %v3477_v62, %v3365_v5  ;;  %4278 = vmatmul.f32.gmra.mxu2 %v8789_v15  ;;  %4507 = vmatpush.msra.mxu3 %v4441_v19  ;;  %v4438_v62 = vld [vmem:[#allocation8 + $0x3c0] sm:$0xff]  ;;  %v4433_v8 = vld [vmem:[#allocation8 + $0x398] sm:$0xff] }
 0x5a1   : > { %v3102_v38 = vpop.f32.mrf.mxu0 }
 0x5a2   : > { %v3786_v3 = vrot.slane %v3695_v52, 4  ;;  %v3527_v26 = vadd.f32 %v3478_v63, %v3091_v48  ;;  %4508 = vmatpush.msra.mxu3 %v4440_v22  ;;  %v3263_v48 = vpop.f32.mrf.mxu1 }
 0x5a4   : > { %v3850_v44 = vmax.f32 %v3695_v52, %v3786_v3  ;;  %v3563_v23 = vadd.f32 %v8467_v42, %v3527_v26  ;;  %v3849_v42 = vmax.f32 %v3691_v28, %v3785_v45  ;;  %4509 = vmatpush.msra.mxu3 %v4439_v25  ;;  %v9779_v52 = vld [vmem:[#allocation92_spill] sm:$0xff]  ;;  %v3374_v28 = vadd.f32 %v3373_v20, %v3260_v13 }
 0x5a5   : > { %v3097_v63 = vadd.f32 %v3096_v14, %v9779_v52  ;;  %v3100_v45 = vadd.f32 %v3099_v36, %v8431_v37  ;;  %v4435_v14 = vld [vmem:[#allocation8 + $0x3a8] sm:$0xff]  ;;  %v4432_v25 = vld [vmem:[#allocation8 + $0x390] sm:$0xff] }
 0x5a6   : > { %v3892_v12 = vsel %vm3860_vm10, %v3850_v44, -inf  ;;  %v3595_v56 = vmax.f32 %v3563_v23, 0.0  ;;  %v3894_v40 = vsel %vm3860_vm10, %v3849_v42, -inf  ;;  %4510 = vmatpush.msra.mxu3 %v4438_v62  ;;  %v4082_v44 = vld [vmem:[#allocation8 + $0xf0] sm:$0xff]  ;;  %v4081_v23 = vld [vmem:[#allocation8 + $0xe8] sm:$0xff] }
 0x5a7   : > { %v3893_v0 = vmax.f32 %v3891_v59, %v3892_v12  ;;  %v3480_v29 = vpop.f32.mrf.mxu3  ;;  %4333 = vmatpush.msra.mxu0 %v4082_v44  ;;  %v4436_v59 = vld [vmem:[#allocation8 + $0x3b0] sm:$0xff]  ;;  %v3379_v22 = vpop.f32.mrf.mxu2 }
 0x5a8   : > { %v3699_v32 = vperm.slane %v3595_v56, %v8478_v10  ;;  %v3481_v55 = vadd.f32 %v3480_v29, %v3368_v43  ;;  %4511 = vmatpush.msra.mxu3 %v4437_v58 }
 0x5a9   : > { %3947 = vst [vmem:[#allocation1 + $0x10] ss:$2 sm:$0xff] %v3893_v0  ;;  %4334 = vmatpush.msra.mxu0 %v4081_v23 }
 0x5aa   : > { %v3787_v61 = vrot.slane %v3699_v32, 4  ;;  %v3528_v4 = vadd.f32 %v3481_v55, %v3094_v9  ;;  %4512 = vmatpush.msra.mxu3 %v4436_v59  ;;  %v3266_v9 = vpop.f32.mrf.mxu1 }
 0x5ac   : > { %v3851_v47 = vmax.f32 %v3699_v32, %v3787_v61  ;;  %v3564_v30 = vadd.f32 %v8806_v51, %v3528_v4  ;;  %4513 = vmatpush.msra.mxu3 %v4435_v14  ;;  %v3377_v61 = vadd.f32 %v3376_v34, %v3263_v48  ;;  %v4431_v48 = vld [vmem:[#allocation8 + $0x388] sm:$0xff] }
 0x5ae   : > { %v3895_v18 = vsel %vm3860_vm10, %v3851_v47, -inf  ;;  %v3596_v3 = vmax.f32 %v3564_v30, 0.0  ;;  %4514 = vmatpush.msra.mxu3 %v4434_v17  ;;  %v3105_v47 = vpop.f32.mrf.mxu0  ;;  %v3103_v30 = vadd.f32 %v3102_v38, %v8439_v27 }
 0x5af   : > { %v3896_v2 = vmax.f32 %v3894_v40, %v3895_v18  ;;  %v3483_v5 = vpop.f32.mrf.mxu3 }
 0x5b0   : > { %v3484_v6 = vadd.f32 %v3483_v5, %v3371_v46  ;;  %v3703_v29 = vperm.slane %v3596_v3, %v8478_v10  ;;  %v4079_v5 = vld [vmem:[#allocation8 + $0xd8] sm:$0xff]  ;;  %4515 = vmatpush.msra.mxu3 %v4433_v8 }
 0x5b1   : > { %3948 = vst [vmem:[#allocation1 + $0x11] ss:$2 sm:$0xff] %v3896_v2  ;;  %v4080_v2 = vld [vmem:[#allocation8 + $0xe0] sm:$0xff] }
 0x5b2   : > { %v3529_v26 = vadd.f32 %v3484_v6, %v3097_v63  ;;  %v3788_v19 = vrot.slane %v3703_v29, 4  ;;  %4335 = vmatpush.msra.mxu0 %v4080_v2  ;;  %4516 = vmatpush.msra.mxu3 %v4432_v25  ;;  %v4426_v25 = vld [vmem:[#allocation8 + $0x360] sm:$0xff] }
 0x5b4   : > { %v3565_v49 = vadd.f32 %v8806_v51, %v3529_v26  ;;  %4336 = vmatpush.msra.mxu0 %v4079_v5  ;;  %v3852_v52 = vmax.f32 %v3703_v29, %v3788_v19  ;;  %4517 = vmatpush.msra.mxu3 %v4431_v48  ;;  %v3382_v29 = vpop.f32.mrf.mxu2  ;;  %v4427_v19 = vld [vmem:[#allocation8 + $0x368] sm:$0xff]  ;;  %v4075_v48 = vld [vmem:[#allocation8 + $0xb8] sm:$0xff] }
 0x5b6   : > { %v3597_v40 = vmax.f32 %v3565_v49, 0.0  ;;  %v3897_v27 = vsel %vm3860_vm10, %v3852_v52, -inf  ;;  %v3108_v14 = vpop.f32.mrf.mxu0  ;;  %v4078_v49 = vld [vmem:[#allocation8 + $0xd0] sm:$0xff] }
 0x5b7   : > { %v3486_v41 = vpop.f32.mrf.mxu3  ;;  %4337 = vmatpush.msra.mxu0 %v4078_v49 }
 0x5b8   : > { %v3487_v12 = vadd.f32 %v3486_v41, %v3374_v28  ;;  %v3949_v56 = vld.sshfl [vmem:[#allocation1 + $0x10] sm:$0xff pattern:$0x75316420]  ;;  %v3707_v63 = vperm.slane %v3597_v40, %v8478_v10  ;;  %v4430_v28 = vld [vmem:[#allocation8 + $0x380] sm:$0xff] }
 0x5b9   : > { %v8811_v0 = vrot.slane %v3949_v56, 7  ;;  %4518 = vmatpush.msra.mxu3 %v4430_v28 }
 0x5ba   : > { %v3530_v43 = vadd.f32 %v3487_v12, %v3100_v45  ;;  %v3789_v38 = vrot.slane %v3707_v63, 4  ;;  %v3269_v45 = vpop.f32.mrf.mxu1  ;;  %v3380_v12 = vadd.f32 %v3379_v22, %v3266_v9  ;;  %v4097_v9 = vld [vmem:[#allocation8 + $0x168] sm:$0xff] }
 0x5bb   : > { %5894 = vmatmul.msk.f32.gmra.mxu0 %vm6874_vm9, %v8811_v0  ;;  %5912 = vmatmul.msk.f32.gmra.mxu3 %vm6874_vm9, %v8811_v0  ;;  %v3977_v37 = vsel %vm1936_vm8, 0.0, %v8811_v0  ;;  %v3985_v32 = vsel %vm1936_vm8, %v8811_v0, 0.0 }
 0x5bc   : > { %v3566_v13 = vadd.f32 %v8806_v51, %v3530_v43  ;;  %v4013_v36 = vrot.slane %v3977_v37, 1  ;;  %v4014_v42 = vrot.slane %v3985_v32, 1  ;;  %v4039_v55 = vrot.slane %v3977_v37, 2  ;;  %v4077_v43 = vld [vmem:[#allocation8 + $0xc8] sm:$0xff]  ;;  %v4099_v37 = vld [vmem:[#allocation8 + $0x178] sm:$0xff] }
 0x5bd   : > { %v4040_v20 = vrot.slane %v3985_v32, 2  ;;  %v3853_v32 = vmax.f32 %v3707_v63, %v3789_v38  ;;  %4373 = vmatpush.msra.mxu1 %v4099_v37  ;;  %4338 = vmatpush.msra.mxu0 %v4077_v43  ;;  %v9781_v38 = vld [vmem:[#allocation25_spill] sm:$0xff]  ;;  %v4072_v43 = vld [vmem:[#allocation8 + $0xa0] sm:$0xff] }
 0x5be   : > { %v3598_v18 = vmax.f32 %v3566_v13, 0.0  ;;  %v8827_v4 = vsel %vm955_vm4, %v4013_v36, %v4014_v42  ;;  %v4429_v36 = vld [vmem:[#allocation8 + $0x378] sm:$0xff]  ;;  %v4098_v42 = vld [vmem:[#allocation8 + $0x170] sm:$0xff]  ;;  %v3111_v28 = vpop.f32.mrf.mxu0  ;;  %v4422_v37 = vld [vmem:[#allocation8 + $0x340] sm:$0xff] }
 0x5bf   : > { %v3489_v46 = vpop.f32.mrf.mxu3  ;;  %4240 = vmatmul.f32.gmra.mxu1 %v8827_v4  ;;  %v8831_v60 = vsel %vm1068_vm5, %v4039_v55, %v4040_v20  ;;  %4462 = vmatpush.msra.mxu2 %v4429_v36  ;;  %v9780_v55 = vld [vmem:[#allocation34_spill] sm:$0xff]  ;;  %v3900_v40 = vsel %vm3860_vm10, %v3853_v32, -inf  ;;  %v9782_v32 = vld [vmem:[#allocation35_spill] sm:$0xff] }
 0x5c0   : > { %v3711_v6 = vperm.slane %v3598_v18, %v8478_v10  ;;  %v3490_v62 = vadd.f32 %v3489_v46, %v3377_v61  ;;  %4281 = vmatmul.f32.gmra.mxu2 %v8831_v60  ;;  %v4428_v61 = vld [vmem:[#allocation8 + $0x370] sm:$0xff]  ;;  %v3106_v20 = vadd.f32 %v3105_v47, %v9780_v55  ;;  %4374 = vmatpush.msra.mxu1 %v4098_v42  ;;  %v4096_v46 = vld [vmem:[#allocation8 + $0x160] sm:$0xff]  ;;  %v4071_v42 = vld [vmem:[#allocation8 + $0x98] sm:$0xff] }
 0x5c1   : > { %4463 = vmatpush.msra.mxu2 %v4428_v61  ;;  %v4091_v61 = vld [vmem:[#allocation8 + $0x138] sm:$0xff] }
 0x5c2   : > { %v3790_v34 = vrot.slane %v3711_v6, 4  ;;  %v3531_v58 = vadd.f32 %v3490_v62, %v3103_v30  ;;  %4375 = vmatpush.msra.mxu1 %v4097_v9  ;;  %v3383_v30 = vadd.f32 %v3382_v29, %v3269_v45  ;;  %v3272_v47 = vpop.f32.mrf.mxu1  ;;  %v4076_v62 = vld [vmem:[#allocation8 + $0xc0] sm:$0xff]  ;;  %v4423_v45 = vld [vmem:[#allocation8 + $0x348] sm:$0xff]  ;;  %v4421_v9 = vld [vmem:[#allocation8 + $0x338] sm:$0xff] }
 0x5c3   : > { %4464 = vmatpush.msra.mxu2 %v4427_v19  ;;  %4339 = vmatpush.msra.mxu0 %v4076_v62  ;;  %v4092_v29 = vld [vmem:[#allocation8 + $0x140] sm:$0xff] }
 0x5c4   : > { %v3854_v3 = vmax.f32 %v3711_v6, %v3790_v34  ;;  %v3567_v26 = vadd.f32 %v8806_v51, %v3531_v58  ;;  %4376 = vmatpush.msra.mxu1 %v4096_v46  ;;  %v3385_v6 = vpop.f32.mrf.mxu2  ;;  %v4074_v34 = vld [vmem:[#allocation8 + $0xb0] sm:$0xff]  ;;  %v4095_v58 = vld [vmem:[#allocation8 + $0x158] sm:$0xff] }
 0x5c5   : > { %4465 = vmatpush.msra.mxu2 %v4426_v25  ;;  %4340 = vmatpush.msra.mxu0 %v4075_v48 }
 0x5c6   : > { %v3898_v44 = vsel %vm3860_vm10, %v3854_v3, -inf  ;;  %v3599_v23 = vmax.f32 %v3567_v26, 0.0  ;;  %4377 = vmatpush.msra.mxu1 %v4095_v58  ;;  %v4425_v3 = vld [vmem:[#allocation8 + $0x358] sm:$0xff]  ;;  %v4094_v26 = vld [vmem:[#allocation8 + $0x150] sm:$0xff]  ;;  %v3114_v62 = vpop.f32.mrf.mxu0 }
 0x5c7   : > { %v3899_v41 = vmax.f32 %v3897_v27, %v3898_v44  ;;  %v3492_v59 = vpop.f32.mrf.mxu3  ;;  %v4424_v27 = vld [vmem:[#allocation8 + $0x350] sm:$0xff]  ;;  %v3109_v44 = vadd.f32 %v3108_v14, %v9781_v38  ;;  %4466 = vmatpush.msra.mxu2 %v4425_v3  ;;  %4341 = vmatpush.msra.mxu0 %v4074_v34 }
 0x5c8   : > { %v3715_v56 = vperm.slane %v3599_v23, %v8478_v10  ;;  %v3493_v13 = vadd.f32 %v3492_v59, %v3380_v12  ;;  %v3386_v23 = vadd.f32 %v3385_v6, %v3272_v47  ;;  %v4073_v59 = vld [vmem:[#allocation8 + $0xa8] sm:$0xff]  ;;  %4378 = vmatpush.msra.mxu1 %v4094_v26  ;;  %v4420_v6 = vld [vmem:[#allocation8 + $0x330] sm:$0xff] }
 0x5c9   : > { %3950 = vst [vmem:[#allocation1 + $0x20] ss:$2 sm:$0xff] %v3899_v41  ;;  %v4093_v41 = vld [vmem:[#allocation8 + $0x148] sm:$0xff]  ;;  %4467 = vmatpush.msra.mxu2 %v4424_v27  ;;  %4342 = vmatpush.msra.mxu0 %v4073_v59 }
 0x5ca   : > { %v3791_v17 = vrot.slane %v3715_v56, 4  ;;  %v3532_v2 = vadd.f32 %v3493_v13, %v3106_v20  ;;  %4379 = vmatpush.msra.mxu1 %v4093_v41  ;;  %v3275_v19 = vpop.f32.mrf.mxu1  ;;  %v4089_v26 = vld [vmem:[#allocation8 + $0x128] sm:$0xff]  ;;  %v9783_v41 = vld [vmem:[#allocation90_spill] sm:$0xff] }
 0x5cb   : > { %4468 = vmatpush.msra.mxu2 %v4423_v45  ;;  %4343 = vmatpush.msra.mxu0 %v4072_v43  ;;  %v4419_v27 = vld [vmem:[#allocation8 + $0x328] sm:$0xff]  ;;  %v3115_v59 = vadd.f32 %v3114_v62, %v9783_v41 }
 0x5cc   : > { %v3855_v8 = vmax.f32 %v3715_v56, %v3791_v17  ;;  %v3568_v52 = vadd.f32 %v8806_v51, %v3532_v2  ;;  %v3112_v17 = vadd.f32 %v3111_v28, %v9782_v32  ;;  %4380 = vmatpush.msra.mxu1 %v4092_v29  ;;  %v4418_v29 = vld [vmem:[#allocation8 + $0x320] sm:$0xff] }
 0x5cd   : > { %4469 = vmatpush.msra.mxu2 %v4422_v37  ;;  %4344 = vmatpush.msra.mxu0 %v4071_v42 }
 0x5ce   : > { %v3901_v18 = vsel %vm3860_vm10, %v3855_v8, -inf  ;;  %v3600_v12 = vmax.f32 %v3568_v52, 0.0  ;;  %4381 = vmatpush.msra.mxu1 %v4091_v61  ;;  %v4086_v61 = vld [vmem:[#allocation8 + $0x110] sm:$0xff] }
 0x5cf   : > { %v3902_v5 = vmax.f32 %v3900_v40, %v3901_v18  ;;  %v3495_v22 = vpop.f32.mrf.mxu3  ;;  %v3388_v40 = vpop.f32.mrf.mxu2  ;;  %4470 = vmatpush.msra.mxu2 %v4421_v9 }
 0x5d0   : > { %v3496_v63 = vadd.f32 %v3495_v22, %v3383_v30  ;;  %v3719_v55 = vperm.slane %v3600_v12, %v8478_v10  ;;  %v4090_v22 = vld [vmem:[#allocation8 + $0x130] sm:$0xff]  ;;  %v3389_v46 = vadd.f32 %v3388_v40, %v3275_v19 }
 0x5d1   : > { %3951 = vst [vmem:[#allocation1 + $0x21] ss:$2 sm:$0xff] %v3902_v5  ;;  %v4070_v5 = vld [vmem:[#allocation8 + $0x90] sm:$0xff]  ;;  %4382 = vmatpush.msra.mxu1 %v4090_v22  ;;  %4471 = vmatpush.msra.mxu2 %v4420_v6  ;;  %v4459_v6 = vld [vmem:[#allocation8 + $0x468] sm:$0xff] }
 0x5d2   : > { %v3533_v56 = vadd.f32 %v3496_v63, %v3109_v44  ;;  %v4069_v63 = vld [vmem:[#allocation8 + $0x88] sm:$0xff]  ;;  %v3792_v34 = vrot.slane %v3719_v55, 4  ;;  %4345 = vmatpush.msra.mxu0 %v4070_v5  ;;  %v4460_v22 = vld [vmem:[#allocation8 + $0x470] sm:$0xff] }
 0x5d3   : > { %4383 = vmatpush.msra.mxu1 %v4089_v26  ;;  %4472 = vmatpush.msra.mxu2 %v4419_v27  ;;  %v4415_v5 = vld [vmem:[#allocation8 + $0x308] sm:$0xff] }
 0x5d4   : > { %v3569_v20 = vadd.f32 %v8806_v51, %v3533_v56  ;;  %4346 = vmatpush.msra.mxu0 %v4069_v63  ;;  %v4088_v56 = vld [vmem:[#allocation8 + $0x120] sm:$0xff] }
 0x5d5   : > { %4384 = vmatpush.msra.mxu1 %v4088_v56  ;;  %4473 = vmatpush.msra.mxu2 %v4418_v29 }
 0x5d6   : > { %v3601_v58 = vmax.f32 %v3569_v20, 0.0  ;;  %v4461_v20 = vld [vmem:[#allocation8 + $0x478] sm:$0xff] }
 0x5d7   : > { %v3498_v49 = vpop.f32.mrf.mxu3 }
 0x5d8   : > { %v3499_v13 = vadd.f32 %v3498_v49, %v3386_v23  ;;  %v3952_v14 = vld.sshfl [vmem:[#allocation1 + $0x20] sm:$0xff pattern:$0x75316420]  ;;  %v4068_v23 = vld [vmem:[#allocation8 + $0x80] sm:$0xff]  ;;  %v3856_v49 = vmax.f32 %v3719_v55, %v3792_v34  ;;  %v3723_v43 = vperm.slane %v3601_v58, %v8478_v10  ;;  %v4457_v58 = vld [vmem:[#allocation8 + $0x458] sm:$0xff] }
 0x5d9   : > { %v8847_v36 = vrot.slane %v3952_v14, 7  ;;  %4347 = vmatpush.msra.mxu0 %v4068_v23  ;;  %v4458_v34 = vld [vmem:[#allocation8 + $0x460] sm:$0xff] }
 0x5da   : > { %v3534_v8 = vadd.f32 %v3499_v13, %v3112_v17  ;;  %v4087_v17 = vld [vmem:[#allocation8 + $0x118] sm:$0xff]  ;;  %v3903_v55 = vsel %vm3860_vm10, %v3856_v49, -inf  ;;  %v3793_v9 = vrot.slane %v3723_v43, 4 }
 0x5db   : > { %5896 = vmatmul.msk.f32.gmra.mxu0 %vm6874_vm9, %v8847_v36  ;;  %5914 = vmatmul.msk.f32.gmra.mxu3 %vm6874_vm9, %v8847_v36  ;;  %v3978_v18 = vsel %vm1936_vm8, 0.0, %v8847_v36  ;;  %v3986_v2 = vsel %vm1936_vm8, %v8847_v36, 0.0  ;;  %v4417_v13 = vld [vmem:[#allocation8 + $0x318] sm:$0xff] }
 0x5dc   : > { %v3570_v25 = vadd.f32 %v8806_v51, %v3534_v8  ;;  %v4016_v30 = vrot.slane %v3978_v18, 1  ;;  %v4017_v47 = vrot.slane %v3986_v2, 1  ;;  %v4042_v48 = vrot.slane %v3978_v18, 2  ;;  %4385 = vmatpush.msra.mxu1 %v4087_v17  ;;  %v4416_v8 = vld [vmem:[#allocation8 + $0x310] sm:$0xff]  ;;  %4544 = vmatpush.msrb.mxu0 %v4461_v20  ;;  %v4085_v18 = vld [vmem:[#allocation8 + $0x108] sm:$0xff] }
 0x5dd   : > { %v4043_v52 = vrot.slane %v3986_v2, 2  ;;  %4474 = vmatpush.msra.mxu2 %v4417_v13  ;;  %v4452_v17 = vld [vmem:[#allocation8 + $0x430] sm:$0xff]  ;;  %v4451_v13 = vld [vmem:[#allocation8 + $0x428] sm:$0xff] }
 0x5de   : > { %v3602_v28 = vmax.f32 %v3570_v25, 0.0  ;;  %v8863_v3 = vsel %vm955_vm4, %v4016_v30, %v4017_v47  ;;  %4386 = vmatpush.msra.mxu1 %v4086_v61  ;;  %4545 = vmatpush.msrb.mxu0 %v4460_v22  ;;  %v4414_v25 = vld [vmem:[#allocation8 + $0x300] sm:$0xff]  ;;  %v3857_v30 = vmax.f32 %v3723_v43, %v3793_v9  ;;  %v4794_v61 = vld [vmem:[#allocation10 + $0x1e8] sm:$0xff]  ;;  %v4792_v9 = vld [vmem:[#allocation10 + $0x1d8] sm:$0xff] }
 0x5df   : > { %v3501_v38 = vpop.f32.mrf.mxu3  ;;  %4243 = vmatmul.f32.gmra.mxu1 %v8863_v3  ;;  %v8867_v44 = vsel %vm1068_vm5, %v4042_v48, %v4043_v52  ;;  %4475 = vmatpush.msra.mxu2 %v4416_v8  ;;  %v4454_v43 = vld [vmem:[#allocation8 + $0x440] sm:$0xff]  ;;  %v4790_v22 = vld [vmem:[#allocation10 + $0x1c8] sm:$0xff] }
 0x5e0   : > { %v3727_v45 = vperm.slane %v3602_v28, %v8478_v10  ;;  %v3502_v12 = vadd.f32 %v3501_v38, %v3389_v46  ;;  %4284 = vmatmul.f32.gmra.mxu2 %v8867_v44  ;;  %v4084_v46 = vld [vmem:[#allocation8 + $0x100] sm:$0xff]  ;;  %4387 = vmatpush.msra.mxu1 %v4085_v18  ;;  %v3906_v48 = vsel %vm3860_vm10, %v3857_v30, -inf  ;;  %v4456_v28 = vld [vmem:[#allocation8 + $0x450] sm:$0xff]  ;;  %v9784_v38 = vld [vmem:[#allocation83_spill] sm:$0xff] }
 0x5e1   : > { %4476 = vmatpush.msra.mxu2 %v4415_v5  ;;  %4546 = vmatpush.msrb.mxu0 %v4459_v6  ;;  %v4789_v30 = vld [vmem:[#allocation10 + $0x1c0] sm:$0xff] }
 0x5e2   : > { %v3794_v37 = vrot.slane %v3727_v45, 4  ;;  %v3535_v32 = vadd.f32 %v3502_v12, %v3115_v59  ;;  %4388 = vmatpush.msra.mxu1 %v4084_v46  ;;  %v4455_v59 = vld [vmem:[#allocation8 + $0x448] sm:$0xff]  ;;  %v4728_v46 = vld [vmem:[#allocation10 + $0x78] sm:$0xff] }
 0x5e3   : > { %4519 = vmatmul.f32.vlgmr.msra.gmra.mxu3 %v8619_v7  ;;  %4477 = vmatpush.msra.mxu2 %v4414_v25  ;;  %v4727_v25 = vld [vmem:[#allocation10 + $0x70] sm:$0xff] }
 0x5e4   : > { %v3858_v14 = vmax.f32 %v3727_v45, %v3794_v37  ;;  %v3571_v42 = vadd.f32 %v8806_v51, %v3535_v32  ;;  %4547 = vmatpush.msrb.mxu0 %v4458_v34  ;;  %v4453_v37 = vld [vmem:[#allocation8 + $0x438] sm:$0xff]  ;;  %v9785_v32 = vld [vmem:[#allocation68_spill] sm:$0xff] }
 0x5e6   : > { %v3904_v19 = vsel %vm3860_vm10, %v3858_v14, -inf  ;;  %v3603_v40 = vmax.f32 %v3571_v42, 0.0  ;;  %4548 = vmatpush.msrb.mxu0 %v4457_v58  ;;  %v4450_v14 = vld [vmem:[#allocation8 + $0x420] sm:$0xff]  ;;  %v4724_v58 = vld [vmem:[#allocation10 + $0x58] sm:$0xff] }
 0x5e7   : > { %v3905_v2 = vmax.f32 %v3903_v55, %v3904_v19 }
 0x5e8   : > { %v3731_v51 = vperm.slane %v3603_v40, %v8478_v10  ;;  %4549 = vmatpush.msrb.mxu0 %v4456_v28  ;;  %v4791_v40 = vld [vmem:[#allocation10 + $0x1d0] sm:$0xff] }
 0x5e9   : > { %3953 = vst [vmem:[#allocation1 + $0x30] ss:$2 sm:$0xff] %v3905_v2  ;;  %v4723_v28 = vld [vmem:[#allocation10 + $0x50] sm:$0xff] }
 0x5ea   : > { %v3795_v47 = vrot.slane %v3731_v51, 4  ;;  %4550 = vmatpush.msrb.mxu0 %v4455_v59  ;;  %v4828_v59 = vld [vmem:[#allocation10 + $0x2f8] sm:$0xff] }
 0x5eb   : > { %4522 = vmatmul.f32.gmra.mxu3 %v8684_v1 }
 0x5ec   : > { %v3859_v62 = vmax.f32 %v3731_v51, %v3795_v47  ;;  %4551 = vmatpush.msrb.mxu0 %v4454_v43  ;;  %4911 = vmatpush.msrb.mxu3 %v4828_v59  ;;  %v4786_v43 = vld [vmem:[#allocation10 + $0x1a8] sm:$0xff]  ;;  %v4783_v59 = vld [vmem:[#allocation10 + $0x190] sm:$0xff] }
 0x5ee   : > { %v3907_v52 = vsel %vm3860_vm10, %v3859_v62, -inf  ;;  %4552 = vmatpush.msrb.mxu0 %v4453_v37  ;;  %v4810_v37 = vld [vmem:[#allocation10 + $0x268] sm:$0xff] }
 0x5ef   : > { %v3908_v63 = vmax.f32 %v3906_v48, %v3907_v52  ;;  %v4726_v48 = vld [vmem:[#allocation10 + $0x68] sm:$0xff]  ;;  %v4725_v52 = vld [vmem:[#allocation10 + $0x60] sm:$0xff] }
 0x5f0   : > { %4553 = vmatpush.msrb.mxu0 %v4452_v17  ;;  %v4826_v17 = vld [vmem:[#allocation10 + $0x2e8] sm:$0xff] }
 0x5f1   : > { %3954 = vst [vmem:[#allocation1 + $0x31] ss:$2 sm:$0xff] %v3908_v63  ;;  %v4788_v63 = vld [vmem:[#allocation10 + $0x1b8] sm:$0xff] }
 0x5f2   : > { %4554 = vmatpush.msrb.mxu0 %v4451_v13  ;;  %v4720_v13 = vld [vmem:[#allocation10 + $0x38] sm:$0xff] }
 0x5f3   : > { %4525 = vmatmul.f32.gmra.mxu3 %v8746_v35 }
 0x5f4   : > { %4555 = vmatpush.msrb.mxu0 %v4450_v14 }
 0x5f8   : > { %v3955_v26 = vld.sshfl [vmem:[#allocation1 + $0x30] sm:$0xff pattern:$0x75316420] }
 0x5f9   : > { %v3963_v27 = vrot.slane %v3955_v26, 7  ;;  %v4787_v26 = vld [vmem:[#allocation10 + $0x1b0] sm:$0xff] }
 0x5fb   : > { %5898 = vmatmul.msk.f32.gmra.mxu0 %vm6874_vm9, %v3963_v27  ;;  %4528 = vmatmul.f32.gmra.mxu3 %v9784_v38  ;;  %v3979_v23 = vsel %vm1936_vm8, 0.0, %v3963_v27  ;;  %v3987_v41 = vsel %vm1936_vm8, %v3963_v27, 0.0 }
 0x5fc   : > { %v4107_v45 = vrot.slane %v3979_v23, 1  ;;  %v4108_v12 = vrot.slane %v3987_v41, 1  ;;  %v4115_v56 = vrot.slane %v3979_v23, 2  ;;  %v4116_v35 = vrot.slane %v3987_v41, 2  ;;  %v4812_v41 = vld [vmem:[#allocation10 + $0x278] sm:$0xff] }
 0x5fd   : > { %4870 = vmatpush.msrb.mxu2 %v4812_v41  ;;  %v4715_v41 = vld [vmem:[#allocation10 + $0x10] sm:$0xff] }
 0x5fe   : > { %v4109_v29 = vsel %vm955_vm4, %v4107_v45, %v4108_v12  ;;  %v8889_v49 = vsel %vm1068_vm5, %v4115_v56, %v4116_v35  ;;  %v4722_v45 = vld [vmem:[#allocation10 + $0x48] sm:$0xff]  ;;  %v4811_v56 = vld [vmem:[#allocation10 + $0x270] sm:$0xff] }
 0x5ff   : > { %4246 = vmatmul.f32.gmra.mxu1 %v4109_v29  ;;  %4287 = vmatmul.f32.gmra.mxu2 %v8889_v49  ;;  %v4827_v35 = vld [vmem:[#allocation10 + $0x2f0] sm:$0xff] }
 0x600   : > { %4871 = vmatpush.msrb.mxu2 %v4811_v56  ;;  %4912 = vmatpush.msrb.mxu3 %v4827_v35  ;;  %v4804_v56 = vld [vmem:[#allocation10 + $0x238] sm:$0xff] }
 0x601   : > { %v4820_v35 = vld [vmem:[#allocation10 + $0x2b8] sm:$0xff] }
 0x602   : > { %4872 = vmatpush.msrb.mxu2 %v4810_v37  ;;  %4913 = vmatpush.msrb.mxu3 %v4826_v17  ;;  %v4803_v37 = vld [vmem:[#allocation10 + $0x230] sm:$0xff] }
 0x603   : > { %4348 = vmatmul.f32.vlgmr.msra.gmra.mxu0 %v9784_v38  ;;  %4531 = vmatmul.f32.gmra.mxu3 %v8827_v4  ;;  %v4819_v17 = vld [vmem:[#allocation10 + $0x2b0] sm:$0xff] }
 0x607   : > { %4389 = vmatmul.f32.vlgmr.msra.gmra.mxu1 %v9785_v32  ;;  %5916 = vmatmul.msk.f32.vlgmr.msra.gmra.mxu2 %vm6874_vm9, %v8597_v39  ;;  %v4449_v39 = vld [vmem:[#allocation8 + $0x418] sm:$0xff] }
 0x608   : > { %4556 = vmatpush.msrb.mxu0 %v4449_v39  ;;  %v4809_v39 = vld [vmem:[#allocation10 + $0x260] sm:$0xff] }
 0x609   : > { %4873 = vmatpush.msrb.mxu2 %v4809_v39  ;;  %v4713_v39 = vld [vmem:[#allocation10] sm:$0xff] }
 0x60b   : > { %4351 = vmatmul.f32.gmra.mxu0 %v8549_v33  ;;  %4534 = vmatmul.f32.gmra.mxu3 %v8863_v3  ;;  %v4448_v33 = vld [vmem:[#allocation8 + $0x410] sm:$0xff] }
 0x60c   : > { %4557 = vmatpush.msrb.mxu0 %v4448_v33  ;;  %v4825_v33 = vld [vmem:[#allocation10 + $0x2e0] sm:$0xff] }
 0x60d   : > { %4914 = vmatpush.msrb.mxu3 %v4825_v33  ;;  %v4802_v33 = vld [vmem:[#allocation10 + $0x228] sm:$0xff] }
 0x60f   : > { %4392 = vmatmul.f32.gmra.mxu1 %v8555_v54  ;;  %5918 = vmatmul.msk.f32.gmra.mxu2 %vm6874_vm9, %v8664_v16  ;;  %v4447_v54 = vld [vmem:[#allocation8 + $0x408] sm:$0xff]  ;;  %v8934_v16 = vpop.f32.mrf.mxu0 }
 0x610   : > { %4558 = vmatpush.msrb.mxu0 %v4447_v54  ;;  %v4719_v54 = vld [vmem:[#allocation10 + $0x30] sm:$0xff] }
 0x613   : > { %4354 = vmatmul.f32.gmra.mxu0 %v8619_v7  ;;  %4537 = vmatmul.f32.gmra.mxu3 %v4109_v29  ;;  %v4446_v7 = vld [vmem:[#allocation8 + $0x400] sm:$0xff] }
 0x614   : > { %4559 = vmatpush.msrb.mxu0 %v4446_v7  ;;  %v4721_v29 = vld [vmem:[#allocation10 + $0x40] sm:$0xff] }
 0x615   : > { %v4785_v7 = vld [vmem:[#allocation10 + $0x1a0] sm:$0xff] }
 0x616   : > { %4952 = vmatpush.msra.mxu0 %v4728_v46  ;;  %v4717_v46 = vld [vmem:[#allocation10 + $0x20] sm:$0xff] }
 0x617   : > { %4395 = vmatmul.f32.gmra.mxu1 %v8623_v50  ;;  %5920 = vmatmul.msk.f32.gmra.mxu2 %vm6874_vm9, %v8730_v57 }
 0x618   : > { %4953 = vmatpush.msra.mxu0 %v4727_v25 }
 0x61a   : > { %4954 = vmatpush.msra.mxu0 %v4726_v48  ;;  %v4806_v48 = vld [vmem:[#allocation10 + $0x248] sm:$0xff] }
 0x61b   : > { %4357 = vmatmul.f32.gmra.mxu0 %v8684_v1  ;;  %4540 = vmatmul.f32.gmra.mxu3 %v9784_v38  ;;  %v8937_v1 = vpop.f32.mrf.mxu0 }
 0x61c   : > { %4955 = vmatpush.msra.mxu0 %v4725_v52  ;;  %v4822_v52 = vld [vmem:[#allocation10 + $0x2c8] sm:$0xff] }
 0x61e   : > { %4956 = vmatpush.msra.mxu0 %v4724_v58 }
 0x61f   : > { %4398 = vmatmul.f32.gmra.mxu1 %v8688_v21  ;;  %5922 = vmatmul.msk.f32.gmra.mxu2 %vm6874_vm9, %v7321_v53 }
 0x620   : > { %4957 = vmatpush.msra.mxu0 %v4723_v28  ;;  %v4805_v28 = vld [vmem:[#allocation10 + $0x240] sm:$0xff] }
 0x622   : > { %4958 = vmatpush.msra.mxu0 %v4722_v45 }
 0x623   : > { %4360 = vmatmul.f32.gmra.mxu0 %v9784_v38  ;;  %v8940_v57 = vpop.f32.mrf.mxu0 }
 0x624   : > { %4959 = vmatpush.msra.mxu0 %v4721_v29  ;;  %v4714_v29 = vld [vmem:[#allocation10 + $0x8] sm:$0xff] }
 0x626   : > { %4960 = vmatpush.msra.mxu0 %v4720_v13 }
 0x627   : > { %4401 = vmatmul.f32.gmra.mxu1 %v9785_v32  ;;  %5924 = vmatmul.msk.f32.gmra.mxu2 %vm6874_vm9, %v8811_v0  ;;  %v8948_v0 = vpop.f32.mrf.mxu3 }
 0x628   : > { %4961 = vmatpush.msra.mxu0 %v4719_v54  ;;  %v4818_v54 = vld [vmem:[#allocation10 + $0x2a8] sm:$0xff] }
 0x62b   : > { %4363 = vmatmul.f32.gmra.mxu0 %v8785_v24  ;;  %v8943_v24 = vpop.f32.mrf.mxu0 }
 0x62f   : > { %4404 = vmatmul.f32.gmra.mxu1 %v8789_v15  ;;  %5926 = vmatmul.msk.f32.gmra.mxu2 %vm6874_vm9, %v8847_v36  ;;  %v8956_v36 = vpop.f32.mrf.mxu3 }
 0x633   : > { %4366 = vmatmul.f32.gmra.mxu0 %v8827_v4  ;;  %v8946_v15 = vpop.f32.mrf.mxu0 }
 0x637   : > { %4407 = vmatmul.f32.gmra.mxu1 %v8831_v60  ;;  %5928 = vmatmul.msk.f32.gmra.mxu2 %vm6874_vm9, %v3963_v27  ;;  %v8967_v8 = vpop.f32.mrf.mxu3 }
 0x63b   : > { %4369 = vmatmul.f32.gmra.mxu0 %v8863_v3  ;;  %v8951_v4 = vpop.f32.mrf.mxu0  ;;  %v4795_v3 = vld [vmem:[#allocation10 + $0x1f0] sm:$0xff] }
 0x63f   : > { %4410 = vmatmul.f32.gmra.mxu1 %v8867_v44  ;;  %5930 = vmatmul.msk.f32.gmra.mxu2 %vm6874_vm9, %v7321_v53  ;;  %v8978_v5 = vpop.f32.mrf.mxu3 }
 0x643   : > { %4560 = vmatmul.f32.vlgmr.msrb.gmra.mxu0 %v8623_v50  ;;  %v4796_v50 = vld [vmem:[#allocation10 + $0x1f8] sm:$0xff] }
 0x644   : > { %4829 = vmatpush.msrb.mxu1 %v4796_v50 }
 0x646   : > { %4830 = vmatpush.msrb.mxu1 %v4795_v3  ;;  %v4808_v3 = vld [vmem:[#allocation10 + $0x258] sm:$0xff] }
 0x647   : > { %v8986_v62 = vpop.f32.mrf.mxu3  ;;  %4874 = vmatpush.msrb.mxu2 %v4808_v3  ;;  %v4801_v3 = vld [vmem:[#allocation10 + $0x220] sm:$0xff] }
 0x648   : > { %4831 = vmatpush.msrb.mxu1 %v4794_v61  ;;  %v4824_v61 = vld [vmem:[#allocation10 + $0x2d8] sm:$0xff] }
 0x649   : > { %4915 = vmatpush.msrb.mxu3 %v4824_v61  ;;  %v4817_v61 = vld [vmem:[#allocation10 + $0x2a0] sm:$0xff] }
 0x64b   : > { %4563 = vmatmul.f32.gmra.mxu0 %v8688_v21  ;;  %v8954_v21 = vpop.f32.mrf.mxu2 }
 0x64f   : > { %v8994_v12 = vpop.f32.mrf.mxu3 }
 0x653   : > { %4566 = vmatmul.f32.gmra.mxu0 %v8750_v11  ;;  %v8958_v11 = vpop.f32.mrf.mxu1 }
 0x658   : > { %v8960_v42 = vpop.f32.mrf.mxu0 }
 0x65b   : > { %4569 = vmatmul.f32.gmra.mxu0 %v9785_v32  ;;  %v8965_v20 = vpop.f32.mrf.mxu1 }
 0x663   : > { %4572 = vmatmul.f32.gmra.mxu0 %v8831_v60  ;;  %v8963_v60 = vpop.f32.mrf.mxu2  ;;  %v8974_v18 = vpop.f32.mrf.mxu1 }
 0x66b   : > { %4575 = vmatmul.f32.gmra.mxu0 %v8867_v44  ;;  %v4793_v44 = vld [vmem:[#allocation10 + $0x1e0] sm:$0xff]  ;;  %v8972_v19 = vpop.f32.mrf.mxu2  ;;  %v8982_v47 = vpop.f32.mrf.mxu1 }
 0x66c   : > { %4832 = vmatpush.msrb.mxu1 %v4793_v44  ;;  %v4718_v44 = vld [vmem:[#allocation10 + $0x28] sm:$0xff] }
 0x66d   : > { %4962 = vmatpush.msra.mxu0 %v4718_v44 }
 0x66e   : > { %4833 = vmatpush.msrb.mxu1 %v4792_v9  ;;  %v9002_v9 = vpop.f32.mrf.mxu3 }
 0x66f   : > { %4963 = vmatpush.msra.mxu0 %v4717_v46  ;;  %v4800_v46 = vld [vmem:[#allocation10 + $0x218] sm:$0xff] }
 0x670   : > { %4834 = vmatpush.msrb.mxu1 %v4791_v40  ;;  %v4807_v40 = vld [vmem:[#allocation10 + $0x250] sm:$0xff] }
 0x671   : > { %4875 = vmatpush.msrb.mxu2 %v4807_v40  ;;  %v4782_v40 = vld [vmem:[#allocation10 + $0x188] sm:$0xff] }
 0x672   : > { %4835 = vmatpush.msrb.mxu1 %v4790_v22  ;;  %v4823_v22 = vld [vmem:[#allocation10 + $0x2d0] sm:$0xff] }
 0x673   : > { %4578 = vmatmul.f32.gmra.mxu0 %v8889_v49  ;;  %v8980_v51 = vpop.f32.mrf.mxu2  ;;  %v8990_v27 = vpop.f32.mrf.mxu1  ;;  %4916 = vmatpush.msrb.mxu3 %v4823_v22  ;;  %v4781_v22 = vld [vmem:[#allocation10 + $0x180] sm:$0xff] }
 0x674   : > { %4836 = vmatpush.msrb.mxu1 %v4789_v30  ;;  %v4784_v30 = vld [vmem:[#allocation10 + $0x198] sm:$0xff]  ;;  %4876 = vmatpush.msrb.mxu2 %v4806_v48  ;;  %v4799_v48 = vld [vmem:[#allocation10 + $0x210] sm:$0xff] }
 0x675   : > { %4917 = vmatpush.msrb.mxu3 %v4822_v52  ;;  %v4815_v52 = vld [vmem:[#allocation10 + $0x290] sm:$0xff] }
 0x676   : > { %4837 = vmatpush.msrb.mxu1 %v4788_v63  ;;  %v4716_v63 = vld [vmem:[#allocation10 + $0x18] sm:$0xff]  ;;  %4877 = vmatpush.msrb.mxu2 %v4805_v28  ;;  %v4798_v28 = vld [vmem:[#allocation10 + $0x208] sm:$0xff] }
 0x677   : > { %4964 = vmatpush.msra.mxu0 %v4716_v63 }
 0x678   : > { %v8969_v55 = vpop.f32.mrf.mxu0  ;;  %4838 = vmatpush.msrb.mxu1 %v4787_v26  ;;  %v4821_v26 = vld [vmem:[#allocation10 + $0x2c0] sm:$0xff]  ;;  %4878 = vmatpush.msrb.mxu2 %v4804_v56 }
 0x679   : > { %4918 = vmatpush.msrb.mxu3 %v4821_v26  ;;  %4965 = vmatpush.msra.mxu0 %v4715_v41  ;;  %v4814_v26 = vld [vmem:[#allocation10 + $0x288] sm:$0xff]  ;;  %v4813_v56 = vld [vmem:[#allocation10 + $0x280] sm:$0xff] }
 0x67a   : > { %4839 = vmatpush.msrb.mxu1 %v4786_v43  ;;  %v9010_v43 = vpop.f32.mrf.mxu3  ;;  %4879 = vmatpush.msrb.mxu2 %v4803_v37  ;;  %v4744_v37 = vld [vmem:[#allocation10 + $0xf8] sm:$0xff] }
 0x67b   : > { %4581 = vmatmul.f32.gmra.mxu0 %v9785_v32  ;;  %v8988_v34 = vpop.f32.mrf.mxu2  ;;  %v8998_v14 = vpop.f32.mrf.mxu1  ;;  %4919 = vmatpush.msrb.mxu3 %v4820_v35 }
 0x67c   : > { %4840 = vmatpush.msrb.mxu1 %v4785_v7  ;;  %4966 = vmatpush.msra.mxu0 %v4714_v29 }
 0x67d   : > { %4920 = vmatpush.msrb.mxu3 %v4819_v17  ;;  %4880 = vmatpush.msrb.mxu2 %v4802_v33  ;;  %v4743_v17 = vld [vmem:[#allocation10 + $0xf0] sm:$0xff] }
 0x67e   : > { %4841 = vmatpush.msrb.mxu1 %v4784_v30  ;;  %4967 = vmatpush.msra.mxu0 %v4713_v39  ;;  %v4816_v30 = vld [vmem:[#allocation10 + $0x298] sm:$0xff] }
 0x67f   : > { %4921 = vmatpush.msrb.mxu3 %v4818_v54  ;;  %4881 = vmatpush.msrb.mxu2 %v4801_v3  ;;  %v4227_v3 = vadd.f32 %v8958_v11, %v8934_v16  ;;  %v9035_v16 = vld [vmem:[%s9394_s6] ss:$0 sm:$0xff]  ;;  %v4740_v11 = vld [vmem:[#allocation10 + $0xd8] sm:$0xff] }
 0x680   : > { %v8976_v2 = vpop.f32.mrf.mxu0  ;;  %4842 = vmatpush.msrb.mxu1 %v4783_v59  ;;  %v4797_v59 = vld [vmem:[#allocation10 + $0x200] sm:$0xff] }
 0x681   : > { %4922 = vmatpush.msrb.mxu3 %v4817_v61  ;;  %4882 = vmatpush.msrb.mxu2 %v4800_v46  ;;  %v4742_v61 = vld [vmem:[#allocation10 + $0xe8] sm:$0xff]  ;;  %v4268_v46 = vadd.f32 %v8954_v21, %v4227_v3  ;;  %v4739_v21 = vld [vmem:[#allocation10 + $0xd0] sm:$0xff] }
 0x682   : > { %4843 = vmatpush.msrb.mxu1 %v4782_v40  ;;  %v4520_v63 = vpop.f32.mrf.mxu3  ;;  %v4741_v40 = vld [vmem:[#allocation10 + $0xe0] sm:$0xff] }
 0x683   : > { %v8996_v49 = vpop.f32.mrf.mxu2  ;;  %v9006_v58 = vpop.f32.mrf.mxu1  ;;  %5948 = vmatmul.msk.f32.vlgmr.msra.gmra.mxu0 %vm6874_vm9, %v7321_v53  ;;  %4923 = vmatpush.msrb.mxu3 %v4816_v30  ;;  %v4309_v30 = vadd.f32 %v8948_v0, %v4268_v46 }
 0x684   : > { %4844 = vmatpush.msrb.mxu1 %v4781_v22  ;;  %4883 = vmatpush.msrb.mxu2 %v4799_v48 }
 0x685   : > { %4924 = vmatpush.msrb.mxu3 %v4815_v52  ;;  %v4350_v48 = vadd.f32 %v8976_v2, %v4309_v30  ;;  %v4233_v30 = vadd.f32 %v8974_v18, %v8940_v57 }
 0x686   : > { %4884 = vmatpush.msrb.mxu2 %v4798_v28  ;;  %4993 = vmatpush.msra.mxu1 %v4744_v37 }
 0x687   : > { %4925 = vmatpush.msrb.mxu3 %v4814_v26  ;;  %v4230_v26 = vadd.f32 %v8965_v20, %v8937_v1  ;;  %v5106_v20 = vld [vmem:[#allocation10 + $0x3f8] sm:$0xff] }
 0x688   : > { %v8984_v6 = vpop.f32.mrf.mxu0  ;;  %4885 = vmatpush.msrb.mxu2 %v4797_v59  ;;  %4994 = vmatpush.msra.mxu1 %v4743_v17 }
 0x689   : > { %4926 = vmatpush.msrb.mxu3 %v4813_v56  ;;  %v4271_v0 = vadd.f32 %v8963_v60, %v4230_v26  ;;  %5164 = vmatpush.msrb.mxu0 %v5106_v20  ;;  %v4737_v26 = vld [vmem:[#allocation10 + $0xc0] sm:$0xff] }
 0x68a   : > { %v4523_v39 = vpop.f32.mrf.mxu3  ;;  %4995 = vmatpush.msra.mxu1 %v4742_v61 }
 0x68b   : > { %v9004_v25 = vpop.f32.mrf.mxu2  ;;  %v9014_v7 = vpop.f32.mrf.mxu1 }
 0x68c   : > { %4996 = vmatpush.msra.mxu1 %v4741_v40  ;;  %v5105_v40 = vld [vmem:[#allocation10 + $0x3f0] sm:$0xff] }
 0x68d   : > { %5165 = vmatpush.msrb.mxu0 %v5105_v40 }
 0x68e   : > { %4997 = vmatpush.msra.mxu1 %v4740_v11 }
 0x690   : > { %v8992_v23 = vpop.f32.mrf.mxu0  ;;  %4998 = vmatpush.msra.mxu1 %v4739_v21 }
 0x692   : > { %v4526_v59 = vpop.f32.mrf.mxu3 }
 0x693   : > { %v9012_v13 = vpop.f32.mrf.mxu2  ;;  %v4390_v35 = vpop.f32.mrf.mxu1 }
 0x694   : > { %v4391_v56 = vadd.f32 %v4390_v35, %v4350_v48 }
 0x698   : > { %v9000_v50 = vpop.f32.mrf.mxu0 }
 0x69b   : > { %v4479_v41 = vpop.f32.mrf.mxu2  ;;  %v4393_v22 = vpop.f32.mrf.mxu1 }
 0x69c   : > { %v4521_v52 = vadd.f32 %v4520_v63, %v4479_v41  ;;  %v4312_v41 = vadd.f32 %v8956_v36, %v4271_v0  ;;  %v5104_v36 = vld [vmem:[#allocation10 + $0x3e8] sm:$0xff] }
 0x69d   : > { %5166 = vmatpush.msrb.mxu0 %v5104_v36  ;;  %v4735_v36 = vld [vmem:[#allocation10 + $0xb0] sm:$0xff] }
 0x69e   : > { %v4353_v35 = vadd.f32 %v8984_v6, %v4312_v41  ;;  %v5102_v41 = vld [vmem:[#allocation10 + $0x3d8] sm:$0xff] }
 0x6a0   : > { %v9008_v45 = vpop.f32.mrf.mxu0  ;;  %v4394_v60 = vadd.f32 %v4393_v22, %v4353_v35 }
 0x6a3   : > { %v4482_v33 = vpop.f32.mrf.mxu2  ;;  %v4396_v63 = vpop.f32.mrf.mxu1 }
 0x6a4   : > { %v4524_v3 = vadd.f32 %v4523_v39, %v4482_v33  ;;  %v5103_v39 = vld [vmem:[#allocation10 + $0x3e0] sm:$0xff] }
 0x6a5   : > { %5167 = vmatpush.msrb.mxu0 %v5103_v39 }
 0x6a7   : > { %5168 = vmatpush.msrb.mxu0 %v5102_v41 }
 0x6a8   : > { %v9019_v44 = vpop.f32.mrf.mxu0 }
 0x6ab   : > { %v4485_v17 = vpop.f32.mrf.mxu2 }
 0x6ac   : > { %v4527_v40 = vadd.f32 %v4526_v59, %v4485_v17 }
 0x6b0   : > { %v9021_v29 = vpop.f32.mrf.mxu0 }
 0x6b3   : > { %v4488_v33 = vpop.f32.mrf.mxu2 }
 0x6b8   : > { %v9023_v54 = vpop.f32.mrf.mxu0 }
 0x6bb   : > { %v4491_v41 = vpop.f32.mrf.mxu2 }
 0x6c0   : > { %v4561_v28 = vpop.f32.mrf.mxu0 }
 0x6c1   : > { %v4562_v37 = vadd.f32 %v4561_v28, %v4521_v52  ;;  %v4738_v28 = vld [vmem:[#allocation10 + $0xc8] sm:$0xff] }
 0x6c2   : > { %4999 = vmatpush.msra.mxu1 %v4738_v28 }
 0x6c3   : > { %v4585_v2 = vadd.f32 %v4562_v37, %v4391_v56  ;;  %v4274_v56 = vadd.f32 %v8972_v19, %v4233_v30  ;;  %v4529_v37 = vpop.f32.mrf.mxu3 }
 0x6c4   : > { %5000 = vmatpush.msra.mxu1 %v4737_v26  ;;  %v4736_v26 = vld [vmem:[#allocation10 + $0xb8] sm:$0xff] }
 0x6c5   : > { %v4597_v1 = vadd.f32 %v9035_v16, %v4585_v2  ;;  %v4315_v19 = vadd.f32 %v8967_v8, %v4274_v56  ;;  %v5101_v8 = vld [vmem:[#allocation10 + $0x3d0] sm:$0xff] }
 0x6c6   : > { %5169 = vmatpush.msrb.mxu0 %v5101_v8  ;;  %5001 = vmatpush.msra.mxu1 %v4736_v26  ;;  %v5089_v56 = vld [vmem:[#allocation10 + $0x370] sm:$0xff] }
 0x6c7   : > { %v4605_v61 = vmax.f32 %v4597_v1, 0.0  ;;  %v4399_v1 = vpop.f32.mrf.mxu1 }
 0x6c8   : > { %v4564_v46 = vpop.f32.mrf.mxu0  ;;  %5002 = vmatpush.msra.mxu1 %v4735_v36  ;;  %v4734_v36 = vld [vmem:[#allocation10 + $0xa8] sm:$0xff] }
 0x6c9   : > { %v4621_v48 = vrot.slane %v4605_v61, 7  ;;  %v4565_v52 = vadd.f32 %v4564_v46, %v4524_v3  ;;  %v4236_v3 = vadd.f32 %v8982_v47, %v8943_v24  ;;  %v4356_v61 = vadd.f32 %v8992_v23, %v4315_v19  ;;  %v4760_v24 = vld [vmem:[#allocation10 + $0x178] sm:$0xff]  ;;  %v5100_v23 = vld [vmem:[#allocation10 + $0x3c8] sm:$0xff]  ;;  %v5099_v19 = vld [vmem:[#allocation10 + $0x3c0] sm:$0xff] }
 0x6ca   : > { %5034 = vmatpush.msra.mxu2 %v4760_v24  ;;  %v5090_v47 = vld [vmem:[#allocation10 + $0x378] sm:$0xff]  ;;  %5170 = vmatpush.msrb.mxu0 %v5100_v23  ;;  %v4733_v24 = vld [vmem:[#allocation10 + $0xa0] sm:$0xff] }
 0x6cb   : > { %v4586_v6 = vadd.f32 %v4565_v52, %v4394_v60  ;;  %5932 = vmatmul.msk.f32.vlgmr.msrb.gmra.mxu1 %vm6874_vm9, %v4621_v48  ;;  %5950 = vmatmul.msk.f32.gmra.mxu0 %vm6874_vm9, %v4621_v48  ;;  %v4637_v57 = vsel %vm1936_vm8, 0.0, %v4621_v48  ;;  %v4645_v18 = vsel %vm1936_vm8, %v4621_v48, 0.0  ;;  %v4277_v60 = vadd.f32 %v8980_v51, %v4236_v3  ;;  %v4756_v23 = vld [vmem:[#allocation10 + $0x158] sm:$0xff] }
 0x6cc   : > { %v4665_v22 = vrot.slane %v4637_v57, 1  ;;  %v4666_v11 = vrot.slane %v4645_v18, 1  ;;  %v4689_v21 = vrot.slane %v4637_v57, 2  ;;  %v4690_v0 = vrot.slane %v4645_v18, 2  ;;  %5123 = vmatpush.msra.mxu3 %v5090_v47  ;;  %5171 = vmatpush.msrb.mxu0 %v5099_v19 }
 0x6cd   : > { %v4598_v2 = vadd.f32 %v9035_v16, %v4586_v6  ;;  %v4397_v48 = vadd.f32 %v4396_v63, %v4356_v61  ;;  %v4759_v63 = vld [vmem:[#allocation10 + $0x170] sm:$0xff]  ;;  %5003 = vmatpush.msra.mxu1 %v4734_v36  ;;  %v4242_v19 = vadd.f32 %v8998_v14, %v8951_v4  ;;  %v4732_v14 = vld [vmem:[#allocation10 + $0x98] sm:$0xff] }
 0x6ce   : > { %v9053_v20 = vsel %vm955_vm4, %v4665_v22, %v4666_v11  ;;  %v9056_v35 = vsel %vm1068_vm5, %v4689_v21, %v4690_v0  ;;  %v4532_v22 = vpop.f32.mrf.mxu3  ;;  %v4318_v11 = vadd.f32 %v8978_v5, %v4277_v60  ;;  %v4530_v21 = vadd.f32 %v4529_v37, %v4488_v33  ;;  %5035 = vmatpush.msra.mxu2 %v4759_v63  ;;  %v5098_v33 = vld [vmem:[#allocation10 + $0x3b8] sm:$0xff]  ;;  %v4731_v36 = vld [vmem:[#allocation10 + $0x90] sm:$0xff] }
 0x6cf   : > { %v4606_v46 = vmax.f32 %v4598_v2, 0.0  ;;  %4886 = vmatmul.f32.vlgmr.msrb.gmra.mxu2 %v9053_v20  ;;  %4927 = vmatmul.f32.vlgmr.msrb.gmra.mxu3 %v9056_v35  ;;  %v4758_v2 = vld [vmem:[#allocation10 + $0x168] sm:$0xff]  ;;  %v4402_v8 = vpop.f32.mrf.mxu1 }
 0x6d0   : > { %v4567_v30 = vpop.f32.mrf.mxu0  ;;  %5124 = vmatpush.msra.mxu3 %v5089_v56  ;;  %v4359_v5 = vadd.f32 %v9000_v50, %v4318_v11  ;;  %5036 = vmatpush.msra.mxu2 %v4758_v2  ;;  %v5097_v50 = vld [vmem:[#allocation10 + $0x3b0] sm:$0xff] }
 0x6d1   : > { %v9064_v52 = vrot.slane %v4606_v46, 7  ;;  %v4568_v28 = vadd.f32 %v4567_v30, %v4527_v40  ;;  %v5088_v40 = vld [vmem:[#allocation10 + $0x368] sm:$0xff]  ;;  %v4239_v46 = vadd.f32 %v8990_v27, %v8946_v15  ;;  %v4757_v15 = vld [vmem:[#allocation10 + $0x160] sm:$0xff]  ;;  %5172 = vmatpush.msrb.mxu0 %v5098_v33  ;;  %5004 = vmatpush.msra.mxu1 %v4733_v24 }
 0x6d2   : > { %5125 = vmatpush.msra.mxu3 %v5088_v40  ;;  %v5087_v27 = vld [vmem:[#allocation10 + $0x360] sm:$0xff]  ;;  %5037 = vmatpush.msra.mxu2 %v4757_v15  ;;  %v4533_v40 = vadd.f32 %v4532_v22, %v4491_v41  ;;  %v5084_v22 = vld [vmem:[#allocation10 + $0x348] sm:$0xff] }
 0x6d3   : > { %v4587_v59 = vadd.f32 %v4568_v28, %v4397_v48  ;;  %5934 = vmatmul.msk.f32.gmra.mxu1 %vm6874_vm9, %v9064_v52  ;;  %5952 = vmatmul.msk.f32.gmra.mxu0 %vm6874_vm9, %v9064_v52  ;;  %v4638_v51 = vsel %vm1936_vm8, 0.0, %v9064_v52  ;;  %v4646_v17 = vsel %vm1936_vm8, %v9064_v52, 0.0  ;;  %v4280_v60 = vadd.f32 %v8988_v34, %v4239_v46 }
 0x6d4   : > { %v4668_v6 = vrot.slane %v4638_v51, 1  ;;  %v4669_v57 = vrot.slane %v4646_v17, 1  ;;  %v4692_v18 = vrot.slane %v4638_v51, 2  ;;  %v4693_v39 = vrot.slane %v4646_v17, 2  ;;  %5126 = vmatpush.msra.mxu3 %v5087_v27  ;;  %5173 = vmatpush.msrb.mxu0 %v5097_v50  ;;  %v4753_v27 = vld [vmem:[#allocation10 + $0x140] sm:$0xff] }
 0x6d5   : > { %v4599_v0 = vadd.f32 %v9035_v16, %v4587_v59  ;;  %v4400_v48 = vadd.f32 %v4399_v1, %v4359_v5  ;;  %v5086_v59 = vld [vmem:[#allocation10 + $0x358] sm:$0xff]  ;;  %5038 = vmatpush.msra.mxu2 %v4756_v23  ;;  %v5095_v5 = vld [vmem:[#allocation10 + $0x3a0] sm:$0xff]  ;;  %5005 = vmatpush.msra.mxu1 %v4732_v14 }
 0x6d6   : > { %v9079_v3 = vsel %vm955_vm4, %v4668_v6, %v4669_v57  ;;  %v9082_v61 = vsel %vm1068_vm5, %v4692_v18, %v4693_v39  ;;  %v4321_v6 = vadd.f32 %v8986_v62, %v4280_v60  ;;  %v5096_v18 = vld [vmem:[#allocation10 + $0x3a8] sm:$0xff]  ;;  %v4755_v39 = vld [vmem:[#allocation10 + $0x150] sm:$0xff]  ;;  %5127 = vmatpush.msra.mxu3 %v5086_v59  ;;  %v4535_v2 = vpop.f32.mrf.mxu3  ;;  %v5083_v50 = vld [vmem:[#allocation10 + $0x340] sm:$0xff] }
 0x6d7   : > { %v4607_v37 = vmax.f32 %v4599_v0, 0.0  ;;  %4889 = vmatmul.f32.gmra.mxu2 %v9079_v3  ;;  %4930 = vmatmul.f32.gmra.mxu3 %v9082_v61  ;;  %v5085_v0 = vld [vmem:[#allocation10 + $0x350] sm:$0xff]  ;;  %v4405_v41 = vpop.f32.mrf.mxu1 }
 0x6d8   : > { %v4570_v30 = vpop.f32.mrf.mxu0  ;;  %v4362_v62 = vadd.f32 %v9008_v45, %v4321_v6  ;;  %5174 = vmatpush.msrb.mxu0 %v5096_v18  ;;  %5039 = vmatpush.msra.mxu2 %v4755_v39  ;;  %v4754_v45 = vld [vmem:[#allocation10 + $0x148] sm:$0xff]  ;;  %v5082_v6 = vld [vmem:[#allocation10 + $0x338] sm:$0xff]  ;;  %v4245_v18 = vadd.f32 %v9006_v58, %v8960_v42  ;;  %v5081_v42 = vld [vmem:[#allocation10 + $0x330] sm:$0xff] }
 0x6d9   : > { %v9090_v28 = vrot.slane %v4607_v37, 7  ;;  %v4571_v26 = vadd.f32 %v4570_v30, %v4530_v21  ;;  %v4494_v37 = vpop.f32.mrf.mxu2  ;;  %v4283_v30 = vadd.f32 %v8996_v49, %v4242_v19  ;;  %5128 = vmatpush.msra.mxu3 %v5085_v0  ;;  %5006 = vmatpush.msra.mxu1 %v4731_v36  ;;  %v5092_v19 = vld [vmem:[#allocation10 + $0x388] sm:$0xff]  ;;  %v5091_v58 = vld [vmem:[#allocation10 + $0x380] sm:$0xff] }
 0x6da   : > { %v4403_v60 = vadd.f32 %v4402_v8, %v4362_v62  ;;  %5175 = vmatpush.msrb.mxu0 %v5095_v5  ;;  %5040 = vmatpush.msra.mxu2 %v4754_v45  ;;  %v4536_v39 = vadd.f32 %v4535_v2, %v4494_v37  ;;  %v4751_v62 = vld [vmem:[#allocation10 + $0x130] sm:$0xff]  ;;  %v4750_v37 = vld [vmem:[#allocation10 + $0x128] sm:$0xff] }
 0x6db   : > { %v4588_v47 = vadd.f32 %v4571_v26, %v4400_v48  ;;  %5936 = vmatmul.msk.f32.gmra.mxu1 %vm6874_vm9, %v9090_v28  ;;  %5954 = vmatmul.msk.f32.gmra.mxu0 %vm6874_vm9, %v9090_v28  ;;  %v4639_v34 = vsel %vm1936_vm8, 0.0, %v9090_v28  ;;  %v4647_v1 = vsel %vm1936_vm8, %v9090_v28, 0.0  ;;  %v5094_v26 = vld [vmem:[#allocation10 + $0x398] sm:$0xff]  ;;  %v4324_v23 = vadd.f32 %v8994_v12, %v4283_v30  ;;  %v5080_v45 = vld [vmem:[#allocation10 + $0x328] sm:$0xff] }
 0x6dc   : > { %v4671_v51 = vrot.slane %v4639_v34, 1  ;;  %v4672_v17 = vrot.slane %v4647_v1, 1  ;;  %v4695_v63 = vrot.slane %v4639_v34, 2  ;;  %v4696_v56 = vrot.slane %v4647_v1, 2  ;;  %5129 = vmatpush.msra.mxu3 %v5084_v22  ;;  %5176 = vmatpush.msrb.mxu0 %v5094_v26  ;;  %v5122_v22 = vld [vmem:[#allocation10 + $0x478] sm:$0xff] }
 0x6dd   : > { %v4600_v57 = vadd.f32 %v9035_v16, %v4588_v47  ;;  %5041 = vmatpush.msra.mxu2 %v4753_v27  ;;  %v4365_v12 = vadd.f32 %v9019_v44, %v4324_v23 }
 0x6de   : > { %v9105_v11 = vsel %vm955_vm4, %v4671_v51, %v4672_v17  ;;  %v9108_v21 = vsel %vm1068_vm5, %v4695_v63, %v4696_v56  ;;  %v5093_v51 = vld [vmem:[#allocation10 + $0x390] sm:$0xff]  ;;  %v4752_v17 = vld [vmem:[#allocation10 + $0x138] sm:$0xff]  ;;  %5130 = vmatpush.msra.mxu3 %v5083_v50  ;;  %v4538_v44 = vpop.f32.mrf.mxu3  ;;  %v4749_v50 = vld [vmem:[#allocation10 + $0x120] sm:$0xff] }
 0x6df   : > { %v4608_v46 = vmax.f32 %v4600_v57, 0.0  ;;  %4892 = vmatmul.f32.gmra.mxu2 %v9105_v11  ;;  %4933 = vmatmul.f32.gmra.mxu3 %v9108_v21  ;;  %v4730_v57 = vld [vmem:[#allocation10 + $0x88] sm:$0xff]  ;;  %v4406_v5 = vadd.f32 %v4405_v41, %v4365_v12  ;;  %v4408_v41 = vpop.f32.mrf.mxu1 }
 0x6e0   : > { %v4573_v33 = vpop.f32.mrf.mxu0  ;;  %5177 = vmatpush.msrb.mxu0 %v5093_v51  ;;  %5042 = vmatpush.msra.mxu2 %v4752_v17  ;;  %v4748_v51 = vld [vmem:[#allocation10 + $0x118] sm:$0xff] }
 0x6e1   : > { %v9116_v48 = vrot.slane %v4608_v46, 7  ;;  %v4574_v4 = vadd.f32 %v4573_v33, %v4533_v40  ;;  %v4286_v46 = vadd.f32 %v9004_v25, %v4245_v18  ;;  %5131 = vmatpush.msra.mxu3 %v5082_v6  ;;  %5007 = vmatpush.msra.mxu1 %v4730_v57  ;;  %v4497_v2 = vpop.f32.mrf.mxu2  ;;  %v5078_v17 = vld [vmem:[#allocation10 + $0x318] sm:$0xff]  ;;  %v5121_v6 = vld [vmem:[#allocation10 + $0x470] sm:$0xff] }
 0x6e2   : > { %5178 = vmatpush.msrb.mxu0 %v5092_v19  ;;  %5043 = vmatpush.msra.mxu2 %v4751_v62 }
 0x6e3   : > { %v4589_v15 = vadd.f32 %v4574_v4, %v4403_v60  ;;  %5938 = vmatmul.msk.f32.gmra.mxu1 %vm6874_vm9, %v9116_v48  ;;  %5956 = vmatmul.msk.f32.gmra.mxu0 %vm6874_vm9, %v7321_v53  ;;  %v4640_v49 = vsel %vm1936_vm8, 0.0, %v9116_v48  ;;  %v4648_v8 = vsel %vm1936_vm8, %v9116_v48, 0.0  ;;  %v4729_v60 = vld [vmem:[#allocation10 + $0x80] sm:$0xff] }
 0x6e4   : > { %v4765_v24 = vrot.slane %v4640_v49, 1  ;;  %v4766_v47 = vrot.slane %v4648_v8, 1  ;;  %v4773_v34 = vrot.slane %v4640_v49, 2  ;;  %v4774_v1 = vrot.slane %v4648_v8, 2  ;;  %5132 = vmatpush.msra.mxu3 %v5081_v42  ;;  %5179 = vmatpush.msrb.mxu0 %v5091_v58 }
 0x6e5   : > { %v4601_v59 = vadd.f32 %v9035_v16, %v4589_v15  ;;  %v4327_v8 = vadd.f32 %v9002_v9, %v4286_v46  ;;  %5044 = vmatpush.msra.mxu2 %v4750_v37  ;;  %5008 = vmatpush.msra.mxu1 %v4729_v60  ;;  %v4539_v9 = vadd.f32 %v4538_v44, %v4497_v2  ;;  %v4746_v46 = vld [vmem:[#allocation10 + $0x108] sm:$0xff] }
 0x6e6   : > { %v9131_v63 = vsel %vm955_vm4, %v4765_v24, %v4766_v47  ;;  %v9134_v56 = vsel %vm1068_vm5, %v4773_v34, %v4774_v1  ;;  %v5079_v24 = vld [vmem:[#allocation10 + $0x320] sm:$0xff]  ;;  %5133 = vmatpush.msra.mxu3 %v5080_v45  ;;  %v4248_v1 = vadd.f32 %v9014_v7, %v8969_v55  ;;  %v4747_v7 = vld [vmem:[#allocation10 + $0x110] sm:$0xff]  ;;  %v4541_v19 = vpop.f32.mrf.mxu3 }
 0x6e7   : > { %v4609_v0 = vmax.f32 %v4601_v59, 0.0  ;;  %4895 = vmatmul.f32.gmra.mxu2 %v9131_v63  ;;  %4936 = vmatmul.f32.gmra.mxu3 %v9134_v56  ;;  %v4368_v23 = vadd.f32 %v9021_v29, %v4327_v8  ;;  %v5077_v29 = vld [vmem:[#allocation10 + $0x310] sm:$0xff] }
 0x6e8   : > { %v4576_v40 = vpop.f32.mrf.mxu0  ;;  %5205 = vmatpush.msrb.mxu1 %v5122_v22  ;;  %5045 = vmatpush.msra.mxu2 %v4749_v50  ;;  %v4289_v18 = vadd.f32 %v9012_v13, %v4248_v1 }
 0x6e9   : > { %v4625_v33 = vrot.slane %v4609_v0, 7  ;;  %v4577_v30 = vadd.f32 %v4576_v40, %v4536_v39  ;;  %5134 = vmatpush.msra.mxu3 %v5079_v24  ;;  %v4409_v12 = vadd.f32 %v4408_v41, %v4368_v23  ;;  %v4500_v0 = vpop.f32.mrf.mxu2  ;;  %v5118_v24 = vld [vmem:[#allocation10 + $0x458] sm:$0xff] }
 0x6ea   : > { %5206 = vmatpush.msrb.mxu1 %v5121_v6  ;;  %5046 = vmatpush.msra.mxu2 %v4748_v51  ;;  %v4330_v2 = vadd.f32 %v9010_v43, %v4289_v18  ;;  %v4542_v60 = vadd.f32 %v4541_v19, %v4500_v0  ;;  %v5119_v43 = vld [vmem:[#allocation10 + $0x460] sm:$0xff]  ;;  %v5117_v18 = vld [vmem:[#allocation10 + $0x450] sm:$0xff] }
 0x6eb   : > { %v4590_v4 = vadd.f32 %v4577_v30, %v4406_v5  ;;  %5940 = vmatmul.msk.f32.gmra.mxu1 %vm6874_vm9, %v4625_v33  ;;  %5958 = vmatmul.msk.f32.gmra.mxu0 %vm6874_vm9, %v4625_v33  ;;  %v4641_v25 = vsel %vm1936_vm8, 0.0, %v4625_v33  ;;  %v4649_v14 = vsel %vm1936_vm8, %v4625_v33, 0.0  ;;  %v5076_v5 = vld [vmem:[#allocation10 + $0x308] sm:$0xff] }
 0x6ec   : > { %v4674_v26 = vrot.slane %v4641_v25, 1  ;;  %v4675_v36 = vrot.slane %v4649_v14, 1  ;;  %v4698_v15 = vrot.slane %v4641_v25, 2  ;;  %v4699_v49 = vrot.slane %v4649_v14, 2  ;;  %5135 = vmatpush.msra.mxu3 %v5078_v17  ;;  %v5120_v33 = vld [vmem:[#allocation10 + $0x468] sm:$0xff]  ;;  %5047 = vmatpush.msra.mxu2 %v4747_v7  ;;  %v5075_v25 = vld [vmem:[#allocation10 + $0x300] sm:$0xff]  ;;  %v4411_v14 = vpop.f32.mrf.mxu1 }
 0x6ed   : > { %v4602_v27 = vadd.f32 %v9035_v16, %v4590_v4  ;;  %v4745_v4 = vld [vmem:[#allocation10 + $0x100] sm:$0xff]  ;;  %5207 = vmatpush.msrb.mxu1 %v5120_v33  ;;  %v4371_v41 = vadd.f32 %v9023_v54, %v4330_v2  ;;  %v5116_v7 = vld [vmem:[#allocation10 + $0x448] sm:$0xff]  ;;  %v5113_v33 = vld [vmem:[#allocation10 + $0x430] sm:$0xff] }
 0x6ee   : > { %v9151_v47 = vsel %vm955_vm4, %v4674_v26, %v4675_v36  ;;  %v9154_v34 = vsel %vm1068_vm5, %v4698_v15, %v4699_v49  ;;  %5136 = vmatpush.msra.mxu3 %v5077_v29  ;;  %5048 = vmatpush.msra.mxu2 %v4746_v46  ;;  %v5115_v46 = vld [vmem:[#allocation10 + $0x440] sm:$0xff] }
 0x6ef   : > { %v4610_v59 = vmax.f32 %v4602_v27, 0.0  ;;  %4898 = vmatmul.f32.gmra.mxu2 %v9151_v47  ;;  %4939 = vmatmul.f32.gmra.mxu3 %v9154_v34  ;;  %v4412_v15 = vadd.f32 %v4411_v14, %v4371_v41 }
 0x6f0   : > { %v4579_v57 = vpop.f32.mrf.mxu0  ;;  %5137 = vmatpush.msra.mxu3 %v5076_v5  ;;  %5049 = vmatpush.msra.mxu2 %v4745_v4  ;;  %v5114_v5 = vld [vmem:[#allocation10 + $0x438] sm:$0xff] }
 0x6f1   : > { %v9162_v39 = vrot.slane %v4610_v59, 7  ;;  %v4580_v55 = vadd.f32 %v4579_v57, %v4539_v9  ;;  %5208 = vmatpush.msrb.mxu1 %v5119_v43 }
 0x6f2   : > { %5138 = vmatpush.msra.mxu3 %v5075_v25 }
 0x6f3   : > { %v4591_v62 = vadd.f32 %v4580_v55, %v4409_v12  ;;  %5942 = vmatmul.msk.f32.gmra.mxu1 %vm6874_vm9, %v9162_v39  ;;  %5960 = vmatmul.msk.f32.gmra.mxu0 %vm6874_vm9, %v9162_v39  ;;  %v4642_v13 = vsel %vm1936_vm8, 0.0, %v9162_v39  ;;  %v4650_v40 = vsel %vm1936_vm8, %v9162_v39, 0.0 }
 0x6f4   : > { %v4677_v30 = vrot.slane %v4642_v13, 1  ;;  %v4678_v42 = vrot.slane %v4650_v40, 1  ;;  %v4701_v58 = vrot.slane %v4642_v13, 2  ;;  %v4702_v44 = vrot.slane %v4650_v40, 2  ;;  %5209 = vmatpush.msrb.mxu1 %v5118_v24 }
 0x6f5   : > { %v4603_v37 = vadd.f32 %v9035_v16, %v4591_v62 }
 0x6f6   : > { %v9177_v45 = vsel %vm955_vm4, %v4677_v30, %v4678_v42  ;;  %v9180_v22 = vsel %vm1068_vm5, %v4701_v58, %v4702_v44  ;;  %5210 = vmatpush.msrb.mxu1 %v5117_v18  ;;  %v5112_v30 = vld [vmem:[#allocation10 + $0x428] sm:$0xff]  ;;  %v5111_v42 = vld [vmem:[#allocation10 + $0x420] sm:$0xff] }
 0x6f7   : > { %v4611_v26 = vmax.f32 %v4603_v37, 0.0  ;;  %4901 = vmatmul.f32.gmra.mxu2 %v9177_v45  ;;  %4942 = vmatmul.f32.gmra.mxu3 %v9180_v22 }
 0x6f8   : > { %v4582_v36 = vpop.f32.mrf.mxu0  ;;  %5211 = vmatpush.msrb.mxu1 %v5116_v7 }
 0x6f9   : > { %v9185_v49 = vrot.slane %v4611_v26, 7  ;;  %v4583_v8 = vadd.f32 %v4582_v36, %v4542_v60 }
 0x6fa   : > { %5212 = vmatpush.msrb.mxu1 %v5115_v46 }
 0x6fb   : > { %v4592_v27 = vadd.f32 %v4583_v8, %v4412_v15  ;;  %5944 = vmatmul.msk.f32.gmra.mxu1 %vm6874_vm9, %v9185_v49  ;;  %5962 = vmatmul.msk.f32.gmra.mxu0 %vm6874_vm9, %v9185_v49  ;;  %v4643_v54 = vsel %vm1936_vm8, 0.0, %v9185_v49  ;;  %v4651_v50 = vsel %vm1936_vm8, %v9185_v49, 0.0 }
 0x6fc   : > { %v4680_v1 = vrot.slane %v4643_v54, 1  ;;  %v4681_v23 = vrot.slane %v4651_v50, 1  ;;  %v4704_v9 = vrot.slane %v4643_v54, 2  ;;  %v4705_v59 = vrot.slane %v4651_v50, 2  ;;  %5213 = vmatpush.msrb.mxu1 %v5114_v5 }
 0x6fd   : > { %v4604_v51 = vadd.f32 %v9035_v16, %v4592_v27 }
 0x6fe   : > { %v9199_v17 = vsel %vm955_vm4, %v4680_v1, %v4681_v23  ;;  %v9202_v6 = vsel %vm1068_vm5, %v4704_v9, %v4705_v59  ;;  %5214 = vmatpush.msrb.mxu1 %v5113_v33 }
 0x6ff   : > { %v4612_v57 = vmax.f32 %v4604_v51, 0.0  ;;  %4904 = vmatmul.f32.gmra.mxu2 %v9199_v17  ;;  %4945 = vmatmul.f32.gmra.mxu3 %v9202_v6 }
 0x700   : > { %5215 = vmatpush.msrb.mxu1 %v5112_v30 }
 0x701   : > { %v4628_v12 = vrot.slane %v4612_v57, 7 }
 0x702   : > { %5216 = vmatpush.msrb.mxu1 %v5111_v42 }
 0x703   : > { %5946 = vmatmul.msk.f32.gmra.mxu1 %vm6874_vm9, %v4628_v12  ;;  %5180 = vmatmul.f32.vlgmr.msrb.gmra.mxu0 %v9079_v3  ;;  %v4644_v16 = vsel %vm1936_vm8, 0.0, %v4628_v12  ;;  %v4652_v55 = vsel %vm1936_vm8, %v4628_v12, 0.0 }
 0x704   : > { %v4768_v29 = vrot.slane %v4644_v16, 1  ;;  %v4769_v0 = vrot.slane %v4652_v55, 1  ;;  %v4776_v19 = vrot.slane %v4644_v16, 2  ;;  %v4777_v62 = vrot.slane %v4652_v55, 2 }
 0x706   : > { %v4770_v13 = vsel %vm955_vm4, %v4768_v29, %v4769_v0  ;;  %v9213_v40 = vsel %vm1068_vm5, %v4776_v19, %v4777_v62 }
 0x707   : > { %4907 = vmatmul.f32.gmra.mxu2 %v4770_v13  ;;  %4948 = vmatmul.f32.gmra.mxu3 %v9213_v40 }
 0x70b   : > { %5009 = vmatmul.f32.vlgmr.msra.gmra.mxu1 %v9784_v38  ;;  %5183 = vmatmul.f32.gmra.mxu0 %v9105_v11 }
 0x70f   : > { %5050 = vmatmul.f32.vlgmr.msra.gmra.mxu2 %v9785_v32  ;;  %5964 = vmatmul.msk.f32.vlgmr.msra.gmra.mxu3 %vm6874_vm9, %v9064_v52  ;;  %v5110_v52 = vld [vmem:[#allocation10 + $0x418] sm:$0xff] }
 0x710   : > { %5217 = vmatpush.msrb.mxu1 %v5110_v52 }
 0x713   : > { %5012 = vmatmul.f32.gmra.mxu1 %v9053_v20  ;;  %5186 = vmatmul.f32.gmra.mxu0 %v9131_v63  ;;  %v5109_v20 = vld [vmem:[#allocation10 + $0x410] sm:$0xff] }
 0x714   : > { %5218 = vmatpush.msrb.mxu1 %v5109_v20 }
 0x717   : > { %5053 = vmatmul.f32.gmra.mxu2 %v9056_v35  ;;  %5966 = vmatmul.msk.f32.gmra.mxu3 %vm6874_vm9, %v9090_v28  ;;  %v5108_v35 = vld [vmem:[#allocation10 + $0x408] sm:$0xff] }
 0x718   : > { %5219 = vmatpush.msrb.mxu1 %v5108_v35 }
 0x71b   : > { %5015 = vmatmul.f32.gmra.mxu1 %v9079_v3  ;;  %5189 = vmatmul.f32.gmra.mxu0 %v9784_v38  ;;  %v5107_v3 = vld [vmem:[#allocation10 + $0x400] sm:$0xff] }
 0x71c   : > { %5220 = vmatpush.msrb.mxu1 %v5107_v3 }
 0x71f   : > { %5056 = vmatmul.f32.gmra.mxu2 %v9082_v61  ;;  %5968 = vmatmul.msk.f32.gmra.mxu3 %vm6874_vm9, %v9116_v48 }
 0x723   : > { %5018 = vmatmul.f32.gmra.mxu1 %v9105_v11  ;;  %5192 = vmatmul.f32.gmra.mxu0 %v9177_v45  ;;  %v4969_v11 = vpop.f32.mrf.mxu0 }
 0x727   : > { %5059 = vmatmul.f32.gmra.mxu2 %v9108_v21  ;;  %5970 = vmatmul.msk.f32.gmra.mxu3 %vm6874_vm9, %v7321_v53 }
 0x72b   : > { %5021 = vmatmul.f32.gmra.mxu1 %v9784_v38  ;;  %5195 = vmatmul.f32.gmra.mxu0 %v9199_v17 }
 0x72f   : > { %5062 = vmatmul.f32.gmra.mxu2 %v9785_v32  ;;  %5972 = vmatmul.msk.f32.gmra.mxu3 %vm6874_vm9, %v9162_v39 }
 0x733   : > { %5024 = vmatmul.f32.gmra.mxu1 %v9151_v47  ;;  %5198 = vmatmul.f32.gmra.mxu0 %v4770_v13 }
 0x737   : > { %5065 = vmatmul.f32.gmra.mxu2 %v9154_v34  ;;  %5974 = vmatmul.msk.f32.gmra.mxu3 %vm6874_vm9, %v9185_v49 }
 0x73b   : > { %5027 = vmatmul.f32.gmra.mxu1 %v9177_v45  ;;  %5201 = vmatmul.f32.gmra.mxu0 %v9784_v38 }
 0x73f   : > { %5068 = vmatmul.f32.gmra.mxu2 %v9180_v22  ;;  %5976 = vmatmul.msk.f32.gmra.mxu3 %vm6874_vm9, %v4628_v12 }
 0x743   : > { %5030 = vmatmul.f32.gmra.mxu1 %v9199_v17 }
 0x747   : > { %5071 = vmatmul.f32.gmra.mxu2 %v9202_v6  ;;  %5978 = vmatmul.msk.f32.gmra.mxu3 %vm6874_vm9, %v7321_v53 }
 0x748   : > { %v4846_v28 = vpop.f32.mrf.mxu1  ;;  %v4972_v47 = vpop.f32.mrf.mxu0 }
 0x74b   : > { %5221 = vmatmul.f32.vlgmr.msrb.gmra.mxu1 %v9082_v61 }
 0x750   : > { %v4849_v48 = vpop.f32.mrf.mxu1  ;;  %v4975_v31 = vpop.f32.mrf.mxu0 }
 0x752   : > { %v4887_v63 = vpop.f32.mrf.mxu2  ;;  %v4928_v38 = vpop.f32.mrf.mxu3 }
 0x753   : > { %v4888_v34 = vadd.f32 %v4887_v63, %v4846_v28  ;;  %5224 = vmatmul.f32.gmra.mxu1 %v9108_v21 }
 0x755   : > { %v4929_v39 = vadd.f32 %v4928_v38, %v4888_v34 }
 0x757   : > { %v4970_v58 = vadd.f32 %v4969_v11, %v4929_v39 }
 0x758   : > { %v4852_v44 = vpop.f32.mrf.mxu1  ;;  %v4978_v26 = vpop.f32.mrf.mxu0 }
 0x75a   : > { %v4890_v2 = vpop.f32.mrf.mxu2  ;;  %v4931_v37 = vpop.f32.mrf.mxu3 }
 0x75b   : > { %v4891_v60 = vadd.f32 %v4890_v2, %v4849_v48  ;;  %5227 = vmatmul.f32.gmra.mxu1 %v9134_v56 }
 0x75d   : > { %v4932_v53 = vadd.f32 %v4931_v37, %v4891_v60  ;;  %v5365_v60 = vld [vmem:[#allocation11 + $0x78] sm:$0xff] }
 0x75e   : > { %5447 = vmatpush.msrb.mxu2 %v5365_v60 }
 0x75f   : > { %v4973_v4 = vadd.f32 %v4972_v47, %v4932_v53 }
 0x760   : > { %v4855_v25 = vpop.f32.mrf.mxu1  ;;  %v4981_v54 = vpop.f32.mrf.mxu0 }
 0x762   : > { %v4893_v61 = vpop.f32.mrf.mxu2  ;;  %v4934_v14 = vpop.f32.mrf.mxu3 }
 0x763   : > { %v4894_v45 = vadd.f32 %v4893_v61, %v4852_v44  ;;  %5230 = vmatmul.f32.gmra.mxu1 %v9785_v32 }
 0x765   : > { %v4935_v41 = vadd.f32 %v4934_v14, %v4894_v45  ;;  %v9292_v14 = vld [vmem:[%s9396_s8] ss:$0 sm:$0xff]  ;;  %v5364_v45 = vld [vmem:[#allocation11 + $0x70] sm:$0xff] }
 0x766   : > { %5448 = vmatpush.msrb.mxu2 %v5364_v45 }
 0x767   : > { %v4976_v21 = vadd.f32 %v4975_v31, %v4935_v41  ;;  %v5381_v31 = vld [vmem:[#allocation11 + $0xf8] sm:$0xff] }
 0x768   : > { %v4858_v43 = vpop.f32.mrf.mxu1  ;;  %v4984_v18 = vpop.f32.mrf.mxu0  ;;  %5467 = vmatpush.msrb.mxu3 %v5381_v31 }
 0x76a   : > { %v4896_v36 = vpop.f32.mrf.mxu2  ;;  %v4937_v15 = vpop.f32.mrf.mxu3 }
 0x76b   : > { %v4897_v49 = vadd.f32 %v4896_v36, %v4855_v25  ;;  %5233 = vmatmul.f32.gmra.mxu1 %v9180_v22 }
 0x76d   : > { %v4938_v8 = vadd.f32 %v4937_v15, %v4897_v49  ;;  %v5379_v49 = vld [vmem:[#allocation11 + $0xe8] sm:$0xff] }
 0x76f   : > { %v4979_v56 = vadd.f32 %v4978_v26, %v4938_v8  ;;  %v5362_v8 = vld [vmem:[#allocation11 + $0x60] sm:$0xff] }
 0x770   : > { %v4861_v27 = vpop.f32.mrf.mxu1 }
 0x772   : > { %v4899_v50 = vpop.f32.mrf.mxu2  ;;  %v4940_v24 = vpop.f32.mrf.mxu3 }
 0x773   : > { %v4900_v1 = vadd.f32 %v4899_v50, %v4858_v43  ;;  %5236 = vmatmul.f32.gmra.mxu1 %v9202_v6  ;;  %v4987_v6 = vpop.f32.mrf.mxu0  ;;  %v5363_v43 = vld [vmem:[#allocation11 + $0x68] sm:$0xff]  ;;  %v5361_v50 = vld [vmem:[#allocation11 + $0x58] sm:$0xff] }
 0x774   : > { %5449 = vmatpush.msrb.mxu2 %v5363_v43 }
 0x775   : > { %v4941_v23 = vadd.f32 %v4940_v24, %v4900_v1 }
 0x776   : > { %5450 = vmatpush.msrb.mxu2 %v5362_v8  ;;  %v5352_v8 = vld [vmem:[#allocation11 + $0x10] sm:$0xff] }
 0x777   : > { %v4982_v9 = vadd.f32 %v4981_v54, %v4941_v23  ;;  %v5378_v54 = vld [vmem:[#allocation11 + $0xe0] sm:$0xff] }
 0x778   : > { %v4864_v59 = vpop.f32.mrf.mxu1  ;;  %5451 = vmatpush.msrb.mxu2 %v5361_v50  ;;  %v5351_v50 = vld [vmem:[#allocation11 + $0x8] sm:$0xff] }
 0x77a   : > { %v4902_v51 = vpop.f32.mrf.mxu2  ;;  %v4943_v17 = vpop.f32.mrf.mxu3 }
 0x77b   : > { %v4903_v57 = vadd.f32 %v4902_v51, %v4861_v27  ;;  %5239 = vmatmul.f32.gmra.mxu1 %v9213_v40  ;;  %v9277_v35 = vpop.f32.mrf.mxu0 }
 0x77d   : > { %v4944_v12 = vadd.f32 %v4943_v17, %v4903_v57 }
 0x77f   : > { %v4985_v22 = vadd.f32 %v4984_v18, %v4944_v12  ;;  %v5359_v18 = vld [vmem:[#allocation11 + $0x48] sm:$0xff]  ;;  %v5376_v12 = vld [vmem:[#allocation11 + $0xd0] sm:$0xff] }
 0x780   : > { %v9268_v16 = vpop.f32.mrf.mxu1 }
 0x782   : > { %v4905_v55 = vpop.f32.mrf.mxu2  ;;  %v4946_v29 = vpop.f32.mrf.mxu3 }
 0x783   : > { %v4906_v7 = vadd.f32 %v4905_v55, %v4864_v59  ;;  %5242 = vmatmul.f32.gmra.mxu1 %v9785_v32  ;;  %v5181_v48 = vpop.f32.mrf.mxu0  ;;  %v5360_v59 = vld [vmem:[#allocation11 + $0x50] sm:$0xff] }
 0x784   : > { %5452 = vmatpush.msrb.mxu2 %v5360_v59  ;;  %v5397_v59 = vld [vmem:[#allocation11 + $0x178] sm:$0xff] }
 0x785   : > { %v4947_v0 = vadd.f32 %v4946_v29, %v4906_v7  ;;  %v5358_v7 = vld [vmem:[#allocation11 + $0x40] sm:$0xff]  ;;  %v5375_v29 = vld [vmem:[#allocation11 + $0xc8] sm:$0xff] }
 0x786   : > { %5453 = vmatpush.msrb.mxu2 %v5359_v18  ;;  %v5366_v18 = vld [vmem:[#allocation11 + $0x80] sm:$0xff] }
 0x787   : > { %v4988_v19 = vadd.f32 %v4987_v6, %v4947_v0 }
 0x788   : > { %v5010_v62 = vpop.f32.mrf.mxu1  ;;  %5454 = vmatpush.msrb.mxu2 %v5358_v7  ;;  %v5413_v7 = vld [vmem:[#allocation11 + $0x1f8] sm:$0xff] }
 0x789   : > { %v5011_v13 = vadd.f32 %v5010_v62, %v4970_v58 }
 0x78a   : > { %v9279_v32 = vpop.f32.mrf.mxu3  ;;  %v9281_v3 = vpop.f32.mrf.mxu2 }
 0x78b   : > { %v5184_v39 = vpop.f32.mrf.mxu0 }
 0x790   : > { %v5013_v46 = vpop.f32.mrf.mxu1 }
 0x791   : > { %v5014_v5 = vadd.f32 %v5013_v46, %v4973_v4  ;;  %v5374_v46 = vld [vmem:[#allocation11 + $0xc0] sm:$0xff] }
 0x792   : > { %v5140_v63 = vpop.f32.mrf.mxu3  ;;  %v5051_v38 = vpop.f32.mrf.mxu2 }
 0x793   : > { %v5182_v37 = vadd.f32 %v5181_v48, %v5140_v63  ;;  %v5187_v4 = vpop.f32.mrf.mxu0  ;;  %v5052_v25 = vadd.f32 %v5051_v38, %v5011_v13  ;;  %v5357_v13 = vld [vmem:[#allocation11 + $0x38] sm:$0xff] }
 0x794   : > { %5455 = vmatpush.msrb.mxu2 %v5357_v13  ;;  %v5373_v48 = vld [vmem:[#allocation11 + $0xb8] sm:$0xff]  ;;  %v5412_v13 = vld [vmem:[#allocation11 + $0x1f0] sm:$0xff] }
 0x798   : > { %v5016_v33 = vpop.f32.mrf.mxu1 }
 0x799   : > { %v9271_v30 = vadd.f32 %v5016_v33, %v4976_v21  ;;  %v5380_v21 = vld [vmem:[#allocation11 + $0xf0] sm:$0xff] }
 0x79a   : > { %v5143_v58 = vpop.f32.mrf.mxu3  ;;  %v5054_v2 = vpop.f32.mrf.mxu2  ;;  %5468 = vmatpush.msrb.mxu3 %v5380_v21 }
 0x79b   : > { %v5055_v1 = vadd.f32 %v5054_v2, %v5014_v5  ;;  %v5190_v51 = vpop.f32.mrf.mxu0 }
 0x79c   : > { %5469 = vmatpush.msrb.mxu3 %v5379_v49 }
 0x79e   : > { %5470 = vmatpush.msrb.mxu3 %v5378_v54 }
 0x7a0   : > { %v5019_v40 = vpop.f32.mrf.mxu1 }
 0x7a1   : > { %v9273_v42 = vadd.f32 %v5019_v40, %v4979_v56  ;;  %v5185_v56 = vadd.f32 %v5184_v39, %v5143_v58  ;;  %v5355_v39 = vld [vmem:[#allocation11 + $0x28] sm:$0xff]  ;;  %v5372_v58 = vld [vmem:[#allocation11 + $0xb0] sm:$0xff] }
 0x7a2   : > { %v5146_v41 = vpop.f32.mrf.mxu3  ;;  %v5057_v36 = vpop.f32.mrf.mxu2 }
 0x7a3   : > { %v5188_v6 = vadd.f32 %v5187_v4, %v5146_v41  ;;  %v5058_v33 = vadd.f32 %v5057_v36, %v9271_v30  ;;  %v5193_v2 = vpop.f32.mrf.mxu0  ;;  %v5354_v30 = vld [vmem:[#allocation11 + $0x20] sm:$0xff]  ;;  %v5353_v41 = vld [vmem:[#allocation11 + $0x18] sm:$0xff] }
 0x7a8   : > { %v5022_v52 = vpop.f32.mrf.mxu1 }
 0x7a9   : > { %v9275_v20 = vadd.f32 %v5022_v52, %v4982_v9  ;;  %v5377_v9 = vld [vmem:[#allocation11 + $0xd8] sm:$0xff] }
 0x7aa   : > { %5471 = vmatpush.msrb.mxu3 %v5377_v9  ;;  %v5060_v0 = vpop.f32.mrf.mxu2  ;;  %v5367_v9 = vld [vmem:[#allocation11 + $0x88] sm:$0xff] }
 0x7ac   : > { %5472 = vmatpush.msrb.mxu3 %v5376_v12 }
 0x7ae   : > { %5473 = vmatpush.msrb.mxu3 %v5375_v29 }
 0x7b0   : > { %v5025_v28 = vpop.f32.mrf.mxu1  ;;  %5474 = vmatpush.msrb.mxu3 %v5374_v46 }
 0x7b1   : > { %v9283_v11 = vadd.f32 %v5025_v28, %v4985_v22  ;;  %v5149_v22 = vpop.f32.mrf.mxu3  ;;  %v5356_v28 = vld [vmem:[#allocation11 + $0x30] sm:$0xff] }
 0x7b2   : > { %5456 = vmatpush.msrb.mxu2 %v5356_v28  ;;  %5475 = vmatpush.msrb.mxu3 %v5373_v48  ;;  %v5063_v21 = vpop.f32.mrf.mxu2 }
 0x7b3   : > { %v5064_v29 = vadd.f32 %v5063_v21, %v9275_v20  ;;  %v5393_v20 = vld [vmem:[#allocation11 + $0x158] sm:$0xff] }
 0x7b4   : > { %5457 = vmatpush.msrb.mxu2 %v5355_v39  ;;  %5476 = vmatpush.msrb.mxu3 %v5372_v58 }
 0x7b6   : > { %5458 = vmatpush.msrb.mxu2 %v5354_v30 }
 0x7b8   : > { %v5028_v47 = vpop.f32.mrf.mxu1  ;;  %5459 = vmatpush.msrb.mxu2 %v5353_v41  ;;  %v5391_v41 = vld [vmem:[#allocation11 + $0x148] sm:$0xff] }
 0x7b9   : > { %v9285_v34 = vadd.f32 %v5028_v47, %v4988_v19  ;;  %v5152_v4 = vpop.f32.mrf.mxu3 }
 0x7ba   : > { %5460 = vmatpush.msrb.mxu2 %v5352_v8  ;;  %v5390_v8 = vld [vmem:[#allocation11 + $0x140] sm:$0xff] }
 0x7bc   : > { %5461 = vmatpush.msrb.mxu2 %v5351_v50  ;;  %v5388_v50 = vld [vmem:[#allocation11 + $0x130] sm:$0xff] }
 0x7c0   : > { %v9287_v44 = vpop.f32.mrf.mxu1 }
 0x7c1   : > { %v5155_v12 = vpop.f32.mrf.mxu3 }
 0x7c8   : > { %v5222_v53 = vpop.f32.mrf.mxu1 }
 0x7c9   : > { %v5223_v61 = vadd.f32 %v5222_v53, %v5182_v37  ;;  %v5191_v37 = vadd.f32 %v5190_v51, %v5149_v22  ;;  %v5371_v53 = vld [vmem:[#allocation11 + $0xa8] sm:$0xff]  ;;  %v5194_v51 = vadd.f32 %v5193_v2, %v5152_v4 }
 0x7ca   : > { %5477 = vmatpush.msrb.mxu3 %v5371_v53 }
 0x7cb   : > { %v5246_v26 = vadd.f32 %v5223_v61, %v5052_v25 }
 0x7cd   : > { %v5258_v15 = vadd.f32 %v9292_v14, %v5246_v26  ;;  %v5370_v26 = vld [vmem:[#allocation11 + $0xa0] sm:$0xff] }
 0x7ce   : > { %5478 = vmatpush.msrb.mxu3 %v5370_v26  ;;  %v5408_v26 = vld [vmem:[#allocation11 + $0x1d0] sm:$0xff] }
 0x7cf   : > { %v5266_v27 = vmax.f32 %v5258_v15, 0.0  ;;  %v5061_v15 = vadd.f32 %v5060_v0, %v9273_v42  ;;  %v5196_v42 = vpop.f32.mrf.mxu0 }
 0x7d0   : > { %v5225_v24 = vpop.f32.mrf.mxu1 }
 0x7d1   : > { %v5226_v23 = vadd.f32 %v5225_v24, %v5185_v56  ;;  %v5277_v17 = vperm.slane %v5266_v27, %v8478_v10  ;;  %v5369_v56 = vld [vmem:[#allocation11 + $0x98] sm:$0xff]  ;;  %v5368_v24 = vld [vmem:[#allocation11 + $0x90] sm:$0xff] }
 0x7d2   : > { %5479 = vmatpush.msrb.mxu3 %v5369_v56  ;;  %v5407_v56 = vld [vmem:[#allocation11 + $0x1c8] sm:$0xff] }
 0x7d3   : > { %v5247_v57 = vadd.f32 %v5226_v23, %v5055_v1  ;;  %v5314_v19 = vrot.slane %v5277_v17, 4  ;;  %v5350_v23 = vld [vmem:[#allocation11] sm:$0xff] }
 0x7d4   : > { %5480 = vmatpush.msrb.mxu3 %v5368_v24  ;;  %5462 = vmatpush.msrb.mxu2 %v5350_v23  ;;  %v5405_v24 = vld [vmem:[#allocation11 + $0x1b8] sm:$0xff] }
 0x7d5   : > { %v5259_v55 = vadd.f32 %v9292_v14, %v5247_v57  ;;  %v5330_v63 = vmax.f32 %v5277_v17, %v5314_v19  ;;  %v5066_v19 = vpop.f32.mrf.mxu2 }
 0x7d6   : > { %5481 = vmatpush.msrb.mxu3 %v5367_v9  ;;  %5487 = vmatpush.msra.mxu2 %v5397_v59  ;;  %v5067_v30 = vadd.f32 %v5066_v19, %v9283_v11  ;;  %v5402_v19 = vld [vmem:[#allocation11 + $0x1a0] sm:$0xff] }
 0x7d7   : > { %v5267_v62 = vmax.f32 %v5259_v55, 0.0  ;;  %v9301_v25 = vsel %vm3860_vm10, %v5330_v63, -inf  ;;  %v5396_v55 = vld [vmem:[#allocation11 + $0x170] sm:$0xff]  ;;  %v5410_v63 = vld [vmem:[#allocation11 + $0x1e0] sm:$0xff]  ;;  %v5199_v4 = vpop.f32.mrf.mxu0 }
 0x7d8   : > { %v5228_v5 = vpop.f32.mrf.mxu1  ;;  %5482 = vmatpush.msrb.mxu3 %v5366_v18  ;;  %5488 = vmatpush.msra.mxu2 %v5396_v55  ;;  %v5403_v55 = vld [vmem:[#allocation11 + $0x1a8] sm:$0xff] }
 0x7d9   : > { %v5281_v40 = vperm.slane %v5267_v62, %v8478_v10  ;;  %v5229_v52 = vadd.f32 %v5228_v5, %v5188_v6  ;;  %v5395_v62 = vld [vmem:[#allocation11 + $0x168] sm:$0xff] }
 0x7da   : > { %5507 = vmatpush.msra.mxu3 %v5413_v7  ;;  %5489 = vmatpush.msra.mxu2 %v5395_v62 }
 0x7db   : > { %v5315_v38 = vrot.slane %v5281_v40, 4  ;;  %v5248_v47 = vadd.f32 %v5229_v52, %v5058_v33  ;;  %v5411_v52 = vld [vmem:[#allocation11 + $0x1e8] sm:$0xff] }
 0x7dc   : > { %5508 = vmatpush.msra.mxu3 %v5412_v13 }
 0x7dd   : > { %v5331_v60 = vmax.f32 %v5281_v40, %v5315_v38  ;;  %v5260_v31 = vadd.f32 %v9292_v14, %v5248_v47  ;;  %v5394_v40 = vld [vmem:[#allocation11 + $0x160] sm:$0xff]  ;;  %v5197_v38 = vadd.f32 %v5196_v42, %v5155_v12 }
 0x7de   : > { %5490 = vmatpush.msra.mxu2 %v5394_v40  ;;  %5509 = vmatpush.msra.mxu3 %v5411_v52 }
 0x7df   : > { %v9304_v61 = vsel %vm3860_vm10, %v5331_v60, -inf  ;;  %v5268_v45 = vmax.f32 %v5260_v31, 0.0  ;;  %v5392_v60 = vld [vmem:[#allocation11 + $0x150] sm:$0xff]  ;;  %v5409_v31 = vld [vmem:[#allocation11 + $0x1d8] sm:$0xff]  ;;  %v5202_v12 = vpop.f32.mrf.mxu0 }
 0x7e0   : > { %v5340_v43 = vmax.f32 %v9301_v25, %v9304_v61  ;;  %v5231_v36 = vpop.f32.mrf.mxu1  ;;  %5491 = vmatpush.msra.mxu2 %v5393_v20  ;;  %5510 = vmatpush.msra.mxu3 %v5410_v63  ;;  %v5383_v63 = vld [vmem:[#allocation11 + $0x108] sm:$0xff] }
 0x7e1   : > { %v5232_v49 = vadd.f32 %v5231_v36, %v5191_v37  ;;  %v5285_v27 = vperm.slane %v5268_v45, %v8478_v10  ;;  %v5158_v45 = vpop.f32.mrf.mxu3 }
 0x7e2   : > { %5492 = vmatpush.msra.mxu2 %v5392_v60  ;;  %5511 = vmatpush.msra.mxu3 %v5409_v31  ;;  %v5382_v31 = vld [vmem:[#allocation11 + $0x100] sm:$0xff] }
 0x7e3   : > { %v5249_v54 = vadd.f32 %v5232_v49, %v5061_v15  ;;  %v5316_v17 = vrot.slane %v5285_v27, 4  ;;  %v4909_v15 = vadd.f32 %v9281_v3, %v9268_v16  ;;  %v5069_v49 = vpop.f32.mrf.mxu2  ;;  %v5387_v16 = vld [vmem:[#allocation11 + $0x128] sm:$0xff]  ;;  %v5404_v3 = vld [vmem:[#allocation11 + $0x1b0] sm:$0xff] }
 0x7e4   : > { %5493 = vmatpush.msra.mxu2 %v5391_v41  ;;  %5512 = vmatpush.msra.mxu3 %v5408_v26 }
 0x7e5   : > { %v5261_v1 = vadd.f32 %v9292_v14, %v5249_v54  ;;  %v5332_v46 = vmax.f32 %v5285_v27, %v5316_v17  ;;  %v5389_v27 = vld [vmem:[#allocation11 + $0x138] sm:$0xff]  ;;  %v5406_v54 = vld [vmem:[#allocation11 + $0x1c0] sm:$0xff]  ;;  %v4950_v59 = vadd.f32 %v9279_v32, %v4909_v15  ;;  %v6415_v15 = vmov 1983009808  }
 0x7e6   : > { %5494 = vmatpush.msra.mxu2 %v5390_v8  ;;  %5513 = vmatpush.msra.mxu3 %v5407_v56 }
 0x7e7   : > { %v5269_v57 = vmax.f32 %v5261_v1, 0.0  ;;  %v9315_v47 = vsel %vm3860_vm10, %v5332_v46, -inf  ;;  %v5200_v1 = vadd.f32 %v5199_v4, %v5158_v45  ;;  %v4991_v32 = vadd.f32 %v9277_v35, %v4950_v59  ;;  %v5398_v45 = vld [vmem:[#allocation11 + $0x180] sm:$0xff] }
 0x7e8   : > { %v5234_v22 = vpop.f32.mrf.mxu1  ;;  %5495 = vmatpush.msra.mxu2 %v5389_v27  ;;  %5514 = vmatpush.msra.mxu3 %v5406_v54 }
 0x7e9   : > { %v5289_v0 = vperm.slane %v5269_v57, %v8478_v10  ;;  %v5235_v6 = vadd.f32 %v5234_v22, %v5194_v51  ;;  %v5070_v51 = vadd.f32 %v5069_v49, %v9285_v34  ;;  %v5161_v18 = vpop.f32.mrf.mxu3  ;;  %v5386_v22 = vld [vmem:[#allocation11 + $0x120] sm:$0xff]  ;;  %v5032_v40 = vadd.f32 %v9287_v44, %v4991_v32 }
 0x7ea   : > { %5496 = vmatpush.msra.mxu2 %v5388_v50  ;;  %5515 = vmatpush.msra.mxu3 %v5405_v24  ;;  %v5203_v13 = vadd.f32 %v5202_v12, %v5161_v18  ;;  %v5419_v49 = vunpack.c.l.s4 %v6415_v15  ;;  %v6416_v24 = vmov 1934713408  }
 0x7eb   : > { %v5317_v5 = vrot.slane %v5289_v0, 4  ;;  %v5250_v33 = vadd.f32 %v5235_v6, %v5064_v29  ;;  %v5385_v6 = vld [vmem:[#allocation11 + $0x118] sm:$0xff]  ;;  %v5072_v46 = vpop.f32.mrf.mxu2 }
 0x7ec   : > { %5497 = vmatpush.msra.mxu2 %v5387_v16  ;;  %5516 = vmatpush.msra.mxu3 %v5404_v3  ;;  %v5420_v27 = vunpack.c.0.s8 %v5419_v49 }
 0x7ed   : > { %v5333_v28 = vmax.f32 %v5289_v0, %v5317_v5  ;;  %v5262_v48 = vadd.f32 %v9292_v14, %v5250_v33  ;;  %v5384_v5 = vld [vmem:[#allocation11 + $0x110] sm:$0xff]  ;;  %v5401_v33 = vld [vmem:[#allocation11 + $0x198] sm:$0xff] }
 0x7ee   : > { %5498 = vmatpush.msra.mxu2 %v5386_v22  ;;  %5517 = vmatpush.msra.mxu3 %v5403_v55 }
 0x7ef   : > { %v9318_v39 = vsel %vm3860_vm10, %v5333_v28, -inf  ;;  %v5270_v58 = vmax.f32 %v5262_v48, 0.0 }
 0x7f0   : > { %v5343_v2 = vmax.f32 %v9315_v47, %v9318_v39  ;;  %v5237_v37 = vpop.f32.mrf.mxu1  ;;  %5499 = vmatpush.msra.mxu2 %v5385_v6  ;;  %5518 = vmatpush.msra.mxu3 %v5402_v19 }
 0x7f1   : > { %v5238_v53 = vadd.f32 %v5237_v37, %v5197_v38  ;;  %v5293_v21 = vperm.slane %v5270_v58, %v8478_v10  ;;  %v5400_v38 = vld [vmem:[#allocation11 + $0x190] sm:$0xff]  ;;  %v5073_v58 = vadd.f32 %v5072_v46, %v5032_v40 }
 0x7f2   : > { %5500 = vmatpush.msra.mxu2 %v5384_v5  ;;  %5519 = vmatpush.msra.mxu3 %v5401_v33 }
 0x7f3   : > { %v5251_v36 = vadd.f32 %v5238_v53, %v5067_v30  ;;  %v5318_v23 = vrot.slane %v5293_v21, 4  ;;  %v5399_v30 = vld [vmem:[#allocation11 + $0x188] sm:$0xff] }
 0x7f4   : > { %5501 = vmatpush.msra.mxu2 %v5383_v63  ;;  %5520 = vmatpush.msra.mxu3 %v5400_v38 }
 0x7f5   : > { %v5263_v11 = vadd.f32 %v9292_v14, %v5251_v36  ;;  %v5334_v7 = vmax.f32 %v5293_v21, %v5318_v23 }
 0x7f6   : > { %5502 = vmatpush.msra.mxu2 %v5382_v31  ;;  %5521 = vmatpush.msra.mxu3 %v5399_v30 }
 0x7f7   : > { %v5271_v9 = vmax.f32 %v5263_v11, 0.0  ;;  %v5344_v52 = vsel %vm3860_vm10, %v5334_v7, -inf }
 0x7f8   : > { %v5240_v42 = vpop.f32.mrf.mxu1  ;;  %5522 = vmatpush.msra.mxu3 %v5398_v45 }
 0x7f9   : > { %v5297_v17 = vperm.slane %v5271_v9, %v8478_v10  ;;  %v5241_v57 = vadd.f32 %v5240_v42, %v5200_v1 }
 0x7fb   : > { %v5319_v29 = vrot.slane %v5297_v17, 4  ;;  %v5252_v0 = vadd.f32 %v5241_v57, %v5070_v51 }
 0x7fd   : > { %v5335_v62 = vmax.f32 %v5297_v17, %v5319_v29  ;;  %v5264_v34 = vadd.f32 %v9292_v14, %v5252_v0 }
 0x7ff   : > { %v5345_v28 = vsel %vm3860_vm10, %v5335_v62, -inf  ;;  %v5272_v48 = vmax.f32 %v5264_v34, 0.0 }
 0x800   : > { %v5346_v35 = vmax.f32 %v5344_v52, %v5345_v28  ;;  %v5243_v20 = vpop.f32.mrf.mxu1 }
 0x801   : > { %v5244_v37 = vadd.f32 %v5243_v20, %v5203_v13  ;;  %v5301_v44 = vperm.slane %v5272_v48, %v8478_v10 }
 0x802   : > { %v5415_v60 = vrot.slane %v5346_v35, 4 }
 0x803   : > { %v5253_v53 = vadd.f32 %v5244_v37, %v5073_v58  ;;  %v5320_v26 = vrot.slane %v5301_v44, 4 }
 0x804   : > { %v5417_v4 = vsel %vm5416_vm11, %v5415_v60, %v5340_v43 }
 0x805   : > { %v5265_v41 = vadd.f32 %v9292_v14, %v5253_v53  ;;  %v5336_v8 = vmax.f32 %v5301_v44, %v5320_v26  ;;  %v5421_v54 = vperm.slane %v5417_v4, %v5420_v27 }
 0x807   : > { %v5273_v21 = vmax.f32 %v5265_v41, 0.0  ;;  %v5347_v25 = vsel %vm3860_vm10, %v5336_v8, -inf  ;;  %v5430_v23 = vrot.slane %v5421_v54, 4 }
 0x809   : > { %v5305_v36 = vperm.slane %v5273_v21, %v8478_v10  ;;  %v5433_v10 = vunpack.c.l.s4 %v6416_v24 }
 0x80b   : > { %v5321_v56 = vrot.slane %v5305_v36, 4  ;;  %v5434_v42 = vunpack.c.0.s8 %v5433_v10 }
 0x80d   : > { %v5337_v11 = vmax.f32 %v5305_v36, %v5321_v56 }
 0x80f   : > { %v5348_v61 = vsel %vm3860_vm10, %v5337_v11, -inf }
 0x810   : > { %v5349_v43 = vmax.f32 %v5347_v25, %v5348_v61 }
 0x812   : > { %v5422_v14 = vrot.slane %v5349_v43, 4 }
 0x814   : > { %v5423_v50 = vsel %vm5416_vm11, %v5422_v14, %v5343_v2  ;;  %v6142_v2 = vld [vmem:[%s9398_s10] ss:$0 sm:$0xff] }
 0x815   : > { %v5427_v1 = vperm.slane %v5423_v50, %v5420_v27 }
 0x817   : > { %v5428_v9 = vrot.slane %v5427_v1, 4  ;;  %v5431_v59 = vsel %vm5416_vm11, %v5427_v1, %v5430_v23 }
 0x818   : > { %v5439_v47 = vperm.slane %v5431_v59, %v5434_v42 }
 0x819   : > { %v5429_v16 = vsel %vm5416_vm11, %v5428_v9, %v5421_v54 }
 0x81a   : > { %v5435_v3 = vperm.slane %v5429_v16, %v5434_v42  ;;  %v5442_v39 = vrot.slane %v5439_v47, 4 }
 0x81c   : > { %v5440_v51 = vrot.slane %v5435_v3, 4  ;;  %5463 = vmatmul.f32.vlgmr.msrb.gmra.mxu2 %v5435_v3 }
 0x81e   : > { %5980 = vmatmul.msk.f32.vlgmr.msrb.gmra.mxu3 %vm5979_vm12, %v5440_v51 }
 0x824   : > { %5503 = vmatmul.f32.vlgmr.msra.gmra.mxu2 %v5439_v47 }
 0x826   : > { %5982 = vmatmul.msk.f32.vlgmr.msra.gmra.mxu3 %vm5979_vm12, %v5442_v39 }
 0x89f   : > { %v5464_v17 = vpop.f32.mrf.mxu2 }
 0x8a0   : > { %v5465_v18 = vadd.f32 %v6142_v2, %v5464_v17 }
 0x8a1   : > { %v5484_v57 = vpop.f32.mrf.mxu3 }
 0x8a2   : > { %v5485_v12 = vadd.f32 %v5484_v57, %v5465_v18 }
 0x8a7   : > { %v5504_v22 = vpop.f32.mrf.mxu2 }
 0x8a8   : > { %v5505_v55 = vadd.f32 %v5504_v22, %v5485_v12 }
 0x8a9   : > { %v5524_v7 = vpop.f32.mrf.mxu3 }
 0x8aa   : > { %v5525_v29 = vadd.f32 %v5524_v7, %v5505_v55 }
 0x8ac   : > { %v5528_v0 = vrot.slane %v5525_v29, 2  ;;  %5530 = vst [vmem:[%s489_s1] sm:$0x3] %v5525_v29 }
 0x8ae   : > { %5531 = vst [vmem:[%s489_s1 + $0x2] sm:$0x3] %v5528_v0 }
 0x8af   : > { %6352 = shalt.err (!%p6349_p9)
}
 0x8b0   : > { %s6417_s29 = smov 32   ;;  %s6418_s25 = smov 2  }
 0x8b1   : > { %6012 = dma.vmem_to_hbm [thread:$0]  (%p6580_p13), %s5546_s15, 64, %s5548_s23, %s5533_s21, %s6417_s29, %s6417_s29, %s6418_s25  }
 0x8b2 PF: > { %s5562_s26 = sand.u32 1, %s6391_s17   ;;  %p9786_p10 = scmp.ge.s32.totalorder %s6403_s20, 2 }
 0x8b3   : > { %s5563_s12 = scalar_lea.sflag [#allocation4], %s5562_s26 }
 0x8b4   : > { %p6035_p11 = pnand %p9786_p10, %p6585_p4 }
 0x8b6   : > { %p6036_p0 = pneg %p6035_p11 }
 0x8b8   : > { %6386 = dma.done.wait (%p6036_p0), %s5563_s12, 64  }
 0x8b9   : > { %6388 = vsyncadd (%p6036_p0), %s5563_s12, 4294967232  ;;  %p27_p2 = scmp.ge.s32.totalorder %s6560_s16, 4   ;;  %s9787_s17 = smov %s6395_s18 }
 0x8ba   : > { %s9788_s18 = smov %s6399_s19  ;;  %s9789_s19 = smov %s6572_s13 }
 0x8bb   : > { %s9790_s20 = smov %s6560_s16  ;;  %29 = sbr.rel (!%p27_p2) target bundleno = 14 (0xe), region = 136 }
 0x8c0   :  { %5569 = vsyncpa [#allocation3], 1 }
 0x8c1   :  { %5571 = vsyncpa [#allocation3 + $0x1], 1 }
 0x8c2   :  { %5572 = vsyncpa [#allocation6], 1 }
 0x8c3   :  { %5573 = vsyncpa [#allocation9], 1 }
 0x8c4   :  { %5574 = vsyncpa [#allocation12], 1 }
 0x8c5   :  { %5575 = vsyncpa [#allocation4], 1 }
 0x8c6   :  { %5577 = vsyncpa [#allocation4 + $0x1], 1 }

</bundles_post_ra>
